<compile_context>
chip_gen: v5e
topology: v5e:2x2
jax: 0.10.0
libtpu: 0.0.40
codegen_flags: <defaults>
</compile_context>

<pallas_src>
import jax
import jax.numpy as jnp
from jax import lax
from jax.experimental import pallas as pl
from jax.experimental.pallas import tpu as pltpu

NUM_SEG_CLASSES = 6
BN_EPS = 1e-5
CLASS_PAD = 128   # classifier padded to 128 out-channels for aligned matmul/transpose/store

# (Cin, Cout) per pointwise layer; layer 5 takes the 1088-ch concat
# (64-ch local feature + 1024-ch global max).
LAYER_DIMS = [(3, 64), (64, 64), (64, 128), (128, 1024),
              (1088, 512), (512, 256), (256, 128), (128, NUM_SEG_CLASSES)]
# BatchNorm present on all layers except the final classifier.
HAS_BN = [True, True, True, True, True, True, True, False]


def make_folded_params(key):
    """Deterministic synthetic weights; BN (eval mode) folded into W/b.

    Returns a list of (W_eff (Cin, Cout) bf16, b_eff (1, Cout) f32) per layer.
    """
    params = []
    keys = jax.random.split(key, len(LAYER_DIMS))
    for (cin, cout), k, has_bn in zip(LAYER_DIMS, keys, HAS_BN):
        kw, kb, kg, kbeta, km, kv = jax.random.split(k, 6)
        bound = 1.0 / jnp.sqrt(cin)
        W = jax.random.uniform(kw, (cout, cin), jnp.float32, -bound, bound)
        b = jax.random.uniform(kb, (cout,), jnp.float32, -bound, bound)
        if has_bn:
            gamma = 1.0 + 0.1 * jax.random.normal(kg, (cout,), jnp.float32)
            beta = 0.1 * jax.random.normal(kbeta, (cout,), jnp.float32)
            mean = 0.1 * jax.random.normal(km, (cout,), jnp.float32)
            var = jnp.abs(jax.random.normal(kv, (cout,), jnp.float32)) + 0.5
            scale = gamma / jnp.sqrt(var + BN_EPS)
            W = W * scale[:, None]
            b = scale * (b - mean) + beta
        params.append((W.T.astype(jnp.bfloat16), b[None, :].astype(jnp.float32)))
    return params


def seg_model_pallas(points, params, *, tile_n=512):
    """points: (B, N, 3) f32 -> (B, NUM_SEG_CLASSES, N), like the PyTorch module.

    tile_n: point-tile size (multiple of 128).  ~512 is a safe default for
    v7x's 64 MiB VMEM; v5e/v6e can afford 1024-2048.
    """
    assert tile_n % 128 == 0
    B, N, cin = points.shape
    assert cin == 3
    n_pad = pl.cdiv(N, tile_n) * tile_n
    num_tiles = n_pad // tile_n
    needs_mask = (n_pad != N)
    if needs_mask:
        # Zero-pad the point axis; padded rows are masked out of the global
        # max in-kernel and sliced off the output below.
        points = jnp.pad(points, ((0, 0), (0, n_pad - N), (0, 0)))

    (w1, b1), (w2, b2), (w3, b3), (w4, b4), (w5, b5), (w6, b6), (w7, b7), (w8, b8) = params
    # Split the 1088->512 weight: first 64 rows act on the local feature,
    # last 1024 rows act on the per-batch global max feature.
    w5a, w5b = w5[:64, :], w5[64:, :]
    # Pad the classifier to 128 output channels so the final matmul, the
    # transpose to (C, tile_n) and the store stay (8,128)-aligned.
    w8p = jnp.pad(w8, ((0, 0), (0, CLASS_PAD - NUM_SEG_CLASSES)))
    b8p = jnp.pad(b8, ((0, 0), (0, CLASS_PAD - NUM_SEG_CLASSES)))

    weight_inputs = [w1, b1, w2, b2, w3, b3, w4, b4,
                     w5a, w5b, b5, w6, b6, w7, b7, w8p, b8p]

    def kernel(x_ref,
               w1r, b1r, w2r, b2r, w3r, b3r, w4r, b4r,
               w5ar, w5br, b5r, w6r, b6r, w7r, b7r, w8r, b8r,
               out_ref, gmax_ref, gproj_ref):
        p = pl.program_id(1)   # 0: features + running max, 1: segmentation head
        t = pl.program_id(2)   # point-tile index

        def layer(h, w_ref, b_ref):
            y = jnp.dot(h.astype(jnp.bfloat16), w_ref[...],
                        preferred_element_type=jnp.float32) + b_ref[...]
            return jnp.maximum(y, 0.0)

        @pl.when(p == 0)
        def _features_and_max():
            @pl.when(t == 0)
            def _():
                # h4 is post-ReLU (>= 0), so 0 is a safe identity for the max.
                gmax_ref[...] = jnp.zeros_like(gmax_ref)
            x = x_ref[0]                                      # (tile_n, 3)
            h1 = layer(x, w1r, b1r)
            h2 = layer(h1, w2r, b2r)
            h3 = layer(h2, w3r, b3r)
            h4 = layer(h3, w4r, b4r)                          # (tile_n, 1024)
            if needs_mask:
                # Padded (zero) points still produce bias-driven features;
                # exclude them from the global max explicitly.
                row = t * tile_n + lax.broadcasted_iota(jnp.int32, (tile_n, 1), 0)
                h4 = jnp.where(row < N, h4, 0.0)
            gmax_ref[...] = jnp.maximum(gmax_ref[...],
                                        jnp.max(h4, axis=0, keepdims=True))

        @pl.when(p == 1)
        def _segmentation_head():
            @pl.when(t == 0)
            def _():
                # Hoisted once per batch element: global-feature projection.
                g = gmax_ref[...].astype(jnp.bfloat16)        # (1, 1024)
                gproj_ref[...] = jnp.dot(
                    g, w5br[...], preferred_element_type=jnp.float32) + b5r[...]
            x = x_ref[0]
            # Recompute the cheap local feature (conv1/conv2) instead of
            # staging 64-ch activations through HBM.
            h1 = layer(x, w1r, b1r)
            h2 = layer(h1, w2r, b2r)                          # (tile_n, 64)
            h5 = jnp.maximum(
                jnp.dot(h2.astype(jnp.bfloat16), w5ar[...],
                        preferred_element_type=jnp.float32) + gproj_ref[...], 0.0)
            h6 = layer(h5, w6r, b6r)
            h7 = layer(h6, w7r, b7r)
            logits = jnp.dot(h7.astype(jnp.bfloat16), w8r[...],
                             preferred_element_type=jnp.float32) + b8r[...]  # (tile_n, 128)
            # Write directly in (C, N) layout: tile_n on lanes -> lane-dense
            # stores, and no wrapper transpose afterwards.
            out_ref[0] = jnp.transpose(logits)[:NUM_SEG_CLASSES, :]

    def _const_spec(arr):
        nd = arr.ndim
        # Constant block index -> each weight is DMA'd once and stays resident.
        return pl.BlockSpec(arr.shape, lambda b, p, t, _nd=nd: (0,) * _nd)

    in_specs = [pl.BlockSpec((1, tile_n, 3), lambda b, p, t: (b, t, 0))] + \
               [_const_spec(w) for w in weight_inputs]
    # Phase 0 parks the output on block (b, 0, 0) and never writes it; phase 1
    # fully overwrites that block at t == 0 before the first writeback
    # (block-index change) happens, then walks the remaining tiles.
    out_specs = pl.BlockSpec((1, NUM_SEG_CLASSES, tile_n),
                             lambda b, p, t: (b, 0, t * p))

    out = pl.pallas_call(
        kernel,
        out_shape=jax.ShapeDtypeStruct((B, NUM_SEG_CLASSES, n_pad), jnp.float32),
        grid_spec=pltpu.PrefetchScalarGridSpec(
            num_scalar_prefetch=0,
            grid=(B, 2, num_tiles),
            in_specs=in_specs,
            out_specs=out_specs,
            scratch_shapes=[pltpu.VMEM((1, 1024), jnp.float32),   # running max of h4
                            pltpu.VMEM((1, 512), jnp.float32)],   # cached global projection
        ),
        compiler_params=pltpu.CompilerParams(
            dimension_semantics=("parallel", "arbitrary", "arbitrary"),
        ),
    )(points, *weight_inputs)

    return out[:, :, :N] if needs_mask else out


def seg_model_ref(points, params):
    """Plain-JAX reference with matching bf16-matmul / f32-accumulate math."""
    B, N, _ = points.shape

    def lin(h, w, b, relu=True):
        y = jnp.dot(h.astype(jnp.bfloat16), w,
                    preferred_element_type=jnp.float32) + b
        return jnp.maximum(y, 0.0) if relu else y

    (w1, b1), (w2, b2), (w3, b3), (w4, b4), (w5, b5), (w6, b6), (w7, b7), (w8, b8) = params
    h1 = lin(points, w1, b1)
    h2 = lin(h1, w2, b2)
    h3 = lin(h2, w3, b3)
    h4 = lin(h3, w4, b4)
    g = jnp.max(h4, axis=1, keepdims=True)                         # (B, 1, 1024)
    feat = jnp.concatenate(
        [h2, jnp.broadcast_to(g, (B, N, g.shape[-1]))], axis=-1)   # (B, N, 1088)
    h5 = lin(feat, w5, b5)
    h6 = lin(h5, w6, b6)
    h7 = lin(h6, w7, b7)
    out = lin(h7, w8, b8, relu=False)
    return jnp.transpose(out, (0, 2, 1))                           # (B, C, N)


if __name__ == "__main__":
    key = jax.random.PRNGKey(0)
    kp, kx = jax.random.split(key)

    # Small demo shapes (module default is N=10000).  N=600 with tile_n=256
    # exercises the multi-tile + padded-last-tile path.
    B, N = 2, 600
    points = jax.random.normal(kx, (B, N, 3), jnp.float32)
    params = make_folded_params(kp)

    out = seg_model_pallas(points, params, tile_n=256)
    out = jax.block_until_ready(out)

    ref = seg_model_ref(points, params)
    assert out.shape == (B, NUM_SEG_CLASSES, N), out.shape
    err = float(jnp.max(jnp.abs(out - ref)))
    assert jnp.allclose(out, ref, atol=5e-2, rtol=5e-2), err
    print("KERNEL_OK")
</pallas_src>

<mosaic_0001>
module attributes {stable_mosaic.version = 11 : i64} {
  func.func @kernel(%arg0: i32, %arg1: i32, %arg2: i32, %arg3: memref<1x256x3xf32, #tpu.memory_space<vmem>>, %arg4: memref<3x64xbf16, #tpu.memory_space<vmem>>, %arg5: memref<1x64xf32, #tpu.memory_space<vmem>>, %arg6: memref<64x64xbf16, #tpu.memory_space<vmem>>, %arg7: memref<1x64xf32, #tpu.memory_space<vmem>>, %arg8: memref<64x128xbf16, #tpu.memory_space<vmem>>, %arg9: memref<1x128xf32, #tpu.memory_space<vmem>>, %arg10: memref<128x1024xbf16, #tpu.memory_space<vmem>>, %arg11: memref<1x1024xf32, #tpu.memory_space<vmem>>, %arg12: memref<64x512xbf16, #tpu.memory_space<vmem>>, %arg13: memref<1024x512xbf16, #tpu.memory_space<vmem>>, %arg14: memref<1x512xf32, #tpu.memory_space<vmem>>, %arg15: memref<512x256xbf16, #tpu.memory_space<vmem>>, %arg16: memref<1x256xf32, #tpu.memory_space<vmem>>, %arg17: memref<256x128xbf16, #tpu.memory_space<vmem>>, %arg18: memref<1x128xf32, #tpu.memory_space<vmem>>, %arg19: memref<128x128xbf16, #tpu.memory_space<vmem>>, %arg20: memref<1x128xf32, #tpu.memory_space<vmem>>, %arg21: memref<1x6x256xf32, #tpu.memory_space<vmem>>, %arg22: memref<1x1024xf32, #tpu.memory_space<vmem>>, %arg23: memref<1x512xf32, #tpu.memory_space<vmem>>) attributes {dimension_semantics = [#tpu.dimension_semantics<parallel>, #tpu.dimension_semantics<arbitrary>, #tpu.dimension_semantics<arbitrary>], iteration_bounds = array<i64: 2, 2, 3>, scalar_prefetch = 0 : i64, scratch_operands = 2 : i64, tpu.core_type = #tpu.core_type<tc>, window_params = [{transform_indices = @transform_0, window_bounds = array<i64: 1, 256, 3>}, {pipeline_mode = #tpu.pipeline_mode<synchronous>, transform_indices = @transform_1, window_bounds = array<i64: 3, 64>}, {pipeline_mode = #tpu.pipeline_mode<synchronous>, transform_indices = @transform_2, window_bounds = array<i64: 1, 64>}, {pipeline_mode = #tpu.pipeline_mode<synchronous>, transform_indices = @transform_3, window_bounds = array<i64: 64, 64>}, {pipeline_mode = #tpu.pipeline_mode<synchronous>, transform_indices = @transform_4, window_bounds = array<i64: 1, 64>}, {pipeline_mode = #tpu.pipeline_mode<synchronous>, transform_indices = @transform_5, window_bounds = array<i64: 64, 128>}, {pipeline_mode = #tpu.pipeline_mode<synchronous>, transform_indices = @transform_6, window_bounds = array<i64: 1, 128>}, {pipeline_mode = #tpu.pipeline_mode<synchronous>, transform_indices = @transform_7, window_bounds = array<i64: 128, 1024>}, {pipeline_mode = #tpu.pipeline_mode<synchronous>, transform_indices = @transform_8, window_bounds = array<i64: 1, 1024>}, {pipeline_mode = #tpu.pipeline_mode<synchronous>, transform_indices = @transform_9, window_bounds = array<i64: 64, 512>}, {pipeline_mode = #tpu.pipeline_mode<synchronous>, transform_indices = @transform_10, window_bounds = array<i64: 1024, 512>}, {pipeline_mode = #tpu.pipeline_mode<synchronous>, transform_indices = @transform_11, window_bounds = array<i64: 1, 512>}, {pipeline_mode = #tpu.pipeline_mode<synchronous>, transform_indices = @transform_12, window_bounds = array<i64: 512, 256>}, {pipeline_mode = #tpu.pipeline_mode<synchronous>, transform_indices = @transform_13, window_bounds = array<i64: 1, 256>}, {pipeline_mode = #tpu.pipeline_mode<synchronous>, transform_indices = @transform_14, window_bounds = array<i64: 256, 128>}, {pipeline_mode = #tpu.pipeline_mode<synchronous>, transform_indices = @transform_15, window_bounds = array<i64: 1, 128>}, {pipeline_mode = #tpu.pipeline_mode<synchronous>, transform_indices = @transform_16, window_bounds = array<i64: 128, 128>}, {pipeline_mode = #tpu.pipeline_mode<synchronous>, transform_indices = @transform_17, window_bounds = array<i64: 1, 128>}, {transform_indices = @transform_18, window_bounds = array<i64: 1, 6, 256>}]} {
    %c0_i32 = arith.constant 0 : i32
    %0 = arith.cmpi eq, %arg1, %c0_i32 : i32
    %1 = arith.extui %0 : i1 to i32
    %c0_i32_0 = arith.constant 0 : i32
    %2 = arith.cmpi ne, %1, %c0_i32_0 : i32
    scf.if %2 {
      %c0_i32_2 = arith.constant 0 : i32
      %6 = arith.cmpi eq, %arg2, %c0_i32_2 : i32
      %7 = arith.extui %6 : i1 to i32
      %c0_i32_3 = arith.constant 0 : i32
      %8 = arith.cmpi ne, %7, %c0_i32_3 : i32
      scf.if %8 {
        %cst_35 = arith.constant 0.000000e+00 : f32
        %58 = vector.broadcast %cst_35 : f32 to vector<1x1024xf32>
        %c0_36 = arith.constant 0 : index
        %c0_37 = arith.constant 0 : index
        %59 = vector.load %arg22[%c0_36, %c0_37] : memref<1x1024xf32, #tpu.memory_space<vmem>>, vector<1x1024xf32>
        tpu.vector_store %arg22[%c0_36, %c0_37], %58 {strides = array<i32>} : memref<1x1024xf32, #tpu.memory_space<vmem>>, vector<1x1024xf32>,
      } else {
      }
      %c0 = arith.constant 0 : index
      %c0_4 = arith.constant 0 : index
      %c0_5 = arith.constant 0 : index
      %9 = vector.load %arg3[%c0, %c0_4, %c0_5] : memref<1x256x3xf32, #tpu.memory_space<vmem>>, vector<1x256x3xf32>
      %10 = vector.shape_cast %9 : vector<1x256x3xf32> to vector<256x3xf32>
      %11 = arith.truncf %10 : vector<256x3xf32> to vector<256x3xbf16>
      %c0_6 = arith.constant 0 : index
      %c0_7 = arith.constant 0 : index
      %12 = vector.load %arg4[%c0_6, %c0_7] : memref<3x64xbf16, #tpu.memory_space<vmem>>, vector<3x64xbf16>
      %cst = arith.constant dense<0.000000e+00> : vector<256x64xf32>
      %13 = tpu.matmul %11, %12, %cst {dimension_numbers = #tpu.dot_dimension_numbers<[1], [0], [0], [1], [0, 0, 1, 1], [], []>} : vector<256x3xbf16>, vector<3x64xbf16>, vector<256x64xf32> -> vector<256x64xf32>
      %c0_8 = arith.constant 0 : index
      %c0_9 = arith.constant 0 : index
      %14 = vector.load %arg5[%c0_8, %c0_9] : memref<1x64xf32, #tpu.memory_space<vmem>>, vector<1x64xf32>
      %15 = vector.broadcast %14 : vector<1x64xf32> to vector<256x64xf32>
      %16 = arith.addf %13, %15 : vector<256x64xf32>
      %cst_10 = arith.constant 0.000000e+00 : f32
      %17 = vector.broadcast %cst_10 : f32 to vector<256x64xf32>
      %18 = arith.maximumf %16, %17 : vector<256x64xf32>
      %19 = arith.truncf %18 : vector<256x64xf32> to vector<256x64xbf16>
      %c0_11 = arith.constant 0 : index
      %c0_12 = arith.constant 0 : index
      %20 = vector.load %arg6[%c0_11, %c0_12] : memref<64x64xbf16, #tpu.memory_space<vmem>>, vector<64x64xbf16>
      %cst_13 = arith.constant dense<0.000000e+00> : vector<256x64xf32>
      %21 = tpu.matmul %19, %20, %cst_13 {dimension_numbers = #tpu.dot_dimension_numbers<[1], [0], [0], [1], [0, 0, 1, 1], [], []>} : vector<256x64xbf16>, vector<64x64xbf16>, vector<256x64xf32> -> vector<256x64xf32>
      %c0_14 = arith.constant 0 : index
      %c0_15 = arith.constant 0 : index
      %22 = vector.load %arg7[%c0_14, %c0_15] : memref<1x64xf32, #tpu.memory_space<vmem>>, vector<1x64xf32>
      %23 = vector.broadcast %22 : vector<1x64xf32> to vector<256x64xf32>
      %24 = arith.addf %21, %23 : vector<256x64xf32>
      %cst_16 = arith.constant 0.000000e+00 : f32
      %25 = vector.broadcast %cst_16 : f32 to vector<256x64xf32>
      %26 = arith.maximumf %24, %25 : vector<256x64xf32>
      %27 = arith.truncf %26 : vector<256x64xf32> to vector<256x64xbf16>
      %c0_17 = arith.constant 0 : index
      %c0_18 = arith.constant 0 : index
      %28 = vector.load %arg8[%c0_17, %c0_18] : memref<64x128xbf16, #tpu.memory_space<vmem>>, vector<64x128xbf16>
      %cst_19 = arith.constant dense<0.000000e+00> : vector<256x128xf32>
      %29 = tpu.matmul %27, %28, %cst_19 {dimension_numbers = #tpu.dot_dimension_numbers<[1], [0], [0], [1], [0, 0, 1, 1], [], []>} : vector<256x64xbf16>, vector<64x128xbf16>, vector<256x128xf32> -> vector<256x128xf32>
      %c0_20 = arith.constant 0 : index
      %c0_21 = arith.constant 0 : index
      %30 = vector.load %arg9[%c0_20, %c0_21] : memref<1x128xf32, #tpu.memory_space<vmem>>, vector<1x128xf32>
      %31 = vector.broadcast %30 : vector<1x128xf32> to vector<256x128xf32>
      %32 = arith.addf %29, %31 : vector<256x128xf32>
      %cst_22 = arith.constant 0.000000e+00 : f32
      %33 = vector.broadcast %cst_22 : f32 to vector<256x128xf32>
      %34 = arith.maximumf %32, %33 : vector<256x128xf32>
      %35 = arith.truncf %34 : vector<256x128xf32> to vector<256x128xbf16>
      %c0_23 = arith.constant 0 : index
      %c0_24 = arith.constant 0 : index
      %36 = vector.load %arg10[%c0_23, %c0_24] : memref<128x1024xbf16, #tpu.memory_space<vmem>>, vector<128x1024xbf16>
      %cst_25 = arith.constant dense<0.000000e+00> : vector<256x1024xf32>
      %37 = tpu.matmul %35, %36, %cst_25 {dimension_numbers = #tpu.dot_dimension_numbers<[1], [0], [0], [1], [0, 0, 1, 1], [], []>} : vector<256x128xbf16>, vector<128x1024xbf16>, vector<256x1024xf32> -> vector<256x1024xf32>
      %c0_26 = arith.constant 0 : index
      %c0_27 = arith.constant 0 : index
      %38 = vector.load %arg11[%c0_26, %c0_27] : memref<1x1024xf32, #tpu.memory_space<vmem>>, vector<1x1024xf32>
      %39 = vector.broadcast %38 : vector<1x1024xf32> to vector<256x1024xf32>
      %40 = arith.addf %37, %39 : vector<256x1024xf32>
      %cst_28 = arith.constant 0.000000e+00 : f32
      %41 = vector.broadcast %cst_28 : f32 to vector<256x1024xf32>
      %42 = arith.maximumf %40, %41 : vector<256x1024xf32>
      %c256_i32 = arith.constant 256 : i32
      %43 = arith.muli %arg2, %c256_i32 : i32
      %44 = tpu.iota {dimensions = array<i32: 0>} : vector<256x1xi32>
      %45 = vector.broadcast %43 : i32 to vector<256x1xi32>
      %46 = arith.addi %45, %44 : vector<256x1xi32>
      %c600_i32 = arith.constant 600 : i32
      %47 = vector.broadcast %c600_i32 : i32 to vector<256x1xi32>
      %48 = arith.cmpi slt, %46, %47 : vector<256x1xi32>
      %cst_29 = arith.constant 0.000000e+00 : f32
      %49 = vector.shape_cast %48 : vector<256x1xi1> to vector<256x1xi1>
      %50 = vector.broadcast %49 : vector<256x1xi1> to vector<256x1024xi1>
      %51 = vector.broadcast %cst_29 : f32 to vector<256x1024xf32>
      %52 = arith.select %50, %42, %51 : vector<256x1024xi1>, vector<256x1024xf32>
      %c0_30 = arith.constant 0 : index
      %c0_31 = arith.constant 0 : index
      %53 = vector.load %arg22[%c0_30, %c0_31] : memref<1x1024xf32, #tpu.memory_space<vmem>>, vector<1x1024xf32>
      %cst_32 = arith.constant dense<0xFF800000> : vector<1024xf32>
      %54 = vector.multi_reduction <maximumf>, %52, %cst_32 [0] : vector<256x1024xf32> to vector<1024xf32>
      %55 = vector.shape_cast %54 : vector<1024xf32> to vector<1x1024xf32>
      %56 = arith.maximumf %53, %55 : vector<1x1024xf32>
      %c0_33 = arith.constant 0 : index
      %c0_34 = arith.constant 0 : index
      %57 = vector.load %arg22[%c0_33, %c0_34] : memref<1x1024xf32, #tpu.memory_space<vmem>>, vector<1x1024xf32>
      tpu.vector_store %arg22[%c0_33, %c0_34], %56 {strides = array<i32>} : memref<1x1024xf32, #tpu.memory_space<vmem>>, vector<1x1024xf32>,
    } else {
    }
    %c1_i32 = arith.constant 1 : i32
    %3 = arith.cmpi eq, %arg1, %c1_i32 : i32
    %4 = arith.extui %3 : i1 to i32
    %c0_i32_1 = arith.constant 0 : i32
    %5 = arith.cmpi ne, %4, %c0_i32_1 : i32
    scf.if %5 {
      %c0_i32_2 = arith.constant 0 : i32
      %6 = arith.cmpi eq, %arg2, %c0_i32_2 : i32
      %7 = arith.extui %6 : i1 to i32
      %c0_i32_3 = arith.constant 0 : i32
      %8 = arith.cmpi ne, %7, %c0_i32_3 : i32
      scf.if %8 {
        %c0_43 = arith.constant 0 : index
        %c0_44 = arith.constant 0 : index
        %62 = vector.load %arg22[%c0_43, %c0_44] : memref<1x1024xf32, #tpu.memory_space<vmem>>, vector<1x1024xf32>
        %63 = arith.truncf %62 : vector<1x1024xf32> to vector<1x1024xbf16>
        %c0_45 = arith.constant 0 : index
        %c0_46 = arith.constant 0 : index
        %64 = vector.load %arg13[%c0_45, %c0_46] : memref<1024x512xbf16, #tpu.memory_space<vmem>>, vector<1024x512xbf16>
        %cst_47 = arith.constant dense<0.000000e+00> : vector<1x512xf32>
        %65 = tpu.matmul %63, %64, %cst_47 {dimension_numbers = #tpu.dot_dimension_numbers<[1], [0], [0], [1], [0, 0, 1, 1], [], []>} : vector<1x1024xbf16>, vector<1024x512xbf16>, vector<1x512xf32> -> vector<1x512xf32>
        %c0_48 = arith.constant 0 : index
        %c0_49 = arith.constant 0 : index
        %66 = vector.load %arg14[%c0_48, %c0_49] : memref<1x512xf32, #tpu.memory_space<vmem>>, vector<1x512xf32>
        %67 = arith.addf %65, %66 : vector<1x512xf32>
        %c0_50 = arith.constant 0 : index
        %c0_51 = arith.constant 0 : index
        %68 = vector.load %arg23[%c0_50, %c0_51] : memref<1x512xf32, #tpu.memory_space<vmem>>, vector<1x512xf32>
        tpu.vector_store %arg23[%c0_50, %c0_51], %67 {strides = array<i32>} : memref<1x512xf32, #tpu.memory_space<vmem>>, vector<1x512xf32>,
      } else {
      }
      %c0 = arith.constant 0 : index
      %c0_4 = arith.constant 0 : index
      %c0_5 = arith.constant 0 : index
      %9 = vector.load %arg3[%c0, %c0_4, %c0_5] : memref<1x256x3xf32, #tpu.memory_space<vmem>>, vector<1x256x3xf32>
      %10 = vector.shape_cast %9 : vector<1x256x3xf32> to vector<256x3xf32>
      %11 = arith.truncf %10 : vector<256x3xf32> to vector<256x3xbf16>
      %c0_6 = arith.constant 0 : index
      %c0_7 = arith.constant 0 : index
      %12 = vector.load %arg4[%c0_6, %c0_7] : memref<3x64xbf16, #tpu.memory_space<vmem>>, vector<3x64xbf16>
      %cst = arith.constant dense<0.000000e+00> : vector<256x64xf32>
      %13 = tpu.matmul %11, %12, %cst {dimension_numbers = #tpu.dot_dimension_numbers<[1], [0], [0], [1], [0, 0, 1, 1], [], []>} : vector<256x3xbf16>, vector<3x64xbf16>, vector<256x64xf32> -> vector<256x64xf32>
      %c0_8 = arith.constant 0 : index
      %c0_9 = arith.constant 0 : index
      %14 = vector.load %arg5[%c0_8, %c0_9] : memref<1x64xf32, #tpu.memory_space<vmem>>, vector<1x64xf32>
      %15 = vector.broadcast %14 : vector<1x64xf32> to vector<256x64xf32>
      %16 = arith.addf %13, %15 : vector<256x64xf32>
      %cst_10 = arith.constant 0.000000e+00 : f32
      %17 = vector.broadcast %cst_10 : f32 to vector<256x64xf32>
      %18 = arith.maximumf %16, %17 : vector<256x64xf32>
      %19 = arith.truncf %18 : vector<256x64xf32> to vector<256x64xbf16>
      %c0_11 = arith.constant 0 : index
      %c0_12 = arith.constant 0 : index
      %20 = vector.load %arg6[%c0_11, %c0_12] : memref<64x64xbf16, #tpu.memory_space<vmem>>, vector<64x64xbf16>
      %cst_13 = arith.constant dense<0.000000e+00> : vector<256x64xf32>
      %21 = tpu.matmul %19, %20, %cst_13 {dimension_numbers = #tpu.dot_dimension_numbers<[1], [0], [0], [1], [0, 0, 1, 1], [], []>} : vector<256x64xbf16>, vector<64x64xbf16>, vector<256x64xf32> -> vector<256x64xf32>
      %c0_14 = arith.constant 0 : index
      %c0_15 = arith.constant 0 : index
      %22 = vector.load %arg7[%c0_14, %c0_15] : memref<1x64xf32, #tpu.memory_space<vmem>>, vector<1x64xf32>
      %23 = vector.broadcast %22 : vector<1x64xf32> to vector<256x64xf32>
      %24 = arith.addf %21, %23 : vector<256x64xf32>
      %cst_16 = arith.constant 0.000000e+00 : f32
      %25 = vector.broadcast %cst_16 : f32 to vector<256x64xf32>
      %26 = arith.maximumf %24, %25 : vector<256x64xf32>
      %27 = arith.truncf %26 : vector<256x64xf32> to vector<256x64xbf16>
      %c0_17 = arith.constant 0 : index
      %c0_18 = arith.constant 0 : index
      %28 = vector.load %arg12[%c0_17, %c0_18] : memref<64x512xbf16, #tpu.memory_space<vmem>>, vector<64x512xbf16>
      %cst_19 = arith.constant dense<0.000000e+00> : vector<256x512xf32>
      %29 = tpu.matmul %27, %28, %cst_19 {dimension_numbers = #tpu.dot_dimension_numbers<[1], [0], [0], [1], [0, 0, 1, 1], [], []>} : vector<256x64xbf16>, vector<64x512xbf16>, vector<256x512xf32> -> vector<256x512xf32>
      %c0_20 = arith.constant 0 : index
      %c0_21 = arith.constant 0 : index
      %30 = vector.load %arg23[%c0_20, %c0_21] : memref<1x512xf32, #tpu.memory_space<vmem>>, vector<1x512xf32>
      %31 = vector.broadcast %30 : vector<1x512xf32> to vector<256x512xf32>
      %32 = arith.addf %29, %31 : vector<256x512xf32>
      %cst_22 = arith.constant 0.000000e+00 : f32
      %33 = vector.broadcast %cst_22 : f32 to vector<256x512xf32>
      %34 = arith.maximumf %32, %33 : vector<256x512xf32>
      %35 = arith.truncf %34 : vector<256x512xf32> to vector<256x512xbf16>
      %c0_23 = arith.constant 0 : index
      %c0_24 = arith.constant 0 : index
      %36 = vector.load %arg15[%c0_23, %c0_24] : memref<512x256xbf16, #tpu.memory_space<vmem>>, vector<512x256xbf16>
      %cst_25 = arith.constant dense<0.000000e+00> : vector<256x256xf32>
      %37 = tpu.matmul %35, %36, %cst_25 {dimension_numbers = #tpu.dot_dimension_numbers<[1], [0], [0], [1], [0, 0, 1, 1], [], []>} : vector<256x512xbf16>, vector<512x256xbf16>, vector<256x256xf32> -> vector<256x256xf32>
      %c0_26 = arith.constant 0 : index
      %c0_27 = arith.constant 0 : index
      %38 = vector.load %arg16[%c0_26, %c0_27] : memref<1x256xf32, #tpu.memory_space<vmem>>, vector<1x256xf32>
      %39 = vector.broadcast %38 : vector<1x256xf32> to vector<256x256xf32>
      %40 = arith.addf %37, %39 : vector<256x256xf32>
      %cst_28 = arith.constant 0.000000e+00 : f32
      %41 = vector.broadcast %cst_28 : f32 to vector<256x256xf32>
      %42 = arith.maximumf %40, %41 : vector<256x256xf32>
      %43 = arith.truncf %42 : vector<256x256xf32> to vector<256x256xbf16>
      %c0_29 = arith.constant 0 : index
      %c0_30 = arith.constant 0 : index
      %44 = vector.load %arg17[%c0_29, %c0_30] : memref<256x128xbf16, #tpu.memory_space<vmem>>, vector<256x128xbf16>
      %cst_31 = arith.constant dense<0.000000e+00> : vector<256x128xf32>
      %45 = tpu.matmul %43, %44, %cst_31 {dimension_numbers = #tpu.dot_dimension_numbers<[1], [0], [0], [1], [0, 0, 1, 1], [], []>} : vector<256x256xbf16>, vector<256x128xbf16>, vector<256x128xf32> -> vector<256x128xf32>
      %c0_32 = arith.constant 0 : index
      %c0_33 = arith.constant 0 : index
      %46 = vector.load %arg18[%c0_32, %c0_33] : memref<1x128xf32, #tpu.memory_space<vmem>>, vector<1x128xf32>
      %47 = vector.broadcast %46 : vector<1x128xf32> to vector<256x128xf32>
      %48 = arith.addf %45, %47 : vector<256x128xf32>
      %cst_34 = arith.constant 0.000000e+00 : f32
      %49 = vector.broadcast %cst_34 : f32 to vector<256x128xf32>
      %50 = arith.maximumf %48, %49 : vector<256x128xf32>
      %51 = arith.truncf %50 : vector<256x128xf32> to vector<256x128xbf16>
      %c0_35 = arith.constant 0 : index
      %c0_36 = arith.constant 0 : index
      %52 = vector.load %arg19[%c0_35, %c0_36] : memref<128x128xbf16, #tpu.memory_space<vmem>>, vector<128x128xbf16>
      %cst_37 = arith.constant dense<0.000000e+00> : vector<256x128xf32>
      %53 = tpu.matmul %51, %52, %cst_37 {dimension_numbers = #tpu.dot_dimension_numbers<[1], [0], [0], [1], [0, 0, 1, 1], [], []>} : vector<256x128xbf16>, vector<128x128xbf16>, vector<256x128xf32> -> vector<256x128xf32>
      %c0_38 = arith.constant 0 : index
      %c0_39 = arith.constant 0 : index
      %54 = vector.load %arg20[%c0_38, %c0_39] : memref<1x128xf32, #tpu.memory_space<vmem>>, vector<1x128xf32>
      %55 = vector.broadcast %54 : vector<1x128xf32> to vector<256x128xf32>
      %56 = arith.addf %53, %55 : vector<256x128xf32>
      %57 = tpu.transpose %56, [1, 0] : vector<256x128xf32> -> vector<128x256xf32>
      %58 = vector.extract_strided_slice %57 {offsets = [0, 0], sizes = [6, 256], strides = [1, 1]} : vector<128x256xf32> to vector<6x256xf32>
      %c0_40 = arith.constant 0 : index
      %c0_41 = arith.constant 0 : index
      %c0_42 = arith.constant 0 : index
      %59 = vector.load %arg21[%c0_40, %c0_41, %c0_42] : memref<1x6x256xf32, #tpu.memory_space<vmem>>, vector<1x6x256xf32>
      %60 = vector.shape_cast %59 : vector<1x6x256xf32> to vector<6x256xf32>
      %61 = vector.shape_cast %58 : vector<6x256xf32> to vector<1x6x256xf32>
      tpu.vector_store %arg21[%c0_40, %c0_41, %c0_42], %61 {strides = array<i32>} : memref<1x6x256xf32, #tpu.memory_space<vmem>>, vector<1x6x256xf32>,
    } else {
    }
    return
  }
  func.func @transform_0(%arg0: i32, %arg1: i32, %arg2: i32) -> (i32, i32, i32) {
    %c0_i32 = arith.constant 0 : i32
    %c0_i32_0 = arith.constant 0 : i32
    return %arg0, %arg2, %c0_i32 : i32, i32, i32
  }
  func.func @transform_1(%arg0: i32, %arg1: i32, %arg2: i32) -> (i32, i32) {
    %c0_i32 = arith.constant 0 : i32
    %c0_i32_0 = arith.constant 0 : i32
    %c0_i32_1 = arith.constant 0 : i32
    return %c0_i32, %c0_i32_0 : i32, i32
  }
  func.func @transform_2(%arg0: i32, %arg1: i32, %arg2: i32) -> (i32, i32) {
    %c0_i32 = arith.constant 0 : i32
    %c0_i32_0 = arith.constant 0 : i32
    %c0_i32_1 = arith.constant 0 : i32
    return %c0_i32, %c0_i32_0 : i32, i32
  }
  func.func @transform_3(%arg0: i32, %arg1: i32, %arg2: i32) -> (i32, i32) {
    %c0_i32 = arith.constant 0 : i32
    %c0_i32_0 = arith.constant 0 : i32
    %c0_i32_1 = arith.constant 0 : i32
    return %c0_i32, %c0_i32_0 : i32, i32
  }
  func.func @transform_4(%arg0: i32, %arg1: i32, %arg2: i32) -> (i32, i32) {
    %c0_i32 = arith.constant 0 : i32
    %c0_i32_0 = arith.constant 0 : i32
    %c0_i32_1 = arith.constant 0 : i32
    return %c0_i32, %c0_i32_0 : i32, i32
  }
  func.func @transform_5(%arg0: i32, %arg1: i32, %arg2: i32) -> (i32, i32) {
    %c0_i32 = arith.constant 0 : i32
    %c0_i32_0 = arith.constant 0 : i32
    %c0_i32_1 = arith.constant 0 : i32
    return %c0_i32, %c0_i32_0 : i32, i32
  }
  func.func @transform_6(%arg0: i32, %arg1: i32, %arg2: i32) -> (i32, i32) {
    %c0_i32 = arith.constant 0 : i32
    %c0_i32_0 = arith.constant 0 : i32
    %c0_i32_1 = arith.constant 0 : i32
    return %c0_i32, %c0_i32_0 : i32, i32
  }
  func.func @transform_7(%arg0: i32, %arg1: i32, %arg2: i32) -> (i32, i32) {
    %c0_i32 = arith.constant 0 : i32
    %c0_i32_0 = arith.constant 0 : i32
    %c0_i32_1 = arith.constant 0 : i32
    return %c0_i32, %c0_i32_0 : i32, i32
  }
  func.func @transform_8(%arg0: i32, %arg1: i32, %arg2: i32) -> (i32, i32) {
    %c0_i32 = arith.constant 0 : i32
    %c0_i32_0 = arith.constant 0 : i32
    %c0_i32_1 = arith.constant 0 : i32
    return %c0_i32, %c0_i32_0 : i32, i32
  }
  func.func @transform_9(%arg0: i32, %arg1: i32, %arg2: i32) -> (i32, i32) {
    %c0_i32 = arith.constant 0 : i32
    %c0_i32_0 = arith.constant 0 : i32
    %c0_i32_1 = arith.constant 0 : i32
    return %c0_i32, %c0_i32_0 : i32, i32
  }
  func.func @transform_10(%arg0: i32, %arg1: i32, %arg2: i32) -> (i32, i32) {
    %c0_i32 = arith.constant 0 : i32
    %c0_i32_0 = arith.constant 0 : i32
    %c0_i32_1 = arith.constant 0 : i32
    return %c0_i32, %c0_i32_0 : i32, i32
  }
  func.func @transform_11(%arg0: i32, %arg1: i32, %arg2: i32) -> (i32, i32) {
    %c0_i32 = arith.constant 0 : i32
    %c0_i32_0 = arith.constant 0 : i32
    %c0_i32_1 = arith.constant 0 : i32
    return %c0_i32, %c0_i32_0 : i32, i32
  }
  func.func @transform_12(%arg0: i32, %arg1: i32, %arg2: i32) -> (i32, i32) {
    %c0_i32 = arith.constant 0 : i32
    %c0_i32_0 = arith.constant 0 : i32
    %c0_i32_1 = arith.constant 0 : i32
    return %c0_i32, %c0_i32_0 : i32, i32
  }
  func.func @transform_13(%arg0: i32, %arg1: i32, %arg2: i32) -> (i32, i32) {
    %c0_i32 = arith.constant 0 : i32
    %c0_i32_0 = arith.constant 0 : i32
    %c0_i32_1 = arith.constant 0 : i32
    return %c0_i32, %c0_i32_0 : i32, i32
  }
  func.func @transform_14(%arg0: i32, %arg1: i32, %arg2: i32) -> (i32, i32) {
    %c0_i32 = arith.constant 0 : i32
    %c0_i32_0 = arith.constant 0 : i32
    %c0_i32_1 = arith.constant 0 : i32
    return %c0_i32, %c0_i32_0 : i32, i32
  }
  func.func @transform_15(%arg0: i32, %arg1: i32, %arg2: i32) -> (i32, i32) {
    %c0_i32 = arith.constant 0 : i32
    %c0_i32_0 = arith.constant 0 : i32
    %c0_i32_1 = arith.constant 0 : i32
    return %c0_i32, %c0_i32_0 : i32, i32
  }
  func.func @transform_16(%arg0: i32, %arg1: i32, %arg2: i32) -> (i32, i32) {
    %c0_i32 = arith.constant 0 : i32
    %c0_i32_0 = arith.constant 0 : i32
    %c0_i32_1 = arith.constant 0 : i32
    return %c0_i32, %c0_i32_0 : i32, i32
  }
  func.func @transform_17(%arg0: i32, %arg1: i32, %arg2: i32) -> (i32, i32) {
    %c0_i32 = arith.constant 0 : i32
    %c0_i32_0 = arith.constant 0 : i32
    %c0_i32_1 = arith.constant 0 : i32
    return %c0_i32, %c0_i32_0 : i32, i32
  }
  func.func @transform_18(%arg0: i32, %arg1: i32, %arg2: i32) -> (i32, i32, i32) {
    %0 = arith.muli %arg2, %arg1 : i32
    %c0_i32 = arith.constant 0 : i32
    %c0_i32_0 = arith.constant 0 : i32
    return %arg0, %c0_i32, %0 : i32, i32, i32
  }
}

</mosaic_0001>

<bundles_post_ra>
// kernel: tpu_custom_call.1
= control target key start
LH: loop header
LB: loop body
LE: loop exit
PB: predicated region body
PF: predicated region fallthrough
CT: control target
= control target key end

     0   :  { %s14964_s0 = inlined_call_operand.vmem [shape: f32[2,768,3], index: 0, kind: input, shape index: {}]   ;;  %s14965_s1 = inlined_call_operand.vmem [shape: bf16[3,64], index: 1, kind: input, shape index: {}]   ;;  %s14966_s2 = inlined_call_operand.vmem [shape: f32[1,64], index: 2, kind: input, shape index: {}]   ;;  %s14967_s3 = inlined_call_operand.vmem [shape: bf16[64,64], index: 3, kind: input, shape index: {}]   ;;  %s14968_s4 = inlined_call_operand.vmem [shape: f32[1,64], index: 4, kind: input, shape index: {}]   ;;  %s14969_s5 = inlined_call_operand.vmem [shape: bf16[64,128], index: 5, kind: input, shape index: {}]   ;;  %s14970_s6 = inlined_call_operand.vmem [shape: f32[1,128], index: 6, kind: input, shape index: {}]   ;;  %s14971_s7 = inlined_call_operand.vmem [shape: bf16[128,1024], index: 7, kind: input, shape index: {}]   ;;  %s14972_s8 = inlined_call_operand.vmem [shape: f32[1,1024], index: 8, kind: input, shape index: {}]   ;;  %s14973_s9 = inlined_call_operand.vmem [shape: bf16[64,512], index: 9, kind: input, shape index: {}]   ;;  %s14974_s10 = inlined_call_operand.hbm [shape: bf16[1024,512], index: 10, kind: input, shape index: {}]   ;;  %s14975_s11 = inlined_call_operand.vmem [shape: f32[1,512], index: 11, kind: input, shape index: {}]   ;;  %s14976_s12 = inlined_call_operand.vmem [shape: bf16[512,256], index: 12, kind: input, shape index: {}]   ;;  %s14977_s13 = inlined_call_operand.vmem [shape: f32[1,256], index: 13, kind: input, shape index: {}]   ;;  %s14978_s14 = inlined_call_operand.vmem [shape: bf16[256,128], index: 14, kind: input, shape index: {}]   ;;  %s14979_s15 = inlined_call_operand.vmem [shape: f32[1,128], index: 15, kind: input, shape index: {}]   ;;  %s14980_s16 = inlined_call_operand.vmem [shape: bf16[128,128], index: 16, kind: input, shape index: {}]   ;;  %s14981_s17 = inlined_call_operand.vmem [shape: f32[1,128], index: 17, kind: input, shape index: {}]   ;;  %s14982_s18 = inlined_call_operand.vmem [shape: f32[2,6,768], index: 18, kind: output, shape index: {}]  }
   0x1   :  { %15076 = sst [smem:[#allocation65_spill]] %s14964_s0 }
   0x2   :  { %15077 = sst [smem:[#allocation66_spill]] %s14965_s1 }
   0x3   :  { %15078 = sst [smem:[#allocation67_spill]] %s14966_s2 }
   0x4   :  { %15079 = sst [smem:[#allocation68_spill]] %s14974_s10 }
   0x5   :  { %15080 = sst [smem:[#allocation69_spill]] %s14979_s15 }
   0x6   :  { %15081 = sst [smem:[#allocation70_spill]] %s14980_s16 }
   0x7   :  { %15082 = sst [smem:[#allocation71_spill]] %s14981_s17 }
   0x8   :  { %23 = vsyncpa [#allocation5], 0  ;;  %s11162_s27 = smov 0   ;;  %s11164_s28 = smov 0  }
   0x9   :  { %s11166_s29 = smov 0   ;;  %s11168_s30 = smov 0  }
   0xa   :  { %s11170_s0 = smov 0   ;;  %s11172_s19 = smov 0  }
   0xb   :  { %s11174_s1 = smov 0  }
   0xc LB: > { %15083 = sst [smem:[#allocation7_spill]] %s11047_s30  ;;  %s8534_s20 = sadd.s32 4294967295, %s11059_s1   ;;  %s11059_s1 = sphi %s11174_s1, %s29_s1   ;;  %s11055_s19 = sphi %s11172_s19, %s15299_s19   ;;  %s11051_s0 = sphi %s11170_s0, %s15298_s0   ;;  %s11047_s30 = sphi %s11168_s30, %s15297_s30   ;;  %s11043_s29 = sphi %s11166_s29, %s15296_s29   ;;  %s11039_s28 = sphi %s11164_s28, %s15295_s28   ;;  %s11035_s27 = sphi %s11162_s27, %s15294_s27  }
   0xd   : > { %15084 = sst [smem:[#allocation8_spill]] %s11051_s0  ;;  %s41_s21 = sadd.s32 1, %s11047_s30 }
   0xe   : > { %15085 = sst [smem:[#allocation9_spill]] %s11055_s19  ;;  %p42_p0 = scmp.ge.s32.totalorder %s41_s21, 3 }
   0xf   : > { %15086 = sst [smem:[#allocation10_spill]] %s11059_s1  ;;  %s44_s22 = sadd.s32 1, %s11051_s0 }
  0x10   : > { %s48_s2 = sadd.s32 1, %s11055_s19  ;;  %p8536_p1 = scmp.ge.s32.totalorder %s11059_s1, 1 }
  0x11   : > { %s15301_s21 = smov (%p42_p0, %s41_s21), 0  ;;  %s15303_s22 = smov (!%p42_p0, %s44_s22), %s11051_s0 }
  0x12   : > { %15087 = sst [smem:[#allocation11_spill]] %s15301_s21  ;;  %p468_p2 = scmp.lt.s32.totalorder %s11059_s1, 13 }
  0x13   : > { %p46_p3 = scmp.ge.s32.totalorder %s15303_s22, 2  ;;  %p11206_p4 = scmp.eq.s32.totalorder %s8534_s20, 0 }
  0x14   : > { %p11210_p5 = pnand %p8536_p1, %p468_p2  ;;  %s15090_s10 = sld [smem:[#allocation68_spill]] }
  0x15   : > { %s15305_s22 = smov (%p46_p3, %s15303_s22), 0  ;;  %s15307_s2 = smov (!%p46_p3, %s48_s2), %s11055_s19 }
  0x16   : > { %15091 = sst [smem:[#allocation12_spill]] %s15305_s22  ;;  %p10894_p6 = pneg %p11210_p5 }
  0x17   : > { %p50_p7 = scmp.ge.s32.totalorder %s15307_s2, 2  ;;  %s11061_s20 = smov [#allocation4]  }
  0x18   : > { %s508_s21 = sshll.u32 %s11061_s20, 4  ;;  %p10895_p8 = pnand %p11206_p4, %p10894_p6  ;;  %s509_s21 = int_to_ptr.vmem [resolvable:$true] %s508_s21 }
  0x19   : > { %s15309_s2 = smov (%p50_p7, %s15307_s2), 0  ;;  %s11062_s0 = smov 256  }
  0x1a   : > { %s506_s30 = sshll.u32 %s15090_s10, 4  ;;  %15092 = sst [smem:[#allocation13_spill]] %s15309_s2  ;;  %s507_s30 = int_to_ptr.hbm [resolvable:$true] %s506_s30 }
  0x1b   : > { %s11063_s1 = smov 16   ;;  %558 = sbr.rel (%p11210_p5) target bundleno = 3318 (0xcf6), region = 92 }
  0x1c   : > { %10897 = dma.hbm_to_vmem [thread:$0]  (!%p10895_p8), %s507_s30, 32768, %s509_s21, [#allocation5], %s11062_s0, %s11062_s0, %s11063_s1  }
  0x20   : > { %11030 = dma.done.wait (%p11206_p4), [#allocation5], 32768  }
  0x21   : > { %11032 = vsyncadd (%p11206_p4), [#allocation5], 4294934528  ;;  %s8541_s25 = sshll.u32 %s11035_s27, 5  ;;  %p623_p9 = scmp.lt.s32.totalorder %s11043_s29, 1 }
  0x22   : > { %p625_p10 = scmp.lt.s32.totalorder %s8541_s25, 95  ;;  %s632_s26 = smul.u32 %s11035_s27, %s11039_s28 }
  0x23   : > { %s15311_s29 = smov (!%p623_p9, %s11043_s29), 1  ;;  %s15093_s10 = sld [smem:[#allocation65_spill]] }
  0x24   : > { %s15313_s25 = smov (!%p625_p10, %s8541_s25), 95  ;;  %s10888_s30 = smul.u32 96, %s15311_s29 }
  0x25   : > { %s8543_s0 = sshll.u32 %s632_s26, 1  ;;  %s10889_s24 = smul.u32 6, %s15311_s29 }
  0x26   : > { %p636_p11 = scmp.lt.s32.totalorder %s8543_s0, 5  ;;  %s628_s1 = sadd.s32 %s10888_s30, %s15313_s25 }
  0x27   : > { %s8542_s21 = sshll.u32 %s628_s1, 3  ;;  %p8545_p12 = scmp.ne.s32.totalorder %s11039_s28, 0 }
  0x28   : > { %s15315_s0 = smov (!%p636_p11, %s8543_s0), 5 }
  0x29   : > { %s11240_s2 = scalar_lea.vmem %s15093_s10, %s8542_s21  ;;  %s639_s22 = sadd.s32 %s10889_s24, %s15315_s0 }
  0x2a   : > { %s8544_s19 = sshll.u32 %s639_s22, 3  ;;  %648 = sbr.rel (%p8545_p12) target bundleno = 1273 (0x4f9), region = 100 }
  0x2b   : > { %s11245_s16 = scalar_lea.vmem %s14982_s18, %s8544_s19 }
  0x2f   : > { %p8546_p13 = scmp.ne.s32.totalorder %s11035_s27, 0 }
  0x31   : > { %652 = sbr.rel (%p8546_p13) target bundleno = 56 (0x38), region = 104 }
  0x36   : > { %v11064_v0 = vmov 0.0  }
  0x37   : > { %653 = vst [vmem:[#allocation2] sm:$0xff] %v11064_v0 }
  0x38 PF: > { %s15094_s25 = sld [smem:[#allocation66_spill]]  ;;  %vm14989_vm0 = vcmask 1040384   ;;  %vm14988_vm1 = vcmask 1041408   ;;  %v11065_v2 = vmov 65535   ;;  %v654_v4 = vld [vmem:[%s11240_s2] sm:$0xff]  ;;  %v655_v5 = vld [vmem:[%s11240_s2 + $0x8] sm:$0xff] }
  0x39   : > { %v758_v3 = vsel %vm14989_vm0, 4294967295, %v11065_v2  ;;  %v686_v8 = vpack.c.bf16 %v655_v5, %v654_v4  ;;  %vm707_vm2 = vcmask 23552   ;;  %v656_v9 = vld [vmem:[%s11240_s2 + $0x10] sm:$0xff]  ;;  %v657_v10 = vld [vmem:[%s11240_s2 + $0x18] sm:$0xff]  ;;  %v658_v12 = vld [vmem:[%s11240_s2 + $0x20] sm:$0xff]  ;;  %s15095_s20 = sld [smem:[#allocation67_spill]] }
  0x3a   : > { %v759_v6 = vsel %vm14988_vm1, %v758_v3, 0  ;;  %v687_v11 = vpack.c.bf16 %v657_v10, %v656_v9  ;;  %v659_v13 = vld [vmem:[%s11240_s2 + $0x28] sm:$0xff]  ;;  %v660_v15 = vld [vmem:[%s11240_s2 + $0x30] sm:$0xff]  ;;  %v661_v16 = vld [vmem:[%s11240_s2 + $0x38] sm:$0xff]  ;;  %vm936_vm3 = vcmask 523264   ;;  %s8883_s29 = sshll.u32 %s11035_s27, 8 }
  0x3b   : > { %v688_v14 = vpack.c.bf16 %v659_v13, %v658_v12  ;;  %v689_v17 = vpack.c.bf16 %v661_v16, %v660_v15  ;;  %v662_v18 = vld [vmem:[%s11240_s2 + $0x40] sm:$0xff]  ;;  %v663_v19 = vld [vmem:[%s11240_s2 + $0x48] sm:$0xff]  ;;  %v664_v21 = vld [vmem:[%s11240_s2 + $0x50] sm:$0xff] }
  0x3c   : > { %v690_v20 = vpack.c.bf16 %v663_v19, %v662_v18  ;;  %v665_v22 = vld [vmem:[%s11240_s2 + $0x58] sm:$0xff]  ;;  %v666_v24 = vld [vmem:[%s11240_s2 + $0x60] sm:$0xff]  ;;  %v667_v25 = vld [vmem:[%s11240_s2 + $0x68] sm:$0xff] }
  0x3d   : > { %v691_v23 = vpack.c.bf16 %v665_v22, %v664_v21  ;;  %v10443_v26 = vld [vmem:[%s14967_s3 + $0x18] sm:$0xff]  ;;  %v692_v27 = vpack.c.bf16 %v667_v25, %v666_v24  ;;  %v10442_v28 = vld [vmem:[%s14967_s3 + $0x10] sm:$0xff]  ;;  %v10441_v29 = vld [vmem:[%s14967_s3 + $0x8] sm:$0xff] }
  0x3e   : > { %v702_v1 = vld [vmem:[%s15094_s25] sm:$0x3]  ;;  %989 = vmatpush.bf16.msra.mxu1 %v10443_v26  ;;  %v668_v31 = vld [vmem:[%s11240_s2 + $0x70] sm:$0xff]  ;;  %v669_v32 = vld [vmem:[%s11240_s2 + $0x78] sm:$0xff] }
  0x3f   : > { %v761_v7 = vand.u32 %v759_v6, %v702_v1  ;;  %v10440_v30 = vld [vmem:[%s14967_s3] sm:$0xff]  ;;  %v693_v33 = vpack.c.bf16 %v669_v32, %v668_v31  ;;  %v671_v35 = vld [vmem:[%s11240_s2 + $0x88] sm:$0xff]  ;;  %v672_v44 = vld [vmem:[%s11240_s2 + $0x90] sm:$0xff] }
  0x40   : > { %v670_v34 = vld [vmem:[%s11240_s2 + $0x80] sm:$0xff]  ;;  %v673_v45 = vld [vmem:[%s11240_s2 + $0x98] sm:$0xff]  ;;  %v675_v55 = vld [vmem:[%s11240_s2 + $0xa8] sm:$0xff] }
  0x41   : > { %770 = vmatpush.bf16.msra.mxu0 %v761_v7  ;;  %10876 = vmatpush.bf16.msra.mxu3 %v761_v7  ;;  %v694_v36 = vpack.c.bf16 %v671_v35, %v670_v34  ;;  %v11295_v38 = vld [vmem:[%s15095_s20] ss:$0 sm:$0xff]  ;;  %v695_v47 = vpack.c.bf16 %v673_v45, %v672_v44  ;;  %v680_v59 = vld [vmem:[%s11240_s2 + $0xd0] sm:$0xff]  ;;  %v681_v60 = vld [vmem:[%s11240_s2 + $0xd8] sm:$0xff] }
  0x42   : > { %990 = vmatpush.bf16.msra.mxu1 %v10442_v28  ;;  %v674_v54 = vld [vmem:[%s11240_s2 + $0xa0] sm:$0xff]  ;;  %v699_v61 = vpack.c.bf16 %v681_v60, %v680_v59  ;;  %v676_v3 = vld [vmem:[%s11240_s2 + $0xb0] sm:$0xff]  ;;  %v677_v4 = vld [vmem:[%s11240_s2 + $0xb8] sm:$0xff] }
  0x43   : > { %v696_v57 = vpack.c.bf16 %v675_v55, %v674_v54  ;;  %v697_v6 = vpack.c.bf16 %v677_v4, %v676_v3  ;;  %v683_v9 = vld [vmem:[%s11240_s2 + $0xe8] sm:$0xff]  ;;  %v678_v16 = vld [vmem:[%s11240_s2 + $0xc0] sm:$0xff]  ;;  %v684_v21 = vld [vmem:[%s11240_s2 + $0xf0] sm:$0xff] }
  0x44   : > { %8547 = vmatmul.msk.bf16.vlgmr.msra.gmra.mxu0 %vm707_vm2, %v686_v8  ;;  %8560 = vmatmul.msk.bf16.vlgmr.msra.gmra.mxu3 %vm707_vm2, %v699_v61  ;;  %v682_v8 = vld [vmem:[%s11240_s2 + $0xe0] sm:$0xff]  ;;  %v685_v22 = vld [vmem:[%s11240_s2 + $0xf8] sm:$0xff] }
  0x45   : > { %10877 = vmatpush.bf16.msrb.mxu3 %v10443_v26  ;;  %v700_v10 = vpack.c.bf16 %v683_v9, %v682_v8 }
  0x46   : > { %991 = vmatpush.bf16.msra.mxu1 %v10441_v29 }
  0x49   : > { %10878 = vmatpush.bf16.msrb.mxu3 %v10442_v28 }
  0x4a   : > { %992 = vmatpush.bf16.msra.mxu1 %v10440_v30 }
  0x4d   : > { %10879 = vmatpush.bf16.msrb.mxu3 %v10441_v29 }
  0x51   : > { %10880 = vmatpush.bf16.msrb.mxu3 %v10440_v30 }
  0x54   : > { %8548 = vmatmul.msk.bf16.gmra.mxu0 %vm707_vm2, %v687_v11  ;;  %8561 = vmatmul.msk.bf16.gmra.mxu3 %vm707_vm2, %v700_v10 }
  0x64   : > { %8549 = vmatmul.msk.bf16.gmra.mxu0 %vm707_vm2, %v688_v14 }
  0x74   : > { %8550 = vmatmul.msk.bf16.gmra.mxu0 %vm707_vm2, %v689_v17  ;;  %v679_v17 = vld [vmem:[%s11240_s2 + $0xc8] sm:$0xff] }
  0x75   : > { %v698_v19 = vpack.c.bf16 %v679_v17, %v678_v16 }
  0x84   : > { %8551 = vmatmul.msk.bf16.gmra.mxu0 %vm707_vm2, %v690_v20 }
  0x94   : > { %8552 = vmatmul.msk.bf16.gmra.mxu0 %vm707_vm2, %v691_v23  ;;  %v701_v23 = vpack.c.bf16 %v685_v22, %v684_v21 }
  0x96   : > { %8562 = vmatmul.msk.bf16.gmra.mxu3 %vm707_vm2, %v701_v23 }
  0xa4   : > { %8553 = vmatmul.msk.bf16.gmra.mxu0 %vm707_vm2, %v692_v27 }
  0xb4   : > { %8554 = vmatmul.msk.bf16.gmra.mxu0 %vm707_vm2, %v693_v33 }
  0xc1   : > { %v772_v37 = vpop.f32.mrf.mxu0 }
  0xc2   : > { %v773_v39 = vadd.f32 %v11295_v38, %v772_v37 }
  0xc4   : > { %8555 = vmatmul.msk.bf16.gmra.mxu0 %vm707_vm2, %v694_v36  ;;  %v852_v42 = vmax.f32 %v773_v39, 0.0 }
  0xc9   : > { %v774_v40 = vpop.f32.mrf.mxu0 }
  0xca   : > { %v775_v41 = vadd.f32 %v11295_v38, %v774_v40 }
  0xcc   : > { %v853_v43 = vmax.f32 %v775_v41, 0.0 }
  0xce   : > { %v884_v46 = vpack.c.bf16 %v853_v43, %v852_v42  ;;  %v10447_v42 = vld [vmem:[%s14969_s5 + $0x18] sm:$0xff] }
  0xcf   : > { %1210 = vmatpush.bf16.msra.mxu2 %v10447_v42  ;;  %10881 = vmatpush.bf16.msra.mxu3 %v10447_v42 }
  0xd0   : > { %8579 = vmatmul.msk.bf16.vlgmr.msra.gmra.mxu1 %vm936_vm3, %v884_v46  ;;  %v10446_v46 = vld [vmem:[%s14969_s5 + $0x10] sm:$0xff] }
  0xd1   : > { %v777_v48 = vpop.f32.mrf.mxu0 }
  0xd2   : > { %v778_v49 = vadd.f32 %v11295_v38, %v777_v48  ;;  %v10445_v48 = vld [vmem:[%s14969_s5 + $0x8] sm:$0xff] }
  0xd3   : > { %1211 = vmatpush.bf16.msra.mxu2 %v10446_v46  ;;  %10882 = vmatpush.bf16.msra.mxu3 %v10446_v46 }
  0xd4   : > { %8556 = vmatmul.msk.bf16.gmra.mxu0 %vm707_vm2, %v695_v47  ;;  %v854_v52 = vmax.f32 %v778_v49, 0.0  ;;  %v10444_v49 = vld [vmem:[%s14969_s5] sm:$0xff] }
  0xd7   : > { %1212 = vmatpush.bf16.msra.mxu2 %v10445_v48  ;;  %10883 = vmatpush.bf16.msra.mxu3 %v10445_v48  ;;  %v8863_v48 = vld [vmem:[%s14971_s7 + $0x1e8] sm:$0xf0] }
  0xd9   : > { %v779_v50 = vpop.f32.mrf.mxu0 }
  0xda   : > { %v780_v51 = vadd.f32 %v11295_v38, %v779_v50 }
  0xdb   : > { %1213 = vmatpush.bf16.msra.mxu2 %v10444_v49  ;;  %10884 = vmatpush.bf16.msra.mxu3 %v10444_v49 }
  0xdc   : > { %v855_v53 = vmax.f32 %v780_v51, 0.0 }
  0xde   : > { %v885_v56 = vpack.c.bf16 %v855_v53, %v854_v52 }
  0xe0   : > { %8580 = vmatmul.msk.bf16.gmra.mxu1 %vm936_vm3, %v885_v56 }
  0xe1   : > { %v782_v58 = vpop.f32.mrf.mxu0 }
  0xe2   : > { %v783_v62 = vadd.f32 %v11295_v38, %v782_v58 }
  0xe4   : > { %8557 = vmatmul.msk.bf16.gmra.mxu0 %vm707_vm2, %v696_v57  ;;  %v856_v1 = vmax.f32 %v783_v62, 0.0 }
  0xe9   : > { %v784_v63 = vpop.f32.mrf.mxu0 }
  0xea   : > { %v785_v0 = vadd.f32 %v11295_v38, %v784_v63 }
  0xec   : > { %v857_v2 = vmax.f32 %v785_v0, 0.0  ;;  %v11360_v0 = vld [vmem:[%s14968_s4] ss:$0 sm:$0xff] }
  0xee   : > { %v886_v5 = vpack.c.bf16 %v857_v2, %v856_v1 }
  0xf0   : > { %8581 = vmatmul.msk.bf16.gmra.mxu1 %vm936_vm3, %v886_v5 }
  0xf1   : > { %v787_v7 = vpop.f32.mrf.mxu0 }
  0xf2   : > { %v788_v11 = vadd.f32 %v11295_v38, %v787_v7 }
  0xf4   : > { %8558 = vmatmul.msk.bf16.gmra.mxu0 %vm707_vm2, %v697_v6  ;;  %v858_v14 = vmax.f32 %v788_v11, 0.0 }
  0xf9   : > { %v789_v12 = vpop.f32.mrf.mxu0 }
  0xfa   : > { %v790_v13 = vadd.f32 %v11295_v38, %v789_v12 }
  0xfc   : > { %v859_v15 = vmax.f32 %v790_v13, 0.0 }
  0xfe   : > { %v887_v18 = vpack.c.bf16 %v859_v15, %v858_v14 }
 0x100   : > { %8582 = vmatmul.msk.bf16.gmra.mxu1 %vm936_vm3, %v887_v18 }
 0x101   : > { %v792_v20 = vpop.f32.mrf.mxu0 }
 0x102   : > { %v793_v24 = vadd.f32 %v11295_v38, %v792_v20 }
 0x104   : > { %8559 = vmatmul.msk.bf16.gmra.mxu0 %vm707_vm2, %v698_v19  ;;  %v860_v27 = vmax.f32 %v793_v24, 0.0 }
 0x109   : > { %v794_v25 = vpop.f32.mrf.mxu0 }
 0x10a   : > { %v795_v26 = vadd.f32 %v11295_v38, %v794_v25 }
 0x10c   : > { %v861_v28 = vmax.f32 %v795_v26, 0.0 }
 0x10e   : > { %v888_v29 = vpack.c.bf16 %v861_v28, %v860_v27 }
 0x110   : > { %8583 = vmatmul.msk.bf16.gmra.mxu1 %vm936_vm3, %v888_v29 }
 0x111   : > { %v797_v30 = vpop.f32.mrf.mxu0 }
 0x112   : > { %v798_v31 = vadd.f32 %v11295_v38, %v797_v30 }
 0x114   : > { %v862_v34 = vmax.f32 %v798_v31, 0.0 }
 0x119   : > { %v799_v32 = vpop.f32.mrf.mxu0 }
 0x11a   : > { %v800_v33 = vadd.f32 %v11295_v38, %v799_v32 }
 0x11c   : > { %v863_v35 = vmax.f32 %v800_v33, 0.0 }
 0x11e   : > { %v889_v36 = vpack.c.bf16 %v863_v35, %v862_v34 }
 0x120   : > { %8584 = vmatmul.msk.bf16.gmra.mxu1 %vm936_vm3, %v889_v36  ;;  %v10504_v36 = vld [vmem:[%s14971_s7 + $0x1c4] sm:$0xf] }
 0x121   : > { %v802_v37 = vpop.f32.mrf.mxu0 }
 0x122   : > { %v803_v39 = vadd.f32 %v11295_v38, %v802_v37  ;;  %v8855_v37 = vld [vmem:[%s14971_s7 + $0x1e0] sm:$0xf0] }
 0x124   : > { %v864_v43 = vmax.f32 %v803_v39, 0.0 }
 0x129   : > { %v804_v40 = vpop.f32.mrf.mxu0 }
 0x12a   : > { %v805_v41 = vadd.f32 %v11295_v38, %v804_v40  ;;  %v8858_v40 = vor.u32 %v10504_v36, %v8855_v37 }
 0x12c   : > { %v865_v44 = vmax.f32 %v805_v41, 0.0  ;;  %1834 = vmatpush.bf16.msrb.mxu0 %v8858_v40 }
 0x12e   : > { %v890_v45 = vpack.c.bf16 %v865_v44, %v864_v43 }
 0x130   : > { %8585 = vmatmul.msk.bf16.gmra.mxu1 %vm936_vm3, %v890_v45 }
 0x131   : > { %v807_v47 = vpop.f32.mrf.mxu0 }
 0x132   : > { %v808_v50 = vadd.f32 %v11295_v38, %v807_v47  ;;  %v10505_v47 = vld [vmem:[%s14971_s7 + $0x1cc] sm:$0xf] }
 0x134   : > { %v866_v53 = vmax.f32 %v808_v50, 0.0  ;;  %v837_v50 = vpop.f32.mrf.mxu3 }
 0x139   : > { %v809_v51 = vpop.f32.mrf.mxu0 }
 0x13a   : > { %v810_v52 = vadd.f32 %v11295_v38, %v809_v51  ;;  %v8866_v51 = vor.u32 %v10505_v47, %v8863_v48  ;;  %v8799_v47 = vld [vmem:[%s14971_s7 + $0x168] sm:$0xf0] }
 0x13c   : > { %v867_v54 = vmax.f32 %v810_v52, 0.0  ;;  %2012 = vmatpush.bf16.msrb.mxu2 %v8866_v51  ;;  %v8797_v51 = vld [vmem:[%s14971_s7 + $0x148] sm:$0xf] }
 0x13e   : > { %v891_v55 = vpack.c.bf16 %v867_v54, %v866_v53 }
 0x140   : > { %8586 = vmatmul.msk.bf16.gmra.mxu1 %vm936_vm3, %v891_v55 }
 0x141   : > { %v812_v56 = vpop.f32.mrf.mxu0 }
 0x142   : > { %v813_v57 = vadd.f32 %v11295_v38, %v812_v56 }
 0x144   : > { %v868_v60 = vmax.f32 %v813_v57, 0.0 }
 0x149   : > { %v814_v58 = vpop.f32.mrf.mxu0 }
 0x14a   : > { %v815_v59 = vadd.f32 %v11295_v38, %v814_v58  ;;  %v8861_v58 = vld [vmem:[%s14971_s7 + $0x1c8] sm:$0xf] }
 0x14c   : > { %v869_v61 = vmax.f32 %v815_v59, 0.0  ;;  %v10509_v59 = vld [vmem:[%s14971_s7 + $0x1e4] sm:$0xf0] }
 0x14d   : > { %v994_v62 = vpop.f32.mrf.mxu1 }
 0x14e   : > { %v892_v63 = vpack.c.bf16 %v869_v61, %v868_v60  ;;  %v995_v2 = vadd.f32 %v11360_v0, %v994_v62  ;;  %v8862_v61 = vor.u32 %v10509_v59, %v8861_v58 }
 0x150   : > { %8587 = vmatmul.msk.bf16.gmra.mxu1 %vm936_vm3, %v892_v63  ;;  %v1074_v5 = vmax.f32 %v995_v2, 0.0 }
 0x151   : > { %v817_v1 = vpop.f32.mrf.mxu0  ;;  %1923 = vmatpush.bf16.msrb.mxu1 %v8862_v61  ;;  %v8759_v61 = vld [vmem:[%s14971_s7 + $0x120] sm:$0xf0] }
 0x152   : > { %v818_v6 = vadd.f32 %v11295_v38, %v817_v1  ;;  %v839_v1 = vpop.f32.mrf.mxu3 }
 0x154   : > { %v870_v11 = vmax.f32 %v818_v6, 0.0  ;;  %v10496_v6 = vld [vmem:[%s14971_s7 + $0x184] sm:$0xf] }
 0x155   : > { %v996_v3 = vpop.f32.mrf.mxu1 }
 0x156   : > { %v997_v4 = vadd.f32 %v11360_v0, %v996_v3 }
 0x158   : > { %v1075_v7 = vmax.f32 %v997_v4, 0.0 }
 0x159   : > { %v819_v8 = vpop.f32.mrf.mxu0 }
 0x15a   : > { %v820_v9 = vadd.f32 %v11295_v38, %v819_v8  ;;  %v1106_v10 = vpack.c.bf16 %v1075_v7, %v1074_v5  ;;  %v8823_v7 = vld [vmem:[%s14971_s7 + $0x1a0] sm:$0xf0] }
 0x15b   : > { %v8826_v8 = vor.u32 %v10496_v6, %v8823_v7  ;;  %v8727_v6 = vld [vmem:[%s14971_s7 + $0xe0] sm:$0xf0]  ;;  %v8733_v7 = vld [vmem:[%s14971_s7 + $0xc8] sm:$0xf] }
 0x15c   : > { %v871_v12 = vmax.f32 %v820_v9, 0.0  ;;  %8611 = vmatmul.msk.bf16.vlgmr.msra.gmra.mxu2 %vm936_vm3, %v1106_v10 }
 0x15d   : > { %v999_v13 = vpop.f32.mrf.mxu1  ;;  %1835 = vmatpush.bf16.msrb.mxu0 %v8826_v8 }
 0x15e   : > { %v893_v14 = vpack.c.bf16 %v871_v12, %v870_v11  ;;  %v1000_v16 = vadd.f32 %v11360_v0, %v999_v13  ;;  %v842_v11 = vpop.f32.mrf.mxu3  ;;  %v838_v12 = vadd.f32 %v11295_v38, %v837_v50  ;;  %v840_v13 = vadd.f32 %v11295_v38, %v839_v1 }
 0x160   : > { %8588 = vmatmul.msk.bf16.gmra.mxu1 %vm936_vm3, %v893_v14  ;;  %v1076_v19 = vmax.f32 %v1000_v16, 0.0 }
 0x161   : > { %v822_v15 = vpop.f32.mrf.mxu0 }
 0x162   : > { %v823_v20 = vadd.f32 %v11295_v38, %v822_v15 }
 0x164   : > { %v872_v25 = vmax.f32 %v823_v20, 0.0  ;;  %v878_v20 = vmax.f32 %v838_v12, 0.0 }
 0x165   : > { %v1001_v17 = vpop.f32.mrf.mxu1 }
 0x166   : > { %v1002_v18 = vadd.f32 %v11360_v0, %v1001_v17  ;;  %v10497_v17 = vld [vmem:[%s14971_s7 + $0x18c] sm:$0xf] }
 0x168   : > { %v1077_v21 = vmax.f32 %v1002_v18, 0.0  ;;  %v8831_v18 = vld [vmem:[%s14971_s7 + $0x1a8] sm:$0xf0] }
 0x169   : > { %v824_v22 = vpop.f32.mrf.mxu0 }
 0x16a   : > { %v825_v23 = vadd.f32 %v11295_v38, %v824_v22  ;;  %v1107_v24 = vpack.c.bf16 %v1077_v21, %v1076_v19  ;;  %v8834_v19 = vor.u32 %v10497_v17, %v8831_v18  ;;  %v879_v21 = vmax.f32 %v840_v13, 0.0  ;;  %v10464_v13 = vld [vmem:[%s14971_s7 + $0x84] sm:$0xf]  ;;  %v10469_v17 = vld [vmem:[%s14971_s7 + $0xa4] sm:$0xf0] }
 0x16c   : > { %v873_v26 = vmax.f32 %v825_v23, 0.0  ;;  %8612 = vmatmul.msk.bf16.gmra.mxu2 %vm936_vm3, %v1107_v24  ;;  %v897_v24 = vpack.c.bf16 %v879_v21, %v878_v20  ;;  %v10456_v20 = vld [vmem:[%s14971_s7 + $0x44] sm:$0xf] }
 0x16d   : > { %v1004_v27 = vpop.f32.mrf.mxu1  ;;  %2013 = vmatpush.bf16.msrb.mxu2 %v8834_v19  ;;  %v8663_v21 = vld [vmem:[%s14971_s7 + $0x60] sm:$0xf0] }
 0x16e   : > { %v894_v28 = vpack.c.bf16 %v873_v26, %v872_v25  ;;  %v1005_v30 = vadd.f32 %v11360_v0, %v1004_v27  ;;  %v844_v25 = vpop.f32.mrf.mxu3  ;;  %v8829_v26 = vld [vmem:[%s14971_s7 + $0x188] sm:$0xf] }
 0x16f   : > { %v10501_v27 = vld [vmem:[%s14971_s7 + $0x1a4] sm:$0xf0] }
 0x170   : > { %8589 = vmatmul.msk.bf16.gmra.mxu1 %vm936_vm3, %v894_v28  ;;  %v1078_v33 = vmax.f32 %v1005_v30, 0.0  ;;  %v8830_v28 = vor.u32 %v10501_v27, %v8829_v26 }
 0x171   : > { %v827_v29 = vpop.f32.mrf.mxu0 }
 0x172   : > { %v828_v34 = vadd.f32 %v11295_v38, %v827_v29  ;;  %1924 = vmatpush.bf16.msrb.mxu1 %v8830_v28 }
 0x174   : > { %v874_v43 = vmax.f32 %v828_v34, 0.0 }
 0x175   : > { %v1006_v31 = vpop.f32.mrf.mxu1 }
 0x176   : > { %v1007_v32 = vadd.f32 %v11360_v0, %v1006_v31  ;;  %v843_v31 = vadd.f32 %v11295_v38, %v842_v11  ;;  %v847_v36 = vpop.f32.mrf.mxu3 }
 0x178   : > { %v1079_v35 = vmax.f32 %v1007_v32, 0.0  ;;  %v845_v32 = vadd.f32 %v11295_v38, %v844_v25  ;;  %v880_v37 = vmax.f32 %v843_v31, 0.0  ;;  %v10461_v25 = vld [vmem:[%s14971_s7 + $0x64] sm:$0xf0]  ;;  %v8631_v31 = vld [vmem:[%s14971_s7 + $0x20] sm:$0xf0] }
 0x179   : > { %v829_v39 = vpop.f32.mrf.mxu0 }
 0x17a   : > { %v830_v41 = vadd.f32 %v11295_v38, %v829_v39  ;;  %v1108_v42 = vpack.c.bf16 %v1079_v35, %v1078_v33  ;;  %v881_v39 = vmax.f32 %v845_v32, 0.0 }
 0x17c   : > { %v875_v44 = vmax.f32 %v830_v41, 0.0  ;;  %8613 = vmatmul.msk.bf16.gmra.mxu2 %vm936_vm3, %v1108_v42  ;;  %v10488_v41 = vld [vmem:[%s14971_s7 + $0x144] sm:$0xf] }
 0x17d   : > { %v1009_v45 = vpop.f32.mrf.mxu1  ;;  %v8791_v42 = vld [vmem:[%s14971_s7 + $0x160] sm:$0xf0] }
 0x17e   : > { %v895_v46 = vpack.c.bf16 %v875_v44, %v874_v43  ;;  %v1010_v52 = vadd.f32 %v11360_v0, %v1009_v45  ;;  %v8794_v44 = vor.u32 %v10488_v41, %v8791_v42  ;;  %v898_v45 = vpack.c.bf16 %v881_v39, %v880_v37  ;;  %v10481_v37 = vld [vmem:[%s14971_s7 + $0x10c] sm:$0xf] }
 0x17f   : > { %v8767_v39 = vld [vmem:[%s14971_s7 + $0x128] sm:$0xf0] }
 0x180   : > { %8590 = vmatmul.msk.bf16.gmra.mxu1 %vm936_vm3, %v895_v46  ;;  %v1080_v55 = vmax.f32 %v1010_v52, 0.0  ;;  %1836 = vmatpush.bf16.msrb.mxu0 %v8794_v44  ;;  %v10489_v46 = vld [vmem:[%s14971_s7 + $0x14c] sm:$0xf]  ;;  %v10493_v52 = vld [vmem:[%s14971_s7 + $0x164] sm:$0xf0]  ;;  %v8770_v41 = vor.u32 %v10481_v37, %v8767_v39 }
 0x181   : > { %v832_v49 = vpop.f32.mrf.mxu0  ;;  %v8802_v48 = vor.u32 %v10489_v46, %v8799_v47 }
 0x182   : > { %v833_v56 = vadd.f32 %v11295_v38, %v832_v49  ;;  %v849_v49 = vpop.f32.mrf.mxu3 }
 0x183   : > { %2014 = vmatpush.bf16.msrb.mxu2 %v8802_v48 }
 0x184   : > { %v876_v2 = vmax.f32 %v833_v56, 0.0  ;;  %v850_v56 = vadd.f32 %v11295_v38, %v849_v49 }
 0x185   : > { %v1011_v53 = vpop.f32.mrf.mxu1 }
 0x186   : > { %v1012_v54 = vadd.f32 %v11360_v0, %v1011_v53 }
 0x187   : > { %2015 = vmatpush.bf16.msrb.mxu2 %v8770_v41 }
 0x188   : > { %v1081_v57 = vmax.f32 %v1012_v54, 0.0  ;;  %v8798_v54 = vor.u32 %v10493_v52, %v8797_v51  ;;  %v10473_v51 = vld [vmem:[%s14971_s7 + $0xcc] sm:$0xf] }
 0x189   : > { %v834_v60 = vpop.f32.mrf.mxu0  ;;  %v8735_v52 = vld [vmem:[%s14971_s7 + $0xe8] sm:$0xf0] }
 0x18a   : > { %v835_v62 = vadd.f32 %v11295_v38, %v834_v60  ;;  %v1109_v63 = vpack.c.bf16 %v1081_v57, %v1080_v55  ;;  %v848_v55 = vadd.f32 %v11295_v38, %v847_v36  ;;  %1925 = vmatpush.bf16.msrb.mxu1 %v8798_v54  ;;  %v10480_v60 = vld [vmem:[%s14971_s7 + $0x104] sm:$0xf]  ;;  %v10485_v38 = vld [vmem:[%s14971_s7 + $0x124] sm:$0xf0] }
 0x18c   : > { %v877_v3 = vmax.f32 %v835_v62, 0.0  ;;  %8614 = vmatmul.msk.bf16.gmra.mxu2 %vm936_vm3, %v1109_v63  ;;  %v8762_v62 = vor.u32 %v10480_v60, %v8759_v61  ;;  %v8765_v63 = vld [vmem:[%s14971_s7 + $0x108] sm:$0xf]  ;;  %v882_v1 = vmax.f32 %v848_v55, 0.0 }
 0x18d   : > { %v1014_v4 = vpop.f32.mrf.mxu1 }
 0x18e   : > { %v896_v5 = vpack.c.bf16 %v877_v3, %v876_v2  ;;  %v1015_v9 = vadd.f32 %v11360_v0, %v1014_v4  ;;  %v883_v2 = vmax.f32 %v850_v56, 0.0  ;;  %v8766_v4 = vor.u32 %v10485_v38, %v8765_v63  ;;  %1837 = vmatpush.bf16.msrb.mxu0 %v8762_v62 }
 0x190   : > { %8591 = vmatmul.msk.bf16.vlgmr.msrb.gmra.mxu3 %vm936_vm3, %v896_v5  ;;  %v1082_v15 = vmax.f32 %v1015_v9, 0.0  ;;  %1926 = vmatpush.bf16.msrb.mxu1 %v8766_v4  ;;  %v10472_v5 = vld [vmem:[%s14971_s7 + $0xc4] sm:$0xf]  ;;  %v899_v11 = vpack.c.bf16 %v883_v2, %v882_v1  ;;  %v8703_v4 = vld [vmem:[%s14971_s7 + $0xa8] sm:$0xf0] }
 0x191   : > { %v8730_v9 = vor.u32 %v10472_v5, %v8727_v6 }
 0x193   : > { %1838 = vmatpush.bf16.msrb.mxu0 %v8730_v9 }
 0x195   : > { %v1016_v10 = vpop.f32.mrf.mxu1 }
 0x196   : > { %v1017_v14 = vadd.f32 %v11360_v0, %v1016_v10  ;;  %v10477_v10 = vld [vmem:[%s14971_s7 + $0xe4] sm:$0xf0] }
 0x197   : > { %v8734_v12 = vor.u32 %v10477_v10, %v8733_v7  ;;  %v10457_v7 = vld [vmem:[%s14971_s7 + $0x4c] sm:$0xf] }
 0x198   : > { %v1083_v16 = vmax.f32 %v1017_v14, 0.0  ;;  %v8695_v14 = vld [vmem:[%s14971_s7 + $0xa0] sm:$0xf0] }
 0x199   : > { %1927 = vmatpush.bf16.msrb.mxu1 %v8734_v12 }
 0x19a   : > { %v1110_v22 = vpack.c.bf16 %v1083_v16, %v1082_v15  ;;  %v8698_v15 = vor.u32 %v10464_v13, %v8695_v14  ;;  %v8701_v16 = vld [vmem:[%s14971_s7 + $0x88] sm:$0xf]  ;;  %v10449_v14 = vld [vmem:[%s14971_s7 + $0xc] sm:$0xf] }
 0x19b   : > { %v8702_v18 = vor.u32 %v10469_v17, %v8701_v16 }
 0x19c   : > { %8615 = vmatmul.msk.bf16.gmra.mxu2 %vm936_vm3, %v1110_v22  ;;  %1839 = vmatpush.bf16.msrb.mxu0 %v8698_v15  ;;  %v8669_v22 = vld [vmem:[%s14971_s7 + $0x48] sm:$0xf]  ;;  %v8639_v15 = vld [vmem:[%s14971_s7 + $0x28] sm:$0xf0] }
 0x19d   : > { %v1019_v23 = vpop.f32.mrf.mxu1  ;;  %1928 = vmatpush.bf16.msrb.mxu1 %v8702_v18  ;;  %v8670_v27 = vor.u32 %v10461_v25, %v8669_v22  ;;  %v8642_v17 = vor.u32 %v10449_v14, %v8639_v15 }
 0x19e   : > { %v1020_v29 = vadd.f32 %v11360_v0, %v1019_v23 }
 0x1a0   : > { %8592 = vmatmul.msk.bf16.gmra.mxu3 %vm936_vm3, %v897_v24  ;;  %v1084_v34 = vmax.f32 %v1020_v29, 0.0  ;;  %v8666_v24 = vor.u32 %v10456_v20, %v8663_v21 }
 0x1a1   : > { %1929 = vmatpush.bf16.msrb.mxu1 %v8670_v27  ;;  %v8853_v27 = vld [vmem:[%s14971_s7 + $0x1c0] sm:$0xf] }
 0x1a2   : > { %1840 = vmatpush.bf16.msrb.mxu0 %v8666_v24 }
 0x1a5   : > { %v1021_v30 = vpop.f32.mrf.mxu1 }
 0x1a6   : > { %v1022_v33 = vadd.f32 %v11360_v0, %v1021_v30  ;;  %v10448_v30 = vld [vmem:[%s14971_s7 + $0x4] sm:$0xf] }
 0x1a7   : > { %v8634_v32 = vor.u32 %v10448_v30, %v8631_v31 }
 0x1a8   : > { %v1085_v35 = vmax.f32 %v1022_v33, 0.0  ;;  %v8637_v33 = vld [vmem:[%s14971_s7 + $0x8] sm:$0xf] }
 0x1a9   : > { %1841 = vmatpush.bf16.msrb.mxu0 %v8634_v32 }
 0x1aa   : > { %v1111_v40 = vpack.c.bf16 %v1085_v35, %v1084_v34  ;;  %v10453_v34 = vld [vmem:[%s14971_s7 + $0x24] sm:$0xf0] }
 0x1ab   : > { %v8638_v36 = vor.u32 %v10453_v34, %v8637_v33 }
 0x1ac   : > { %8616 = vmatmul.msk.bf16.gmra.mxu2 %vm936_vm3, %v1111_v40 }
 0x1ad   : > { %v1024_v43 = vpop.f32.mrf.mxu1  ;;  %1930 = vmatpush.bf16.msrb.mxu1 %v8638_v36 }
 0x1ae   : > { %v1025_v50 = vadd.f32 %v11360_v0, %v1024_v43 }
 0x1b0   : > { %8593 = vmatmul.msk.bf16.gmra.mxu3 %vm936_vm3, %v898_v45  ;;  %v1086_v58 = vmax.f32 %v1025_v50, 0.0  ;;  %v11534_v50 = vld [vmem:[%s14970_s6] ss:$0 sm:$0xff] }
 0x1b5   : > { %v1026_v53 = vpop.f32.mrf.mxu1 }
 0x1b6   : > { %v1027_v57 = vadd.f32 %v11360_v0, %v1026_v53  ;;  %v8738_v53 = vor.u32 %v10473_v51, %v8735_v52 }
 0x1b8   : > { %v1087_v59 = vmax.f32 %v1027_v57, 0.0  ;;  %2016 = vmatpush.bf16.msrb.mxu2 %v8738_v53 }
 0x1ba   : > { %v1112_v3 = vpack.c.bf16 %v1087_v59, %v1086_v58 }
 0x1bc   : > { %8617 = vmatmul.msk.bf16.gmra.mxu2 %vm936_vm3, %v1112_v3  ;;  %v10465_v3 = vld [vmem:[%s14971_s7 + $0x8c] sm:$0xf] }
 0x1bd   : > { %v1029_v8 = vpop.f32.mrf.mxu1  ;;  %v8706_v6 = vor.u32 %v10465_v3, %v8703_v4 }
 0x1be   : > { %v1030_v19 = vadd.f32 %v11360_v0, %v1029_v8  ;;  %v8671_v8 = vld [vmem:[%s14971_s7 + $0x68] sm:$0xf0] }
 0x1bf   : > { %2017 = vmatpush.bf16.msrb.mxu2 %v8706_v6  ;;  %v8674_v9 = vor.u32 %v10457_v7, %v8671_v8  ;;  %v10476_v6 = vld [vmem:[%s14971_s7 + $0xdc] sm:$0xf0] }
 0x1c0   : > { %8594 = vmatmul.msk.bf16.gmra.mxu3 %vm936_vm3, %v899_v11  ;;  %v1088_v28 = vmax.f32 %v1030_v19, 0.0 }
 0x1c3   : > { %2018 = vmatpush.bf16.msrb.mxu2 %v8674_v9 }
 0x1c5   : > { %v1031_v23 = vpop.f32.mrf.mxu1 }
 0x1c6   : > { %v1032_v26 = vadd.f32 %v11360_v0, %v1031_v23 }
 0x1c7   : > { %2019 = vmatpush.bf16.msrb.mxu2 %v8642_v17 }
 0x1c8   : > { %v1089_v29 = vmax.f32 %v1032_v26, 0.0 }
 0x1ca   : > { %v1113_v35 = vpack.c.bf16 %v1089_v29, %v1088_v28  ;;  %v10508_v28 = vld [vmem:[%s14971_s7 + $0x1dc] sm:$0xf0] }
 0x1cb   : > { %v8854_v29 = vor.u32 %v10508_v28, %v8853_v27  ;;  %v10460_v27 = vld [vmem:[%s14971_s7 + $0x5c] sm:$0xf0] }
 0x1cc   : > { %8618 = vmatmul.msk.bf16.gmra.mxu2 %vm936_vm3, %v1113_v35 }
 0x1cd   : > { %v1034_v40 = vpop.f32.mrf.mxu1  ;;  %1745 = vmatpush.bf16.msrb.mxu3 %v8854_v29 }
 0x1ce   : > { %v1035_v42 = vadd.f32 %v11360_v0, %v1034_v40 }
 0x1d0   : > { %v1090_v45 = vmax.f32 %v1035_v42, 0.0 }
 0x1d5   : > { %v1036_v43 = vpop.f32.mrf.mxu1 }
 0x1d6   : > { %v1037_v44 = vadd.f32 %v11360_v0, %v1036_v43  ;;  %v8821_v43 = vld [vmem:[%s14971_s7 + $0x180] sm:$0xf] }
 0x1d8   : > { %v1091_v46 = vmax.f32 %v1037_v44, 0.0  ;;  %v10500_v44 = vld [vmem:[%s14971_s7 + $0x19c] sm:$0xf0] }
 0x1da   : > { %v1114_v47 = vpack.c.bf16 %v1091_v46, %v1090_v45  ;;  %v8822_v45 = vor.u32 %v10500_v44, %v8821_v43 }
 0x1dc   : > { %8619 = vmatmul.msk.bf16.gmra.mxu2 %vm936_vm3, %v1114_v47  ;;  %1746 = vmatpush.bf16.msrb.mxu3 %v8822_v45  ;;  %v8789_v47 = vld [vmem:[%s14971_s7 + $0x140] sm:$0xf] }
 0x1dd   : > { %v1039_v48 = vpop.f32.mrf.mxu1 }
 0x1de   : > { %v1040_v54 = vadd.f32 %v11360_v0, %v1039_v48  ;;  %v10492_v48 = vld [vmem:[%s14971_s7 + $0x15c] sm:$0xf0] }
 0x1df   : > { %v1215_v49 = vpop.f32.mrf.mxu2  ;;  %v8790_v51 = vor.u32 %v10492_v48, %v8789_v47  ;;  %v8869_v48 = vld [vmem:[%s14971_s7 + $0x1d0] sm:$0xf] }
 0x1e0   : > { %v1216_v56 = vadd.f32 %v11534_v50, %v1215_v49  ;;  %v1092_v59 = vmax.f32 %v1040_v54, 0.0 }
 0x1e1   : > { %1747 = vmatpush.bf16.msrb.mxu3 %v8790_v51 }
 0x1e2   : > { %v1295_v62 = vmax.f32 %v1216_v56, 0.0 }
 0x1e5   : > { %v1041_v55 = vpop.f32.mrf.mxu1 }
 0x1e6   : > { %v1042_v57 = vadd.f32 %v11360_v0, %v1041_v55 }
 0x1e7   : > { %v1217_v58 = vpop.f32.mrf.mxu2 }
 0x1e8   : > { %v1093_v60 = vmax.f32 %v1042_v57, 0.0  ;;  %v1218_v61 = vadd.f32 %v11534_v50, %v1217_v58 }
 0x1ea   : > { %v1296_v63 = vmax.f32 %v1218_v61, 0.0  ;;  %v1115_v38 = vpack.c.bf16 %v1093_v60, %v1092_v59  ;;  %v8757_v61 = vld [vmem:[%s14971_s7 + $0x100] sm:$0xf] }
 0x1ec   : > { %v11546_v1 = vpack.c.bf16 %v1296_v63, %v1295_v62  ;;  %8620 = vmatmul.msk.bf16.gmra.mxu2 %vm936_vm3, %v1115_v38  ;;  %v10484_v62 = vld [vmem:[%s14971_s7 + $0x11c] sm:$0xf0] }
 0x1ed   : > { %v1044_v2 = vpop.f32.mrf.mxu1  ;;  %v8758_v63 = vor.u32 %v10484_v62, %v8757_v61 }
 0x1ee   : > { %1842 = vmatmul.bf16.vlgmr.msrb.gmra.mxu0 %v11546_v1  ;;  %1931 = vmatmul.bf16.vlgmr.msrb.gmra.mxu1 %v11546_v1  ;;  %v1045_v10 = vadd.f32 %v11360_v0, %v1044_v2 }
 0x1ef   : > { %v1220_v5 = vpop.f32.mrf.mxu2  ;;  %1748 = vmatpush.bf16.msrb.mxu3 %v8758_v63 }
 0x1f0   : > { %v1221_v12 = vadd.f32 %v11534_v50, %v1220_v5  ;;  %v1094_v18 = vmax.f32 %v1045_v10, 0.0  ;;  %v8725_v5 = vld [vmem:[%s14971_s7 + $0xc0] sm:$0xf] }
 0x1f1   : > { %v8726_v8 = vor.u32 %v10476_v6, %v8725_v5  ;;  %v8877_v5 = vld [vmem:[%s14971_s7 + $0x1d8] sm:$0xf] }
 0x1f2   : > { %v1297_v21 = vmax.f32 %v1221_v12, 0.0 }
 0x1f3   : > { %1749 = vmatpush.bf16.msrb.mxu3 %v8726_v8 }
 0x1f5   : > { %v1046_v11 = vpop.f32.mrf.mxu1 }
 0x1f6   : > { %v1047_v13 = vadd.f32 %v11360_v0, %v1046_v11 }
 0x1f7   : > { %v1222_v16 = vpop.f32.mrf.mxu2 }
 0x1f8   : > { %v1095_v19 = vmax.f32 %v1047_v13, 0.0  ;;  %v1223_v20 = vadd.f32 %v11534_v50, %v1222_v16 }
 0x1fa   : > { %v1298_v22 = vmax.f32 %v1223_v20, 0.0  ;;  %v1116_v23 = vpack.c.bf16 %v1095_v19, %v1094_v18  ;;  %v8693_v18 = vld [vmem:[%s14971_s7 + $0x80] sm:$0xf] }
 0x1fb   : > { %v10468_v19 = vld [vmem:[%s14971_s7 + $0x9c] sm:$0xf0] }
 0x1fc   : > { %v11573_v24 = vpack.c.bf16 %v1298_v22, %v1297_v21  ;;  %8621 = vmatmul.msk.bf16.gmra.mxu2 %vm936_vm3, %v1116_v23  ;;  %v8694_v20 = vor.u32 %v10468_v19, %v8693_v18 }
 0x1fd   : > { %v1049_v25 = vpop.f32.mrf.mxu1 }
 0x1fe   : > { %1847 = vmatmul.bf16.gmra.mxu0 %v11573_v24  ;;  %1936 = vmatmul.bf16.gmra.mxu1 %v11573_v24  ;;  %v1050_v30 = vadd.f32 %v11360_v0, %v1049_v25 }
 0x1ff   : > { %v1225_v26 = vpop.f32.mrf.mxu2  ;;  %1750 = vmatpush.bf16.msrb.mxu3 %v8694_v20  ;;  %v8837_v20 = vld [vmem:[%s14971_s7 + $0x190] sm:$0xf] }
 0x200   : > { %v1226_v32 = vadd.f32 %v11534_v50, %v1225_v26  ;;  %v1096_v35 = vmax.f32 %v1050_v30, 0.0  ;;  %v8661_v26 = vld [vmem:[%s14971_s7 + $0x40] sm:$0xf] }
 0x201   : > { %v8662_v29 = vor.u32 %v10460_v27, %v8661_v26 }
 0x202   : > { %v1299_v39 = vmax.f32 %v1226_v32, 0.0 }
 0x203   : > { %1751 = vmatpush.bf16.msrb.mxu3 %v8662_v29  ;;  %v2714_v29 = vlaneseq }
 0x205   : > { %v1051_v31 = vpop.f32.mrf.mxu1 }
 0x206   : > { %v1052_v33 = vadd.f32 %v11360_v0, %v1051_v31 }
 0x207   : > { %v1227_v34 = vpop.f32.mrf.mxu2 }
 0x208   : > { %v1097_v36 = vmax.f32 %v1052_v33, 0.0  ;;  %v1228_v37 = vadd.f32 %v11534_v50, %v1227_v34 }
 0x20a   : > { %v1300_v40 = vmax.f32 %v1228_v37, 0.0  ;;  %v1117_v41 = vpack.c.bf16 %v1097_v36, %v1096_v35 }
 0x20c   : > { %v11588_v42 = vpack.c.bf16 %v1300_v40, %v1299_v39  ;;  %8622 = vmatmul.msk.bf16.gmra.mxu2 %vm936_vm3, %v1117_v41  ;;  %v8629_v40 = vld [vmem:[%s14971_s7] sm:$0xf] }
 0x20d   : > { %v10452_v41 = vld [vmem:[%s14971_s7 + $0x1c] sm:$0xf0] }
 0x20e   : > { %1852 = vmatmul.bf16.gmra.mxu0 %v11588_v42  ;;  %1941 = vmatmul.bf16.gmra.mxu1 %v11588_v42  ;;  %v8630_v43 = vor.u32 %v10452_v41, %v8629_v40 }
 0x20f   : > { %v1230_v46 = vpop.f32.mrf.mxu2 }
 0x210   : > { %v1231_v52 = vadd.f32 %v11534_v50, %v1230_v46  ;;  %1752 = vmatpush.bf16.msrb.mxu3 %v8630_v43  ;;  %v10498_v43 = vld [vmem:[%s14971_s7 + $0x194] sm:$0xf] }
 0x212   : > { %v1301_v55 = vmax.f32 %v1231_v52, 0.0 }
 0x213   : > { %v1054_v49 = vpop.f32.mrf.mxu3 }
 0x214   : > { %v1055_v56 = vadd.f32 %v11360_v0, %v1054_v49  ;;  %v10510_v49 = vld [vmem:[%s14971_s7 + $0x1ec] sm:$0xf0] }
 0x215   : > { %v8870_v52 = vor.u32 %v10510_v49, %v8869_v48  ;;  %v10503_v49 = vld [vmem:[%s14971_s7 + $0x1b4] sm:$0xf0] }
 0x216   : > { %v1098_v38 = vmax.f32 %v1055_v56, 0.0 }
 0x217   : > { %v1232_v53 = vpop.f32.mrf.mxu2 }
 0x218   : > { %v1233_v54 = vadd.f32 %v11534_v50, %v1232_v53  ;;  %v10507_v53 = vld [vmem:[%s14971_s7 + $0x1dc] sm:$0xf] }
 0x21a   : > { %v1302_v57 = vmax.f32 %v1233_v54, 0.0  ;;  %v8879_v54 = vld [vmem:[%s14971_s7 + $0x1f8] sm:$0xf0] }
 0x21b   : > { %v1056_v58 = vpop.f32.mrf.mxu3 }
 0x21c   : > { %v11608_v59 = vpack.c.bf16 %v1302_v57, %v1301_v55  ;;  %v1057_v60 = vadd.f32 %v11360_v0, %v1056_v58  ;;  %2020 = vmatmul.bf16.vlgmr.msrb.gmra.mxu2 %v11546_v1  ;;  %v8882_v55 = vor.u32 %v10507_v53, %v8879_v54 }
 0x21e   : > { %v1099_v2 = vmax.f32 %v1057_v60, 0.0  ;;  %1857 = vmatmul.bf16.gmra.mxu0 %v11608_v59  ;;  %1946 = vmatmul.bf16.gmra.mxu1 %v11608_v59 }
 0x21f   : > { %v1235_v3 = vpop.f32.mrf.mxu2  ;;  %2368 = vmatpush.bf16.msra.mxu2 %v8882_v55 }
 0x220   : > { %v1118_v4 = vpack.c.bf16 %v1099_v2, %v1098_v38  ;;  %v1236_v9 = vadd.f32 %v11534_v50, %v1235_v3  ;;  %v10506_v3 = vld [vmem:[%s14971_s7 + $0x1d4] sm:$0xf] }
 0x222   : > { %8623 = vmatmul.msk.bf16.vlgmr.msra.gmra.mxu3 %vm936_vm3, %v1118_v4  ;;  %v1303_v12 = vmax.f32 %v1236_v9, 0.0  ;;  %v8871_v4 = vld [vmem:[%s14971_s7 + $0x1f0] sm:$0xf0] }
 0x223   : > { %v1059_v7 = vpop.f32.mrf.mxu3  ;;  %2101 = vmatpush.bf16.msra.mxu3 %v8870_v52  ;;  %v8874_v6 = vor.u32 %v10506_v3, %v8871_v4 }
 0x224   : > { %v1060_v13 = vadd.f32 %v11360_v0, %v1059_v7  ;;  %v10511_v7 = vld [vmem:[%s14971_s7 + $0x1f4] sm:$0xf0] }
 0x225   : > { %v8878_v9 = vor.u32 %v10511_v7, %v8877_v5  ;;  %2190 = vmatpush.bf16.msra.mxu0 %v8874_v6 }
 0x226   : > { %v1100_v21 = vmax.f32 %v1060_v13, 0.0 }
 0x227   : > { %v1237_v10 = vpop.f32.mrf.mxu2  ;;  %2279 = vmatpush.bf16.msra.mxu1 %v8878_v9 }
 0x228   : > { %v1238_v11 = vadd.f32 %v11534_v50, %v1237_v10 }
 0x22a   : > { %v1304_v14 = vmax.f32 %v1238_v11, 0.0 }
 0x22b   : > { %v1061_v15 = vpop.f32.mrf.mxu3 }
 0x22c   : > { %v11630_v16 = vpack.c.bf16 %v1304_v14, %v1303_v12  ;;  %v1062_v17 = vadd.f32 %v11360_v0, %v1061_v15  ;;  %2025 = vmatmul.bf16.gmra.mxu2 %v11573_v24 }
 0x22e   : > { %v1101_v22 = vmax.f32 %v1062_v17, 0.0  ;;  %1862 = vmatmul.bf16.gmra.mxu0 %v11630_v16  ;;  %1951 = vmatmul.bf16.gmra.mxu1 %v11630_v16 }
 0x22f   : > { %v1240_v23 = vpop.f32.mrf.mxu2 }
 0x230   : > { %v1119_v25 = vpack.c.bf16 %v1101_v22, %v1100_v21  ;;  %v1241_v30 = vadd.f32 %v11534_v50, %v1240_v23  ;;  %v10502_v21 = vld [vmem:[%s14971_s7 + $0x1ac] sm:$0xf0]  ;;  %v10499_v23 = vld [vmem:[%s14971_s7 + $0x19c] sm:$0xf] }
 0x231   : > { %v8838_v22 = vor.u32 %v10502_v21, %v8837_v20 }
 0x232   : > { %8624 = vmatmul.msk.bf16.gmra.mxu3 %vm936_vm3, %v1119_v25  ;;  %v1305_v33 = vmax.f32 %v1241_v30, 0.0  ;;  %v8847_v25 = vld [vmem:[%s14971_s7 + $0x1b8] sm:$0xf0] }
 0x233   : > { %v1064_v28 = vpop.f32.mrf.mxu3  ;;  %v8850_v26 = vor.u32 %v10499_v23, %v8847_v25  ;;  %2102 = vmatpush.bf16.msra.mxu3 %v8838_v22 }
 0x234   : > { %v1065_v34 = vadd.f32 %v11360_v0, %v1064_v28 }
 0x235   : > { %2369 = vmatpush.bf16.msra.mxu2 %v8850_v26 }
 0x236   : > { %v1102_v44 = vmax.f32 %v1065_v34, 0.0 }
 0x237   : > { %v1242_v31 = vpop.f32.mrf.mxu2 }
 0x238   : > { %v1243_v32 = vadd.f32 %v11534_v50, %v1242_v31  ;;  %v11724_v31 = vld [vmem:[%s14972_s8] sm:$0xff] }
 0x239   : > { %v11728_v34 = vperm.slane %v11724_v31, 1 }
 0x23a   : > { %v1306_v35 = vmax.f32 %v1243_v32, 0.0 }
 0x23b   : > { %v1066_v36 = vpop.f32.mrf.mxu3 }
 0x23c   : > { %v11652_v37 = vpack.c.bf16 %v1306_v35, %v1305_v33  ;;  %v1067_v39 = vadd.f32 %v11360_v0, %v1066_v36  ;;  %2030 = vmatmul.bf16.gmra.mxu2 %v11588_v42  ;;  %v11730_v36 = vshrl.u32 %v2714_v29, 7 }
 0x23e   : > { %v1103_v45 = vmax.f32 %v1067_v39, 0.0  ;;  %1867 = vmatmul.bf16.gmra.mxu0 %v11652_v37  ;;  %1956 = vmatmul.bf16.gmra.mxu1 %v11652_v37  ;;  %v11733_v39 = vperm.slane %v11724_v31, 2  ;;  %v2718_v23 = vadd.s32 24, %v11730_v36 }
 0x23f   : > { %v1245_v46 = vpop.f32.mrf.mxu2 }
 0x240   : > { %v1120_v47 = vpack.c.bf16 %v1103_v45, %v1102_v44  ;;  %v1246_v56 = vadd.f32 %v11534_v50, %v1245_v46  ;;  %v8839_v44 = vld [vmem:[%s14971_s7 + $0x1b0] sm:$0xf0]  ;;  %v8845_v45 = vld [vmem:[%s14971_s7 + $0x198] sm:$0xf]  ;;  %v11747_v46 = vstv %s8883_s29 }
 0x241   : > { %v8842_v48 = vor.u32 %v10498_v43, %v8839_v44  ;;  %v11758_v54 = vadd.s32 %v11747_v46, %v11730_v36  ;;  %v2719_v43 = vadd.s32 32, %v11730_v36 }
 0x242   : > { %8625 = vmatmul.msk.bf16.gmra.mxu3 %vm936_vm3, %v1120_v47  ;;  %v1307_v60 = vmax.f32 %v1246_v56, 0.0  ;;  %v2716_v47 = vadd.s32 8, %v11730_v36 }
 0x243   : > { %v1069_v51 = vpop.f32.mrf.mxu3  ;;  %2191 = vmatpush.bf16.msra.mxu0 %v8842_v48  ;;  %vm14992_vm4 = vcmp.lt.s32.totalorder %v11758_v54, 600  ;;  %v10494_v48 = vld [vmem:[%s14971_s7 + $0x16c] sm:$0xf0] }
 0x244   : > { %v1070_v61 = vadd.f32 %v11360_v0, %v1069_v51  ;;  %v8846_v51 = vor.u32 %v10503_v49, %v8845_v45  ;;  %v11762_v56 = vadd.s32 %v11747_v46, %v2716_v47  ;;  %v8805_v47 = vld [vmem:[%s14971_s7 + $0x150] sm:$0xf]  ;;  %v10491_v49 = vld [vmem:[%s14971_s7 + $0x15c] sm:$0xf] }
 0x246   : > { %2280 = vmatpush.bf16.msra.mxu1 %v8846_v51  ;;  %vm14991_vm5 = vcmp.lt.s32.totalorder %v11762_v56, 600  ;;  %v8806_v51 = vor.u32 %v10494_v48, %v8805_v47 }
 0x247   : > { %v1247_v57 = vpop.f32.mrf.mxu2 }
 0x248   : > { %v1248_v58 = vadd.f32 %v11534_v50, %v1247_v57  ;;  %2103 = vmatpush.bf16.msra.mxu3 %v8806_v51 }
 0x24a   : > { %v1308_v62 = vmax.f32 %v1248_v58, 0.0 }
 0x24b   : > { %v1071_v63 = vpop.f32.mrf.mxu3 }
 0x24c   : > { %v11680_v38 = vpack.c.bf16 %v1308_v62, %v1307_v60  ;;  %v1072_v2 = vadd.f32 %v11360_v0, %v1071_v63  ;;  %2035 = vmatmul.bf16.gmra.mxu2 %v11608_v59  ;;  %v1104_v0 = vmax.f32 %v1070_v61, 0.0 }
 0x24e   : > { %v1105_v8 = vmax.f32 %v1072_v2, 0.0  ;;  %1872 = vmatmul.bf16.gmra.mxu0 %v11680_v38  ;;  %1961 = vmatmul.bf16.gmra.mxu1 %v11680_v38  ;;  %v2717_v2 = vadd.s32 16, %v11730_v36 }
 0x24f   : > { %v1250_v10 = vpop.f32.mrf.mxu2 }
 0x250   : > { %v1121_v11 = vpack.c.bf16 %v1105_v8, %v1104_v0  ;;  %v1251_v12 = vadd.f32 %v11534_v50, %v1250_v10 }
 0x252   : > { %8626 = vmatmul.msk.bf16.gmra.mxu3 %vm936_vm3, %v1121_v11  ;;  %v1309_v15 = vmax.f32 %v1251_v12, 0.0 }
 0x257   : > { %v1252_v13 = vpop.f32.mrf.mxu2 }
 0x258   : > { %v1253_v14 = vadd.f32 %v11534_v50, %v1252_v13  ;;  %v11781_v13 = vadd.s32 %v11747_v46, %v2717_v2 }
 0x25a   : > { %v1310_v17 = vmax.f32 %v1253_v14, 0.0  ;;  %vm14994_vm6 = vcmp.lt.s32.totalorder %v11781_v13, 600 }
 0x25c   : > { %v11701_v18 = vpack.c.bf16 %v1310_v17, %v1309_v15  ;;  %2040 = vmatmul.bf16.gmra.mxu2 %v11630_v16 }
 0x25e   : > { %1877 = vmatmul.bf16.gmra.mxu0 %v11701_v18  ;;  %1966 = vmatmul.bf16.gmra.mxu1 %v11701_v18 }
 0x25f   : > { %v1255_v19 = vpop.f32.mrf.mxu2 }
 0x260   : > { %v1256_v27 = vadd.f32 %v11534_v50, %v1255_v19 }
 0x262   : > { %1753 = vmatmul.bf16.vlgmr.msrb.gmra.mxu3 %v11546_v1  ;;  %v1311_v32 = vmax.f32 %v1256_v27, 0.0 }
 0x267   : > { %v1257_v28 = vpop.f32.mrf.mxu2 }
 0x268   : > { %v1258_v30 = vadd.f32 %v11534_v50, %v1257_v28 }
 0x26a   : > { %v1312_v33 = vmax.f32 %v1258_v30, 0.0 }
 0x26b   : > { %v1843_v35 = vpop.f32.mrf.mxu0  ;;  %v1932_v40 = vpop.f32.mrf.mxu1 }
 0x26c   : > { %v11735_v41 = vpack.c.bf16 %v1312_v33, %v1311_v32  ;;  %2045 = vmatmul.bf16.gmra.mxu2 %v11652_v37  ;;  %v1844_v52 = vadd.f32 %v1843_v35, %v11728_v34  ;;  %v1933_v55 = vadd.f32 %v1932_v40, %v11733_v39  ;;  %v11797_v33 = vadd.s32 %v11747_v46, %v2718_v23 }
 0x26e   : > { %1882 = vmatmul.bf16.gmra.mxu0 %v11735_v41  ;;  %1971 = vmatmul.bf16.gmra.mxu1 %v11735_v41  ;;  %v2458_v57 = vmax.f32 %v1844_v52, 0.0  ;;  %v2459_v61 = vmax.f32 %v1933_v55, 0.0  ;;  %vm14993_vm7 = vcmp.lt.s32.totalorder %v11797_v33, 600  ;;  %v8815_v52 = vld [vmem:[%s14971_s7 + $0x178] sm:$0xf0] }
 0x26f   : > { %v1260_v53 = vpop.f32.mrf.mxu2 }
 0x270   : > { %v1261_v3 = vadd.f32 %v11534_v50, %v1260_v53  ;;  %v2877_v6 = vsel %vm14992_vm4, %v2458_v57, 0.0  ;;  %v2878_v0 = vsel %vm14992_vm4, %v2459_v61, 0.0  ;;  %v11818_v61 = vadd.s32 %v11747_v46, %v2719_v43 }
 0x272   : > { %1758 = vmatmul.bf16.gmra.mxu3 %v11573_v24  ;;  %v1313_v14 = vmax.f32 %v1261_v3, 0.0  ;;  %vm14998_vm8 = vcmp.lt.s32.totalorder %v11818_v61, 600 }
 0x273   : > { %v1845_v58 = vpop.f32.mrf.mxu0  ;;  %v1934_v60 = vpop.f32.mrf.mxu1 }
 0x274   : > { %v1846_v62 = vadd.f32 %v1845_v58, %v11728_v34  ;;  %v1935_v63 = vadd.f32 %v1934_v60, %v11733_v39  ;;  %v8818_v58 = vor.u32 %v10491_v49, %v8815_v52 }
 0x276   : > { %v2466_v4 = vmax.f32 %v1846_v62, 0.0  ;;  %v2467_v5 = vmax.f32 %v1935_v63, 0.0  ;;  %2370 = vmatpush.bf16.msra.mxu2 %v8818_v58 }
 0x277   : > { %v1262_v7 = vpop.f32.mrf.mxu2 }
 0x278   : > { %v2885_v8 = vsel %vm14991_vm5, %v2466_v4, 0.0  ;;  %v2886_v9 = vsel %vm14991_vm5, %v2467_v5, 0.0  ;;  %v1263_v10 = vadd.f32 %v11534_v50, %v1262_v7 }
 0x279   : > { %v3170_v11 = vmax.f32 %v2877_v6, %v2885_v8  ;;  %v3207_v12 = vmax.f32 %v2878_v0, %v2886_v9 }
 0x27a   : > { %v1314_v15 = vmax.f32 %v1263_v10, 0.0 }
 0x27b   : > { %v1848_v17 = vpop.f32.mrf.mxu0  ;;  %v1937_v19 = vpop.f32.mrf.mxu1 }
 0x27c   : > { %v11783_v20 = vpack.c.bf16 %v1314_v15, %v1313_v14  ;;  %v1849_v21 = vadd.f32 %v1848_v17, %v11728_v34  ;;  %v1938_v22 = vadd.f32 %v1937_v19, %v11733_v39  ;;  %2050 = vmatmul.bf16.gmra.mxu2 %v11680_v38  ;;  %v8807_v14 = vld [vmem:[%s14971_s7 + $0x170] sm:$0xf0]  ;;  %v8813_v15 = vld [vmem:[%s14971_s7 + $0x158] sm:$0xf] }
 0x27e   : > { %v2474_v25 = vmax.f32 %v1849_v21, 0.0  ;;  %v2475_v26 = vmax.f32 %v1938_v22, 0.0  ;;  %1887 = vmatmul.bf16.gmra.mxu0 %v11783_v20  ;;  %1976 = vmatmul.bf16.gmra.mxu1 %v11783_v20  ;;  %v10495_v22 = vld [vmem:[%s14971_s7 + $0x174] sm:$0xf0] }
 0x27f   : > { %v1265_v27 = vpop.f32.mrf.mxu2 }
 0x280   : > { %v2893_v28 = vsel %vm14994_vm6, %v2474_v25, 0.0  ;;  %v2894_v29 = vsel %vm14994_vm6, %v2475_v26, 0.0  ;;  %v1266_v53 = vadd.f32 %v11534_v50, %v1265_v27  ;;  %v8814_v25 = vor.u32 %v10495_v22, %v8813_v15 }
 0x281   : > { %v3171_v30 = vmax.f32 %v3170_v11, %v2893_v28  ;;  %v3208_v32 = vmax.f32 %v3207_v12, %v2894_v29  ;;  %v2720_v11 = vadd.s32 40, %v11730_v36  ;;  %v10490_v12 = vld [vmem:[%s14971_s7 + $0x154] sm:$0xf]  ;;  %v2723_v22 = vadd.s32 64, %v11730_v36 }
 0x282   : > { %1763 = vmatmul.bf16.gmra.mxu3 %v11588_v42  ;;  %v1315_v5 = vmax.f32 %v1266_v53, 0.0  ;;  %v8810_v21 = vor.u32 %v10490_v12, %v8807_v14  ;;  %2281 = vmatpush.bf16.msra.mxu1 %v8814_v25  ;;  %v11881_v12 = vperm.slane %v11724_v31, 3 }
 0x283   : > { %v1850_v35 = vpop.f32.mrf.mxu0  ;;  %v1939_v40 = vpop.f32.mrf.mxu1 }
 0x284   : > { %v1851_v44 = vadd.f32 %v1850_v35, %v11728_v34  ;;  %v1940_v45 = vadd.f32 %v1939_v40, %v11733_v39  ;;  %2192 = vmatpush.bf16.msra.mxu0 %v8810_v21 }
 0x286   : > { %v2482_v55 = vmax.f32 %v1851_v44, 0.0  ;;  %v2483_v57 = vmax.f32 %v1940_v45, 0.0  ;;  %v2721_v44 = vadd.s32 48, %v11730_v36 }
 0x287   : > { %v1267_v60 = vpop.f32.mrf.mxu2 }
 0x288   : > { %v2901_v62 = vsel %vm14993_vm7, %v2482_v55, 0.0  ;;  %v2902_v63 = vsel %vm14993_vm7, %v2483_v57, 0.0  ;;  %v1268_v2 = vadd.f32 %v11534_v50, %v1267_v60  ;;  %v11865_v58 = vadd.s32 %v11747_v46, %v2721_v44  ;;  %v8783_v44 = vld [vmem:[%s14971_s7 + $0x138] sm:$0xf0] }
 0x289   : > { %v3172_v3 = vmax.f32 %v3171_v30, %v2901_v62  ;;  %v3209_v4 = vmax.f32 %v3208_v32, %v2902_v63  ;;  %v11851_v30 = vadd.s32 %v11747_v46, %v2720_v11 }
 0x28a   : > { %v1316_v6 = vmax.f32 %v1268_v2, 0.0  ;;  %vm15000_vm10 = vcmp.lt.s32.totalorder %v11865_v58, 600 }
 0x28b   : > { %v1853_v7 = vpop.f32.mrf.mxu0  ;;  %v1942_v0 = vpop.f32.mrf.mxu1  ;;  %vm14995_vm9 = vcmp.lt.s32.totalorder %v11851_v30, 600 }
 0x28c   : > { %v11826_v8 = vpack.c.bf16 %v1316_v6, %v1315_v5  ;;  %v1854_v9 = vadd.f32 %v1853_v7, %v11728_v34  ;;  %v1943_v10 = vadd.f32 %v1942_v0, %v11733_v39  ;;  %2055 = vmatmul.bf16.gmra.mxu2 %v11701_v18  ;;  %v2722_v6 = vadd.s32 56, %v11730_v36 }
 0x28e   : > { %v2490_v17 = vmax.f32 %v1854_v9, 0.0  ;;  %v2491_v19 = vmax.f32 %v1943_v10, 0.0  ;;  %1892 = vmatmul.bf16.gmra.mxu0 %v11826_v8  ;;  %1981 = vmatmul.bf16.gmra.mxu1 %v11826_v8  ;;  %v11884_v14 = vadd.s32 %v11747_v46, %v2722_v6 }
 0x28f   : > { %v1270_v23 = vpop.f32.mrf.mxu2 }
 0x290   : > { %v2909_v26 = vsel %vm14998_vm8, %v2490_v17, 0.0  ;;  %v2910_v27 = vsel %vm14998_vm8, %v2491_v19, 0.0  ;;  %v1271_v45 = vadd.f32 %v11534_v50, %v1270_v23  ;;  %15097 = vst [vmem:[#allocation15_spill] sm:$0xff] %v11884_v14  ;;  %vm14999_vm11 = vcmp.lt.s32.totalorder %v11884_v14, 600 }
 0x291   : > { %v3173_v28 = vmax.f32 %v3172_v3, %v2909_v26  ;;  %v3210_v29 = vmax.f32 %v3209_v4, %v2910_v27  ;;  %v2739_v14 = vadd.s32 192, %v11730_v36 }
 0x292   : > { %1768 = vmatmul.bf16.gmra.mxu3 %v11608_v59  ;;  %v1317_v60 = vmax.f32 %v1271_v45, 0.0 }
 0x293   : > { %v1855_v32 = vpop.f32.mrf.mxu0  ;;  %v1944_v35 = vpop.f32.mrf.mxu1 }
 0x294   : > { %v1856_v40 = vadd.f32 %v1855_v32, %v11728_v34  ;;  %v1945_v43 = vadd.f32 %v1944_v35, %v11733_v39  ;;  %v10483_v32 = vld [vmem:[%s14971_s7 + $0x11c] sm:$0xf] }
 0x296   : > { %v2498_v47 = vmax.f32 %v1856_v40, 0.0  ;;  %v2499_v48 = vmax.f32 %v1945_v43, 0.0 }
 0x297   : > { %v1272_v49 = vpop.f32.mrf.mxu2 }
 0x298   : > { %v2917_v51 = vsel %vm14995_vm9, %v2498_v47, 0.0  ;;  %v2918_v52 = vsel %vm14995_vm9, %v2499_v48, 0.0  ;;  %v1273_v53 = vadd.f32 %v11534_v50, %v1272_v49  ;;  %v11905_v47 = vadd.s32 %v11747_v46, %v2723_v22 }
 0x299   : > { %v3174_v55 = vmax.f32 %v3173_v28, %v2917_v51  ;;  %v3211_v57 = vmax.f32 %v3210_v29, %v2918_v52  ;;  %v8773_v28 = vld [vmem:[%s14971_s7 + $0x110] sm:$0xf]  ;;  %v8786_v48 = vor.u32 %v10483_v32, %v8783_v44 }
 0x29a   : > { %v1318_v62 = vmax.f32 %v1273_v53, 0.0  ;;  %v10486_v29 = vld [vmem:[%s14971_s7 + $0x12c] sm:$0xf0]  ;;  %vm14990_vm12 = vcmp.lt.s32.totalorder %v11905_v47, 600 }
 0x29b   : > { %v1858_v63 = vpop.f32.mrf.mxu0  ;;  %v1947_v2 = vpop.f32.mrf.mxu1  ;;  %v8774_v43 = vor.u32 %v10486_v29, %v8773_v28  ;;  %2371 = vmatpush.bf16.msra.mxu2 %v8786_v48 }
 0x29c   : > { %v11867_v3 = vpack.c.bf16 %v1318_v62, %v1317_v60  ;;  %v1859_v4 = vadd.f32 %v1858_v63, %v11728_v34  ;;  %v1948_v5 = vadd.f32 %v1947_v2, %v11733_v39  ;;  %2060 = vmatmul.bf16.gmra.mxu2 %v11735_v41 }
 0x29d   : > { %2104 = vmatpush.bf16.msra.mxu3 %v8774_v43 }
 0x29e   : > { %15096 = vst [vmem:[#allocation14_spill] sm:$0xff] %v11867_v3  ;;  %v2506_v7 = vmax.f32 %v1859_v4, 0.0  ;;  %v2507_v0 = vmax.f32 %v1948_v5, 0.0  ;;  %1897 = vmatmul.bf16.gmra.mxu0 %v11867_v3  ;;  %1986 = vmatmul.bf16.gmra.mxu1 %v11867_v3  ;;  %v2724_v4 = vadd.s32 72, %v11730_v36 }
 0x29f   : > { %v2021_v9 = vpop.f32.mrf.mxu2 }
 0x2a0   : > { %v2925_v10 = vsel %vm15000_vm10, %v2506_v7, 0.0  ;;  %v2926_v11 = vsel %vm15000_vm10, %v2507_v0, 0.0  ;;  %v2022_v23 = vadd.f32 %v2021_v9, %v11881_v12 }
 0x2a1   : > { %v3175_v15 = vmax.f32 %v3174_v55, %v2925_v10  ;;  %v3212_v17 = vmax.f32 %v3211_v57, %v2926_v11  ;;  %v10482_v11 = vld [vmem:[%s14971_s7 + $0x114] sm:$0xf] }
 0x2a2   : > { %1773 = vmatmul.bf16.gmra.mxu3 %v11630_v16  ;;  %v2460_v49 = vmax.f32 %v2022_v23, 0.0 }
 0x2a3   : > { %v1860_v19 = vpop.f32.mrf.mxu0  ;;  %v1949_v21 = vpop.f32.mrf.mxu1 }
 0x2a4   : > { %v1861_v25 = vadd.f32 %v1860_v19, %v11728_v34  ;;  %v1950_v26 = vadd.f32 %v1949_v21, %v11733_v39  ;;  %v2879_v5 = vsel %vm14992_vm4, %v2460_v49, 0.0 }
 0x2a5   : > { %v1275_v27 = vpop.f32.mrf.mxu3 }
 0x2a6   : > { %v2514_v35 = vmax.f32 %v1861_v25, 0.0  ;;  %v2515_v40 = vmax.f32 %v1950_v26, 0.0  ;;  %v1276_v62 = vadd.f32 %v11534_v50, %v1275_v27  ;;  %v10487_v25 = vld [vmem:[%s14971_s7 + $0x134] sm:$0xf0] }
 0x2a7   : > { %v2023_v45 = vpop.f32.mrf.mxu2 }
 0x2a8   : > { %v2933_v51 = vsel %vm14999_vm11, %v2514_v35, 0.0  ;;  %v2934_v52 = vsel %vm14999_vm11, %v2515_v40, 0.0  ;;  %v2024_v53 = vadd.f32 %v2023_v45, %v11881_v12  ;;  %v1319_v26 = vmax.f32 %v1276_v62, 0.0 }
 0x2a9   : > { %v3176_v55 = vmax.f32 %v3175_v15, %v2933_v51  ;;  %v3213_v57 = vmax.f32 %v3212_v17, %v2934_v52  ;;  %v8775_v15 = vld [vmem:[%s14971_s7 + $0x130] sm:$0xf0]  ;;  %v8781_v17 = vld [vmem:[%s14971_s7 + $0x118] sm:$0xf]  ;;  %v11941_v45 = vadd.s32 %v11747_v46, %v2724_v4 }
 0x2aa   : > { %v2468_v60 = vmax.f32 %v2024_v53, 0.0  ;;  %v8778_v23 = vor.u32 %v10482_v11, %v8775_v15  ;;  %v8782_v28 = vor.u32 %v10487_v25, %v8781_v17 }
 0x2ab   : > { %v1863_v63 = vpop.f32.mrf.mxu0  ;;  %v1952_v2 = vpop.f32.mrf.mxu1  ;;  %vm15007_vm13 = vcmp.lt.s32.totalorder %v11941_v45, 600 }
 0x2ac   : > { %v2887_v6 = vsel %vm14991_vm5, %v2468_v60, 0.0  ;;  %v1864_v7 = vadd.f32 %v1863_v63, %v11728_v34  ;;  %v1953_v0 = vadd.f32 %v1952_v2, %v11733_v39  ;;  %2065 = vmatmul.bf16.gmra.mxu2 %v11783_v20  ;;  %2193 = vmatpush.bf16.msra.mxu0 %v8778_v23  ;;  %v2725_v63 = vadd.s32 80, %v11730_v36 }
 0x2ad   : > { %v3244_v9 = vmax.f32 %v2879_v5, %v2887_v6  ;;  %v1277_v10 = vpop.f32.mrf.mxu3  ;;  %2282 = vmatpush.bf16.msra.mxu1 %v8782_v28 }
 0x2ae   : > { %v2522_v19 = vmax.f32 %v1864_v7, 0.0  ;;  %v2523_v21 = vmax.f32 %v1953_v0, 0.0  ;;  %v1278_v22 = vadd.f32 %v11534_v50, %v1277_v10 }
 0x2af   : > { %v2026_v27 = vpop.f32.mrf.mxu2 }
 0x2b0   : > { %v2941_v29 = vsel %vm14990_vm12, %v2522_v19, 0.0  ;;  %v2942_v32 = vsel %vm14990_vm12, %v2523_v21, 0.0  ;;  %v1320_v35 = vmax.f32 %v1278_v22, 0.0  ;;  %v2027_v40 = vadd.f32 %v2026_v27, %v11881_v12 }
 0x2b1   : > { %v3177_v43 = vmax.f32 %v3176_v55, %v2941_v29  ;;  %v3214_v44 = vmax.f32 %v3213_v57, %v2942_v32  ;;  %v2726_v22 = vadd.s32 88, %v11730_v36 }
 0x2b2   : > { %v11943_v48 = vpack.c.bf16 %v1320_v35, %v1319_v26  ;;  %v2476_v49 = vmax.f32 %v2027_v40, 0.0  ;;  %1778 = vmatmul.bf16.gmra.mxu3 %v11652_v37 }
 0x2b3   : > { %v1865_v51 = vpop.f32.mrf.mxu0  ;;  %v1954_v52 = vpop.f32.mrf.mxu1 }
 0x2b4   : > { %15098 = vst [vmem:[#allocation16_spill] sm:$0xff] %v11943_v48  ;;  %v2895_v53 = vsel %vm14994_vm6, %v2476_v49, 0.0  ;;  %v1866_v60 = vadd.f32 %v1865_v51, %v11728_v34  ;;  %v1955_v62 = vadd.f32 %v1954_v52, %v11733_v39  ;;  %1902 = vmatmul.bf16.gmra.mxu0 %v11943_v48  ;;  %1991 = vmatmul.bf16.gmra.mxu1 %v11943_v48 }
 0x2b5   : > { %v3245_v55 = vmax.f32 %v3244_v9, %v2895_v53  ;;  %v1280_v57 = vpop.f32.mrf.mxu3  ;;  %v11960_v9 = vadd.s32 %v11747_v46, %v2725_v63  ;;  %v8743_v63 = vld [vmem:[%s14971_s7 + $0xf0] sm:$0xf0] }
 0x2b6   : > { %v2530_v2 = vmax.f32 %v1866_v60, 0.0  ;;  %v2531_v4 = vmax.f32 %v1955_v62, 0.0  ;;  %v1281_v17 = vadd.f32 %v11534_v50, %v1280_v57  ;;  %v10474_v57 = vld [vmem:[%s14971_s7 + $0xd4] sm:$0xf] }
 0x2b7   : > { %v2028_v5 = vpop.f32.mrf.mxu2  ;;  %15099 = vst [vmem:[#allocation17_spill] sm:$0xff] %v11960_v9  ;;  %vm15010_vm14 = vcmp.lt.s32.totalorder %v11960_v9, 600 }
 0x2b8   : > { %v2949_v6 = vsel %vm15007_vm13, %v2530_v2, 0.0  ;;  %v2950_v7 = vsel %vm15007_vm13, %v2531_v4, 0.0  ;;  %v2029_v0 = vadd.f32 %v2028_v5, %v11881_v12  ;;  %v1321_v40 = vmax.f32 %v1281_v17, 0.0 }
 0x2b9   : > { %v3178_v10 = vmax.f32 %v3177_v43, %v2949_v6  ;;  %v3215_v11 = vmax.f32 %v3214_v44, %v2950_v7  ;;  %v11972_v44 = vadd.s32 %v11747_v46, %v2726_v22  ;;  %v8746_v5 = vor.u32 %v10474_v57, %v8743_v63  ;;  %v8749_v6 = vld [vmem:[%s14971_s7 + $0xd8] sm:$0xf]  ;;  %v10478_v22 = vld [vmem:[%s14971_s7 + $0xec] sm:$0xf0] }
 0x2ba   : > { %v2484_v15 = vmax.f32 %v2029_v0, 0.0  ;;  %v10479_v7 = vld [vmem:[%s14971_s7 + $0xf4] sm:$0xf0] }
 0x2bb   : > { %v1868_v19 = vpop.f32.mrf.mxu0  ;;  %v1957_v21 = vpop.f32.mrf.mxu1  ;;  %vm15013_vm15 = vcmp.lt.s32.totalorder %v11972_v44, 600  ;;  %2194 = vmatpush.bf16.msra.mxu0 %v8746_v5  ;;  %v10471_v57 = vld [vmem:[%s14971_s7 + $0xb4] sm:$0xf0] }
 0x2bc   : > { %v2903_v23 = vsel %vm14993_vm7, %v2484_v15, 0.0  ;;  %v1869_v25 = vadd.f32 %v1868_v19, %v11728_v34  ;;  %v1958_v26 = vadd.f32 %v1957_v21, %v11733_v39  ;;  %2070 = vmatmul.bf16.gmra.mxu2 %v11826_v8  ;;  %v2727_v15 = vadd.s32 96, %v11730_v36  ;;  %v8741_v21 = vld [vmem:[%s14971_s7 + $0xd0] sm:$0xf] }
 0x2bd   : > { %v3246_v27 = vmax.f32 %v3245_v55, %v2903_v23  ;;  %v1282_v28 = vpop.f32.mrf.mxu3  ;;  %v10475_v23 = vld [vmem:[%s14971_s7 + $0xdc] sm:$0xf] }
 0x2be   : > { %v2538_v29 = vmax.f32 %v1869_v25, 0.0  ;;  %v2539_v32 = vmax.f32 %v1958_v26, 0.0  ;;  %v1283_v35 = vadd.f32 %v11534_v50, %v1282_v28  ;;  %v8750_v25 = vor.u32 %v10479_v7, %v8749_v6  ;;  %v10458_v7 = vld [vmem:[%s14971_s7 + $0x54] sm:$0xf] }
 0x2bf   : > { %v2031_v43 = vpop.f32.mrf.mxu2 }
 0x2c0   : > { %v2957_v49 = vsel %vm15010_vm14, %v2538_v29, 0.0  ;;  %v2958_v51 = vsel %vm15010_vm14, %v2539_v32, 0.0  ;;  %v1322_v52 = vmax.f32 %v1283_v35, 0.0  ;;  %v2032_v53 = vadd.f32 %v2031_v43, %v11881_v12  ;;  %v10466_v32 = vld [vmem:[%s14971_s7 + $0x94] sm:$0xf]  ;;  %2283 = vmatpush.bf16.msra.mxu1 %v8750_v25 }
 0x2c1   : > { %v11979_v60 = vmax.f32 %v3178_v10, %v2957_v49  ;;  %v11981_v62 = vmax.f32 %v3215_v11, %v2958_v51  ;;  %v8742_v29 = vor.u32 %v10478_v22, %v8741_v21  ;;  %v8711_v43 = vld [vmem:[%s14971_s7 + $0xb0] sm:$0xf0]  ;;  %v8717_v49 = vld [vmem:[%s14971_s7 + $0x98] sm:$0xf] }
 0x2c2   : > { %v11983_v55 = vpack.c.bf16 %v1322_v52, %v1321_v40  ;;  %v2492_v50 = vmax.f32 %v2032_v53, 0.0  ;;  %1783 = vmatmul.bf16.gmra.mxu3 %v11680_v38  ;;  %v8718_v5 = vor.u32 %v10471_v57, %v8717_v49  ;;  %v8685_v21 = vld [vmem:[%s14971_s7 + $0x58] sm:$0xf]  ;;  %v8647_v49 = vld [vmem:[%s14971_s7 + $0x30] sm:$0xf0] }
 0x2c3   : > { %v1870_v2 = vpop.f32.mrf.mxu0  ;;  %v1959_v4 = vpop.f32.mrf.mxu1  ;;  %2105 = vmatpush.bf16.msra.mxu3 %v8742_v29  ;;  %v10463_v22 = vld [vmem:[%s14971_s7 + $0x74] sm:$0xf0] }
 0x2c4   : > { %15100 = vst [vmem:[#allocation18_spill] sm:$0xff] %v11983_v55  ;;  %v2911_v0 = vsel %vm14998_vm8, %v2492_v50, 0.0  ;;  %v1871_v10 = vadd.f32 %v1870_v2, %v11728_v34  ;;  %v1960_v11 = vadd.f32 %v1959_v4, %v11733_v39  ;;  %1907 = vmatmul.bf16.gmra.mxu0 %v11983_v55  ;;  %1996 = vmatmul.bf16.gmra.mxu1 %v11983_v55  ;;  %v10455_v57 = vld [vmem:[%s14971_s7 + $0x34] sm:$0xf0] }
 0x2c5   : > { %v12006_v17 = vmax.f32 %v3246_v27, %v2911_v0  ;;  %v1285_v19 = vpop.f32.mrf.mxu3  ;;  %v8751_v27 = vld [vmem:[%s14971_s7 + $0xf8] sm:$0xf0]  ;;  %v12035_v50 = vadd.s32 %v11747_v46, %v2727_v15  ;;  %v8714_v4 = vor.u32 %v10466_v32, %v8711_v43  ;;  %v8679_v0 = vld [vmem:[%s14971_s7 + $0x70] sm:$0xf0]  ;;  %2284 = vmatpush.bf16.msra.mxu1 %v8718_v5 }
 0x2c6   : > { %v2546_v26 = vmax.f32 %v1871_v10, 0.0  ;;  %v2547_v28 = vmax.f32 %v1960_v11, 0.0  ;;  %v8754_v40 = vor.u32 %v10475_v23, %v8751_v27  ;;  %v12051_v10 = vld [vmem:[%s14970_s6] ss:$0 sm:$0xff]  ;;  %v8682_v15 = vor.u32 %v10458_v7, %v8679_v0  ;;  %v10450_v43 = vld [vmem:[%s14971_s7 + $0x14] sm:$0xf] }
 0x2c7   : > { %v2033_v35 = vpop.f32.mrf.mxu2  ;;  %15101 = vst [vmem:[#allocation19_spill] sm:$0xff] %v12035_v50  ;;  %2195 = vmatpush.bf16.msra.mxu0 %v8714_v4  ;;  %vm15016_vm2 = vcmp.lt.s32.totalorder %v12035_v50, 600  ;;  %v2728_v27 = vadd.s32 104, %v11730_v36 }
 0x2c8   : > { %v2965_v51 = vsel %vm15013_vm15, %v2546_v26, 0.0  ;;  %v2966_v52 = vsel %vm15013_vm15, %v2547_v28, 0.0  ;;  %v2034_v53 = vadd.f32 %v2033_v35, %v11881_v12  ;;  %2372 = vmatpush.bf16.msra.mxu2 %v8754_v40  ;;  %v8686_v26 = vor.u32 %v10463_v22, %v8685_v21 }
 0x2c9   : > { %v3180_v63 = vmax.f32 %v11979_v60, %v2965_v51  ;;  %v3217_v2 = vmax.f32 %v11981_v62, %v2966_v52  ;;  %v1286_v60 = vadd.f32 %v12051_v10, %v1285_v19 }
 0x2ca   : > { %v2500_v6 = vmax.f32 %v2034_v53, 0.0  ;;  %2285 = vmatpush.bf16.msra.mxu1 %v8686_v26  ;;  %v8653_v53 = vld [vmem:[%s14971_s7 + $0x18] sm:$0xf] }
 0x2cb   : > { %v1873_v62 = vpop.f32.mrf.mxu0  ;;  %v1962_v11 = vpop.f32.mrf.mxu1  ;;  %v1323_v51 = vmax.f32 %v1286_v60, 0.0  ;;  %2196 = vmatpush.bf16.msra.mxu0 %v8682_v15 }
 0x2cc   : > { %v2919_v23 = vsel %vm14995_vm9, %v2500_v6, 0.0  ;;  %v1874_v25 = vadd.f32 %v1873_v62, %v11728_v34  ;;  %v1963_v19 = vadd.f32 %v1962_v11, %v11733_v39  ;;  %2075 = vmatmul.bf16.gmra.mxu2 %v11867_v3  ;;  %v12087_v62 = vadd.s32 %v11747_v46, %v2728_v27 }
 0x2cd   : > { %v3248_v28 = vmax.f32 %v12006_v17, %v2919_v23  ;;  %v1287_v29 = vpop.f32.mrf.mxu3  ;;  %v8650_v17 = vor.u32 %v10450_v43, %v8647_v49  ;;  %v8654_v11 = vor.u32 %v10455_v57, %v8653_v53 }
 0x2ce   : > { %v2554_v32 = vmax.f32 %v1874_v25, 0.0  ;;  %v2555_v35 = vmax.f32 %v1963_v19, 0.0  ;;  %v1288_v40 = vadd.f32 %v12051_v10, %v1287_v29  ;;  %vm15019_vm3 = vcmp.lt.s32.totalorder %v12087_v62, 600 }
 0x2cf   : > { %v2036_v52 = vpop.f32.mrf.mxu2  ;;  %2197 = vmatpush.bf16.msra.mxu0 %v8650_v17  ;;  %2286 = vmatpush.bf16.msra.mxu1 %v8654_v11  ;;  %v2729_v29 = vadd.s32 112, %v11730_v36 }
 0x2d0   : > { %v2973_v4 = vsel %vm15016_vm2, %v2554_v32, 0.0  ;;  %v2974_v5 = vsel %vm15016_vm2, %v2555_v35, 0.0  ;;  %v1324_v6 = vmax.f32 %v1288_v40, 0.0  ;;  %v2037_v7 = vadd.f32 %v2036_v52, %v11881_v12 }
 0x2d1   : > { %v3181_v0 = vmax.f32 %v3180_v63, %v2973_v4  ;;  %v3218_v60 = vmax.f32 %v3217_v2, %v2974_v5  ;;  %v2730_v5 = vadd.s32 120, %v11730_v36 }
 0x2d2   : > { %v12089_v15 = vpack.c.bf16 %v1324_v6, %v1323_v51  ;;  %v2508_v21 = vmax.f32 %v2037_v7, 0.0  ;;  %1788 = vmatmul.bf16.gmra.mxu3 %v11701_v18 }
 0x2d3   : > { %v1875_v22 = vpop.f32.mrf.mxu0  ;;  %v1964_v23 = vpop.f32.mrf.mxu1 }
 0x2d4   : > { %15102 = vst [vmem:[#allocation20_spill] sm:$0xff] %v12089_v15  ;;  %v2927_v25 = vsel %vm15000_vm10, %v2508_v21, 0.0  ;;  %v1876_v19 = vadd.f32 %v1875_v22, %v11728_v34  ;;  %v1965_v63 = vadd.f32 %v1964_v23, %v11733_v39  ;;  %1912 = vmatmul.bf16.gmra.mxu0 %v12089_v15  ;;  %2001 = vmatmul.bf16.gmra.mxu1 %v12089_v15 }
 0x2d5   : > { %v3249_v2 = vmax.f32 %v3248_v28, %v2927_v25  ;;  %v1290_v26 = vpop.f32.mrf.mxu3  ;;  %v12106_v28 = vadd.s32 %v11747_v46, %v2729_v29 }
 0x2d6   : > { %v2562_v27 = vmax.f32 %v1876_v19, 0.0  ;;  %v2563_v32 = vmax.f32 %v1965_v63, 0.0  ;;  %v1291_v53 = vadd.f32 %v12051_v10, %v1290_v26  ;;  %v12118_v63 = vadd.s32 %v11747_v46, %v2730_v5 }
 0x2d7   : > { %v2038_v35 = vpop.f32.mrf.mxu2  ;;  %15103 = vst [vmem:[#allocation21_spill] sm:$0xff] %v12106_v28  ;;  %vm15022_vm1 = vcmp.lt.s32.totalorder %v12106_v28, 600 }
 0x2d8   : > { %v2981_v40 = vsel %vm15019_vm3, %v2562_v27, 0.0  ;;  %v2982_v43 = vsel %vm15019_vm3, %v2563_v32, 0.0  ;;  %v2039_v49 = vadd.f32 %v2038_v35, %v11881_v12  ;;  %v1325_v25 = vmax.f32 %v1291_v53, 0.0 }
 0x2d9   : > { %v3182_v51 = vmax.f32 %v3181_v0, %v2981_v40  ;;  %v3219_v52 = vmax.f32 %v3218_v60, %v2982_v43  ;;  %vm15023_vm0 = vcmp.lt.s32.totalorder %v12118_v63, 600 }
 0x2da   : > { %v2516_v17 = vmax.f32 %v2039_v49, 0.0 }
 0x2db   : > { %v1878_v57 = vpop.f32.mrf.mxu0  ;;  %v1967_v4 = vpop.f32.mrf.mxu1 }
 0x2dc   : > { %v2935_v6 = vsel %vm14999_vm11, %v2516_v17, 0.0  ;;  %v1879_v7 = vadd.f32 %v1878_v57, %v11728_v34  ;;  %v1968_v11 = vadd.f32 %v1967_v4, %v11733_v39  ;;  %2080 = vmatmul.bf16.gmra.mxu2 %v11943_v48  ;;  %v12130_v17 = vperm.slane %v11724_v31, 0  ;;  %v8709_v31 = vld [vmem:[%s14971_s7 + $0x90] sm:$0xf] }
 0x2dd   : > { %v3250_v0 = vmax.f32 %v3249_v2, %v2935_v6  ;;  %v1292_v60 = vpop.f32.mrf.mxu3  ;;  %v10470_v6 = vld [vmem:[%s14971_s7 + $0xac] sm:$0xf0] }
 0x2de   : > { %v2570_v21 = vmax.f32 %v1879_v7, 0.0  ;;  %v2571_v22 = vmax.f32 %v1968_v11, 0.0  ;;  %v1293_v23 = vadd.f32 %v12051_v10, %v1292_v60  ;;  %v10467_v7 = vld [vmem:[%s14971_s7 + $0x9c] sm:$0xf] }
 0x2df   : > { %v2041_v19 = vpop.f32.mrf.mxu2 }
 0x2e0   : > { %v2989_v26 = vsel %vm15022_vm1, %v2570_v21, 0.0  ;;  %v2990_v29 = vsel %vm15022_vm1, %v2571_v22, 0.0  ;;  %v1326_v27 = vmax.f32 %v1293_v23, 0.0  ;;  %v2042_v2 = vadd.f32 %v2041_v19, %v11881_v12 }
 0x2e1   : > { %v3183_v32 = vmax.f32 %v3182_v51, %v2989_v26  ;;  %v3220_v35 = vmax.f32 %v3219_v52, %v2990_v29  ;;  %v2731_v52 = vadd.s32 128, %v11730_v36  ;;  %v8710_v21 = vor.u32 %v10470_v6, %v8709_v31 }
 0x2e2   : > { %v12125_v40 = vpack.c.bf16 %v1326_v27, %v1325_v25  ;;  %v2524_v43 = vmax.f32 %v2042_v2, 0.0  ;;  %1793 = vmatmul.bf16.gmra.mxu3 %v11735_v41 }
 0x2e3   : > { %v1880_v10 = vpop.f32.mrf.mxu0  ;;  %v1969_v49 = vpop.f32.mrf.mxu1  ;;  %2106 = vmatpush.bf16.msra.mxu3 %v8710_v21 }
 0x2e4   : > { %15104 = vst [vmem:[#allocation22_spill] sm:$0xff] %v12125_v40  ;;  %v2943_v53 = vsel %vm14990_vm12, %v2524_v43, 0.0  ;;  %v1881_v57 = vadd.f32 %v1880_v10, %v11728_v34  ;;  %v1970_v51 = vadd.f32 %v1969_v49, %v11733_v39  ;;  %1917 = vmatmul.bf16.gmra.mxu0 %v12125_v40  ;;  %2006 = vmatmul.bf16.gmra.mxu1 %v12125_v40 }
 0x2e5   : > { %v3251_v4 = vmax.f32 %v3250_v0, %v2943_v53  ;;  %v1754_v5 = vpop.f32.mrf.mxu3  ;;  %v8719_v0 = vld [vmem:[%s14971_s7 + $0xb8] sm:$0xf0]  ;;  %v12158_v43 = vadd.s32 %v11747_v46, %v2731_v52  ;;  %v2732_v52 = vadd.s32 136, %v11730_v36 }
 0x2e6   : > { %v2578_v11 = vmax.f32 %v1881_v57, 0.0  ;;  %v2579_v60 = vmax.f32 %v1970_v51, 0.0  ;;  %v8722_v23 = vor.u32 %v10467_v7, %v8719_v0  ;;  %v1755_v2 = vadd.f32 %v1754_v5, %v12130_v17 }
 0x2e7   : > { %v2043_v22 = vpop.f32.mrf.mxu2  ;;  %vm15026_vm12 = vcmp.lt.s32.totalorder %v12158_v43, 600 }
 0x2e8   : > { %v2997_v25 = vsel %vm15023_vm0, %v2578_v11, 0.0  ;;  %v2998_v19 = vsel %vm15023_vm0, %v2579_v60, 0.0  ;;  %v2044_v26 = vadd.f32 %v2043_v22, %v11881_v12  ;;  %2373 = vmatpush.bf16.msra.mxu2 %v8722_v23 }
 0x2e9   : > { %v3184_v29 = vmax.f32 %v3183_v32, %v2997_v25  ;;  %v3221_v27 = vmax.f32 %v3220_v35, %v2998_v19  ;;  %v2457_v32 = vmax.f32 %v1755_v2, 0.0 }
 0x2ea   : > { %v2532_v10 = vmax.f32 %v2044_v26, 0.0  ;;  %v12176_v26 = vadd.s32 %v11747_v46, %v2732_v52 }
 0x2eb   : > { %v1883_v49 = vpop.f32.mrf.mxu0  ;;  %v1972_v53 = vpop.f32.mrf.mxu1 }
 0x2ec   : > { %v2951_v57 = vsel %vm15007_vm13, %v2532_v10, 0.0  ;;  %v1884_v51 = vadd.f32 %v1883_v49, %v11728_v34  ;;  %v1973_v31 = vadd.f32 %v1972_v53, %v11733_v39  ;;  %2085 = vmatmul.bf16.gmra.mxu2 %v11983_v55  ;;  %v10459_v49 = vld [vmem:[%s14971_s7 + $0x5c] sm:$0xf] }
 0x2ed   : > { %v3252_v35 = vmax.f32 %v3251_v4, %v2951_v57  ;;  %v1756_v5 = vpop.f32.mrf.mxu3  ;;  %v2876_v4 = vsel %vm14992_vm4, %v2457_v32, 0.0  ;;  %v8687_v53 = vld [vmem:[%s14971_s7 + $0x78] sm:$0xf0] }
 0x2ee   : > { %v2586_v6 = vmax.f32 %v1884_v51, 0.0  ;;  %v2587_v7 = vmax.f32 %v1973_v31, 0.0  ;;  %v1757_v11 = vadd.f32 %v1756_v5, %v12130_v17  ;;  %v8690_v51 = vor.u32 %v10459_v49, %v8687_v53 }
 0x2ef   : > { %v2046_v60 = vpop.f32.mrf.mxu2 }
 0x2f0   : > { %v3005_v21 = vsel %vm15026_vm12, %v2586_v6, 0.0  ;;  %v3006_v0 = vsel %vm15026_vm12, %v2587_v7, 0.0  ;;  %v2465_v22 = vmax.f32 %v1757_v11, 0.0  ;;  %v2047_v23 = vadd.f32 %v2046_v60, %v11881_v12  ;;  %2374 = vmatpush.bf16.msra.mxu2 %v8690_v51 }
 0x2f1   : > { %v3185_v25 = vmax.f32 %v3184_v29, %v3005_v21  ;;  %v3222_v19 = vmax.f32 %v3221_v27, %v3006_v0  ;;  %v2733_v7 = vadd.s32 144, %v11730_v36  ;;  %v10451_v0 = vld [vmem:[%s14971_s7 + $0x1c] sm:$0xf] }
 0x2f2   : > { %v2884_v2 = vsel %vm14991_vm5, %v2465_v22, 0.0  ;;  %v2540_v10 = vmax.f32 %v2047_v23, 0.0  ;;  %1798 = vmatmul.bf16.gmra.mxu3 %v11783_v20  ;;  %vm15024_vm5 = vcmp.lt.s32.totalorder %v12176_v26, 600  ;;  %v8655_v22 = vld [vmem:[%s14971_s7 + $0x38] sm:$0xf0] }
 0x2f3   : > { %v3133_v57 = vmax.f32 %v2876_v4, %v2884_v2  ;;  %v1885_v29 = vpop.f32.mrf.mxu0  ;;  %v1974_v27 = vpop.f32.mrf.mxu1 }
 0x2f4   : > { %v2959_v31 = vsel %vm15010_vm14, %v2540_v10, 0.0  ;;  %v1886_v32 = vadd.f32 %v1885_v29, %v11728_v34  ;;  %v1975_v5 = vadd.f32 %v1974_v27, %v11733_v39  ;;  %2198 = vmatmul.bf16.vlgmr.msra.gmra.mxu0 %v11546_v1  ;;  %2287 = vmatmul.bf16.vlgmr.msra.gmra.mxu1 %v11546_v1  ;;  %v12208_v27 = vadd.s32 %v11747_v46, %v2733_v7 }
 0x2f5   : > { %v3253_v52 = vmax.f32 %v3252_v35, %v2959_v31  ;;  %v1759_v6 = vpop.f32.mrf.mxu3  ;;  %v8658_v35 = vor.u32 %v10451_v0, %v8655_v22  ;;  %v2734_v7 = vadd.s32 152, %v11730_v36 }
 0x2f6   : > { %v2594_v11 = vmax.f32 %v1886_v32, 0.0  ;;  %v2595_v60 = vmax.f32 %v1975_v5, 0.0  ;;  %v1760_v21 = vadd.f32 %v1759_v6, %v12130_v17  ;;  %vm15025_vm4 = vcmp.lt.s32.totalorder %v12208_v27, 600 }
 0x2f7   : > { %v2048_v23 = vpop.f32.mrf.mxu2  ;;  %2375 = vmatpush.bf16.msra.mxu2 %v8658_v35 }
 0x2f8   : > { %v3013_v4 = vsel %vm15024_vm5, %v2594_v11, 0.0  ;;  %v3014_v2 = vsel %vm15024_vm5, %v2595_v60, 0.0  ;;  %v2473_v10 = vmax.f32 %v1760_v21, 0.0  ;;  %v2049_v49 = vadd.f32 %v2048_v23, %v11881_v12 }
 0x2f9   : > { %v3186_v53 = vmax.f32 %v3185_v25, %v3013_v4  ;;  %v3223_v29 = vmax.f32 %v3222_v19, %v3014_v2 }
 0x2fa   : > { %v2892_v51 = vsel %vm14994_vm6, %v2473_v10, 0.0  ;;  %v2548_v31 = vmax.f32 %v2049_v49, 0.0 }
 0x2fb   : > { %v3134_v32 = vmax.f32 %v3133_v57, %v2892_v51  ;;  %v1888_v5 = vpop.f32.mrf.mxu0  ;;  %v1977_v6 = vpop.f32.mrf.mxu1  ;;  %v12226_v51 = vadd.s32 %v11747_v46, %v2734_v7 }
 0x2fc   : > { %v2967_v11 = vsel %vm15013_vm15, %v2548_v31, 0.0  ;;  %v1889_v60 = vadd.f32 %v1888_v5, %v11728_v34  ;;  %v1978_v21 = vadd.f32 %v1977_v6, %v11733_v39  ;;  %2090 = vmatmul.bf16.gmra.mxu2 %v12089_v15 }
 0x2fd   : > { %v3254_v25 = vmax.f32 %v3253_v52, %v2967_v11  ;;  %v1761_v19 = vpop.f32.mrf.mxu3 }
 0x2fe   : > { %v2602_v0 = vmax.f32 %v1889_v60, 0.0  ;;  %v2603_v22 = vmax.f32 %v1978_v21, 0.0  ;;  %v1762_v57 = vadd.f32 %v1761_v19, %v12130_v17 }
 0x2ff   : > { %v2051_v23 = vpop.f32.mrf.mxu2 }
 0x300   : > { %v3021_v35 = vsel %vm15025_vm4, %v2602_v0, 0.0  ;;  %v3022_v4 = vsel %vm15025_vm4, %v2603_v22, 0.0  ;;  %v2481_v2 = vmax.f32 %v1762_v57, 0.0  ;;  %v2052_v10 = vadd.f32 %v2051_v23, %v11881_v12  ;;  %v10462_v22 = vld [vmem:[%s14971_s7 + $0x6c] sm:$0xf0] }
 0x301   : > { %v3187_v52 = vmax.f32 %v3186_v53, %v3021_v35  ;;  %v3224_v49 = vmax.f32 %v3223_v29, %v3022_v4  ;;  %v2735_v0 = vadd.s32 160, %v11730_v36 }
 0x302   : > { %v2900_v31 = vsel %vm14993_vm7, %v2481_v2, 0.0  ;;  %v2556_v5 = vmax.f32 %v2052_v10, 0.0  ;;  %1803 = vmatmul.bf16.gmra.mxu3 %v11826_v8  ;;  %vm2799_vm7 = vcmp.lt.s32.totalorder %v12226_v51, 600 }
 0x303   : > { %v3135_v6 = vmax.f32 %v3134_v32, %v2900_v31  ;;  %v1890_v11 = vpop.f32.mrf.mxu0  ;;  %v1979_v60 = vpop.f32.mrf.mxu1  ;;  %v8677_v32 = vld [vmem:[%s14971_s7 + $0x50] sm:$0xf] }
 0x304   : > { %v2975_v21 = vsel %vm15016_vm2, %v2556_v5, 0.0  ;;  %v1891_v19 = vadd.f32 %v1890_v11, %v11728_v34  ;;  %v1980_v53 = vadd.f32 %v1979_v60, %v11733_v39  ;;  %2203 = vmatmul.bf16.gmra.mxu0 %v11573_v24  ;;  %2292 = vmatmul.bf16.gmra.mxu1 %v11573_v24  ;;  %v8678_v4 = vor.u32 %v10462_v22, %v8677_v32 }
 0x305   : > { %v3255_v29 = vmax.f32 %v3254_v25, %v2975_v21  ;;  %v1764_v7 = vpop.f32.mrf.mxu3  ;;  %v12252_v21 = vadd.s32 %v11747_v46, %v2735_v0  ;;  %v2736_v0 = vadd.s32 168, %v11730_v36 }
 0x306   : > { %v2610_v57 = vmax.f32 %v1891_v19, 0.0  ;;  %v2611_v23 = vmax.f32 %v1980_v53, 0.0  ;;  %v1765_v35 = vadd.f32 %v1764_v7, %v12130_v17  ;;  %2107 = vmatpush.bf16.msra.mxu3 %v8678_v4 }
 0x307   : > { %v2053_v2 = vpop.f32.mrf.mxu2  ;;  %vm2800_vm6 = vcmp.lt.s32.totalorder %v12252_v21, 600 }
 0x308   : > { %v3029_v25 = vsel %vm2799_vm7, %v2610_v57, 0.0  ;;  %v3030_v10 = vsel %vm2799_vm7, %v2611_v23, 0.0  ;;  %v2489_v31 = vmax.f32 %v1765_v35, 0.0  ;;  %v2054_v5 = vadd.f32 %v2053_v2, %v11881_v12 }
 0x309   : > { %v3188_v11 = vmax.f32 %v3187_v52, %v3029_v25  ;;  %v3225_v60 = vmax.f32 %v3224_v49, %v3030_v10 }
 0x30a   : > { %v2908_v19 = vsel %vm14998_vm8, %v2489_v31, 0.0  ;;  %v2564_v53 = vmax.f32 %v2054_v5, 0.0 }
 0x30b   : > { %v3136_v7 = vmax.f32 %v3135_v6, %v2908_v19  ;;  %v1893_v32 = vpop.f32.mrf.mxu0  ;;  %v1982_v22 = vpop.f32.mrf.mxu1 }
 0x30c   : > { %v2983_v57 = vsel %vm15019_vm3, %v2564_v53, 0.0  ;;  %v1894_v23 = vadd.f32 %v1893_v32, %v11728_v34  ;;  %v1983_v35 = vadd.f32 %v1982_v22, %v11733_v39  ;;  %2095 = vmatmul.bf16.gmra.mxu2 %v12125_v40  ;;  %v12270_v32 = vadd.s32 %v11747_v46, %v2736_v0 }
 0x30d   : > { %v3256_v52 = vmax.f32 %v3255_v29, %v2983_v57  ;;  %v1766_v49 = vpop.f32.mrf.mxu3 }
 0x30e   : > { %v2618_v4 = vmax.f32 %v1894_v23, 0.0  ;;  %v2619_v2 = vmax.f32 %v1983_v35, 0.0  ;;  %v1767_v6 = vadd.f32 %v1766_v49, %v12130_v17 }
 0x30f   : > { %v2056_v25 = vpop.f32.mrf.mxu2 }
 0x310   : > { %v3037_v10 = vsel %vm2800_vm6, %v2618_v4, 0.0  ;;  %v3038_v31 = vsel %vm2800_vm6, %v2619_v2, 0.0  ;;  %v2497_v5 = vmax.f32 %v1767_v6, 0.0  ;;  %v2057_v19 = vadd.f32 %v2056_v25, %v11881_v12 }
 0x311   : > { %v3189_v29 = vmax.f32 %v3188_v11, %v3037_v10  ;;  %v3226_v53 = vmax.f32 %v3225_v60, %v3038_v31  ;;  %v2737_v6 = vadd.s32 176, %v11730_v36 }
 0x312   : > { %v2916_v22 = vsel %vm14995_vm9, %v2497_v5, 0.0  ;;  %v2572_v57 = vmax.f32 %v2057_v19, 0.0  ;;  %1808 = vmatmul.bf16.gmra.mxu3 %v11867_v3  ;;  %vm2801_vm9 = vcmp.lt.s32.totalorder %v12270_v32, 600 }
 0x313   : > { %v3137_v23 = vmax.f32 %v3136_v7, %v2916_v22  ;;  %v1895_v35 = vpop.f32.mrf.mxu0  ;;  %v1984_v49 = vpop.f32.mrf.mxu1 }
 0x314   : > { %v2991_v4 = vsel %vm15022_vm1, %v2572_v57, 0.0  ;;  %v1896_v2 = vadd.f32 %v1895_v35, %v11728_v34  ;;  %v1985_v11 = vadd.f32 %v1984_v49, %v11733_v39  ;;  %2208 = vmatmul.bf16.gmra.mxu0 %v11588_v42  ;;  %2297 = vmatmul.bf16.gmra.mxu1 %v11588_v42  ;;  %v12290_v49 = vadd.s32 %v11747_v46, %v2737_v6 }
 0x315   : > { %v3257_v60 = vmax.f32 %v3256_v52, %v2991_v4  ;;  %v1769_v0 = vpop.f32.mrf.mxu3  ;;  %v2738_v6 = vadd.s32 184, %v11730_v36 }
 0x316   : > { %v2626_v7 = vmax.f32 %v1896_v2, 0.0  ;;  %v2627_v25 = vmax.f32 %v1985_v11, 0.0  ;;  %v1770_v10 = vadd.f32 %v1769_v0, %v12130_v17  ;;  %15105 = vst [vmem:[#allocation23_spill] sm:$0xff] %v12290_v49  ;;  %vm2802_vm8 = vcmp.lt.s32.totalorder %v12290_v49, 600 }
 0x317   : > { %v2058_v31 = vpop.f32.mrf.mxu2 }
 0x318   : > { %v3045_v5 = vsel %vm2801_vm9, %v2626_v7, 0.0  ;;  %v3046_v19 = vsel %vm2801_vm9, %v2627_v25, 0.0  ;;  %v2505_v22 = vmax.f32 %v1770_v10, 0.0  ;;  %v2059_v57 = vadd.f32 %v2058_v31, %v11881_v12 }
 0x319   : > { %v3190_v52 = vmax.f32 %v3189_v29, %v3045_v5  ;;  %v3227_v35 = vmax.f32 %v3226_v53, %v3046_v19 }
 0x31a   : > { %v2924_v4 = vsel %vm15000_vm10, %v2505_v22, 0.0  ;;  %v2580_v2 = vmax.f32 %v2059_v57, 0.0  ;;  %vm15107_vm10 = vcmp.lt.s32.totalorder %v11905_v47, 600 }
 0x31b   : > { %v3138_v11 = vmax.f32 %v3137_v23, %v2924_v4  ;;  %v1898_v0 = vpop.f32.mrf.mxu0  ;;  %v1987_v3 = vpop.f32.mrf.mxu1 }
 0x31c   : > { %v2999_v7 = vsel %vm15023_vm0, %v2580_v2, 0.0  ;;  %v1899_v25 = vadd.f32 %v1898_v0, %v11728_v34  ;;  %v1988_v10 = vadd.f32 %v1987_v3, %v11733_v39  ;;  %2376 = vmatmul.bf16.vlgmr.msra.gmra.mxu2 %v11546_v1  ;;  %v12312_v0 = vadd.s32 %v11747_v46, %v2738_v6 }
 0x31d   : > { %v3258_v29 = vmax.f32 %v3257_v60, %v2999_v7  ;;  %v1771_v53 = vpop.f32.mrf.mxu3 }
 0x31e   : > { %v2634_v31 = vmax.f32 %v1899_v25, 0.0  ;;  %v2635_v5 = vmax.f32 %v1988_v10, 0.0  ;;  %v1772_v23 = vadd.f32 %v1771_v53, %v12130_v17  ;;  %15106 = vst [vmem:[#allocation24_spill] sm:$0xff] %v12312_v0 }
 0x31f   : > { %v2061_v19 = vpop.f32.mrf.mxu2 }
 0x320   : > { %v3053_v22 = vsel %vm2802_vm8, %v2634_v31, 0.0  ;;  %v3054_v57 = vsel %vm2802_vm8, %v2635_v5, 0.0  ;;  %v2513_v3 = vmax.f32 %v1772_v23, 0.0  ;;  %v2062_v4 = vadd.f32 %v2061_v19, %v11881_v12 }
 0x321   : > { %v12307_v60 = vmax.f32 %v3190_v52, %v3053_v22  ;;  %v12309_v2 = vmax.f32 %v3227_v35, %v3054_v57 }
 0x322   : > { %v2932_v7 = vsel %vm14999_vm11, %v2513_v3, 0.0  ;;  %v2588_v25 = vmax.f32 %v2062_v4, 0.0  ;;  %1813 = vmatmul.bf16.gmra.mxu3 %v11943_v48  ;;  %vm2803_vm11 = vcmp.lt.s32.totalorder %v12312_v0, 600  ;;  %v8645_v3 = vld [vmem:[%s14971_s7 + $0x10] sm:$0xf] }
 0x323   : > { %v3139_v10 = vmax.f32 %v3138_v11, %v2932_v7  ;;  %v1900_v53 = vpop.f32.mrf.mxu0  ;;  %v1989_v31 = vpop.f32.mrf.mxu1  ;;  %v10454_v4 = vld [vmem:[%s14971_s7 + $0x2c] sm:$0xf0] }
 0x324   : > { %v3007_v5 = vsel %vm15026_vm12, %v2588_v25, 0.0  ;;  %v1901_v52 = vadd.f32 %v1900_v53, %v11728_v34  ;;  %v1990_v35 = vadd.f32 %v1989_v31, %v11733_v39  ;;  %2213 = vmatmul.bf16.gmra.mxu0 %v11608_v59  ;;  %2302 = vmatmul.bf16.gmra.mxu1 %v11608_v59 }
 0x325   : > { %v3259_v6 = vmax.f32 %v3258_v29, %v3007_v5  ;;  %v1774_v23 = vpop.f32.mrf.mxu3 }
 0x326   : > { %v2642_v19 = vmax.f32 %v1901_v52, 0.0  ;;  %v2643_v22 = vmax.f32 %v1990_v35, 0.0  ;;  %v1775_v11 = vadd.f32 %v1774_v23, %v12130_v17  ;;  %v8646_v52 = vor.u32 %v10454_v4, %v8645_v3 }
 0x327   : > { %v2063_v57 = vpop.f32.mrf.mxu2 }
 0x328   : > { %v3061_v7 = vsel %vm2803_vm11, %v2642_v19, 0.0  ;;  %v3062_v29 = vsel %vm2803_vm11, %v2643_v22, 0.0  ;;  %v2521_v25 = vmax.f32 %v1775_v11, 0.0  ;;  %v2064_v53 = vadd.f32 %v2063_v57, %v11881_v12  ;;  %2108 = vmatpush.bf16.msra.mxu3 %v8646_v52 }
 0x329   : > { %v3192_v31 = vmax.f32 %v12307_v60, %v3061_v7  ;;  %v3229_v5 = vmax.f32 %v12309_v2, %v3062_v29  ;;  %v12346_v2 = vadd.s32 %v11747_v46, %v2739_v14  ;;  %v2740_v14 = vadd.s32 200, %v11730_v36 }
 0x32a   : > { %v2940_v35 = vsel %vm15107_vm10, %v2521_v25, 0.0  ;;  %v2596_v23 = vmax.f32 %v2064_v53, 0.0 }
 0x32b   : > { %v3140_v48 = vmax.f32 %v3139_v10, %v2940_v35  ;;  %vm15032_vm10 = vcmp.lt.s32.totalorder %v12346_v2, 600 }
 0x32c   : > { %v3015_v19 = vsel %vm15024_vm5, %v2596_v23, 0.0  ;;  %2381 = vmatmul.bf16.gmra.mxu2 %v11573_v24 }
 0x32d   : > { %v3260_v22 = vmax.f32 %v3259_v6, %v3015_v19  ;;  %v1776_v11 = vpop.f32.mrf.mxu3 }
 0x32e   : > { %v1777_v60 = vadd.f32 %v1776_v11, %v12130_v17 }
 0x32f   : > { %v2066_v57 = vpop.f32.mrf.mxu2 }
 0x330   : > { %v2529_v3 = vmax.f32 %v1777_v60, 0.0  ;;  %v2067_v4 = vadd.f32 %v2066_v57, %v11881_v12 }
 0x331   : > { %v1903_v10 = vpop.f32.mrf.mxu0  ;;  %v1992_v7 = vpop.f32.mrf.mxu1 }
 0x332   : > { %v2948_v29 = vsel %vm15007_vm13, %v2529_v3, 0.0  ;;  %v2604_v25 = vmax.f32 %v2067_v4, 0.0  ;;  %v1904_v53 = vadd.f32 %v1903_v10, %v11728_v34  ;;  %v1993_v6 = vadd.f32 %v1992_v7, %v11733_v39  ;;  %1818 = vmatmul.bf16.gmra.mxu3 %v11983_v55 }
 0x333   : > { %v3141_v52 = vmax.f32 %v3140_v48, %v2948_v29  ;;  %v12366_v29 = vadd.s32 %v11747_v46, %v2740_v14 }
 0x334   : > { %v3023_v35 = vsel %vm15025_vm4, %v2604_v25, 0.0  ;;  %v2650_v23 = vmax.f32 %v1904_v53, 0.0  ;;  %v2651_v19 = vmax.f32 %v1993_v6, 0.0  ;;  %2218 = vmatmul.bf16.gmra.mxu0 %v11630_v16  ;;  %2307 = vmatmul.bf16.gmra.mxu1 %v11630_v16 }
 0x335   : > { %v3261_v11 = vmax.f32 %v3260_v22, %v3023_v35  ;;  %v1779_v60 = vpop.f32.mrf.mxu3  ;;  %vm2805_vm13 = vcmp.lt.s32.totalorder %v12366_v29, 600 }
 0x336   : > { %v3069_v57 = vsel %vm15032_vm10, %v2650_v23, 0.0  ;;  %v3070_v48 = vsel %vm15032_vm10, %v2651_v19, 0.0  ;;  %v1780_v3 = vadd.f32 %v1779_v60, %v12130_v17 }
 0x337   : > { %v3193_v4 = vmax.f32 %v3192_v31, %v3069_v57  ;;  %v3230_v10 = vmax.f32 %v3229_v5, %v3070_v48  ;;  %v2068_v7 = vpop.f32.mrf.mxu2  ;;  %v2741_v31 = vadd.s32 208, %v11730_v36 }
 0x338   : > { %v2537_v25 = vmax.f32 %v1780_v3, 0.0  ;;  %v2069_v53 = vadd.f32 %v2068_v7, %v11881_v12 }
 0x339   : > { %v1905_v6 = vpop.f32.mrf.mxu0  ;;  %v1994_v22 = vpop.f32.mrf.mxu1 }
 0x33a   : > { %v2956_v35 = vsel %vm15010_vm14, %v2537_v25, 0.0  ;;  %v2612_v23 = vmax.f32 %v2069_v53, 0.0  ;;  %v1906_v55 = vadd.f32 %v1905_v6, %v11728_v34  ;;  %v1995_v19 = vadd.f32 %v1994_v22, %v11733_v39 }
 0x33b   : > { %v3142_v60 = vmax.f32 %v3141_v52, %v2956_v35  ;;  %v12384_v35 = vadd.s32 %v11747_v46, %v2741_v31 }
 0x33c   : > { %v3031_v5 = vsel %vm2799_vm7, %v2612_v23, 0.0  ;;  %v2658_v14 = vmax.f32 %v1906_v55, 0.0  ;;  %v2659_v57 = vmax.f32 %v1995_v19, 0.0  ;;  %2386 = vmatmul.bf16.gmra.mxu2 %v11588_v42 }
 0x33d   : > { %v3262_v48 = vmax.f32 %v3261_v11, %v3031_v5  ;;  %v1781_v3 = vpop.f32.mrf.mxu3  ;;  %vm15027_vm14 = vcmp.lt.s32.totalorder %v12384_v35, 600 }
 0x33e   : > { %v3077_v7 = vsel %vm2805_vm13, %v2658_v14, 0.0  ;;  %v3078_v25 = vsel %vm2805_vm13, %v2659_v57, 0.0  ;;  %v1782_v52 = vadd.f32 %v1781_v3, %v12130_v17 }
 0x33f   : > { %v3194_v53 = vmax.f32 %v3193_v4, %v3077_v7  ;;  %v3231_v6 = vmax.f32 %v3230_v10, %v3078_v25  ;;  %v2071_v22 = vpop.f32.mrf.mxu2  ;;  %v2742_v10 = vadd.s32 216, %v11730_v36 }
 0x340   : > { %v2545_v55 = vmax.f32 %v1782_v52, 0.0  ;;  %v2072_v23 = vadd.f32 %v2071_v22, %v11881_v12 }
 0x341   : > { %v1908_v19 = vpop.f32.mrf.mxu0  ;;  %v1997_v11 = vpop.f32.mrf.mxu1 }
 0x342   : > { %v2964_v5 = vsel %vm15013_vm15, %v2545_v55, 0.0  ;;  %v2620_v14 = vmax.f32 %v2072_v23, 0.0  ;;  %v1909_v9 = vadd.f32 %v1908_v19, %v11728_v34  ;;  %v1998_v57 = vadd.f32 %v1997_v11, %v11733_v39  ;;  %1823 = vmatmul.bf16.gmra.mxu3 %v12089_v15 }
 0x343   : > { %v3143_v4 = vmax.f32 %v3142_v60, %v2964_v5 }
 0x344   : > { %v3039_v31 = vsel %vm2800_vm6, %v2620_v14, 0.0  ;;  %v2666_v3 = vmax.f32 %v1909_v9, 0.0  ;;  %v2667_v7 = vmax.f32 %v1998_v57, 0.0  ;;  %2223 = vmatmul.bf16.gmra.mxu0 %v11652_v37  ;;  %2312 = vmatmul.bf16.gmra.mxu1 %v11652_v37  ;;  %v12404_v9 = vadd.s32 %v11747_v46, %v2742_v10 }
 0x345   : > { %v3263_v25 = vmax.f32 %v3262_v48, %v3039_v31  ;;  %v1784_v52 = vpop.f32.mrf.mxu3 }
 0x346   : > { %v3085_v22 = vsel %vm15027_vm14, %v2666_v3, 0.0  ;;  %v3086_v60 = vsel %vm15027_vm14, %v2667_v7, 0.0  ;;  %v1785_v55 = vadd.f32 %v1784_v52, %v12130_v17  ;;  %vm2807_vm15 = vcmp.lt.s32.totalorder %v12404_v9, 600 }
 0x347   : > { %v3195_v23 = vmax.f32 %v3194_v53, %v3085_v22  ;;  %v3232_v19 = vmax.f32 %v3231_v6, %v3086_v60  ;;  %v2073_v11 = vpop.f32.mrf.mxu2  ;;  %v2743_v53 = vadd.s32 224, %v11730_v36 }
 0x348   : > { %v2553_v5 = vmax.f32 %v1785_v55, 0.0  ;;  %v2074_v14 = vadd.f32 %v2073_v11, %v11881_v12 }
 0x349   : > { %v1910_v57 = vpop.f32.mrf.mxu0  ;;  %v1999_v48 = vpop.f32.mrf.mxu1 }
 0x34a   : > { %v2972_v31 = vsel %vm15016_vm2, %v2553_v5, 0.0  ;;  %v2628_v3 = vmax.f32 %v2074_v14, 0.0  ;;  %v1911_v15 = vadd.f32 %v1910_v57, %v11728_v34  ;;  %v2000_v7 = vadd.f32 %v1999_v48, %v11733_v39 }
 0x34b   : > { %v3144_v52 = vmax.f32 %v3143_v4, %v2972_v31  ;;  %v12422_v31 = vadd.s32 %v11747_v46, %v2743_v53 }
 0x34c   : > { %v3047_v6 = vsel %vm2801_vm9, %v2628_v3, 0.0  ;;  %v2674_v10 = vmax.f32 %v1911_v15, 0.0  ;;  %v2675_v22 = vmax.f32 %v2000_v7, 0.0  ;;  %2391 = vmatmul.bf16.gmra.mxu2 %v11608_v59 }
 0x34d   : > { %v3264_v60 = vmax.f32 %v3263_v25, %v3047_v6  ;;  %v1786_v55 = vpop.f32.mrf.mxu3  ;;  %vm2808_vm2 = vcmp.lt.s32.totalorder %v12422_v31, 600 }
 0x34e   : > { %v3093_v11 = vsel %vm2807_vm15, %v2674_v10, 0.0  ;;  %v3094_v5 = vsel %vm2807_vm15, %v2675_v22, 0.0  ;;  %v1787_v4 = vadd.f32 %v1786_v55, %v12130_v17 }
 0x34f   : > { %v3196_v14 = vmax.f32 %v3195_v23, %v3093_v11  ;;  %v3233_v57 = vmax.f32 %v3232_v19, %v3094_v5  ;;  %v2076_v48 = vpop.f32.mrf.mxu2  ;;  %v2744_v19 = vadd.s32 232, %v11730_v36 }
 0x350   : > { %v2561_v15 = vmax.f32 %v1787_v4, 0.0  ;;  %v2077_v3 = vadd.f32 %v2076_v48, %v11881_v12 }
 0x351   : > { %v1913_v7 = vpop.f32.mrf.mxu0  ;;  %v2002_v25 = vpop.f32.mrf.mxu1 }
 0x352   : > { %v2980_v6 = vsel %vm15019_vm3, %v2561_v15, 0.0  ;;  %v2636_v10 = vmax.f32 %v2077_v3, 0.0  ;;  %v1914_v50 = vadd.f32 %v1913_v7, %v11728_v34  ;;  %v2003_v22 = vadd.f32 %v2002_v25, %v11733_v39  ;;  %1828 = vmatmul.bf16.gmra.mxu3 %v12125_v40 }
 0x353   : > { %v3145_v23 = vmax.f32 %v3144_v52, %v2980_v6 }
 0x354   : > { %v3055_v53 = vsel %vm2802_vm8, %v2636_v10, 0.0  ;;  %v2682_v55 = vmax.f32 %v1914_v50, 0.0  ;;  %v2683_v11 = vmax.f32 %v2003_v22, 0.0  ;;  %2228 = vmatmul.bf16.gmra.mxu0 %v11680_v38  ;;  %2317 = vmatmul.bf16.gmra.mxu1 %v11680_v38  ;;  %v12442_v50 = vadd.s32 %v11747_v46, %v2744_v19 }
 0x355   : > { %v3265_v5 = vmax.f32 %v3264_v60, %v3055_v53  ;;  %v1789_v4 = vpop.f32.mrf.mxu3 }
 0x356   : > { %v3101_v48 = vsel %vm2808_vm2, %v2682_v55, 0.0  ;;  %v3102_v52 = vsel %vm2808_vm2, %v2683_v11, 0.0  ;;  %v1790_v15 = vadd.f32 %v1789_v4, %v12130_v17  ;;  %15108 = vst [vmem:[#allocation25_spill] sm:$0xff] %v12442_v50  ;;  %vm2809_vm3 = vcmp.lt.s32.totalorder %v12442_v50, 600 }
 0x357   : > { %v3197_v3 = vmax.f32 %v3196_v14, %v3101_v48  ;;  %v3234_v7 = vmax.f32 %v3233_v57, %v3102_v52  ;;  %v2078_v25 = vpop.f32.mrf.mxu2  ;;  %v2745_v14 = vadd.s32 240, %v11730_v36 }
 0x358   : > { %v2569_v6 = vmax.f32 %v1790_v15, 0.0  ;;  %v2079_v10 = vadd.f32 %v2078_v25, %v11881_v12 }
 0x359   : > { %v1915_v22 = vpop.f32.mrf.mxu0  ;;  %v2004_v60 = vpop.f32.mrf.mxu1 }
 0x35a   : > { %v2988_v53 = vsel %vm15022_vm1, %v2569_v6, 0.0  ;;  %v2644_v55 = vmax.f32 %v2079_v10, 0.0  ;;  %v1916_v40 = vadd.f32 %v1915_v22, %v11728_v34  ;;  %v2005_v11 = vadd.f32 %v2004_v60, %v11733_v39 }
 0x35b   : > { %v3146_v4 = vmax.f32 %v3145_v23, %v2988_v53  ;;  %v12460_v53 = vadd.s32 %v11747_v46, %v2745_v14 }
 0x35c   : > { %v3063_v57 = vsel %vm2803_vm11, %v2644_v55, 0.0  ;;  %v2690_v19 = vmax.f32 %v1916_v40, 0.0  ;;  %v2691_v48 = vmax.f32 %v2005_v11, 0.0  ;;  %2396 = vmatmul.bf16.gmra.mxu2 %v11630_v16 }
 0x35d   : > { %v3266_v52 = vmax.f32 %v3265_v5, %v3063_v57  ;;  %v1791_v15 = vpop.f32.mrf.mxu3  ;;  %15109 = vst [vmem:[#allocation26_spill] sm:$0xff] %v12460_v53  ;;  %vm2810_vm1 = vcmp.lt.s32.totalorder %v12460_v53, 600 }
 0x35e   : > { %v3109_v25 = vsel %vm2809_vm3, %v2690_v19, 0.0  ;;  %v3110_v6 = vsel %vm2809_vm3, %v2691_v48, 0.0  ;;  %v1792_v23 = vadd.f32 %v1791_v15, %v12130_v17 }
 0x35f   : > { %v3198_v10 = vmax.f32 %v3197_v3, %v3109_v25  ;;  %v3235_v22 = vmax.f32 %v3234_v7, %v3110_v6  ;;  %v2081_v60 = vpop.f32.mrf.mxu2  ;;  %v2746_v7 = vadd.s32 248, %v11730_v36 }
 0x360   : > { %v2577_v40 = vmax.f32 %v1792_v23, 0.0  ;;  %v2082_v55 = vadd.f32 %v2081_v60, %v11881_v12 }
 0x361   : > { %v1918_v11 = vpop.f32.mrf.mxu0  ;;  %v2007_v5 = vpop.f32.mrf.mxu1 }
 0x362   : > { %v2996_v57 = vsel %vm15023_vm0, %v2577_v40, 0.0  ;;  %v2652_v19 = vmax.f32 %v2082_v55, 0.0  ;;  %v1919_v28 = vadd.f32 %v1918_v11, %v11728_v34  ;;  %v2008_v48 = vadd.f32 %v2007_v5, %v11733_v39  ;;  %2109 = vmatmul.bf16.vlgmr.msra.gmra.mxu3 %v11546_v1 }
 0x363   : > { %v3147_v3 = vmax.f32 %v3146_v4, %v2996_v57 }
 0x364   : > { %v3071_v14 = vsel %vm15032_vm10, %v2652_v19, 0.0  ;;  %v2698_v15 = vmax.f32 %v1919_v28, 0.0  ;;  %v2699_v25 = vmax.f32 %v2008_v48, 0.0  ;;  %2233 = vmatmul.bf16.gmra.mxu0 %v11701_v18  ;;  %2322 = vmatmul.bf16.gmra.mxu1 %v11701_v18  ;;  %v12480_v28 = vadd.s32 %v11747_v46, %v2746_v7 }
 0x365   : > { %v3267_v6 = vmax.f32 %v3266_v52, %v3071_v14  ;;  %v1794_v23 = vpop.f32.mrf.mxu3 }
 0x366   : > { %v3117_v60 = vsel %vm2810_vm1, %v2698_v15, 0.0  ;;  %v3118_v1 = vsel %vm2810_vm1, %v2699_v25, 0.0  ;;  %v1795_v4 = vadd.f32 %v1794_v23, %v12130_v17  ;;  %15110 = vst [vmem:[#allocation27_spill] sm:$0xff] %v12480_v28  ;;  %vm2811_vm0 = vcmp.lt.s32.totalorder %v12480_v28, 600 }
 0x367   : > { %v3199_v36 = vmax.f32 %v3198_v10, %v3117_v60  ;;  %v3236_v40 = vmax.f32 %v3235_v22, %v3118_v1  ;;  %v2083_v55 = vpop.f32.mrf.mxu2 }
 0x368   : > { %v2585_v11 = vmax.f32 %v1795_v4, 0.0  ;;  %v2084_v5 = vadd.f32 %v2083_v55, %v11881_v12 }
 0x369   : > { %v1920_v57 = vpop.f32.mrf.mxu0  ;;  %v2009_v52 = vpop.f32.mrf.mxu1 }
 0x36a   : > { %v3004_v19 = vsel %vm15026_vm12, %v2585_v11, 0.0  ;;  %v2660_v48 = vmax.f32 %v2084_v5, 0.0  ;;  %v1921_v14 = vadd.f32 %v1920_v57, %v11728_v34  ;;  %v2010_v15 = vadd.f32 %v2009_v52, %v11733_v39 }
 0x36b   : > { %v3148_v25 = vmax.f32 %v3147_v3, %v3004_v19  ;;  %vm15113_vm12 = vcmp.lt.s32.totalorder %v11762_v56, 600 }
 0x36c   : > { %v3079_v46 = vsel %vm2805_vm13, %v2660_v48, 0.0  ;;  %v2706_v10 = vmax.f32 %v1921_v14, 0.0  ;;  %v2707_v22 = vmax.f32 %v2010_v15, 0.0  ;;  %2401 = vmatmul.bf16.gmra.mxu2 %v11652_v37 }
 0x36d   : > { %v3268_v7 = vmax.f32 %v3267_v6, %v3079_v46  ;;  %v1796_v23 = vpop.f32.mrf.mxu3  ;;  %v12504_v6 = vld [vmem:[%s14972_s8] sm:$0xff] }
 0x36e   : > { %v3125_v60 = vsel %vm2811_vm0, %v2706_v10, 0.0  ;;  %v3126_v34 = vsel %vm2811_vm0, %v2707_v22, 0.0  ;;  %v1797_v39 = vadd.f32 %v1796_v23, %v12130_v17  ;;  %v12507_v5 = vperm.slane %v12504_v6, 5 }
 0x36f   : > { %v12496_v3 = vmax.f32 %v3199_v36, %v3125_v60  ;;  %v12498_v1 = vmax.f32 %v3236_v40, %v3126_v34  ;;  %v2086_v4 = vpop.f32.mrf.mxu2  ;;  %v12510_v52 = vperm.slane %v12504_v6, 6 }
 0x370   : > { %v2593_v55 = vmax.f32 %v1797_v39, 0.0  ;;  %v2087_v11 = vadd.f32 %v2086_v4, %v11881_v12 }
 0x371   : > { %v2199_v57 = vpop.f32.mrf.mxu0  ;;  %v2288_v36 = vpop.f32.mrf.mxu1 }
 0x372   : > { %v3012_v40 = vsel %vm15024_vm5, %v2593_v55, 0.0  ;;  %v2668_v19 = vmax.f32 %v2087_v11, 0.0  ;;  %2114 = vmatmul.bf16.gmra.mxu3 %v11573_v24  ;;  %v2200_v46 = vadd.f32 %v2199_v57, %v12507_v5  ;;  %v2289_v10 = vadd.f32 %v2288_v36, %v12510_v52 }
 0x373   : > { %v3149_v48 = vmax.f32 %v3148_v25, %v3012_v40  ;;  %vm15111_vm5 = vcmp.lt.s32.totalorder %v11758_v54, 600 }
 0x374   : > { %v3087_v14 = vsel %vm15027_vm14, %v2668_v19, 0.0  ;;  %2238 = vmatmul.bf16.gmra.mxu0 %v11735_v41  ;;  %2327 = vmatmul.bf16.gmra.mxu1 %v11735_v41  ;;  %v2462_v25 = vmax.f32 %v2200_v46, 0.0  ;;  %v2463_v39 = vmax.f32 %v2289_v10, 0.0  ;;  %vm15114_vm14 = vmmov %vm15113_vm12 }
 0x375   : > { %v3269_v15 = vmax.f32 %v3268_v7, %v3087_v14  ;;  %v1799_v22 = vpop.f32.mrf.mxu3 }
 0x376   : > { %v1800_v23 = vadd.f32 %v1799_v22, %v12130_v17  ;;  %v2881_v46 = vsel %vm15111_vm5, %v2462_v25, 0.0 }
 0x377   : > { %v2088_v60 = vpop.f32.mrf.mxu2 }
 0x378   : > { %v2601_v34 = vmax.f32 %v1800_v23, 0.0  ;;  %v2089_v24 = vadd.f32 %v2088_v60, %v11881_v12 }
 0x379   : > { %v2201_v4 = vpop.f32.mrf.mxu0  ;;  %v2290_v55 = vpop.f32.mrf.mxu1 }
 0x37a   : > { %v3020_v11 = vsel %vm15025_vm4, %v2601_v34, 0.0  ;;  %v2676_v40 = vmax.f32 %v2089_v24, 0.0  ;;  %v2202_v7 = vadd.f32 %v2201_v4, %v12507_v5  ;;  %v2291_v57 = vadd.f32 %v2290_v55, %v12510_v52  ;;  %vm15112_vm4 = vmmov %vm15111_vm5 }
 0x37b   : > { %v3150_v36 = vmax.f32 %v3149_v48, %v3020_v11  ;;  %v2882_v60 = vsel %vm15112_vm4, %v2463_v39, 0.0  ;;  %vm15115_vm4 = vcmp.lt.s32.totalorder %v11781_v13, 600 }
 0x37c   : > { %v3095_v19 = vsel %vm2807_vm15, %v2676_v40, 0.0  ;;  %v2470_v14 = vmax.f32 %v2202_v7, 0.0  ;;  %v2471_v22 = vmax.f32 %v2291_v57, 0.0  ;;  %2406 = vmatmul.bf16.gmra.mxu2 %v11680_v38  ;;  %vm15116_vm5 = vmmov %vm15115_vm4 }
 0x37d   : > { %v3270_v10 = vmax.f32 %v3269_v15, %v3095_v19  ;;  %v1801_v23 = vpop.f32.mrf.mxu3 }
 0x37e   : > { %v2889_v34 = vsel %vm15113_vm12, %v2470_v14, 0.0  ;;  %v2890_v48 = vsel %vm15114_vm14, %v2471_v22, 0.0  ;;  %v1802_v24 = vadd.f32 %v1801_v23, %v12130_v17  ;;  %vm15117_vm12 = vcmp.lt.s32.totalorder %v11797_v33, 600 }
 0x37f   : > { %v3318_v4 = vmax.f32 %v2881_v46, %v2889_v34  ;;  %v3355_v55 = vmax.f32 %v2882_v60, %v2890_v48  ;;  %v2091_v11 = vpop.f32.mrf.mxu2  ;;  %vm15118_vm14 = vmmov %vm15117_vm12 }
 0x380   : > { %v2609_v40 = vmax.f32 %v1802_v24, 0.0  ;;  %v2092_v7 = vadd.f32 %v2091_v11, %v11881_v12 }
 0x381   : > { %v2204_v25 = vpop.f32.mrf.mxu0  ;;  %v2293_v15 = vpop.f32.mrf.mxu1 }
 0x382   : > { %v3028_v57 = vsel %vm2799_vm7, %v2609_v40, 0.0  ;;  %v2684_v39 = vmax.f32 %v2092_v7, 0.0  ;;  %v2205_v19 = vadd.f32 %v2204_v25, %v12507_v5  ;;  %v2294_v14 = vadd.f32 %v2293_v15, %v12510_v52  ;;  %2119 = vmatmul.bf16.gmra.mxu3 %v11588_v42 }
 0x383   : > { %v3151_v22 = vmax.f32 %v3150_v36, %v3028_v57 }
 0x384   : > { %v3103_v46 = vsel %vm2808_vm2, %v2684_v39, 0.0  ;;  %v2478_v23 = vmax.f32 %v2205_v19, 0.0  ;;  %v2479_v60 = vmax.f32 %v2294_v14, 0.0  ;;  %2243 = vmatmul.bf16.gmra.mxu0 %v11783_v20  ;;  %2332 = vmatmul.bf16.gmra.mxu1 %v11783_v20 }
 0x385   : > { %v3271_v34 = vmax.f32 %v3270_v10, %v3103_v46  ;;  %v1804_v48 = vpop.f32.mrf.mxu3 }
 0x386   : > { %v2897_v24 = vsel %vm15115_vm4, %v2478_v23, 0.0  ;;  %v2898_v11 = vsel %vm15116_vm5, %v2479_v60, 0.0  ;;  %v1805_v42 = vadd.f32 %v1804_v48, %v12130_v17  ;;  %vm15119_vm4 = vcmp.lt.s32.totalorder %v11818_v61, 600 }
 0x387   : > { %v3319_v36 = vmax.f32 %v3318_v4, %v2897_v24  ;;  %v3356_v40 = vmax.f32 %v3355_v55, %v2898_v11  ;;  %v2093_v7 = vpop.f32.mrf.mxu2  ;;  %vm15120_vm5 = vmmov %vm15119_vm4 }
 0x388   : > { %v2617_v25 = vmax.f32 %v1805_v42, 0.0  ;;  %v2094_v15 = vadd.f32 %v2093_v7, %v11881_v12 }
 0x389   : > { %v2206_v57 = vpop.f32.mrf.mxu0  ;;  %v2295_v39 = vpop.f32.mrf.mxu1 }
 0x38a   : > { %v3036_v10 = vsel %vm2800_vm6, %v2617_v25, 0.0  ;;  %v2692_v19 = vmax.f32 %v2094_v15, 0.0  ;;  %v2207_v14 = vadd.f32 %v2206_v57, %v12507_v5  ;;  %v2296_v46 = vadd.f32 %v2295_v39, %v12510_v52 }
 0x38b   : > { %v3152_v23 = vmax.f32 %v3151_v22, %v3036_v10 }
 0x38c   : > { %v3111_v60 = vsel %vm2809_vm3, %v2692_v19, 0.0  ;;  %v2486_v4 = vmax.f32 %v2207_v14, 0.0  ;;  %v2487_v55 = vmax.f32 %v2296_v46, 0.0  ;;  %2411 = vmatmul.bf16.gmra.mxu2 %v11701_v18 }
 0x38d   : > { %v3272_v48 = vmax.f32 %v3271_v34, %v3111_v60  ;;  %v1806_v24 = vpop.f32.mrf.mxu3 }
 0x38e   : > { %v2905_v11 = vsel %vm15117_vm12, %v2486_v4, 0.0  ;;  %v2906_v42 = vsel %vm15118_vm14, %v2487_v55, 0.0  ;;  %v1807_v7 = vadd.f32 %v1806_v24, %v12130_v17  ;;  %v3238_v4 = vrot.slane %v12498_v1, 4 }
 0x38f   : > { %v3320_v25 = vmax.f32 %v3319_v36, %v2905_v11  ;;  %v3357_v15 = vmax.f32 %v3356_v40, %v2906_v42  ;;  %v2096_v22 = vpop.f32.mrf.mxu2  ;;  %vm15121_vm12 = vcmp.lt.s32.totalorder %v11851_v30, 600 }
 0x390   : > { %v2625_v57 = vmax.f32 %v1807_v7, 0.0  ;;  %v2097_v39 = vadd.f32 %v2096_v22, %v11881_v12  ;;  %vm15122_vm14 = vmmov %vm15121_vm12 }
 0x391   : > { %v2209_v10 = vpop.f32.mrf.mxu0  ;;  %v2298_v19 = vpop.f32.mrf.mxu1 }
 0x392   : > { %v3044_v34 = vsel %vm2801_vm9, %v2625_v57, 0.0  ;;  %v2700_v14 = vmax.f32 %v2097_v39, 0.0  ;;  %v2210_v46 = vadd.f32 %v2209_v10, %v12507_v5  ;;  %v2299_v60 = vadd.f32 %v2298_v19, %v12510_v52  ;;  %2124 = vmatmul.bf16.gmra.mxu3 %v11608_v59 }
 0x393   : > { %v3153_v36 = vmax.f32 %v3152_v23, %v3044_v34  ;;  %v3239_v23 = vmax.f32 %v12498_v1, %v3238_v4 }
 0x394   : > { %v3119_v40 = vsel %vm2810_vm1, %v2700_v14, 0.0  ;;  %v2494_v55 = vmax.f32 %v2210_v46, 0.0  ;;  %v2495_v24 = vmax.f32 %v2299_v60, 0.0  ;;  %2248 = vmatmul.bf16.gmra.mxu0 %v11826_v8  ;;  %2337 = vmatmul.bf16.gmra.mxu1 %v11826_v8 }
 0x395   : > { %v3273_v11 = vmax.f32 %v3272_v48, %v3119_v40  ;;  %v1809_v42 = vpop.f32.mrf.mxu3 }
 0x396   : > { %v2913_v7 = vsel %vm15119_vm4, %v2494_v55, 0.0  ;;  %v2914_v59 = vsel %vm15120_vm5, %v2495_v24, 0.0  ;;  %v1810_v22 = vadd.f32 %v1809_v42, %v12130_v17  ;;  %v3240_v24 = vrot.slane %v3239_v23, 2 }
 0x397   : > { %v3321_v57 = vmax.f32 %v3320_v25, %v2913_v7  ;;  %v3358_v39 = vmax.f32 %v3357_v15, %v2914_v59  ;;  %v2098_v10 = vpop.f32.mrf.mxu2  ;;  %vm15124_vm4 = vcmp.lt.s32.totalorder %v11865_v58, 600 }
 0x398   : > { %v2633_v19 = vmax.f32 %v1810_v22, 0.0  ;;  %v2099_v34 = vadd.f32 %v2098_v10, %v11881_v12  ;;  %v3241_v10 = vmax.f32 %v3239_v23, %v3240_v24  ;;  %vm15125_vm5 = vmmov %vm15124_vm4 }
 0x399   : > { %v2211_v14 = vpop.f32.mrf.mxu0  ;;  %v2300_v46 = vpop.f32.mrf.mxu1 }
 0x39a   : > { %v3052_v48 = vsel %vm2802_vm8, %v2633_v19, 0.0  ;;  %v2708_v60 = vmax.f32 %v2099_v34, 0.0  ;;  %v2212_v40 = vadd.f32 %v2211_v14, %v12507_v5  ;;  %v2301_v55 = vadd.f32 %v2300_v46, %v12510_v52 }
 0x39b   : > { %v3154_v42 = vmax.f32 %v3153_v36, %v3052_v48  ;;  %v12598_v48 = vperm.slane %v12504_v6, 7  ;;  %v3242_v23 = vrot.slane %v3241_v10, 1 }
 0x39c   : > { %v3127_v1 = vsel %vm2811_vm0, %v2708_v60, 0.0  ;;  %v2502_v25 = vmax.f32 %v2212_v40, 0.0  ;;  %v2503_v15 = vmax.f32 %v2301_v55, 0.0  ;;  %2416 = vmatmul.bf16.gmra.mxu2 %v11735_v41 }
 0x39d   : > { %v3274_v12 = vmax.f32 %v3273_v11, %v3127_v1  ;;  %v1811_v4 = vpop.f32.mrf.mxu3 }
 0x39e   : > { %v2921_v7 = vsel %vm15121_vm12, %v2502_v25, 0.0  ;;  %v2922_v59 = vsel %vm15122_vm14, %v2503_v15, 0.0  ;;  %v1812_v22 = vadd.f32 %v1811_v4, %v12130_v17  ;;  %vm3445_vm12 = vcmask 1042434  }
 0x39f   : > { %v3275_v19 = vrot.slane %v3274_v12, 4  ;;  %v3322_v36 = vmax.f32 %v3321_v57, %v2921_v7  ;;  %v3359_v34 = vmax.f32 %v3358_v39, %v2922_v59  ;;  %v2377_v14 = vpop.f32.mrf.mxu2  ;;  %v15123_v7 = vld [vmem:[#allocation14_spill] sm:$0xff]  ;;  %vm15126_vm14 = vcmp.lt.s32.totalorder %v11758_v54, 600 }
 0x3a0   : > { %v2641_v46 = vmax.f32 %v1812_v22, 0.0  ;;  %v2378_v24 = vadd.f32 %v2377_v14, %v12598_v48 }
 0x3a1   : > { %v3276_v60 = vmax.f32 %v3274_v12, %v3275_v19  ;;  %v2214_v11 = vpop.f32.mrf.mxu0  ;;  %v2303_v40 = vpop.f32.mrf.mxu1 }
 0x3a2   : > { %v3060_v55 = vsel %vm2803_vm11, %v2641_v46, 0.0  ;;  %v2215_v1 = vadd.f32 %v2214_v11, %v12507_v5  ;;  %v2304_v25 = vadd.f32 %v2303_v40, %v12510_v52  ;;  %2129 = vmatmul.bf16.gmra.mxu3 %v11630_v16  ;;  %v3243_v46 = vmax.f32 %v3241_v10, %v3242_v23 }
 0x3a3   : > { %v3277_v57 = vrot.slane %v3276_v60, 2  ;;  %v3155_v39 = vmax.f32 %v3154_v42, %v3060_v55  ;;  %v2464_v55 = vmax.f32 %v2378_v24, 0.0 }
 0x3a4   : > { %v2510_v15 = vmax.f32 %v2215_v1, 0.0  ;;  %v2511_v4 = vmax.f32 %v2304_v25, 0.0  ;;  %2253 = vmatmul.bf16.gmra.mxu0 %v15123_v7  ;;  %2342 = vmatmul.bf16.gmra.mxu1 %v15123_v7  ;;  %v3438_v23 = vrot.slane %v3243_v46, 6 }
 0x3a5   : > { %v3278_v12 = vmax.f32 %v3276_v60, %v3277_v57  ;;  %v1814_v59 = vpop.f32.mrf.mxu3  ;;  %v2883_v24 = vsel %vm15126_vm14, %v2464_v55, 0.0 }
 0x3a6   : > { %v2929_v22 = vsel %vm15124_vm4, %v2510_v15, 0.0  ;;  %v2930_v19 = vsel %vm15125_vm5, %v2511_v4, 0.0  ;;  %v1815_v16 = vadd.f32 %v1814_v59, %v12130_v17  ;;  %vm15127_vm4 = vcmp.lt.s32.totalorder %v11762_v56, 600 }
 0x3a7   : > { %v3279_v42 = vrot.slane %v3278_v12, 1  ;;  %v3323_v11 = vmax.f32 %v3322_v36, %v2929_v22  ;;  %v3360_v14 = vmax.f32 %v3359_v34, %v2930_v19  ;;  %v2379_v40 = vpop.f32.mrf.mxu2 }
 0x3a8   : > { %v2649_v1 = vmax.f32 %v1815_v16, 0.0  ;;  %v2380_v25 = vadd.f32 %v2379_v40, %v12598_v48  ;;  %v15128_v40 = vld [vmem:[#allocation15_spill] sm:$0xff] }
 0x3a9   : > { %v3280_v0 = vmax.f32 %v3278_v12, %v3279_v42  ;;  %v2216_v60 = vpop.f32.mrf.mxu0  ;;  %v2305_v57 = vpop.f32.mrf.mxu1  ;;  %vm15129_vm5 = vcmp.lt.s32.totalorder %v15128_v40, 600 }
 0x3aa   : > { %v3068_v15 = vsel %vm15032_vm10, %v2649_v1, 0.0  ;;  %v2472_v49 = vmax.f32 %v2380_v25, 0.0  ;;  %v2217_v4 = vadd.f32 %v2216_v60, %v12507_v5  ;;  %v2306_v10 = vadd.f32 %v2305_v57, %v12510_v52  ;;  %vm15130_vm10 = vmmov %vm15129_vm5 }
 0x3ab   : > { %v3439_v36 = vrot.slane %v3280_v0, 5  ;;  %v3156_v34 = vmax.f32 %v3155_v39, %v3068_v15 }
 0x3ac   : > { %v2891_v12 = vsel %vm15127_vm4, %v2472_v49, 0.0  ;;  %v2518_v59 = vmax.f32 %v2217_v4, 0.0  ;;  %v2519_v22 = vmax.f32 %v2306_v10, 0.0  ;;  %2421 = vmatmul.bf16.gmra.mxu2 %v11783_v20  ;;  %vm15135_vm4 = vcmp.lt.s32.totalorder %v12384_v35, 600 }
 0x3ad   : > { %v12623_v19 = vsel %vm3445_vm12, %v3438_v23, %v3439_v36  ;;  %v3392_v16 = vmax.f32 %v2883_v24, %v2891_v12  ;;  %v1816_v42 = vpop.f32.mrf.mxu3  ;;  %vm15133_vm12 = vcmp.lt.s32.totalorder %v11905_v47, 600 }
 0x3ae   : > { %v2937_v1 = vsel %vm15129_vm5, %v2518_v59, 0.0  ;;  %v2938_v0 = vsel %vm15130_vm10, %v2519_v22, 0.0  ;;  %v1817_v39 = vadd.f32 %v1816_v42, %v12130_v17  ;;  %vm15131_vm10 = vcmp.lt.s32.totalorder %v11781_v13, 600  ;;  %v15132_v59 = vld [vmem:[#allocation16_spill] sm:$0xff]  ;;  %vm15134_vm14 = vmmov %vm15133_vm12 }
 0x3af   : > { %v3324_v46 = vmax.f32 %v3323_v11, %v2937_v1  ;;  %v3361_v55 = vmax.f32 %v3360_v14, %v2938_v0  ;;  %v2382_v25 = vpop.f32.mrf.mxu2  ;;  %vm15136_vm5 = vcmp.lt.s32.totalorder %v11797_v33, 600 }
 0x3b0   : > { %v2657_v49 = vmax.f32 %v1817_v39, 0.0  ;;  %v2383_v60 = vadd.f32 %v2382_v25, %v12598_v48 }
 0x3b1   : > { %v2219_v57 = vpop.f32.mrf.mxu0  ;;  %v2308_v15 = vpop.f32.mrf.mxu1 }
 0x3b2   : > { %v3076_v4 = vsel %vm2805_vm13, %v2657_v49, 0.0  ;;  %v2480_v10 = vmax.f32 %v2383_v60, 0.0  ;;  %v2220_v23 = vadd.f32 %v2219_v57, %v12507_v5  ;;  %v2309_v36 = vadd.f32 %v2308_v15, %v12510_v52  ;;  %2134 = vmatmul.bf16.gmra.mxu3 %v11652_v37 }
 0x3b3   : > { %v3157_v24 = vmax.f32 %v3156_v34, %v3076_v4 }
 0x3b4   : > { %v2899_v11 = vsel %vm15131_vm10, %v2480_v10, 0.0  ;;  %v2526_v14 = vmax.f32 %v2220_v23, 0.0  ;;  %v2527_v12 = vmax.f32 %v2309_v36, 0.0  ;;  %2258 = vmatmul.bf16.gmra.mxu0 %v15132_v59  ;;  %2347 = vmatmul.bf16.gmra.mxu1 %v15132_v59  ;;  %vm15137_vm10 = vcmp.lt.s32.totalorder %v11941_v45, 600 }
 0x3b5   : > { %v3393_v22 = vmax.f32 %v3392_v16, %v2899_v11  ;;  %v1819_v42 = vpop.f32.mrf.mxu3 }
 0x3b6   : > { %v2945_v1 = vsel %vm15133_vm12, %v2526_v14, 0.0  ;;  %v2946_v0 = vsel %vm15134_vm14, %v2527_v12, 0.0  ;;  %v1820_v37 = vadd.f32 %v1819_v42, %v12130_v17  ;;  %vm15138_vm12 = vmmov %vm15137_vm10  ;;  %vm15139_vm14 = vcmp.lt.s32.totalorder %v11818_v61, 600 }
 0x3b7   : > { %v3325_v34 = vmax.f32 %v3324_v46, %v2945_v1  ;;  %v3362_v39 = vmax.f32 %v3361_v55, %v2946_v0  ;;  %v2384_v25 = vpop.f32.mrf.mxu2 }
 0x3b8   : > { %v2665_v49 = vmax.f32 %v1820_v37, 0.0  ;;  %v2385_v60 = vadd.f32 %v2384_v25, %v12598_v48 }
 0x3b9   : > { %v2221_v57 = vpop.f32.mrf.mxu0  ;;  %v2310_v15 = vpop.f32.mrf.mxu1 }
 0x3ba   : > { %v3084_v16 = vsel %vm15135_vm4, %v2665_v49, 0.0  ;;  %v2488_v4 = vmax.f32 %v2385_v60, 0.0  ;;  %v2222_v10 = vadd.f32 %v2221_v57, %v12507_v5  ;;  %v2311_v23 = vadd.f32 %v2310_v15, %v12510_v52 }
 0x3bb   : > { %v3158_v36 = vmax.f32 %v3157_v24, %v3084_v16 }
 0x3bc   : > { %v2907_v11 = vsel %vm15136_vm5, %v2488_v4, 0.0  ;;  %v2534_v46 = vmax.f32 %v2222_v10, 0.0  ;;  %v2535_v55 = vmax.f32 %v2311_v23, 0.0  ;;  %2426 = vmatmul.bf16.gmra.mxu2 %v11826_v8 }
 0x3bd   : > { %v3394_v14 = vmax.f32 %v3393_v22, %v2907_v11  ;;  %v1821_v12 = vpop.f32.mrf.mxu3 }
 0x3be   : > { %v2953_v42 = vsel %vm15137_vm10, %v2534_v46, 0.0  ;;  %v2954_v1 = vsel %vm15138_vm12, %v2535_v55, 0.0  ;;  %v1822_v0 = vadd.f32 %v1821_v12, %v12130_v17  ;;  %v15140_v46 = vld [vmem:[#allocation18_spill] sm:$0xff]  ;;  %vm15144_vm10 = vcmp.lt.s32.totalorder %v11851_v30, 600 }
 0x3bf   : > { %v3326_v37 = vmax.f32 %v3325_v34, %v2953_v42  ;;  %v3363_v25 = vmax.f32 %v3362_v39, %v2954_v1  ;;  %v2387_v24 = vpop.f32.mrf.mxu2  ;;  %v15141_v42 = vld [vmem:[#allocation17_spill] sm:$0xff]  ;;  %vm15145_vm12 = vcmp.lt.s32.totalorder %v11972_v44, 600 }
 0x3c0   : > { %v2673_v49 = vmax.f32 %v1822_v0, 0.0  ;;  %v2388_v60 = vadd.f32 %v2387_v24, %v12598_v48  ;;  %vm15142_vm4 = vcmp.lt.s32.totalorder %v15141_v42, 600 }
 0x3c1   : > { %v2224_v57 = vpop.f32.mrf.mxu0  ;;  %v2313_v15 = vpop.f32.mrf.mxu1  ;;  %vm15143_vm5 = vmmov %vm15142_vm4 }
 0x3c2   : > { %v3092_v22 = vsel %vm2807_vm15, %v2673_v49, 0.0  ;;  %v2496_v16 = vmax.f32 %v2388_v60, 0.0  ;;  %v2225_v4 = vadd.f32 %v2224_v57, %v12507_v5  ;;  %v2314_v10 = vadd.f32 %v2313_v15, %v12510_v52  ;;  %2139 = vmatmul.bf16.gmra.mxu3 %v11680_v38 }
 0x3c3   : > { %v3159_v23 = vmax.f32 %v3158_v36, %v3092_v22 }
 0x3c4   : > { %v2915_v34 = vsel %vm15139_vm14, %v2496_v16, 0.0  ;;  %v2542_v39 = vmax.f32 %v2225_v4, 0.0  ;;  %v2543_v11 = vmax.f32 %v2314_v10, 0.0  ;;  %2263 = vmatmul.bf16.gmra.mxu0 %v15140_v46  ;;  %2352 = vmatmul.bf16.gmra.mxu1 %v15140_v46  ;;  %vm15146_vm14 = vmmov %vm15145_vm12 }
 0x3c5   : > { %v3395_v55 = vmax.f32 %v3394_v14, %v2915_v34  ;;  %v1824_v12 = vpop.f32.mrf.mxu3 }
 0x3c6   : > { %v2961_v1 = vsel %vm15142_vm4, %v2542_v39, 0.0  ;;  %v2962_v0 = vsel %vm15143_vm5, %v2543_v11, 0.0  ;;  %v1825_v38 = vadd.f32 %v1824_v12, %v12130_v17  ;;  %vm15147_vm4 = vcmp.lt.s32.totalorder %v11865_v58, 600 }
 0x3c7   : > { %v3327_v36 = vmax.f32 %v3326_v37, %v2961_v1  ;;  %v3364_v24 = vmax.f32 %v3363_v25, %v2962_v0  ;;  %v2389_v49 = vpop.f32.mrf.mxu2 }
 0x3c8   : > { %v2681_v60 = vmax.f32 %v1825_v38, 0.0  ;;  %v2390_v57 = vadd.f32 %v2389_v49, %v12598_v48 }
 0x3c9   : > { %v2226_v15 = vpop.f32.mrf.mxu0  ;;  %v2315_v22 = vpop.f32.mrf.mxu1 }
 0x3ca   : > { %v3100_v14 = vsel %vm2808_vm2, %v2681_v60, 0.0  ;;  %v2504_v16 = vmax.f32 %v2390_v57, 0.0  ;;  %v2227_v4 = vadd.f32 %v2226_v15, %v12507_v5  ;;  %v2316_v10 = vadd.f32 %v2315_v22, %v12510_v52 }
 0x3cb   : > { %v3160_v34 = vmax.f32 %v3159_v23, %v3100_v14 }
 0x3cc   : > { %v2923_v39 = vsel %vm15144_vm10, %v2504_v16, 0.0  ;;  %v2550_v37 = vmax.f32 %v2227_v4, 0.0  ;;  %v2551_v25 = vmax.f32 %v2316_v10, 0.0  ;;  %2431 = vmatmul.bf16.gmra.mxu2 %v15123_v7 }
 0x3cd   : > { %v3396_v11 = vmax.f32 %v3395_v55, %v2923_v39  ;;  %v1826_v12 = vpop.f32.mrf.mxu3 }
 0x3ce   : > { %v2969_v1 = vsel %vm15145_vm12, %v2550_v37, 0.0  ;;  %v2970_v0 = vsel %vm15146_vm14, %v2551_v25, 0.0  ;;  %v1827_v38 = vadd.f32 %v1826_v12, %v12130_v17  ;;  %v15148_v25 = vld [vmem:[#allocation20_spill] sm:$0xff]  ;;  %vm15152_vm12 = vcmp.lt.s32.totalorder %v15128_v40, 600 }
 0x3cf   : > { %v3328_v49 = vmax.f32 %v3327_v36, %v2969_v1  ;;  %v3365_v60 = vmax.f32 %v3364_v24, %v2970_v0  ;;  %v2392_v23 = vpop.f32.mrf.mxu2  ;;  %v15149_v0 = vld [vmem:[#allocation19_spill] sm:$0xff]  ;;  %vm15153_vm14 = vcmp.lt.s32.totalorder %v12087_v62, 600 }
 0x3d0   : > { %v2689_v57 = vmax.f32 %v1827_v38, 0.0  ;;  %v2393_v15 = vadd.f32 %v2392_v23, %v12598_v48  ;;  %vm15150_vm5 = vcmp.lt.s32.totalorder %v15149_v0, 600 }
 0x3d1   : > { %v2229_v22 = vpop.f32.mrf.mxu0  ;;  %v2318_v14 = vpop.f32.mrf.mxu1  ;;  %vm15151_vm10 = vmmov %vm15150_vm5 }
 0x3d2   : > { %v3108_v55 = vsel %vm2809_vm3, %v2689_v57, 0.0  ;;  %v2512_v16 = vmax.f32 %v2393_v15, 0.0  ;;  %v2230_v4 = vadd.f32 %v2229_v22, %v12507_v5  ;;  %v2319_v10 = vadd.f32 %v2318_v14, %v12510_v52  ;;  %2144 = vmatmul.bf16.gmra.mxu3 %v11701_v18 }
 0x3d3   : > { %v3161_v39 = vmax.f32 %v3160_v34, %v3108_v55  ;;  %v3201_v34 = vrot.slane %v12496_v3, 4 }
 0x3d4   : > { %v2931_v36 = vsel %vm15147_vm4, %v2512_v16, 0.0  ;;  %v2558_v24 = vmax.f32 %v2230_v4, 0.0  ;;  %v2559_v37 = vmax.f32 %v2319_v10, 0.0  ;;  %2268 = vmatmul.bf16.gmra.mxu0 %v15148_v25  ;;  %2357 = vmatmul.bf16.gmra.mxu1 %v15148_v25  ;;  %vm15154_vm4 = vmmov %vm15153_vm14 }
 0x3d5   : > { %v3397_v12 = vmax.f32 %v3396_v11, %v2931_v36  ;;  %v1829_v1 = vpop.f32.mrf.mxu3 }
 0x3d6   : > { %v2977_v38 = vsel %vm15150_vm5, %v2558_v24, 0.0  ;;  %v2978_v23 = vsel %vm15151_vm10, %v2559_v37, 0.0  ;;  %v1830_v18 = vadd.f32 %v1829_v1, %v12130_v17  ;;  %v3202_v37 = vmax.f32 %v12496_v3, %v3201_v34 }
 0x3d7   : > { %v3329_v57 = vmax.f32 %v3328_v49, %v2977_v38  ;;  %v3366_v15 = vmax.f32 %v3365_v60, %v2978_v23  ;;  %v2394_v22 = vpop.f32.mrf.mxu2  ;;  %vm15155_vm5 = vcmp.lt.s32.totalorder %v11905_v47, 600 }
 0x3d8   : > { %v2697_v14 = vmax.f32 %v1830_v18, 0.0  ;;  %v2395_v55 = vadd.f32 %v2394_v22, %v12598_v48 }
 0x3d9   : > { %v2231_v16 = vpop.f32.mrf.mxu0  ;;  %v2320_v4 = vpop.f32.mrf.mxu1 }
 0x3da   : > { %v3116_v11 = vsel %vm2810_vm1, %v2697_v14, 0.0  ;;  %v2520_v10 = vmax.f32 %v2395_v55, 0.0  ;;  %v2232_v36 = vadd.f32 %v2231_v16, %v12507_v5  ;;  %v2321_v24 = vadd.f32 %v2320_v4, %v12510_v52 }
 0x3db   : > { %v3162_v1 = vmax.f32 %v3161_v39, %v3116_v11  ;;  %v3203_v16 = vrot.slane %v3202_v37, 2 }
 0x3dc   : > { %v2939_v49 = vsel %vm15152_vm12, %v2520_v10, 0.0  ;;  %v2566_v60 = vmax.f32 %v2232_v36, 0.0  ;;  %v2567_v38 = vmax.f32 %v2321_v24, 0.0  ;;  %2436 = vmatmul.bf16.gmra.mxu2 %v15132_v59 }
 0x3dd   : > { %v3398_v23 = vmax.f32 %v3397_v12, %v2939_v49  ;;  %v1831_v18 = vpop.f32.mrf.mxu3 }
 0x3de   : > { %v2985_v22 = vsel %vm15153_vm14, %v2566_v60, 0.0  ;;  %v2986_v14 = vsel %vm15154_vm4, %v2567_v38, 0.0  ;;  %v1832_v55 = vadd.f32 %v1831_v18, %v12130_v17  ;;  %v3204_v17 = vmax.f32 %v3202_v37, %v3203_v16 }
 0x3df   : > { %v3330_v3 = vmax.f32 %v3329_v57, %v2985_v22  ;;  %v3367_v39 = vmax.f32 %v3366_v15, %v2986_v14  ;;  %v2397_v34 = vpop.f32.mrf.mxu2  ;;  %v15156_v22 = vld [vmem:[#allocation22_spill] sm:$0xff]  ;;  %vm15160_vm14 = vcmp.lt.s32.totalorder %v11941_v45, 600  ;;  %vm15161_vm4 = vcmp.lt.s32.totalorder %v12118_v63, 600 }
 0x3e0   : > { %v2705_v4 = vmax.f32 %v1832_v55, 0.0  ;;  %v2398_v11 = vadd.f32 %v2397_v34, %v12598_v48  ;;  %v12727_v34 = vperm.slane %v12504_v6, 4 }
 0x3e1   : > { %v2234_v10 = vpop.f32.mrf.mxu0  ;;  %v2323_v36 = vpop.f32.mrf.mxu1 }
 0x3e2   : > { %v3124_v12 = vsel %vm2811_vm0, %v2705_v4, 0.0  ;;  %v2528_v24 = vmax.f32 %v2398_v11, 0.0  ;;  %v2235_v49 = vadd.f32 %v2234_v10, %v12507_v5  ;;  %v2324_v60 = vadd.f32 %v2323_v36, %v12510_v52  ;;  %2149 = vmatmul.bf16.gmra.mxu3 %v11735_v41  ;;  %v15157_v11 = vld [vmem:[#allocation21_spill] sm:$0xff] }
 0x3e3   : > { %v3163_v38 = vmax.f32 %v3162_v1, %v3124_v12  ;;  %vm15158_vm10 = vcmp.lt.s32.totalorder %v15157_v11, 600  ;;  %v3205_v1 = vrot.slane %v3204_v17, 1 }
 0x3e4   : > { %v2947_v57 = vsel %vm15155_vm5, %v2528_v24, 0.0  ;;  %v2574_v15 = vmax.f32 %v2235_v49, 0.0  ;;  %v2575_v18 = vmax.f32 %v2324_v60, 0.0  ;;  %2273 = vmatmul.bf16.gmra.mxu0 %v15156_v22  ;;  %2362 = vmatmul.bf16.gmra.mxu1 %v15156_v22  ;;  %vm15159_vm12 = vmmov %vm15158_vm10 }
 0x3e5   : > { %v3164_v14 = vrot.slane %v3163_v38, 4  ;;  %v3399_v55 = vmax.f32 %v3398_v23, %v2947_v57  ;;  %v2110_v4 = vpop.f32.mrf.mxu3  ;;  %v3206_v53 = vmax.f32 %v3204_v17, %v3205_v1  ;;  %vm15162_vm5 = vmmov %vm15161_vm4 }
 0x3e6   : > { %v2993_v41 = vsel %vm15158_vm10, %v2574_v15, 0.0  ;;  %v2994_v37 = vsel %vm15159_vm12, %v2575_v18, 0.0  ;;  %v2111_v23 = vadd.f32 %v2110_v4, %v12727_v34  ;;  %vm15163_vm10 = vcmask 1040384  }
 0x3e7   : > { %v3165_v16 = vmax.f32 %v3163_v38, %v3164_v14  ;;  %v3331_v10 = vmax.f32 %v3330_v3, %v2993_v41  ;;  %v3368_v36 = vmax.f32 %v3367_v39, %v2994_v37  ;;  %v2399_v12 = vpop.f32.mrf.mxu2  ;;  %v3437_v1 = vrot.slane %v3206_v53, 7 }
 0x3e8   : > { %v2400_v24 = vadd.f32 %v2399_v12, %v12598_v48  ;;  %v2461_v14 = vmax.f32 %v2111_v23, 0.0  ;;  %vm15164_vm12 = vcmp.lt.s32.totalorder %v11758_v54, 600 }
 0x3e9   : > { %v3166_v49 = vrot.slane %v3165_v16, 2  ;;  %v2236_v60 = vpop.f32.mrf.mxu0  ;;  %v2325_v6 = vpop.f32.mrf.mxu1 }
 0x3ea   : > { %v2536_v57 = vmax.f32 %v2400_v24, 0.0  ;;  %v2237_v28 = vadd.f32 %v2236_v60, %v12507_v5  ;;  %v2326_v15 = vadd.f32 %v2325_v6, %v12510_v52 }
 0x3eb   : > { %v3167_v50 = vmax.f32 %v3165_v16, %v3166_v49 }
 0x3ec   : > { %v2955_v38 = vsel %vm15160_vm14, %v2536_v57, 0.0  ;;  %v2582_v3 = vmax.f32 %v2237_v28, 0.0  ;;  %v2583_v39 = vmax.f32 %v2326_v15, 0.0  ;;  %2441 = vmatmul.bf16.gmra.mxu2 %v15140_v46  ;;  %vm15165_vm14 = vcmask 1041408  }
 0x3ed   : > { %v3168_v18 = vrot.slane %v3167_v50, 1  ;;  %v3400_v41 = vmax.f32 %v3399_v55, %v2955_v38  ;;  %v2112_v4 = vpop.f32.mrf.mxu3  ;;  %v2880_v55 = vsel %vm15164_vm12, %v2461_v14, 0.0 }
 0x3ee   : > { %v3001_v37 = vsel %vm15161_vm4, %v2582_v3, 0.0  ;;  %v3002_v12 = vsel %vm15162_vm5, %v2583_v39, 0.0  ;;  %v2113_v17 = vadd.f32 %v2112_v4, %v12727_v34  ;;  %vm15166_vm4 = vcmp.lt.s32.totalorder %v11762_v56, 600 }
 0x3ef   : > { %v3169_v16 = vmax.f32 %v3167_v50, %v3168_v18  ;;  %v3332_v24 = vmax.f32 %v3331_v10, %v3001_v37  ;;  %v3369_v49 = vmax.f32 %v3368_v36, %v3002_v12  ;;  %v2402_v28 = vpop.f32.mrf.mxu2  ;;  %vm15167_vm5 = vcmp.lt.s32.totalorder %v15141_v42, 600 }
 0x3f0   : > { %v2469_v60 = vmax.f32 %v2113_v17, 0.0  ;;  %v2403_v6 = vadd.f32 %v2402_v28, %v12598_v48 }
 0x3f1   : > { %v3444_v23 = vsel %vm15163_vm10, %v3169_v16, %v3437_v1  ;;  %v2239_v57 = vpop.f32.mrf.mxu0  ;;  %v2328_v15 = vpop.f32.mrf.mxu1  ;;  %vm15168_vm10 = vcmp.lt.s32.totalorder %v12158_v43, 600 }
 0x3f2   : > { %v12751_v38 = vsel %vm15165_vm14, %v3444_v23, %v12623_v19  ;;  %v2888_v50 = vsel %vm15166_vm4, %v2469_v60, 0.0  ;;  %v2544_v53 = vmax.f32 %v2403_v6, 0.0  ;;  %v2240_v10 = vadd.f32 %v2239_v57, %v12507_v5  ;;  %2154 = vmatmul.bf16.gmra.mxu3 %v11783_v20  ;;  %vm15169_vm12 = vmmov %vm15168_vm10 }
 0x3f3   : > { %v3281_v36 = vmax.f32 %v2880_v55, %v2888_v50  ;;  %v2329_v3 = vadd.f32 %v2328_v15, %v12510_v52  ;;  %vm15170_vm14 = vcmp.lt.s32.totalorder %v11781_v13, 600  ;;  %vm15171_vm4 = vcmp.lt.s32.totalorder %v11972_v44, 600 }
 0x3f4   : > { %v2963_v54 = vsel %vm15167_vm5, %v2544_v53, 0.0  ;;  %v2590_v39 = vmax.f32 %v2240_v10, 0.0  ;;  %vm15172_vm5 = vcmp.lt.s32.totalorder %v12176_v26, 600 }
 0x3f5   : > { %v3401_v18 = vmax.f32 %v3400_v41, %v2963_v54  ;;  %v2591_v14 = vmax.f32 %v2329_v3, 0.0  ;;  %v2115_v4 = vpop.f32.mrf.mxu3 }
 0x3f6   : > { %v3009_v19 = vsel %vm15168_vm10, %v2590_v39, 0.0  ;;  %v2116_v56 = vadd.f32 %v2115_v4, %v12727_v34  ;;  %vm15173_vm10 = vmmov %vm15172_vm5 }
 0x3f7   : > { %v3333_v37 = vmax.f32 %v3332_v24, %v3009_v19  ;;  %v3010_v12 = vsel %vm15169_vm12, %v2591_v14, 0.0  ;;  %v2404_v20 = vpop.f32.mrf.mxu2  ;;  %vm15174_vm12 = vcmp.lt.s32.totalorder %v11797_v33, 600 }
 0x3f8   : > { %v3370_v17 = vmax.f32 %v3369_v49, %v3010_v12  ;;  %v2477_v1 = vmax.f32 %v2116_v56, 0.0  ;;  %v2405_v16 = vadd.f32 %v2404_v20, %v12598_v48 }
 0x3f9   : > { %v2241_v28 = vpop.f32.mrf.mxu0  ;;  %v2330_v60 = vpop.f32.mrf.mxu1 }
 0x3fa   : > { %v2896_v41 = vsel %vm15170_vm14, %v2477_v1, 0.0  ;;  %v2552_v6 = vmax.f32 %v2405_v16, 0.0  ;;  %v2242_v23 = vadd.f32 %v2241_v28, %v12507_v5  ;;  %v2331_v55 = vadd.f32 %v2330_v60, %v12510_v52 }
 0x3fb   : > { %v3282_v57 = vmax.f32 %v3281_v36, %v2896_v41  ;;  %vm15175_vm14 = vcmp.lt.s32.totalorder %v15149_v0, 600 }
 0x3fc   : > { %v2971_v24 = vsel %vm15171_vm4, %v2552_v6, 0.0  ;;  %v2598_v15 = vmax.f32 %v2242_v23, 0.0  ;;  %v2599_v50 = vmax.f32 %v2331_v55, 0.0  ;;  %2446 = vmatmul.bf16.gmra.mxu2 %v15148_v25  ;;  %vm15176_vm4 = vcmp.lt.s32.totalorder %v12208_v27, 600 }
 0x3fd   : > { %v3402_v49 = vmax.f32 %v3401_v18, %v2971_v24  ;;  %v2117_v53 = vpop.f32.mrf.mxu3 }
 0x3fe   : > { %v3017_v10 = vsel %vm15172_vm5, %v2598_v15, 0.0  ;;  %v3018_v13 = vsel %vm15173_vm10, %v2599_v50, 0.0  ;;  %v2118_v3 = vadd.f32 %v2117_v53, %v12727_v34  ;;  %vm15177_vm5 = vmmov %vm15176_vm4  ;;  %vm15178_vm10 = vcmp.lt.s32.totalorder %v11818_v61, 600 }
 0x3ff   : > { %v3334_v54 = vmax.f32 %v3333_v37, %v3017_v10  ;;  %v3371_v39 = vmax.f32 %v3370_v17, %v3018_v13  ;;  %v2407_v36 = vpop.f32.mrf.mxu2 }
 0x400   : > { %v2485_v14 = vmax.f32 %v2118_v3, 0.0  ;;  %v2408_v4 = vadd.f32 %v2407_v36, %v12598_v48 }
 0x401   : > { %v2244_v19 = vpop.f32.mrf.mxu0  ;;  %v2333_v56 = vpop.f32.mrf.mxu1 }
 0x402   : > { %v2904_v18 = vsel %vm15174_vm12, %v2485_v14, 0.0  ;;  %v2560_v12 = vmax.f32 %v2408_v4, 0.0  ;;  %v2245_v20 = vadd.f32 %v2244_v19, %v12507_v5  ;;  %v2334_v1 = vadd.f32 %v2333_v56, %v12510_v52  ;;  %2159 = vmatmul.bf16.gmra.mxu3 %v11826_v8 }
 0x403   : > { %v3283_v16 = vmax.f32 %v3282_v57, %v2904_v18  ;;  %vm15179_vm12 = vcmp.lt.s32.totalorder %v12087_v62, 600 }
 0x404   : > { %v2979_v37 = vsel %vm15175_vm14, %v2560_v12, 0.0  ;;  %v2606_v17 = vmax.f32 %v2245_v20, 0.0  ;;  %v2607_v28 = vmax.f32 %v2334_v1, 0.0  ;;  %vm15180_vm14 = vcmp.lt.s32.totalorder %v11851_v30, 600 }
 0x405   : > { %v3403_v60 = vmax.f32 %v3402_v49, %v2979_v37  ;;  %v2120_v41 = vpop.f32.mrf.mxu3 }
 0x406   : > { %v3025_v6 = vsel %vm15176_vm4, %v2606_v17, 0.0  ;;  %v3026_v33 = vsel %vm15177_vm5, %v2607_v28, 0.0  ;;  %v2121_v23 = vadd.f32 %v2120_v41, %v12727_v34  ;;  %vm15181_vm4 = vcmp.lt.s32.totalorder %v15157_v11, 600 }
 0x407   : > { %v3335_v55 = vmax.f32 %v3334_v54, %v3025_v6  ;;  %v3372_v24 = vmax.f32 %v3371_v39, %v3026_v33  ;;  %v2409_v15 = vpop.f32.mrf.mxu2  ;;  %vm15182_vm5 = vcmp.lt.s32.totalorder %v11865_v58, 600 }
 0x408   : > { %v2493_v8 = vmax.f32 %v2121_v23, 0.0  ;;  %v2410_v57 = vadd.f32 %v2409_v15, %v12598_v48 }
 0x409   : > { %v2246_v50 = vpop.f32.mrf.mxu0  ;;  %v2335_v53 = vpop.f32.mrf.mxu1 }
 0x40a   : > { %v2912_v49 = vsel %vm15178_vm10, %v2493_v8, 0.0  ;;  %v2568_v10 = vmax.f32 %v2410_v57, 0.0  ;;  %v2247_v13 = vadd.f32 %v2246_v50, %v12507_v5  ;;  %v2336_v3 = vadd.f32 %v2335_v53, %v12510_v52 }
 0x40b   : > { %v3284_v36 = vmax.f32 %v3283_v16, %v2912_v49  ;;  %vm15183_vm10 = vcmp.lt.s32.totalorder %v12118_v63, 600 }
 0x40c   : > { %v2987_v14 = vsel %vm15179_vm12, %v2568_v10, 0.0  ;;  %v2614_v54 = vmax.f32 %v2247_v13, 0.0  ;;  %v2615_v39 = vmax.f32 %v2336_v3, 0.0  ;;  %2451 = vmatmul.bf16.gmra.mxu2 %v15156_v22  ;;  %vm15184_vm12 = vcmp.lt.s32.totalorder %v15128_v40, 600 }
 0x40d   : > { %v3404_v4 = vmax.f32 %v3403_v60, %v2987_v14  ;;  %v2122_v19 = vpop.f32.mrf.mxu3 }
 0x40e   : > { %v3033_v56 = vsel %vm2799_vm7, %v2614_v54, 0.0  ;;  %v3034_v61 = vsel %vm2799_vm7, %v2615_v39, 0.0  ;;  %v2123_v18 = vadd.f32 %v2122_v19, %v12727_v34 }
 0x40f   : > { %v3336_v12 = vmax.f32 %v3335_v55, %v3033_v56  ;;  %v3373_v20 = vmax.f32 %v3372_v24, %v3034_v61  ;;  %v2412_v1 = vpop.f32.mrf.mxu2 }
 0x410   : > { %v2501_v16 = vmax.f32 %v2123_v18, 0.0  ;;  %v2413_v37 = vadd.f32 %v2412_v1, %v12598_v48 }
 0x411   : > { %v2249_v17 = vpop.f32.mrf.mxu0  ;;  %v2338_v28 = vpop.f32.mrf.mxu1 }
 0x412   : > { %v2920_v60 = vsel %vm15180_vm14, %v2501_v16, 0.0  ;;  %v2576_v41 = vmax.f32 %v2413_v37, 0.0  ;;  %v2250_v6 = vadd.f32 %v2249_v17, %v12507_v5  ;;  %v2339_v33 = vadd.f32 %v2338_v28, %v12510_v52  ;;  %2164 = vmatmul.bf16.gmra.mxu3 %v15123_v7 }
 0x413   : > { %v3285_v23 = vmax.f32 %v3284_v36, %v2920_v60  ;;  %vm15185_vm14 = vcmp.lt.s32.totalorder %v12158_v43, 600 }
 0x414   : > { %v2995_v55 = vsel %vm15181_vm4, %v2576_v41, 0.0  ;;  %v2622_v24 = vmax.f32 %v2250_v6, 0.0  ;;  %v2623_v15 = vmax.f32 %v2339_v33, 0.0  ;;  %vm15186_vm4 = vcmp.lt.s32.totalorder %v11905_v47, 600 }
 0x415   : > { %v3405_v8 = vmax.f32 %v3404_v4, %v2995_v55  ;;  %v2125_v57 = vpop.f32.mrf.mxu3 }
 0x416   : > { %v3041_v50 = vsel %vm2800_vm6, %v2622_v24, 0.0  ;;  %v3042_v30 = vsel %vm2800_vm6, %v2623_v15, 0.0  ;;  %v2126_v53 = vadd.f32 %v2125_v57, %v12727_v34 }
 0x417   : > { %v12817_v49 = vmax.f32 %v3336_v12, %v3041_v50  ;;  %v12819_v10 = vmax.f32 %v3373_v20, %v3042_v30  ;;  %v2414_v7 = vpop.f32.mrf.mxu2 }
 0x418   : > { %v2509_v13 = vmax.f32 %v2126_v53, 0.0  ;;  %v2415_v3 = vadd.f32 %v2414_v7, %v12598_v48 }
 0x419   : > { %v12826_v19 = vpop.f32.mrf.mxu1 }
 0x41a   : > { %v2928_v36 = vsel %vm15182_vm5, %v2509_v13, 0.0  ;;  %v2584_v14 = vmax.f32 %v2415_v3, 0.0  ;;  %vm15187_vm5 = vcmp.lt.s32.totalorder %v12176_v26, 600 }
 0x41b   : > { %v3286_v54 = vmax.f32 %v3285_v23, %v2928_v36 }
 0x41c   : > { %v3003_v39 = vsel %vm15183_vm10, %v2584_v14, 0.0  ;;  %vm15188_vm10 = vcmp.lt.s32.totalorder %v11941_v45, 600 }
 0x41d   : > { %v3406_v4 = vmax.f32 %v3405_v8, %v3003_v39  ;;  %v2127_v56 = vpop.f32.mrf.mxu3 }
 0x41e   : > { %v2128_v61 = vadd.f32 %v2127_v56, %v12727_v34 }
 0x41f   : > { %v2417_v18 = vpop.f32.mrf.mxu2 }
 0x420   : > { %v2517_v12 = vmax.f32 %v2128_v61, 0.0  ;;  %v2418_v20 = vadd.f32 %v2417_v18, %v12598_v48 }
 0x421   : > { %v12836_v41 = vpop.f32.mrf.mxu1 }
 0x422   : > { %v2936_v1 = vsel %vm15184_vm12, %v2517_v12, 0.0  ;;  %v2592_v58 = vmax.f32 %v2418_v20, 0.0  ;;  %2169 = vmatmul.bf16.gmra.mxu3 %v15132_v59  ;;  %vm15189_vm12 = vcmp.lt.s32.totalorder %v12208_v27, 600 }
 0x423   : > { %v3287_v16 = vmax.f32 %v3286_v54, %v2936_v1 }
 0x424   : > { %v3011_v37 = vsel %vm15185_vm14, %v2592_v58, 0.0  ;;  %vm15190_vm14 = vcmp.lt.s32.totalorder %v15141_v42, 600 }
 0x425   : > { %v3407_v17 = vmax.f32 %v3406_v4, %v3011_v37  ;;  %v2130_v28 = vpop.f32.mrf.mxu3 }
 0x426   : > { %v2131_v60 = vadd.f32 %v2130_v28, %v12727_v34 }
 0x427   : > { %v2419_v6 = vpop.f32.mrf.mxu2 }
 0x428   : > { %v2525_v33 = vmax.f32 %v2131_v60, 0.0  ;;  %v2420_v23 = vadd.f32 %v2419_v6, %v12598_v48 }
 0x429   : > { %v12845_v7 = vpop.f32.mrf.mxu1 }
 0x42a   : > { %v2944_v40 = vsel %vm15186_vm4, %v2525_v33, 0.0  ;;  %v2600_v55 = vmax.f32 %v2420_v23, 0.0  ;;  %vm15191_vm4 = vcmp.lt.s32.totalorder %v11972_v44, 600 }
 0x42b   : > { %v3288_v24 = vmax.f32 %v3287_v16, %v2944_v40 }
 0x42c   : > { %v3019_v59 = vsel %vm15187_vm5, %v2600_v55, 0.0  ;;  %vm15192_vm5 = vcmp.lt.s32.totalorder %v15149_v0, 600 }
 0x42d   : > { %v3408_v15 = vmax.f32 %v3407_v17, %v3019_v59  ;;  %v2132_v8 = vpop.f32.mrf.mxu3 }
 0x42e   : > { %v2133_v57 = vadd.f32 %v2132_v8, %v12727_v34 }
 0x42f   : > { %v2422_v50 = vpop.f32.mrf.mxu2 }
 0x430   : > { %v2533_v30 = vmax.f32 %v2133_v57, 0.0  ;;  %v2423_v53 = vadd.f32 %v2422_v50, %v12598_v48 }
 0x431   : > { %v12856_v12 = vpop.f32.mrf.mxu1 }
 0x432   : > { %v2952_v13 = vsel %vm15188_vm10, %v2533_v30, 0.0  ;;  %v2608_v47 = vmax.f32 %v2423_v53, 0.0  ;;  %2174 = vmatmul.bf16.gmra.mxu3 %v15140_v46  ;;  %vm15193_vm10 = vcmp.lt.s32.totalorder %v12087_v62, 600 }
 0x433   : > { %v3289_v3 = vmax.f32 %v3288_v24, %v2952_v13 }
 0x434   : > { %v3027_v36 = vsel %vm15189_vm12, %v2608_v47, 0.0  ;;  %vm15194_vm12 = vcmp.lt.s32.totalorder %v15157_v11, 600 }
 0x435   : > { %v3409_v14 = vmax.f32 %v3408_v15, %v3027_v36  ;;  %v2135_v54 = vpop.f32.mrf.mxu3 }
 0x436   : > { %v2136_v39 = vadd.f32 %v2135_v54, %v12727_v34 }
 0x437   : > { %v2424_v4 = vpop.f32.mrf.mxu2 }
 0x438   : > { %v2541_v56 = vmax.f32 %v2136_v39, 0.0  ;;  %v2425_v61 = vadd.f32 %v2424_v4, %v12598_v48 }
 0x439   : > { %v2350_v23 = vpop.f32.mrf.mxu1 }
 0x43a   : > { %v2960_v18 = vsel %vm15190_vm14, %v2541_v56, 0.0  ;;  %v2616_v45 = vmax.f32 %v2425_v61, 0.0  ;;  %vm15195_vm14 = vcmp.lt.s32.totalorder %v12118_v63, 600 }
 0x43b   : > { %v3290_v20 = vmax.f32 %v3289_v3, %v2960_v18 }
 0x43c   : > { %v3035_v46 = vsel %vm2799_vm7, %v2616_v45, 0.0  ;;  %v12888_v45 = vpop.f32.mrf.mxu0 }
 0x43d   : > { %v3410_v1 = vmax.f32 %v3409_v14, %v3035_v46  ;;  %v2137_v58 = vpop.f32.mrf.mxu3 }
 0x43e   : > { %v2138_v16 = vadd.f32 %v2137_v58, %v12727_v34 }
 0x43f   : > { %v2427_v37 = vpop.f32.mrf.mxu2 }
 0x440   : > { %v2549_v17 = vmax.f32 %v2138_v16, 0.0  ;;  %v2428_v28 = vadd.f32 %v2427_v37, %v12598_v48 }
 0x441   : > { %v2353_v50 = vpop.f32.mrf.mxu1 }
 0x442   : > { %v2968_v60 = vsel %vm15191_vm4, %v2549_v17, 0.0  ;;  %v2624_v42 = vmax.f32 %v2428_v28, 0.0  ;;  %2179 = vmatmul.bf16.gmra.mxu3 %v15148_v25  ;;  %vm15196_vm4 = vcmp.lt.s32.totalorder %v12158_v43, 600 }
 0x443   : > { %v3291_v6 = vmax.f32 %v3290_v20, %v2968_v60 }
 0x444   : > { %v3043_v33 = vsel %vm2800_vm6, %v2624_v42, 0.0  ;;  %v12897_v28 = vpop.f32.mrf.mxu0 }
 0x445   : > { %v12867_v40 = vmax.f32 %v3410_v1, %v3043_v33  ;;  %v2140_v55 = vpop.f32.mrf.mxu3  ;;  %v2341_v33 = vadd.f32 %v12826_v19, %v12510_v52 }
 0x446   : > { %v2141_v24 = vadd.f32 %v2140_v55, %v12727_v34 }
 0x447   : > { %v12870_v59 = vpop.f32.mrf.mxu2 }
 0x448   : > { %v2557_v15 = vmax.f32 %v2141_v24, 0.0  ;;  %v2344_v24 = vadd.f32 %v12836_v41, %v12510_v52 }
 0x449   : > { %v2355_v54 = vpop.f32.mrf.mxu1 }
 0x44a   : > { %v2976_v44 = vsel %vm15192_vm5, %v2557_v15, 0.0  ;;  %vm15197_vm5 = vcmp.lt.s32.totalorder %v12176_v26, 600 }
 0x44b   : > { %v3292_v8 = vmax.f32 %v3291_v6, %v2976_v44  ;;  %v2631_v44 = vmax.f32 %v2341_v33, 0.0 }
 0x44d   : > { %v2142_v57 = vpop.f32.mrf.mxu3  ;;  %v3050_v26 = vsel %vm2801_vm9, %v2631_v44, 0.0 }
 0x44e   : > { %v2143_v25 = vadd.f32 %v2142_v57, %v12727_v34 }
 0x44f   : > { %v12875_v30 = vpop.f32.mrf.mxu2 }
 0x450   : > { %v2565_v53 = vmax.f32 %v2143_v25, 0.0  ;;  %v2639_v25 = vmax.f32 %v2344_v24, 0.0 }
 0x451   : > { %v2358_v20 = vpop.f32.mrf.mxu1 }
 0x452   : > { %v2984_v13 = vsel %vm15193_vm10, %v2565_v53, 0.0  ;;  %2184 = vmatmul.bf16.gmra.mxu3 %v15156_v22  ;;  %v12910_v53 = vpop.f32.mrf.mxu0  ;;  %vm15199_vm10 = vcmp.lt.s32.totalorder %v12208_v27, 600  ;;  %v2359_v27 = vadd.f32 %v2358_v20, %v12510_v52 }
 0x453   : > { %v3293_v47 = vmax.f32 %v3292_v8, %v2984_v13  ;;  %v2346_v8 = vadd.f32 %v12845_v7, %v12510_v52  ;;  %v2349_v13 = vadd.f32 %v12856_v12, %v12510_v52 }
 0x455   : > { %v2145_v3 = vpop.f32.mrf.mxu3  ;;  %v2647_v41 = vmax.f32 %v2346_v8, 0.0 }
 0x456   : > { %v2146_v36 = vadd.f32 %v2145_v3, %v12727_v34 }
 0x457   : > { %v12881_v14 = vpop.f32.mrf.mxu2 }
 0x458   : > { %v2573_v0 = vmax.f32 %v2146_v36, 0.0  ;;  %v2351_v36 = vadd.f32 %v2350_v23, %v12510_v52  ;;  %v2435_v20 = vadd.f32 %v12881_v14, %v12598_v48 }
 0x459   : > { %v2360_v60 = vpop.f32.mrf.mxu1 }
 0x45a   : > { %v2992_v39 = vsel %vm15194_vm12, %v2573_v0, 0.0  ;;  %vm15201_vm12 = vcmp.lt.s32.totalorder %v12346_v2, 600  ;;  %v2361_v33 = vadd.f32 %v2360_v60, %v12510_v52 }
 0x45b   : > { %v3294_v4 = vmax.f32 %v3293_v47, %v2992_v39  ;;  %v3058_v39 = vsel %vm2802_vm8, %v2639_v25, 0.0 }
 0x45d   : > { %v2147_v56 = vpop.f32.mrf.mxu3 }
 0x45e   : > { %v2148_v61 = vadd.f32 %v2147_v56, %v12727_v34  ;;  %v2354_v56 = vadd.f32 %v2353_v50, %v12510_v52 }
 0x45f   : > { %v12886_v18 = vpop.f32.mrf.mxu2 }
 0x460   : > { %v2581_v62 = vmax.f32 %v2148_v61, 0.0  ;;  %v3375_v61 = vmax.f32 %v12819_v10, %v3050_v26  ;;  %v2695_v26 = vmax.f32 %v2361_v33, 0.0  ;;  %v2438_v14 = vadd.f32 %v12886_v18, %v12598_v48 }
 0x461   : > { %v2363_v47 = vpop.f32.mrf.mxu1 }
 0x462   : > { %v3000_v22 = vsel %vm15195_vm14, %v2581_v62, 0.0  ;;  %v3376_v23 = vmax.f32 %v3375_v61, %v3058_v39  ;;  %vm15202_vm14 = vcmp.lt.s32.totalorder %v12384_v35, 600  ;;  %v2364_v60 = vadd.f32 %v2363_v47, %v12510_v52 }
 0x463   : > { %v3295_v46 = vmax.f32 %v3294_v4, %v3000_v22  ;;  %v2655_v4 = vmax.f32 %v2349_v13, 0.0  ;;  %v2648_v47 = vmax.f32 %v2435_v20, 0.0 }
 0x465   : > { %v2150_v1 = vpop.f32.mrf.mxu3  ;;  %v3074_v50 = vsel %vm15201_vm12, %v2655_v4, 0.0 }
 0x466   : > { %v2151_v58 = vadd.f32 %v2150_v1, %v12727_v34  ;;  %v2663_v1 = vmax.f32 %v2351_v36, 0.0 }
 0x467   : > { %v12893_v16 = vpop.f32.mrf.mxu2 }
 0x468   : > { %v2589_v11 = vmax.f32 %v2151_v58, 0.0  ;;  %v2356_v58 = vadd.f32 %v2355_v54, %v12510_v52  ;;  %v2440_v61 = vadd.f32 %v12893_v16, %v12598_v48  ;;  %v3067_v16 = vsel %vm2803_vm11, %v2648_v47, 0.0 }
 0x469   : > { %v2365_v8 = vpop.f32.mrf.mxu1 }
 0x46a   : > { %v3008_v37 = vsel %vm15196_vm4, %v2589_v11, 0.0  ;;  %v2430_v11 = vadd.f32 %v12870_v59, %v12598_v48  ;;  %v2679_v59 = vmax.f32 %v2356_v58, 0.0  ;;  %vm3450_vm4 = vcmask 1046534  }
 0x46b   : > { %v3296_v17 = vmax.f32 %v3295_v46, %v3008_v37  ;;  %v3066_v46 = vsel %vm2803_vm11, %v2647_v41, 0.0 }
 0x46c   : > { %v2632_v44 = vmax.f32 %v2430_v11, 0.0  ;;  %v3098_v36 = vsel %vm2807_vm15, %v2679_v59, 0.0 }
 0x46d   : > { %v2152_v42 = vpop.f32.mrf.mxu3 }
 0x46e   : > { %v2153_v6 = vadd.f32 %v2152_v42, %v12727_v34  ;;  %v3377_v42 = vmax.f32 %v3376_v23, %v3066_v46  ;;  %v3051_v4 = vsel %vm2801_vm9, %v2632_v44, 0.0  ;;  %v2656_v23 = vmax.f32 %v2438_v14, 0.0 }
 0x46f   : > { %v12900_v63 = vpop.f32.mrf.mxu2 }
 0x470   : > { %v2597_v55 = vmax.f32 %v2153_v6, 0.0  ;;  %v2433_v6 = vadd.f32 %v12875_v30, %v12598_v48  ;;  %v2687_v30 = vmax.f32 %v2359_v27, 0.0 }
 0x472   : > { %v3016_v43 = vsel %vm15197_vm5, %v2597_v55, 0.0  ;;  %v3082_v55 = vsel %vm2805_vm13, %v2663_v1, 0.0  ;;  %v3106_v51 = vsel %vm2808_vm2, %v2687_v30, 0.0  ;;  %v3114_v1 = vsel %vm2809_vm3, %v2695_v26, 0.0 }
 0x473   : > { %v3297_v15 = vmax.f32 %v3296_v17, %v3016_v43  ;;  %v2671_v17 = vmax.f32 %v2354_v56, 0.0  ;;  %v12940_v43 = vpop.f32.mrf.mxu0 }
 0x475   : > { %v2155_v57 = vpop.f32.mrf.mxu3 }
 0x476   : > { %v2156_v19 = vadd.f32 %v2155_v57, %v12727_v34  ;;  %v3090_v57 = vsel %vm15202_vm14, %v2671_v17, 0.0  ;;  %v3412_v17 = vmax.f32 %v12867_v40, %v3051_v4 }
 0x477   : > { %v12915_v3 = vpop.f32.mrf.mxu2 }
 0x478   : > { %v2605_v0 = vmax.f32 %v2156_v19, 0.0  ;;  %v2640_v19 = vmax.f32 %v2433_v6, 0.0  ;;  %v2664_v6 = vmax.f32 %v2440_v61, 0.0  ;;  %v2445_v33 = vadd.f32 %v12915_v3, %v12598_v48 }
 0x47a   : > { %v3024_v12 = vsel %vm15199_vm10, %v2605_v0, 0.0  ;;  %v2366_v0 = vadd.f32 %v2365_v8, %v12510_v52  ;;  %v3059_v18 = vsel %vm2802_vm8, %v2640_v19, 0.0  ;;  %v3083_v21 = vsel %vm2805_vm13, %v2664_v6, 0.0 }
 0x47b   : > { %v3298_v62 = vmax.f32 %v3297_v15, %v3024_v12  ;;  %v3378_v15 = vmax.f32 %v3377_v42, %v3074_v50  ;;  %v2703_v12 = vmax.f32 %v2364_v60, 0.0  ;;  %v12976_v59 = vpop.f32.mrf.mxu0 }
 0x47c   : > { %v2711_v11 = vmax.f32 %v2366_v0, 0.0 }
 0x47d   : > { %v2157_v37 = vpop.f32.mrf.mxu3  ;;  %v3379_v13 = vmax.f32 %v3378_v15, %v3082_v55  ;;  %v3122_v42 = vsel %vm2810_vm1, %v2703_v12, 0.0 }
 0x47e   : > { %v2158_v10 = vadd.f32 %v2157_v37, %v12727_v34  ;;  %v2443_v37 = vadd.f32 %v12900_v63, %v12598_v48  ;;  %v3413_v63 = vmax.f32 %v3412_v17, %v3059_v18  ;;  %v3130_v20 = vsel %vm2811_vm0, %v2711_v11, 0.0 }
 0x47f   : > { %v2447_v54 = vpop.f32.mrf.mxu2  ;;  %v3380_v39 = vmax.f32 %v3379_v13, %v3090_v57 }
 0x480   : > { %v2613_v24 = vmax.f32 %v2158_v10, 0.0  ;;  %v2672_v8 = vmax.f32 %v2443_v37, 0.0  ;;  %v2448_v57 = vadd.f32 %v2447_v54, %v12598_v48  ;;  %v3414_v30 = vmax.f32 %v3413_v63, %v3067_v16 }
 0x481   : > { %v3381_v46 = vmax.f32 %v3380_v39, %v3098_v36 }
 0x482   : > { %v3032_v25 = vsel %vm2799_vm7, %v2613_v24, 0.0  ;;  %vm15205_vm7 = vmmov %vm15201_vm12  ;;  %v2688_v14 = vmax.f32 %v2448_v57, 0.0 }
 0x483   : > { %v3299_v41 = vmax.f32 %v3298_v62, %v3032_v25  ;;  %v3382_v27 = vmax.f32 %v3381_v46, %v3106_v51  ;;  %v3075_v40 = vsel %vm15205_vm7, %v2656_v23, 0.0  ;;  %v2680_v25 = vmax.f32 %v2445_v33, 0.0  ;;  %v2264_v61 = vpop.f32.mrf.mxu0  ;;  %vm15208_vm5 = vmmov %vm15205_vm7 }
 0x484   : > { %v3415_v19 = vmax.f32 %v3414_v30, %v3075_v40  ;;  %v3107_v51 = vsel %vm2808_vm2, %v2688_v14, 0.0 }
 0x485   : > { %v2160_v56 = vpop.f32.mrf.mxu3  ;;  %v3383_v24 = vmax.f32 %v3382_v27, %v3114_v1  ;;  %v3099_v39 = vsel %vm2807_vm15, %v2680_v25, 0.0 }
 0x486   : > { %v2161_v62 = vadd.f32 %v2160_v56, %v12727_v34  ;;  %v3416_v54 = vmax.f32 %v3415_v19, %v3083_v21 }
 0x487   : > { %v2449_v58 = vpop.f32.mrf.mxu2  ;;  %v3384_v3 = vmax.f32 %v3383_v24, %v3122_v42 }
 0x488   : > { %v2621_v50 = vmax.f32 %v2161_v62, 0.0  ;;  %v2450_v13 = vadd.f32 %v2449_v58, %v12598_v48 }
 0x489   : > { %v3385_v26 = vmax.f32 %v3384_v3, %v3130_v20 }
 0x48a   : > { %v3040_v55 = vsel %vm2800_vm6, %v2621_v50, 0.0  ;;  %vm15207_vm6 = vmmov %vm15202_vm14  ;;  %v2696_v4 = vmax.f32 %v2450_v13, 0.0 }
 0x48b   : > { %v12978_v15 = vmax.f32 %v3299_v41, %v3040_v55  ;;  %v3091_v36 = vsel %vm15207_vm6, %v2672_v8, 0.0  ;;  %v3386_v47 = vrot.slane %v3385_v26, 4  ;;  %v2266_v55 = vpop.f32.mrf.mxu0  ;;  %vm15209_vm10 = vmmov %vm15207_vm6 }
 0x48c   : > { %v3417_v56 = vmax.f32 %v3416_v54, %v3091_v36  ;;  %v3115_v18 = vsel %vm2809_vm3, %v2696_v4, 0.0  ;;  %v2255_v54 = vadd.f32 %v12897_v28, %v12507_v5  ;;  %v2257_v4 = vadd.f32 %v12910_v53, %v12507_v5 }
 0x48d   : > { %v12985_v60 = vpop.f32.mrf.mxu3  ;;  %v3387_v1 = vmax.f32 %v3385_v26, %v3386_v47 }
 0x48e   : > { %v3418_v62 = vmax.f32 %v3417_v56, %v3099_v39  ;;  %v2638_v47 = vmax.f32 %v2255_v54, 0.0  ;;  %v2260_v56 = vadd.f32 %v12940_v43, %v12507_v5 }
 0x48f   : > { %v2452_v41 = vpop.f32.mrf.mxu2  ;;  %v3388_v27 = vrot.slane %v3387_v1, 2 }
 0x490   : > { %v2453_v0 = vadd.f32 %v2452_v41, %v12598_v48  ;;  %v3419_v58 = vmax.f32 %v3418_v62, %v3107_v51  ;;  %v3057_v28 = vsel %vm2802_vm8, %v2638_v47, 0.0 }
 0x491   : > { %v3389_v63 = vmax.f32 %v3387_v1, %v3388_v27  ;;  %v2654_v1 = vmax.f32 %v2260_v56, 0.0  ;;  %v2163_v27 = vadd.f32 %v12985_v60, %v12727_v34 }
 0x492   : > { %v2704_v12 = vmax.f32 %v2453_v0, 0.0  ;;  %v3420_v50 = vmax.f32 %v3419_v58, %v3115_v18  ;;  %v2252_v0 = vadd.f32 %v12888_v45, %v12507_v5  ;;  %v2646_v18 = vmax.f32 %v2257_v4, 0.0 }
 0x493   : > { %v3390_v20 = vrot.slane %v3389_v63, 1  ;;  %v2262_v45 = vadd.f32 %v12976_v59, %v12507_v5  ;;  %v2265_v58 = vadd.f32 %v2264_v61, %v12507_v5  ;;  %v3073_v59 = vsel %vm15208_vm5, %v2654_v1, 0.0 }
 0x494   : > { %v3123_v11 = vsel %vm2810_vm1, %v2704_v12, 0.0  ;;  %v2630_v39 = vmax.f32 %v2252_v0, 0.0  ;;  %v3065_v43 = vsel %vm2803_vm11, %v2646_v18, 0.0 }
 0x495   : > { %v2165_v46 = vpop.f32.mrf.mxu3  ;;  %v3421_v16 = vmax.f32 %v3420_v50, %v3123_v11  ;;  %v3391_v3 = vmax.f32 %v3389_v63, %v3390_v20  ;;  %v2267_v11 = vadd.f32 %v2266_v55, %v12507_v5 }
 0x496   : > { %v3049_v62 = vsel %vm2801_vm9, %v2630_v39, 0.0  ;;  %v2166_v55 = vadd.f32 %v2165_v46, %v12727_v34 }
 0x497   : > { %v2454_v23 = vpop.f32.mrf.mxu2  ;;  %v3442_v13 = vrot.slane %v3391_v3, 2  ;;  %v3338_v53 = vmax.f32 %v12817_v49, %v3049_v62 }
 0x498   : > { %v2455_v37 = vadd.f32 %v2454_v23, %v12598_v48  ;;  %v2269_v48 = vpop.f32.mrf.mxu0  ;;  %v2662_v23 = vmax.f32 %v2262_v45, 0.0 }
 0x499   : > { %v2270_v50 = vadd.f32 %v2269_v48, %v12507_v5 }
 0x49a   : > { %v2712_v17 = vmax.f32 %v2455_v37, 0.0  ;;  %v3339_v37 = vmax.f32 %v3338_v53, %v3057_v28 }
 0x49c   : > { %v3131_v42 = vsel %vm2811_vm0, %v2712_v17, 0.0  ;;  %v2670_v17 = vmax.f32 %v2265_v58, 0.0 }
 0x49d   : > { %v3422_v6 = vmax.f32 %v3421_v16, %v3131_v42  ;;  %v2167_v33 = vpop.f32.mrf.mxu3  ;;  %v3340_v16 = vmax.f32 %v3339_v37, %v3065_v43  ;;  %v3081_v42 = vsel %vm2805_vm13, %v2662_v23, 0.0 }
 0x49e   : > { %v3089_v20 = vsel %vm15209_vm10, %v2670_v17, 0.0  ;;  %v2168_v60 = vadd.f32 %v2167_v33, %v12727_v34 }
 0x49f   : > { %v3423_v24 = vrot.slane %v3422_v6, 4  ;;  %v3341_v63 = vmax.f32 %v3340_v16, %v3073_v59 }
 0x4a0   : > { %v2271_v36 = vpop.f32.mrf.mxu0  ;;  %v2645_v39 = vmax.f32 %v2168_v60, 0.0 }
 0x4a1   : > { %v3424_v40 = vmax.f32 %v3422_v6, %v3423_v24  ;;  %v2272_v61 = vadd.f32 %v2271_v36, %v12507_v5  ;;  %v2678_v6 = vmax.f32 %v2267_v11, 0.0  ;;  %v2686_v24 = vmax.f32 %v2270_v50, 0.0 }
 0x4a2   : > { %v3342_v3 = vmax.f32 %v3341_v63, %v3081_v42 }
 0x4a3   : > { %v3425_v8 = vrot.slane %v3424_v40, 2  ;;  %v3097_v48 = vsel %vm2807_vm15, %v2678_v6, 0.0  ;;  %v3105_v36 = vsel %vm2808_vm2, %v2686_v24, 0.0 }
 0x4a5   : > { %v3426_v57 = vmax.f32 %v3424_v40, %v3425_v8  ;;  %v2170_v30 = vpop.f32.mrf.mxu3 }
 0x4a6   : > { %v2171_v46 = vadd.f32 %v2170_v30, %v12727_v34 }
 0x4a7   : > { %v3427_v21 = vrot.slane %v3426_v57, 1 }
 0x4a8   : > { %v2274_v51 = vpop.f32.mrf.mxu0 }
 0x4a9   : > { %v3428_v25 = vmax.f32 %v3426_v57, %v3427_v21  ;;  %v2275_v8 = vadd.f32 %v2274_v51, %v12507_v5  ;;  %v2629_v57 = vmax.f32 %v2163_v27, 0.0  ;;  %v2694_v21 = vmax.f32 %v2272_v61, 0.0 }
 0x4aa   : > { %v2653_v51 = vmax.f32 %v2171_v46, 0.0 }
 0x4ab   : > { %v3443_v19 = vrot.slane %v3428_v25, 1  ;;  %v2702_v0 = vmax.f32 %v2275_v8, 0.0  ;;  %v3048_v54 = vsel %vm2801_vm9, %v2629_v57, 0.0  ;;  %v3113_v47 = vsel %vm2809_vm3, %v2694_v21, 0.0  ;;  %vm15211_vm9 = vmmov %vm15207_vm6 }
 0x4ac   : > { %v3301_v45 = vmax.f32 %v12978_v15, %v3048_v54 }
 0x4ad   : > { %v13004_v26 = vsel %vm3450_vm4, %v3442_v13, %v3443_v19  ;;  %v2172_v41 = vpop.f32.mrf.mxu3  ;;  %v2637_v13 = vmax.f32 %v2166_v55, 0.0  ;;  %v3343_v19 = vmax.f32 %v3342_v3, %v3089_v20  ;;  %v3121_v32 = vsel %vm2810_vm1, %v2702_v0, 0.0 }
 0x4ae   : > { %v2173_v33 = vadd.f32 %v2172_v41, %v12727_v34  ;;  %v3064_v41 = vsel %vm2803_vm11, %v2645_v39, 0.0  ;;  %vm3452_vm11 = vcmask 1045508  }
 0x4af   : > { %v3344_v4 = vmax.f32 %v3343_v19, %v3097_v48  ;;  %v3056_v30 = vsel %vm2802_vm8, %v2637_v13, 0.0  ;;  %vm15210_vm8 = vmmov %vm15208_vm5 }
 0x4b0   : > { %v2276_v40 = vpop.f32.mrf.mxu0  ;;  %v2661_v28 = vmax.f32 %v2173_v33, 0.0  ;;  %v3302_v53 = vmax.f32 %v3301_v45, %v3056_v30 }
 0x4b1   : > { %v2277_v25 = vadd.f32 %v2276_v40, %v12507_v5  ;;  %v3345_v18 = vmax.f32 %v3344_v4, %v3105_v36  ;;  %v3132_v4 = vld [vmem:[#allocation2] sm:$0xff] }
 0x4b2   : > { %v3303_v11 = vmax.f32 %v3302_v53, %v3064_v41  ;;  %v3080_v22 = vsel %vm2805_vm13, %v2661_v28, 0.0  ;;  %vm3454_vm13 = vcmask 1043456  }
 0x4b3   : > { %v2710_v5 = vmax.f32 %v2277_v25, 0.0  ;;  %v3346_v58 = vmax.f32 %v3345_v18, %v3113_v47 }
 0x4b5   : > { %v2175_v14 = vpop.f32.mrf.mxu3  ;;  %v3129_v7 = vsel %vm2811_vm0, %v2710_v5, 0.0  ;;  %v3347_v23 = vmax.f32 %v3346_v58, %v3121_v32 }
 0x4b6   : > { %v2176_v62 = vadd.f32 %v2175_v14, %v12727_v34  ;;  %v3072_v14 = vsel %vm15210_vm8, %v2653_v51, 0.0 }
 0x4b7   : > { %v3304_v59 = vmax.f32 %v3303_v11, %v3072_v14 }
 0x4b8   : > { %v2669_v43 = vmax.f32 %v2176_v62, 0.0 }
 0x4b9   : > { %v3305_v61 = vmax.f32 %v3304_v59, %v3080_v22 }
 0x4ba   : > { %v3088_v27 = vsel %vm15211_vm9, %v2669_v43, 0.0 }
 0x4bb   : > { %v3306_v29 = vmax.f32 %v3305_v61, %v3088_v27 }
 0x4bd   : > { %v2177_v12 = vpop.f32.mrf.mxu3 }
 0x4be   : > { %v2178_v1 = vadd.f32 %v2177_v12, %v12727_v34  ;;  %v3348_v12 = vmax.f32 %v3347_v23, %v3129_v7 }
 0x4c0   : > { %v2677_v37 = vmax.f32 %v2178_v1, 0.0  ;;  %v3349_v6 = vrot.slane %v3348_v12, 4 }
 0x4c2   : > { %v3350_v35 = vmax.f32 %v3348_v12, %v3349_v6 }
 0x4c4   : > { %v3351_v21 = vrot.slane %v3350_v35, 2 }
 0x4c5   : > { %v2180_v49 = vpop.f32.mrf.mxu3 }
 0x4c6   : > { %v2181_v15 = vadd.f32 %v2180_v49, %v12727_v34  ;;  %v3096_v49 = vsel %vm2807_vm15, %v2677_v37, 0.0  ;;  %v3352_v13 = vmax.f32 %v3350_v35, %v3351_v21 }
 0x4c7   : > { %v3307_v24 = vmax.f32 %v3306_v29, %v3096_v49 }
 0x4c8   : > { %v2685_v16 = vmax.f32 %v2181_v15, 0.0  ;;  %v3353_v19 = vrot.slane %v3352_v13, 1 }
 0x4ca   : > { %v3104_v55 = vsel %vm2808_vm2, %v2685_v16, 0.0  ;;  %v3354_v54 = vmax.f32 %v3352_v13, %v3353_v19 }
 0x4cb   : > { %v3308_v20 = vmax.f32 %v3307_v24, %v3104_v55 }
 0x4cc   : > { %v3441_v33 = vrot.slane %v3354_v54, 3 }
 0x4cd   : > { %v2182_v56 = vpop.f32.mrf.mxu3 }
 0x4ce   : > { %v2183_v50 = vadd.f32 %v2182_v56, %v12727_v34 }
 0x4d0   : > { %v2693_v42 = vmax.f32 %v2183_v50, 0.0 }
 0x4d2   : > { %v3112_v40 = vsel %vm2809_vm3, %v2693_v42, 0.0 }
 0x4d3   : > { %v3309_v60 = vmax.f32 %v3308_v20, %v3112_v40 }
 0x4d5   : > { %v2185_v17 = vpop.f32.mrf.mxu3 }
 0x4d6   : > { %v2186_v2 = vadd.f32 %v2185_v17, %v12727_v34 }
 0x4d8   : > { %v2701_v63 = vmax.f32 %v2186_v2, 0.0 }
 0x4da   : > { %v3120_v57 = vsel %vm2810_vm1, %v2701_v63, 0.0  ;;  %vm3448_vm1 = vcmask 1044484  }
 0x4db   : > { %v3310_v48 = vmax.f32 %v3309_v60, %v3120_v57 }
 0x4dd   : > { %v2187_v8 = vpop.f32.mrf.mxu3 }
 0x4de   : > { %v2188_v9 = vadd.f32 %v2187_v8, %v12727_v34 }
 0x4e0   : > { %v2709_v3 = vmax.f32 %v2188_v9, 0.0 }
 0x4e2   : > { %v3128_v31 = vsel %vm2811_vm0, %v2709_v3, 0.0 }
 0x4e3   : > { %v3311_v25 = vmax.f32 %v3310_v48, %v3128_v31 }
 0x4e5   : > { %v3312_v46 = vrot.slane %v3311_v25, 4 }
 0x4e7   : > { %v3313_v52 = vmax.f32 %v3311_v25, %v3312_v46 }
 0x4e9   : > { %v3314_v36 = vrot.slane %v3313_v52, 2 }
 0x4eb   : > { %v3315_v0 = vmax.f32 %v3313_v52, %v3314_v36 }
 0x4ed   : > { %v3316_v39 = vrot.slane %v3315_v0, 1 }
 0x4ef   : > { %v3317_v10 = vmax.f32 %v3315_v0, %v3316_v39 }
 0x4f1   : > { %v3440_v34 = vrot.slane %v3317_v10, 4 }
 0x4f3   : > { %v3449_v47 = vsel %vm3448_vm1, %v3440_v34, %v3441_v33 }
 0x4f4   : > { %v3453_v44 = vsel %vm3452_vm11, %v3449_v47, %v13004_v26 }
 0x4f5   : > { %v3455_v56 = vsel %vm3454_vm13, %v12751_v38, %v3453_v44 }
 0x4f6   : > { %v3457_v5 = vmax.f32 %v3132_v4, %v3455_v56 }
 0x4f8   : > { %3458 = vst [vmem:[#allocation2] sm:$0xff] %v3457_v5 }
 0x4f9 PF: > { %p8884_p0 = scmp.ne.s32.totalorder %s11039_s28, 1 }
 0x4fb   : > { %3462 = sbr.rel (%p8884_p0) target bundleno = 3318 (0xcf6), region = 108 }
 0x500   : > { %p8885_p1 = scmp.ne.s32.totalorder %s11035_s27, 0 }
 0x502   : > { %3466 = sbr.rel (%p8885_p1) target bundleno = 1688 (0x698), region = 112 }
 0x507   : > { %v9000_v30 = vld [vmem:[#allocation4 + $0xe0] sm:$0xf]  ;;  %v10542_v51 = vld [vmem:[#allocation4 + $0xec] sm:$0xf0]  ;;  %vm5462_vm0 = vcmask 1040384   ;;  %vm5464_vm15 = vcmask 1042434  }
 0x508   : > { %v9128_v62 = vld [vmem:[#allocation4 + $0x1e0] sm:$0xf]  ;;  %v9001_v18 = vor.u32 %v10542_v51, %v9000_v30  ;;  %v10574_v45 = vld [vmem:[#allocation4 + $0x1ec] sm:$0xf0]  ;;  %vm5466_vm2 = vcmask 1041408  }
 0x509   : > { %v9256_v32 = vld [vmem:[#allocation4 + $0x2e0] sm:$0xf]  ;;  %v10606_v41 = vld [vmem:[#allocation4 + $0x2ec] sm:$0xf0]  ;;  %v9129_v28 = vor.u32 %v10574_v45, %v9128_v62 }
 0x50a   : > { %v9257_v26 = vor.u32 %v10606_v41, %v9256_v32  ;;  %v9384_v1 = vld [vmem:[#allocation4 + $0x3e0] sm:$0xf]  ;;  %v10638_v38 = vld [vmem:[#allocation4 + $0x3ec] sm:$0xf0]  ;;  %5039 = vmatpush.bf16.msra.mxu0 %v9001_v18 }
 0x50b   : > { %v8984_v58 = vld [vmem:[#allocation4 + $0xc0] sm:$0xf]  ;;  %v9385_v53 = vor.u32 %v10638_v38, %v9384_v1  ;;  %v10538_v7 = vld [vmem:[#allocation4 + $0xcc] sm:$0xf0]  ;;  %5052 = vmatpush.bf16.msra.mxu1 %v9129_v28 }
 0x50c   : > { %v9112_v14 = vld [vmem:[#allocation4 + $0x1c0] sm:$0xf]  ;;  %v10570_v43 = vld [vmem:[#allocation4 + $0x1cc] sm:$0xf0]  ;;  %5065 = vmatpush.bf16.msra.mxu2 %v9257_v26  ;;  %v8985_v15 = vor.u32 %v10538_v7, %v8984_v58 }
 0x50d   : > { %v9113_v23 = vor.u32 %v10570_v43, %v9112_v14  ;;  %v9240_v11 = vld [vmem:[#allocation4 + $0x2c0] sm:$0xf]  ;;  %v10602_v22 = vld [vmem:[#allocation4 + $0x2cc] sm:$0xf0]  ;;  %5078 = vmatpush.bf16.msra.mxu3 %v9385_v53 }
 0x50e   : > { %v9368_v37 = vld [vmem:[#allocation4 + $0x3c0] sm:$0xf]  ;;  %v9241_v50 = vor.u32 %v10602_v22, %v9240_v11  ;;  %v10634_v12 = vld [vmem:[#allocation4 + $0x3cc] sm:$0xf0]  ;;  %5040 = vmatpush.bf16.msra.mxu0 %v8985_v15 }
 0x50f   : > { %v8968_v59 = vld [vmem:[#allocation4 + $0xa0] sm:$0xf]  ;;  %v10534_v17 = vld [vmem:[#allocation4 + $0xac] sm:$0xf0]  ;;  %v9369_v27 = vor.u32 %v10634_v12, %v9368_v37  ;;  %5053 = vmatpush.bf16.msra.mxu1 %v9113_v23 }
 0x510   : > { %v9096_v16 = vld [vmem:[#allocation4 + $0x1a0] sm:$0xf]  ;;  %v10566_v2 = vld [vmem:[#allocation4 + $0x1ac] sm:$0xf0]  ;;  %v8969_v49 = vor.u32 %v10534_v17, %v8968_v59  ;;  %5066 = vmatpush.bf16.msra.mxu2 %v9241_v50 }
 0x511   : > { %v9224_v61 = vld [vmem:[#allocation4 + $0x2a0] sm:$0xf]  ;;  %v10598_v42 = vld [vmem:[#allocation4 + $0x2ac] sm:$0xf0]  ;;  %v9097_v55 = vor.u32 %v10566_v2, %v9096_v16  ;;  %5079 = vmatpush.bf16.msra.mxu3 %v9369_v27 }
 0x512   : > { %v9352_v6 = vld [vmem:[#allocation4 + $0x3a0] sm:$0xf]  ;;  %v10630_v29 = vld [vmem:[#allocation4 + $0x3ac] sm:$0xf0]  ;;  %v9225_v63 = vor.u32 %v10598_v42, %v9224_v61  ;;  %5041 = vmatpush.bf16.msra.mxu0 %v8969_v49 }
 0x513   : > { %v8952_v24 = vld [vmem:[#allocation4 + $0x80] sm:$0xf]  ;;  %v10530_v40 = vld [vmem:[#allocation4 + $0x8c] sm:$0xf0]  ;;  %v9353_v20 = vor.u32 %v10630_v29, %v9352_v6  ;;  %5054 = vmatpush.bf16.msra.mxu1 %v9097_v55 }
 0x514   : > { %v9080_v35 = vld [vmem:[#allocation4 + $0x180] sm:$0xf]  ;;  %v10562_v8 = vld [vmem:[#allocation4 + $0x18c] sm:$0xf0]  ;;  %v8953_v21 = vor.u32 %v10530_v40, %v8952_v24  ;;  %5067 = vmatpush.bf16.msra.mxu2 %v9225_v63 }
 0x515   : > { %v9208_v57 = vld [vmem:[#allocation4 + $0x280] sm:$0xf]  ;;  %v10594_v9 = vld [vmem:[#allocation4 + $0x28c] sm:$0xf0]  ;;  %v9081_v48 = vor.u32 %v10562_v8, %v9080_v35  ;;  %5080 = vmatpush.bf16.msra.mxu3 %v9353_v20 }
 0x516   : > { %v9336_v60 = vld [vmem:[#allocation4 + $0x380] sm:$0xf]  ;;  %v10626_v3 = vld [vmem:[#allocation4 + $0x38c] sm:$0xf0]  ;;  %v9209_v31 = vor.u32 %v10594_v9, %v9208_v57  ;;  %5042 = vmatpush.bf16.msra.mxu0 %v8953_v21 }
 0x517   : > { %v8936_v25 = vld [vmem:[#allocation4 + $0x60] sm:$0xf]  ;;  %v10526_v13 = vld [vmem:[#allocation4 + $0x6c] sm:$0xf0]  ;;  %v9337_v52 = vor.u32 %v10626_v3, %v9336_v60  ;;  %5055 = vmatpush.bf16.msra.mxu1 %v9081_v48 }
 0x518   : > { %v9064_v46 = vld [vmem:[#allocation4 + $0x160] sm:$0xf]  ;;  %v10558_v19 = vld [vmem:[#allocation4 + $0x16c] sm:$0xf0]  ;;  %v8937_v10 = vor.u32 %v10526_v13, %v8936_v25  ;;  %5068 = vmatpush.bf16.msra.mxu2 %v9209_v31 }
 0x519   : > { %v9192_v36 = vld [vmem:[#allocation4 + $0x260] sm:$0xf]  ;;  %v10590_v0 = vld [vmem:[#allocation4 + $0x26c] sm:$0xf0]  ;;  %v9065_v33 = vor.u32 %v10558_v19, %v9064_v46  ;;  %5081 = vmatpush.bf16.msra.mxu3 %v9337_v52 }
 0x51a   : > { %v9320_v54 = vld [vmem:[#allocation4 + $0x360] sm:$0xf]  ;;  %v10622_v39 = vld [vmem:[#allocation4 + $0x36c] sm:$0xf0]  ;;  %v9193_v34 = vor.u32 %v10590_v0, %v9192_v36  ;;  %5043 = vmatpush.bf16.msra.mxu0 %v8937_v10 }
 0x51b   : > { %v8920_v4 = vld [vmem:[#allocation4 + $0x40] sm:$0xf]  ;;  %v10522_v47 = vld [vmem:[#allocation4 + $0x4c] sm:$0xf0]  ;;  %v9321_v56 = vor.u32 %v10622_v39, %v9320_v54  ;;  %5056 = vmatpush.bf16.msra.mxu1 %v9065_v33 }
 0x51c   : > { %v9048_v44 = vld [vmem:[#allocation4 + $0x140] sm:$0xf]  ;;  %v10554_v5 = vld [vmem:[#allocation4 + $0x14c] sm:$0xf0]  ;;  %v8921_v45 = vor.u32 %v10522_v47, %v8920_v4  ;;  %5069 = vmatpush.bf16.msra.mxu2 %v9193_v34  ;;  %v13084_v4 = vld [vmem:[#allocation2] sm:$0xff] }
 0x51d   : > { %v9176_v30 = vld [vmem:[#allocation4 + $0x240] sm:$0xf]  ;;  %v10586_v51 = vld [vmem:[#allocation4 + $0x24c] sm:$0xf0]  ;;  %v9049_v32 = vor.u32 %v10554_v5, %v9048_v44  ;;  %5082 = vmatpush.bf16.msra.mxu3 %v9321_v56  ;;  %v3471_v5 = vperm.slane %v13084_v4, 2 }
 0x51e   : > { %v9304_v62 = vld [vmem:[#allocation4 + $0x340] sm:$0xf]  ;;  %v10618_v18 = vld [vmem:[#allocation4 + $0x34c] sm:$0xf0]  ;;  %v9177_v41 = vor.u32 %v10586_v51, %v9176_v30  ;;  %5044 = vmatpush.bf16.msra.mxu0 %v8921_v45  ;;  %v3469_v30 = vperm.slane %v13084_v4, 0 }
 0x51f   : > { %v8904_v28 = vld [vmem:[#allocation4 + $0x20] sm:$0xf]  ;;  %v10518_v26 = vld [vmem:[#allocation4 + $0x2c] sm:$0xf0]  ;;  %v9305_v38 = vor.u32 %v10618_v18, %v9304_v62  ;;  %5057 = vmatpush.bf16.msra.mxu1 %v9049_v32  ;;  %v13088_v32 = vpack.c.bf16 %v3471_v5, %v3471_v5 }
 0x520   : > { %v9032_v1 = vld [vmem:[#allocation4 + $0x120] sm:$0xf]  ;;  %v10550_v58 = vld [vmem:[#allocation4 + $0x12c] sm:$0xf0]  ;;  %v8905_v15 = vor.u32 %v10518_v26, %v8904_v28  ;;  %5070 = vmatpush.bf16.msra.mxu2 %v9177_v41  ;;  %v13090_v41 = vpack.c.bf16 %v3469_v30, %v3469_v30 }
 0x521   : > { %v9160_v53 = vld [vmem:[#allocation4 + $0x220] sm:$0xf]  ;;  %v10582_v7 = vld [vmem:[#allocation4 + $0x22c] sm:$0xf0]  ;;  %v9033_v22 = vor.u32 %v10550_v58, %v9032_v1  ;;  %5083 = vmatpush.bf16.msra.mxu3 %v9305_v38  ;;  %v3472_v58 = vperm.slane %v13084_v4, 3 }
 0x522   : > { %v9288_v14 = vld [vmem:[#allocation4 + $0x320] sm:$0xf]  ;;  %v10614_v43 = vld [vmem:[#allocation4 + $0x32c] sm:$0xf0]  ;;  %v9161_v37 = vor.u32 %v10582_v7, %v9160_v53  ;;  %5045 = vmatpush.bf16.msra.mxu0 %v8905_v15  ;;  %v3470_v53 = vperm.slane %v13084_v4, 1 }
 0x523   : > { %v8888_v23 = vld [vmem:[#allocation4] sm:$0xf]  ;;  %v10514_v11 = vld [vmem:[#allocation4 + $0xc] sm:$0xf0]  ;;  %v9289_v17 = vor.u32 %v10614_v43, %v9288_v14  ;;  %5058 = vmatpush.bf16.msra.mxu1 %v9033_v22  ;;  %v13096_v22 = vpack.c.bf16 %v3472_v58, %v3472_v58  ;;  %v9130_v58 = vld [vmem:[#allocation4 + $0x1f0] sm:$0xf0] }
 0x524   : > { %v9016_v50 = vld [vmem:[#allocation4 + $0x100] sm:$0xf]  ;;  %v10546_v12 = vld [vmem:[#allocation4 + $0x10c] sm:$0xf0]  ;;  %v8889_v6 = vor.u32 %v10514_v11, %v8888_v23  ;;  %5071 = vmatpush.bf16.msra.mxu2 %v9161_v37  ;;  %v13098_v37 = vpack.c.bf16 %v3470_v53, %v3470_v53 }
 0x525   : > { %v9144_v59 = vld [vmem:[#allocation4 + $0x200] sm:$0xf]  ;;  %v10578_v27 = vld [vmem:[#allocation4 + $0x20c] sm:$0xf0]  ;;  %v9017_v24 = vor.u32 %v10546_v12, %v9016_v50  ;;  %5084 = vmatpush.bf16.msra.mxu3 %v9289_v17 }
 0x526   : > { %v9272_v16 = vld [vmem:[#allocation4 + $0x300] sm:$0xf]  ;;  %v10610_v2 = vld [vmem:[#allocation4 + $0x30c] sm:$0xf0]  ;;  %v9145_v40 = vor.u32 %v10578_v27, %v9144_v59  ;;  %5046 = vmatpush.bf16.msra.mxu0 %v8889_v6 }
 0x527   : > { %v9512_v61 = vld [vmem:[#allocation4 + $0x4e0] sm:$0xf]  ;;  %v10670_v49 = vld [vmem:[#allocation4 + $0x4ec] sm:$0xf0]  ;;  %v9273_v8 = vor.u32 %v10610_v2, %v9272_v16  ;;  %5059 = vmatpush.bf16.msra.mxu1 %v9017_v24 }
 0x528   : > { %v9640_v42 = vld [vmem:[#allocation4 + $0x5e0] sm:$0xf]  ;;  %v10702_v29 = vld [vmem:[#allocation4 + $0x5ec] sm:$0xf0]  ;;  %v9513_v57 = vor.u32 %v10670_v49, %v9512_v61  ;;  %5072 = vmatpush.bf16.msra.mxu2 %v9145_v40 }
 0x529   : > { %v9768_v55 = vld [vmem:[#allocation4 + $0x6e0] sm:$0xf]  ;;  %v10734_v63 = vld [vmem:[#allocation4 + $0x6ec] sm:$0xf0]  ;;  %v9641_v9 = vor.u32 %v10702_v29, %v9640_v42  ;;  %5085 = vmatpush.bf16.msra.mxu3 %v9273_v8  ;;  %5047 = vmatmul.bf16.vlgmr.msra.gmra.mxu0 %v13090_v41 }
 0x52a   : > { %v9896_v35 = vld [vmem:[#allocation4 + $0x7e0] sm:$0xf]  ;;  %v10766_v20 = vld [vmem:[#allocation4 + $0x7ec] sm:$0xf0]  ;;  %v9769_v60 = vor.u32 %v10734_v63, %v9768_v55  ;;  %5091 = vmatpush.bf16.msrb.mxu0 %v9513_v57  ;;  %5060 = vmatmul.bf16.vlgmr.msra.gmra.mxu1 %v13098_v37 }
 0x52b   : > { %v9496_v3 = vld [vmem:[#allocation4 + $0x4c0] sm:$0xf]  ;;  %v10666_v21 = vld [vmem:[#allocation4 + $0x4cc] sm:$0xf0]  ;;  %v9897_v31 = vor.u32 %v10766_v20, %v9896_v35  ;;  %5104 = vmatpush.bf16.msrb.mxu1 %v9641_v9  ;;  %5073 = vmatmul.bf16.vlgmr.msra.gmra.mxu2 %v13088_v32 }
 0x52c   : > { %v9624_v48 = vld [vmem:[#allocation4 + $0x5c0] sm:$0xf]  ;;  %v10698_v25 = vld [vmem:[#allocation4 + $0x5cc] sm:$0xf0]  ;;  %v9497_v36 = vor.u32 %v10666_v21, %v9496_v3  ;;  %5117 = vmatpush.bf16.msrb.mxu2 %v9769_v60  ;;  %5086 = vmatmul.bf16.vlgmr.msra.gmra.mxu3 %v13096_v22 }
 0x52d   : > { %v9752_v13 = vld [vmem:[#allocation4 + $0x6c0] sm:$0xf]  ;;  %v10730_v46 = vld [vmem:[#allocation4 + $0x6cc] sm:$0xf0]  ;;  %v9625_v39 = vor.u32 %v10698_v25, %v9624_v48  ;;  %5130 = vmatpush.bf16.msrb.mxu3 %v9897_v31 }
 0x52e   : > { %v9880_v52 = vld [vmem:[#allocation4 + $0x7c0] sm:$0xf]  ;;  %v10762_v19 = vld [vmem:[#allocation4 + $0x7cc] sm:$0xf0]  ;;  %v9753_v10 = vor.u32 %v10730_v46, %v9752_v13  ;;  %5092 = vmatpush.bf16.msrb.mxu0 %v9497_v36 }
 0x52f   : > { %v9480_v0 = vld [vmem:[#allocation4 + $0x4a0] sm:$0xf]  ;;  %v10662_v54 = vld [vmem:[#allocation4 + $0x4ac] sm:$0xf0]  ;;  %v9881_v47 = vor.u32 %v10762_v19, %v9880_v52  ;;  %5105 = vmatpush.bf16.msrb.mxu1 %v9625_v39 }
 0x530   : > { %v9608_v33 = vld [vmem:[#allocation4 + $0x5a0] sm:$0xf]  ;;  %v10694_v34 = vld [vmem:[#allocation4 + $0x5ac] sm:$0xf0]  ;;  %v9481_v18 = vor.u32 %v10662_v54, %v9480_v0  ;;  %5118 = vmatpush.bf16.msrb.mxu2 %v9753_v10 }
 0x531   : > { %v9736_v44 = vld [vmem:[#allocation4 + $0x6a0] sm:$0xf]  ;;  %v10726_v56 = vld [vmem:[#allocation4 + $0x6ac] sm:$0xf0]  ;;  %v9609_v28 = vor.u32 %v10694_v34, %v9608_v33  ;;  %5131 = vmatpush.bf16.msrb.mxu3 %v9881_v47 }
 0x532   : > { %v9864_v51 = vld [vmem:[#allocation4 + $0x7a0] sm:$0xf]  ;;  %v10758_v62 = vld [vmem:[#allocation4 + $0x7ac] sm:$0xf0]  ;;  %v9737_v26 = vor.u32 %v10726_v56, %v9736_v44  ;;  %5093 = vmatpush.bf16.msrb.mxu0 %v9481_v18 }
 0x533   : > { %v9464_v45 = vld [vmem:[#allocation4 + $0x480] sm:$0xf]  ;;  %v10658_v1 = vld [vmem:[#allocation4 + $0x48c] sm:$0xf0]  ;;  %v9865_v7 = vor.u32 %v10758_v62, %v9864_v51  ;;  %5106 = vmatpush.bf16.msrb.mxu1 %v9609_v28 }
 0x534   : > { %v9592_v38 = vld [vmem:[#allocation4 + $0x580] sm:$0xf]  ;;  %v10690_v14 = vld [vmem:[#allocation4 + $0x58c] sm:$0xf0]  ;;  %v9465_v50 = vor.u32 %v10658_v1, %v9464_v45  ;;  %5119 = vmatpush.bf16.msrb.mxu2 %v9737_v26  ;;  %v10540_v26 = vld [vmem:[#allocation4 + $0xe4] sm:$0xf] }
 0x535   : > { %v9720_v43 = vld [vmem:[#allocation4 + $0x680] sm:$0xf]  ;;  %v10722_v15 = vld [vmem:[#allocation4 + $0x68c] sm:$0xf0]  ;;  %v9593_v12 = vor.u32 %v10690_v14, %v9592_v38  ;;  %5132 = vmatpush.bf16.msrb.mxu3 %v9865_v7  ;;  %v9002_v1 = vld [vmem:[#allocation4 + $0xf0] sm:$0xf0] }
 0x536   : > { %v9848_v23 = vld [vmem:[#allocation4 + $0x780] sm:$0xf]  ;;  %v10754_v11 = vld [vmem:[#allocation4 + $0x78c] sm:$0xf0]  ;;  %v9721_v59 = vor.u32 %v10722_v15, %v9720_v43  ;;  %5094 = vmatpush.bf16.msrb.mxu0 %v9465_v50  ;;  %v10572_v38 = vld [vmem:[#allocation4 + $0x1e4] sm:$0xf] }
 0x537   : > { %v9448_v17 = vld [vmem:[#allocation4 + $0x460] sm:$0xf]  ;;  %v10654_v27 = vld [vmem:[#allocation4 + $0x46c] sm:$0xf0]  ;;  %v9849_v2 = vor.u32 %v10754_v11, %v9848_v23  ;;  %5107 = vmatpush.bf16.msrb.mxu1 %v9593_v12  ;;  %v10604_v7 = vld [vmem:[#allocation4 + $0x2e4] sm:$0xf] }
 0x538   : > { %v9576_v16 = vld [vmem:[#allocation4 + $0x560] sm:$0xf]  ;;  %v10686_v61 = vld [vmem:[#allocation4 + $0x56c] sm:$0xf0]  ;;  %v9449_v55 = vor.u32 %v10654_v27, %v9448_v17  ;;  %5120 = vmatpush.bf16.msrb.mxu2 %v9721_v59  ;;  %v9258_v14 = vld [vmem:[#allocation4 + $0x2f0] sm:$0xf0]  ;;  %v9005_v27 = vor.u32 %v10540_v26, %v9002_v1 }
 0x539   : > { %v9704_v49 = vld [vmem:[#allocation4 + $0x660] sm:$0xf]  ;;  %v10718_v42 = vld [vmem:[#allocation4 + $0x66c] sm:$0xf0]  ;;  %v9577_v63 = vor.u32 %v10686_v61, %v9576_v16  ;;  %5133 = vmatpush.bf16.msrb.mxu3 %v9849_v2  ;;  %v3475_v43 = vperm.slane %v13084_v4, 6  ;;  %v3473_v12 = vperm.slane %v13084_v4, 4  ;;  %v9133_v2 = vor.u32 %v10572_v38, %v9130_v58 }
 0x53a   : > { %v9832_v6 = vld [vmem:[#allocation4 + $0x760] sm:$0xf]  ;;  %v10750_v29 = vld [vmem:[#allocation4 + $0x76c] sm:$0xf0]  ;;  %v9705_v24 = vor.u32 %v10718_v42, %v9704_v49  ;;  %5095 = vmatpush.bf16.msrb.mxu0 %v9449_v55  ;;  %v10636_v11 = vld [vmem:[#allocation4 + $0x3e4] sm:$0xf]  ;;  %v9261_v61 = vor.u32 %v10604_v7, %v9258_v14 }
 0x53b   : > { %v9432_v40 = vld [vmem:[#allocation4 + $0x440] sm:$0xf]  ;;  %v10650_v35 = vld [vmem:[#allocation4 + $0x44c] sm:$0xf0]  ;;  %v9833_v8 = vor.u32 %v10750_v29, %v9832_v6  ;;  %5108 = vmatpush.bf16.msrb.mxu1 %v9577_v63  ;;  %v9386_v50 = vld [vmem:[#allocation4 + $0x3f0] sm:$0xf0] }
 0x53c   : > { %v9560_v20 = vld [vmem:[#allocation4 + $0x540] sm:$0xf]  ;;  %v10682_v57 = vld [vmem:[#allocation4 + $0x54c] sm:$0xf0]  ;;  %v9433_v48 = vor.u32 %v10650_v35, %v9432_v40  ;;  %5121 = vmatpush.bf16.msrb.mxu2 %v9705_v24  ;;  %v3476_v59 = vperm.slane %v13084_v4, 7  ;;  %v3474_v16 = vperm.slane %v13084_v4, 5  ;;  %v9389_v29 = vor.u32 %v10636_v11, %v9386_v50 }
 0x53d   : > { %v9688_v9 = vld [vmem:[#allocation4 + $0x640] sm:$0xf]  ;;  %v10714_v60 = vld [vmem:[#allocation4 + $0x64c] sm:$0xf0]  ;;  %v9561_v31 = vor.u32 %v10682_v57, %v9560_v20  ;;  %5134 = vmatpush.bf16.msrb.mxu3 %v9833_v8  ;;  %v10536_v49 = vld [vmem:[#allocation4 + $0xc4] sm:$0xf]  ;;  %v13106_v40 = vpack.c.bf16 %v3475_v43, %v3475_v43  ;;  %v13108_v8 = vpack.c.bf16 %v3473_v12, %v3473_v12 }
 0x53e   : > { %v9816_v3 = vld [vmem:[#allocation4 + $0x740] sm:$0xf]  ;;  %v10746_v21 = vld [vmem:[#allocation4 + $0x74c] sm:$0xf0]  ;;  %v9689_v25 = vor.u32 %v10714_v60, %v9688_v9  ;;  %5096 = vmatpush.bf16.msrb.mxu0 %v9433_v48  ;;  %v8986_v42 = vld [vmem:[#allocation4 + $0xd0] sm:$0xf0]  ;;  %v13110_v57 = vpack.c.bf16 %v3476_v59, %v3476_v59  ;;  %v13112_v9 = vpack.c.bf16 %v3474_v16, %v3474_v16 }
 0x53f   : > { %v9416_v13 = vld [vmem:[#allocation4 + $0x420] sm:$0xf]  ;;  %v10646_v46 = vld [vmem:[#allocation4 + $0x42c] sm:$0xf0]  ;;  %v9817_v19 = vor.u32 %v10746_v21, %v9816_v3  ;;  %5109 = vmatpush.bf16.msrb.mxu1 %v9561_v31  ;;  %v10568_v6 = vld [vmem:[#allocation4 + $0x1c4] sm:$0xf]  ;;  %v8989_v4 = vor.u32 %v10536_v49, %v8986_v42 }
 0x540   : > { %v9544_v52 = vld [vmem:[#allocation4 + $0x520] sm:$0xf]  ;;  %v10678_v36 = vld [vmem:[#allocation4 + $0x52c] sm:$0xf0]  ;;  %v9417_v33 = vor.u32 %v10646_v46, %v9416_v13  ;;  %5122 = vmatpush.bf16.msrb.mxu2 %v9689_v25  ;;  %v9114_v55 = vld [vmem:[#allocation4 + $0x1d0] sm:$0xf0] }
 0x541   : > { %v9672_v0 = vld [vmem:[#allocation4 + $0x620] sm:$0xf]  ;;  %v10710_v54 = vld [vmem:[#allocation4 + $0x62c] sm:$0xf0]  ;;  %v9545_v56 = vor.u32 %v10678_v36, %v9544_v52  ;;  %5135 = vmatpush.bf16.msrb.mxu3 %v9817_v19  ;;  %v10600_v63 = vld [vmem:[#allocation4 + $0x2c4] sm:$0xf]  ;;  %v9117_v60 = vor.u32 %v10568_v6, %v9114_v55 }
 0x542   : > { %v9800_v39 = vld [vmem:[#allocation4 + $0x720] sm:$0xf]  ;;  %v10742_v10 = vld [vmem:[#allocation4 + $0x72c] sm:$0xf0]  ;;  %v9673_v5 = vor.u32 %v10710_v54, %v9672_v0  ;;  %5097 = vmatpush.bf16.msrb.mxu0 %v9417_v33  ;;  %v9242_v24 = vld [vmem:[#allocation4 + $0x2d0] sm:$0xf0] }
 0x543   : > { %v9400_v34 = vld [vmem:[#allocation4 + $0x400] sm:$0xf]  ;;  %v10642_v47 = vld [vmem:[#allocation4 + $0x40c] sm:$0xf0]  ;;  %v9801_v18 = vor.u32 %v10742_v10, %v9800_v39  ;;  %5110 = vmatpush.bf16.msrb.mxu1 %v9545_v56  ;;  %v10632_v35 = vld [vmem:[#allocation4 + $0x3c4] sm:$0xf]  ;;  %v9245_v3 = vor.u32 %v10600_v63, %v9242_v24 }
 0x544   : > { %v9528_v44 = vld [vmem:[#allocation4 + $0x500] sm:$0xf]  ;;  %v10674_v30 = vld [vmem:[#allocation4 + $0x50c] sm:$0xf0]  ;;  %v9401_v53 = vor.u32 %v10642_v47, %v9400_v34  ;;  %5123 = vmatpush.bf16.msrb.mxu2 %v9673_v5  ;;  %v9370_v20 = vld [vmem:[#allocation4 + $0x3d0] sm:$0xf0] }
 0x545   : > { %v9656_v51 = vld [vmem:[#allocation4 + $0x600] sm:$0xf]  ;;  %v10706_v62 = vld [vmem:[#allocation4 + $0x60c] sm:$0xf0]  ;;  %v9529_v15 = vor.u32 %v10674_v30, %v9528_v44  ;;  %5136 = vmatpush.bf16.msrb.mxu3 %v9801_v18  ;;  %v10532_v21 = vld [vmem:[#allocation4 + $0xa4] sm:$0xf]  ;;  %v9373_v25 = vor.u32 %v10632_v35, %v9370_v20 }
 0x546   : > { %v9784_v45 = vld [vmem:[#allocation4 + $0x700] sm:$0xf]  ;;  %v10738_v28 = vld [vmem:[#allocation4 + $0x70c] sm:$0xf0]  ;;  %v9657_v23 = vor.u32 %v10706_v62, %v9656_v51  ;;  %5098 = vmatpush.bf16.msrb.mxu0 %v9401_v53  ;;  %v8970_v48 = vld [vmem:[#allocation4 + $0xb0] sm:$0xf0] }
 0x547   : > { %v9785_v17 = vor.u32 %v10738_v28, %v9784_v45  ;;  %5111 = vmatpush.bf16.msrb.mxu1 %v9529_v15  ;;  %v10564_v31 = vld [vmem:[#allocation4 + $0x1a4] sm:$0xf]  ;;  %v9098_v13 = vld [vmem:[#allocation4 + $0x1b0] sm:$0xf0]  ;;  %v8973_v0 = vor.u32 %v10532_v21, %v8970_v48 }
 0x548   : > { %5124 = vmatpush.bf16.msrb.mxu2 %v9657_v23  ;;  %v10596_v46 = vld [vmem:[#allocation4 + $0x2a4] sm:$0xf]  ;;  %v9226_v52 = vld [vmem:[#allocation4 + $0x2b0] sm:$0xf0]  ;;  %v9101_v54 = vor.u32 %v10564_v31, %v9098_v13 }
 0x549   : > { %5137 = vmatpush.bf16.msrb.mxu3 %v9785_v17  ;;  %v10628_v19 = vld [vmem:[#allocation4 + $0x3a4] sm:$0xf]  ;;  %v9354_v36 = vld [vmem:[#allocation4 + $0x3b0] sm:$0xf0]  ;;  %5099 = vmatmul.bf16.vlgmr.msrb.gmra.mxu0 %v13108_v8  ;;  %v9229_v39 = vor.u32 %v10596_v46, %v9226_v52 }
 0x54a   : > { %5143 = vmatpush.bf16.msra.mxu0 %v9005_v27  ;;  %5112 = vmatmul.bf16.vlgmr.msrb.gmra.mxu1 %v13112_v9  ;;  %v10528_v10 = vld [vmem:[#allocation4 + $0x84] sm:$0xf]  ;;  %v8954_v33 = vld [vmem:[#allocation4 + $0x90] sm:$0xf0]  ;;  %v9357_v47 = vor.u32 %v10628_v19, %v9354_v36 }
 0x54b   : > { %5156 = vmatpush.bf16.msra.mxu1 %v9133_v2  ;;  %5125 = vmatmul.bf16.vlgmr.msrb.gmra.mxu2 %v13106_v40  ;;  %v10560_v34 = vld [vmem:[#allocation4 + $0x184] sm:$0xf]  ;;  %v9082_v44 = vld [vmem:[#allocation4 + $0x190] sm:$0xf0]  ;;  %v8957_v62 = vor.u32 %v10528_v10, %v8954_v33 }
 0x54c   : > { %5169 = vmatpush.bf16.msra.mxu2 %v9261_v61  ;;  %5138 = vmatmul.bf16.vlgmr.msrb.gmra.mxu3 %v13110_v57  ;;  %v10592_v56 = vld [vmem:[#allocation4 + $0x284] sm:$0xf]  ;;  %v9210_v5 = vld [vmem:[#allocation4 + $0x290] sm:$0xf0]  ;;  %v9085_v18 = vor.u32 %v10560_v34, %v9082_v44 }
 0x54d   : > { %5182 = vmatpush.bf16.msra.mxu3 %v9389_v29  ;;  %v10624_v30 = vld [vmem:[#allocation4 + $0x384] sm:$0xf]  ;;  %v9338_v51 = vld [vmem:[#allocation4 + $0x390] sm:$0xf0]  ;;  %v9213_v45 = vor.u32 %v10592_v56, %v9210_v5 }
 0x54e   : > { %5144 = vmatpush.bf16.msra.mxu0 %v8989_v4  ;;  %v10524_v28 = vld [vmem:[#allocation4 + $0x64] sm:$0xf]  ;;  %v8938_v26 = vld [vmem:[#allocation4 + $0x70] sm:$0xf0]  ;;  %v9341_v38 = vor.u32 %v10624_v30, %v9338_v51 }
 0x54f   : > { %5157 = vmatpush.bf16.msra.mxu1 %v9117_v60  ;;  %v10556_v1 = vld [vmem:[#allocation4 + $0x164] sm:$0xf]  ;;  %v9066_v58 = vld [vmem:[#allocation4 + $0x170] sm:$0xf0]  ;;  %v8941_v15 = vor.u32 %v10524_v28, %v8938_v26 }
 0x550   : > { %5170 = vmatpush.bf16.msra.mxu2 %v9245_v3  ;;  %v10588_v53 = vld [vmem:[#allocation4 + $0x264] sm:$0xf]  ;;  %v9194_v7 = vld [vmem:[#allocation4 + $0x270] sm:$0xf0]  ;;  %v9069_v23 = vor.u32 %v10556_v1, %v9066_v58 }
 0x551   : > { %5183 = vmatpush.bf16.msra.mxu3 %v9373_v25  ;;  %v10620_v14 = vld [vmem:[#allocation4 + $0x364] sm:$0xf]  ;;  %v9322_v43 = vld [vmem:[#allocation4 + $0x370] sm:$0xf0]  ;;  %v9197_v11 = vor.u32 %v10588_v53, %v9194_v7 }
 0x552   : > { %5145 = vmatpush.bf16.msra.mxu0 %v8973_v0  ;;  %v10520_v50 = vld [vmem:[#allocation4 + $0x44] sm:$0xf]  ;;  %v8922_v12 = vld [vmem:[#allocation4 + $0x50] sm:$0xf0]  ;;  %v9325_v17 = vor.u32 %v10620_v14, %v9322_v43 }
 0x553   : > { %5158 = vmatpush.bf16.msra.mxu1 %v9101_v54  ;;  %v10552_v59 = vld [vmem:[#allocation4 + $0x144] sm:$0xf]  ;;  %v9050_v27 = vld [vmem:[#allocation4 + $0x150] sm:$0xf0]  ;;  %v8925_v42 = vor.u32 %v10520_v50, %v8922_v12 }
 0x554   : > { %5171 = vmatpush.bf16.msra.mxu2 %v9229_v39  ;;  %v10584_v16 = vld [vmem:[#allocation4 + $0x244] sm:$0xf]  ;;  %v9178_v2 = vld [vmem:[#allocation4 + $0x250] sm:$0xf0]  ;;  %v9053_v6 = vor.u32 %v10552_v59, %v9050_v27 }
 0x555   : > { %5184 = vmatpush.bf16.msra.mxu3 %v9357_v47  ;;  %v10616_v61 = vld [vmem:[#allocation4 + $0x344] sm:$0xf]  ;;  %v9306_v49 = vld [vmem:[#allocation4 + $0x350] sm:$0xf0]  ;;  %v9181_v29 = vor.u32 %v10584_v16, %v9178_v2 }
 0x556   : > { %5146 = vmatpush.bf16.msra.mxu0 %v8957_v62  ;;  %v10516_v55 = vld [vmem:[#allocation4 + $0x24] sm:$0xf]  ;;  %v8906_v63 = vld [vmem:[#allocation4 + $0x30] sm:$0xf0]  ;;  %v9309_v35 = vor.u32 %v10616_v61, %v9306_v49 }
 0x557   : > { %5159 = vmatpush.bf16.msra.mxu1 %v9085_v18  ;;  %v10548_v24 = vld [vmem:[#allocation4 + $0x124] sm:$0xf]  ;;  %v9034_v20 = vld [vmem:[#allocation4 + $0x130] sm:$0xf0]  ;;  %v8909_v48 = vor.u32 %v10516_v55, %v8906_v63 }
 0x558   : > { %5172 = vmatpush.bf16.msra.mxu2 %v9213_v45  ;;  %v10580_v4 = vld [vmem:[#allocation4 + $0x224] sm:$0xf]  ;;  %v9162_v60 = vld [vmem:[#allocation4 + $0x230] sm:$0xf0]  ;;  %v9037_v13 = vor.u32 %v10548_v24, %v9034_v20 }
 0x559   : > { %5185 = vmatpush.bf16.msra.mxu3 %v9341_v38  ;;  %v10612_v3 = vld [vmem:[#allocation4 + $0x324] sm:$0xf]  ;;  %v9290_v21 = vld [vmem:[#allocation4 + $0x330] sm:$0xf0]  ;;  %v9165_v46 = vor.u32 %v10580_v4, %v9162_v60 }
 0x55a   : > { %5147 = vmatpush.bf16.msra.mxu0 %v8941_v15  ;;  %v10512_v31 = vld [vmem:[#allocation4 + $0x4] sm:$0xf]  ;;  %v8890_v25 = vld [vmem:[#allocation4 + $0x10] sm:$0xf0]  ;;  %v9293_v0 = vor.u32 %v10612_v3, %v9290_v21 }
 0x55b   : > { %5160 = vmatpush.bf16.msra.mxu1 %v9069_v23  ;;  %v10544_v52 = vld [vmem:[#allocation4 + $0x104] sm:$0xf]  ;;  %v9018_v19 = vld [vmem:[#allocation4 + $0x110] sm:$0xf0]  ;;  %v8893_v44 = vor.u32 %v10512_v31, %v8890_v25 }
 0x55c   : > { %5173 = vmatpush.bf16.msra.mxu2 %v9197_v11  ;;  %v10576_v36 = vld [vmem:[#allocation4 + $0x204] sm:$0xf]  ;;  %v9146_v54 = vld [vmem:[#allocation4 + $0x210] sm:$0xf0]  ;;  %v9021_v51 = vor.u32 %v10544_v52, %v9018_v19 }
 0x55d   : > { %5186 = vmatpush.bf16.msra.mxu3 %v9325_v17  ;;  %v10608_v39 = vld [vmem:[#allocation4 + $0x304] sm:$0xf]  ;;  %v9274_v10 = vld [vmem:[#allocation4 + $0x310] sm:$0xf0]  ;;  %v9149_v62 = vor.u32 %v10576_v36, %v9146_v54 }
 0x55e   : > { %5148 = vmatpush.bf16.msra.mxu0 %v8925_v42  ;;  %v10668_v33 = vld [vmem:[#allocation4 + $0x4e4] sm:$0xf]  ;;  %v9514_v34 = vld [vmem:[#allocation4 + $0x4f0] sm:$0xf0]  ;;  %v9277_v28 = vor.u32 %v10608_v39, %v9274_v10 }
 0x55f   : > { %5161 = vmatpush.bf16.msra.mxu1 %v9053_v6  ;;  %v10700_v47 = vld [vmem:[#allocation4 + $0x5e4] sm:$0xf]  ;;  %v9642_v56 = vld [vmem:[#allocation4 + $0x5f0] sm:$0xf0]  ;;  %v9517_v26 = vor.u32 %v10668_v33, %v9514_v34 }
 0x560   : > { %5174 = vmatpush.bf16.msra.mxu2 %v9181_v29  ;;  %v10732_v5 = vld [vmem:[#allocation4 + $0x6e4] sm:$0xf]  ;;  %v9770_v30 = vld [vmem:[#allocation4 + $0x6f0] sm:$0xf0]  ;;  %v9645_v1 = vor.u32 %v10700_v47, %v9642_v56 }
 0x561   : > { %5187 = vmatpush.bf16.msra.mxu3 %v9309_v35  ;;  %v10764_v18 = vld [vmem:[#allocation4 + $0x7e4] sm:$0xf]  ;;  %v9898_v45 = vld [vmem:[#allocation4 + $0x7f0] sm:$0xf0]  ;;  %v9773_v38 = vor.u32 %v10732_v5, %v9770_v30 }
 0x562   : > { %5149 = vmatpush.bf16.msra.mxu0 %v8909_v48  ;;  %v10664_v58 = vld [vmem:[#allocation4 + $0x4c4] sm:$0xf]  ;;  %v9498_v53 = vld [vmem:[#allocation4 + $0x4d0] sm:$0xf0]  ;;  %v9901_v14 = vor.u32 %v10764_v18, %v9898_v45 }
 0x563   : > { %5162 = vmatpush.bf16.msra.mxu1 %v9037_v13  ;;  %v10696_v7 = vld [vmem:[#allocation4 + $0x5c4] sm:$0xf]  ;;  %v9626_v43 = vld [vmem:[#allocation4 + $0x5d0] sm:$0xf0]  ;;  %v9501_v12 = vor.u32 %v10664_v58, %v9498_v53 }
 0x564   : > { %5175 = vmatpush.bf16.msra.mxu2 %v9165_v46  ;;  %v10728_v15 = vld [vmem:[#allocation4 + $0x6c4] sm:$0xf]  ;;  %v9754_v23 = vld [vmem:[#allocation4 + $0x6d0] sm:$0xf0]  ;;  %v9629_v59 = vor.u32 %v10696_v7, %v9626_v43 }
 0x565   : > { %5188 = vmatpush.bf16.msra.mxu3 %v9293_v0  ;;  %v10760_v11 = vld [vmem:[#allocation4 + $0x7c4] sm:$0xf]  ;;  %v9882_v50 = vld [vmem:[#allocation4 + $0x7d0] sm:$0xf0]  ;;  %v9757_v17 = vor.u32 %v10728_v15, %v9754_v23 }
 0x566   : > { %5150 = vmatpush.bf16.msra.mxu0 %v8893_v44  ;;  %v10660_v27 = vld [vmem:[#allocation4 + $0x4a4] sm:$0xf]  ;;  %v9482_v16 = vld [vmem:[#allocation4 + $0x4b0] sm:$0xf0]  ;;  %v9885_v61 = vor.u32 %v10760_v11, %v9882_v50 }
 0x567   : > { %5163 = vmatpush.bf16.msra.mxu1 %v9021_v51  ;;  %v10692_v2 = vld [vmem:[#allocation4 + $0x5a4] sm:$0xf]  ;;  %v9610_v49 = vld [vmem:[#allocation4 + $0x5b0] sm:$0xf0]  ;;  %v9485_v63 = vor.u32 %v10660_v27, %v9482_v16 }
 0x568   : > { %5176 = vmatpush.bf16.msra.mxu2 %v9149_v62  ;;  %v10724_v42 = vld [vmem:[#allocation4 + $0x6a4] sm:$0xf]  ;;  %v9738_v6 = vld [vmem:[#allocation4 + $0x6b0] sm:$0xf0]  ;;  %v9613_v24 = vor.u32 %v10692_v2, %v9610_v49 }
 0x569   : > { %5189 = vmatpush.bf16.msra.mxu3 %v9277_v28  ;;  %v10756_v29 = vld [vmem:[#allocation4 + $0x7a4] sm:$0xf]  ;;  %v9866_v55 = vld [vmem:[#allocation4 + $0x7b0] sm:$0xf0]  ;;  %5151 = vmatmul.bf16.vlgmr.msra.gmra.mxu0 %v13090_v41  ;;  %v9741_v35 = vor.u32 %v10724_v42, %v9738_v6 }
 0x56a   : > { %5195 = vmatpush.bf16.msrb.mxu0 %v9517_v26  ;;  %5164 = vmatmul.bf16.vlgmr.msra.gmra.mxu1 %v13098_v37  ;;  %v10656_v20 = vld [vmem:[#allocation4 + $0x484] sm:$0xf]  ;;  %v9466_v4 = vld [vmem:[#allocation4 + $0x490] sm:$0xf0]  ;;  %v9869_v3 = vor.u32 %v10756_v29, %v9866_v55 }
 0x56b   : > { %5208 = vmatpush.bf16.msrb.mxu1 %v9645_v1  ;;  %5177 = vmatmul.bf16.vlgmr.msra.gmra.mxu2 %v13088_v32  ;;  %v10688_v60 = vld [vmem:[#allocation4 + $0x584] sm:$0xf]  ;;  %v9594_v21 = vld [vmem:[#allocation4 + $0x590] sm:$0xf0]  ;;  %v9469_v46 = vor.u32 %v10656_v20, %v9466_v4  ;;  %v9008_v4 = vld [vmem:[#allocation4 + $0xe8] sm:$0xf] }
 0x56c   : > { %5221 = vmatpush.bf16.msrb.mxu2 %v9773_v38  ;;  %5190 = vmatmul.bf16.vlgmr.msra.gmra.mxu3 %v13096_v22  ;;  %v10720_v48 = vld [vmem:[#allocation4 + $0x684] sm:$0xf]  ;;  %v9722_v31 = vld [vmem:[#allocation4 + $0x690] sm:$0xf0]  ;;  %v9597_v52 = vor.u32 %v10688_v60, %v9594_v21  ;;  %v10543_v60 = vld [vmem:[#allocation4 + $0xf4] sm:$0xf0] }
 0x56d   : > { %5234 = vmatpush.bf16.msrb.mxu3 %v9901_v14  ;;  %v10752_v25 = vld [vmem:[#allocation4 + $0x784] sm:$0xf]  ;;  %v9850_v13 = vld [vmem:[#allocation4 + $0x790] sm:$0xf0]  ;;  %v9725_v19 = vor.u32 %v10720_v48, %v9722_v31  ;;  %v10575_v48 = vld [vmem:[#allocation4 + $0x1f4] sm:$0xf0] }
 0x56e   : > { %5196 = vmatpush.bf16.msrb.mxu0 %v9501_v12  ;;  %v10652_v36 = vld [vmem:[#allocation4 + $0x464] sm:$0xf]  ;;  %v9450_v0 = vld [vmem:[#allocation4 + $0x470] sm:$0xf0]  ;;  %v9853_v39 = vor.u32 %v10752_v25, %v9850_v13  ;;  %v9264_v31 = vld [vmem:[#allocation4 + $0x2e8] sm:$0xf] }
 0x56f   : > { %5209 = vmatpush.bf16.msrb.mxu1 %v9629_v59  ;;  %v10684_v54 = vld [vmem:[#allocation4 + $0x564] sm:$0xf]  ;;  %v9578_v10 = vld [vmem:[#allocation4 + $0x570] sm:$0xf0]  ;;  %v9453_v56 = vor.u32 %v10652_v36, %v9450_v0  ;;  %v10607_v25 = vld [vmem:[#allocation4 + $0x2f4] sm:$0xf0]  ;;  %v9009_v0 = vor.u32 %v10543_v60, %v9008_v4 }
 0x570   : > { %5222 = vmatpush.bf16.msrb.mxu2 %v9757_v17  ;;  %v10716_v33 = vld [vmem:[#allocation4 + $0x664] sm:$0xf]  ;;  %v9706_v34 = vld [vmem:[#allocation4 + $0x670] sm:$0xf0]  ;;  %v9581_v5 = vor.u32 %v10684_v54, %v9578_v10  ;;  %v8992_v10 = vld [vmem:[#allocation4 + $0xc8] sm:$0xf] }
 0x571   : > { %5235 = vmatpush.bf16.msrb.mxu3 %v9885_v61  ;;  %v10748_v47 = vld [vmem:[#allocation4 + $0x764] sm:$0xf]  ;;  %v9834_v44 = vld [vmem:[#allocation4 + $0x770] sm:$0xf0]  ;;  %v9709_v30 = vor.u32 %v10716_v33, %v9706_v34  ;;  %v10539_v33 = vld [vmem:[#allocation4 + $0xd4] sm:$0xf0] }
 0x572   : > { %5197 = vmatpush.bf16.msrb.mxu0 %v9485_v63  ;;  %v10648_v51 = vld [vmem:[#allocation4 + $0x444] sm:$0xf]  ;;  %v9434_v62 = vld [vmem:[#allocation4 + $0x450] sm:$0xf0]  ;;  %v9837_v45 = vor.u32 %v10748_v47, %v9834_v44  ;;  %v9120_v34 = vld [vmem:[#allocation4 + $0x1c8] sm:$0xf] }
 0x573   : > { %5210 = vmatpush.bf16.msrb.mxu1 %v9613_v24  ;;  %v10680_v18 = vld [vmem:[#allocation4 + $0x544] sm:$0xf]  ;;  %v9562_v28 = vld [vmem:[#allocation4 + $0x550] sm:$0xf0]  ;;  %v9437_v53 = vor.u32 %v10648_v51, %v9434_v62  ;;  %v10571_v44 = vld [vmem:[#allocation4 + $0x1d4] sm:$0xf0]  ;;  %v8993_v62 = vor.u32 %v10539_v33, %v8992_v10 }
 0x574   : > { %5223 = vmatpush.bf16.msrb.mxu2 %v9741_v35  ;;  %v10712_v26 = vld [vmem:[#allocation4 + $0x644] sm:$0xf]  ;;  %v9690_v1 = vld [vmem:[#allocation4 + $0x650] sm:$0xf0]  ;;  %v9565_v7 = vor.u32 %v10680_v18, %v9562_v28  ;;  %v10635_v51 = vld [vmem:[#allocation4 + $0x3d4] sm:$0xf0]  ;;  %v9121_v18 = vor.u32 %v10571_v44, %v9120_v34 }
 0x575   : > { %5236 = vmatpush.bf16.msrb.mxu3 %v9869_v3  ;;  %v10744_v38 = vld [vmem:[#allocation4 + $0x744] sm:$0xf]  ;;  %v9818_v58 = vld [vmem:[#allocation4 + $0x750] sm:$0xf0]  ;;  %v9693_v14 = vor.u32 %v10712_v26, %v9690_v1  ;;  %v9136_v3 = vld [vmem:[#allocation4 + $0x1e8] sm:$0xf] }
 0x576   : > { %5198 = vmatpush.bf16.msrb.mxu0 %v9469_v46  ;;  %v10644_v43 = vld [vmem:[#allocation4 + $0x424] sm:$0xf]  ;;  %v9418_v15 = vld [vmem:[#allocation4 + $0x430] sm:$0xf0]  ;;  %v9821_v11 = vor.u32 %v10744_v38, %v9818_v58  ;;  %v9137_v54 = vor.u32 %v10575_v48, %v9136_v3  ;;  %v8976_v28 = vld [vmem:[#allocation4 + $0xa8] sm:$0xf] }
 0x577   : > { %5211 = vmatpush.bf16.msrb.mxu1 %v9597_v52  ;;  %v10676_v23 = vld [vmem:[#allocation4 + $0x524] sm:$0xf]  ;;  %v9546_v50 = vld [vmem:[#allocation4 + $0x530] sm:$0xf0]  ;;  %v9421_v16 = vor.u32 %v10644_v43, %v9418_v15  ;;  %v9392_v52 = vld [vmem:[#allocation4 + $0x3e8] sm:$0xf] }
 0x578   : > { %5224 = vmatpush.bf16.msrb.mxu2 %v9725_v19  ;;  %v10708_v12 = vld [vmem:[#allocation4 + $0x624] sm:$0xf]  ;;  %v9674_v59 = vld [vmem:[#allocation4 + $0x630] sm:$0xf0]  ;;  %v9549_v49 = vor.u32 %v10676_v23, %v9546_v50  ;;  %v10639_v19 = vld [vmem:[#allocation4 + $0x3f4] sm:$0xf0] }
 0x579   : > { %5237 = vmatpush.bf16.msrb.mxu3 %v9853_v39  ;;  %v10740_v17 = vld [vmem:[#allocation4 + $0x724] sm:$0xf]  ;;  %v9802_v27 = vld [vmem:[#allocation4 + $0x730] sm:$0xf0]  ;;  %v9677_v42 = vor.u32 %v10708_v12, %v9674_v59  ;;  %v9265_v39 = vor.u32 %v10607_v25, %v9264_v31  ;;  %v9393_v47 = vor.u32 %v10639_v19, %v9392_v52  ;;  %v10535_v26 = vld [vmem:[#allocation4 + $0xb4] sm:$0xf0] }
 0x57a   : > { %5199 = vmatpush.bf16.msrb.mxu0 %v9453_v56  ;;  %v10640_v2 = vld [vmem:[#allocation4 + $0x404] sm:$0xf]  ;;  %v9402_v61 = vld [vmem:[#allocation4 + $0x410] sm:$0xf0]  ;;  %v9805_v63 = vor.u32 %v10740_v17, %v9802_v27  ;;  %v9248_v56 = vld [vmem:[#allocation4 + $0x2c8] sm:$0xf]  ;;  %v8977_v15 = vor.u32 %v10535_v26, %v8976_v28 }
 0x57b   : > { %5212 = vmatpush.bf16.msrb.mxu1 %v9581_v5  ;;  %v10672_v6 = vld [vmem:[#allocation4 + $0x504] sm:$0xf]  ;;  %v9530_v29 = vld [vmem:[#allocation4 + $0x510] sm:$0xf0]  ;;  %v9405_v21 = vor.u32 %v10640_v2, %v9402_v61  ;;  %v10603_v5 = vld [vmem:[#allocation4 + $0x2d4] sm:$0xf0] }
 0x57c   : > { %5225 = vmatpush.bf16.msrb.mxu2 %v9709_v30  ;;  %v10704_v55 = vld [vmem:[#allocation4 + $0x604] sm:$0xf]  ;;  %v9658_v24 = vld [vmem:[#allocation4 + $0x610] sm:$0xf0]  ;;  %v9533_v13 = vor.u32 %v10672_v6, %v9530_v29  ;;  %v9376_v30 = vld [vmem:[#allocation4 + $0x3c8] sm:$0xf] }
 0x57d   : > { %5238 = vmatpush.bf16.msrb.mxu3 %v9837_v45  ;;  %v10736_v35 = vld [vmem:[#allocation4 + $0x704] sm:$0xf]  ;;  %v9786_v20 = vld [vmem:[#allocation4 + $0x710] sm:$0xf0]  ;;  %v9661_v46 = vor.u32 %v10704_v55, %v9658_v24  ;;  %v9249_v45 = vor.u32 %v10603_v5, %v9248_v56  ;;  %v9104_v1 = vld [vmem:[#allocation4 + $0x1a8] sm:$0xf]  ;;  %v9377_v38 = vor.u32 %v10635_v51, %v9376_v30 }
 0x57e   : > { %5200 = vmatpush.bf16.msrb.mxu0 %v9437_v53  ;;  %v9789_v36 = vor.u32 %v10736_v35, %v9786_v20  ;;  %v10567_v58 = vld [vmem:[#allocation4 + $0x1b4] sm:$0xf0]  ;;  %v9232_v53 = vld [vmem:[#allocation4 + $0x2a8] sm:$0xf] }
 0x57f   : > { %5213 = vmatpush.bf16.msrb.mxu1 %v9565_v7  ;;  %v10599_v7 = vld [vmem:[#allocation4 + $0x2b4] sm:$0xf0]  ;;  %v9105_v23 = vor.u32 %v10567_v58, %v9104_v1  ;;  %v8960_v50 = vld [vmem:[#allocation4 + $0x88] sm:$0xf] }
 0x580   : > { %5226 = vmatpush.bf16.msrb.mxu2 %v9693_v14  ;;  %v9360_v14 = vld [vmem:[#allocation4 + $0x3a8] sm:$0xf]  ;;  %v10631_v43 = vld [vmem:[#allocation4 + $0x3b4] sm:$0xf0] }
 0x581   : > { %5239 = vmatpush.bf16.msrb.mxu3 %v9821_v11  ;;  %v9233_v11 = vor.u32 %v10599_v7, %v9232_v53  ;;  %v10531_v12 = vld [vmem:[#allocation4 + $0x94] sm:$0xf0]  ;;  %v9088_v59 = vld [vmem:[#allocation4 + $0x188] sm:$0xf]  ;;  %v9361_v17 = vor.u32 %v10631_v43, %v9360_v14 }
 0x582   : > { %5201 = vmatpush.bf16.msrb.mxu0 %v9421_v16  ;;  %v10563_v27 = vld [vmem:[#allocation4 + $0x194] sm:$0xf0]  ;;  %v9216_v16 = vld [vmem:[#allocation4 + $0x288] sm:$0xf] }
 0x583   : > { %5214 = vmatpush.bf16.msrb.mxu1 %v9549_v49  ;;  %v10595_v2 = vld [vmem:[#allocation4 + $0x294] sm:$0xf0]  ;;  %v9344_v61 = vld [vmem:[#allocation4 + $0x388] sm:$0xf]  ;;  %v9089_v6 = vor.u32 %v10563_v27, %v9088_v59 }
 0x584   : > { %5227 = vmatpush.bf16.msrb.mxu2 %v9677_v42  ;;  %v10627_v49 = vld [vmem:[#allocation4 + $0x394] sm:$0xf0]  ;;  %v8961_v42 = vor.u32 %v10531_v12, %v8960_v50  ;;  %v9217_v29 = vor.u32 %v10595_v2, %v9216_v16  ;;  %v8944_v55 = vld [vmem:[#allocation4 + $0x68] sm:$0xf] }
 0x585   : > { %5240 = vmatpush.bf16.msrb.mxu3 %v9805_v63  ;;  %v10527_v63 = vld [vmem:[#allocation4 + $0x74] sm:$0xf0]  ;;  %v9072_v24 = vld [vmem:[#allocation4 + $0x168] sm:$0xf]  ;;  %v9345_v35 = vor.u32 %v10627_v49, %v9344_v61 }
 0x586   : > { %5202 = vmatpush.bf16.msrb.mxu0 %v9405_v21  ;;  %v10559_v20 = vld [vmem:[#allocation4 + $0x174] sm:$0xf0]  ;;  %v9200_v4 = vld [vmem:[#allocation4 + $0x268] sm:$0xf]  ;;  %v8945_v48 = vor.u32 %v10527_v63, %v8944_v55 }
 0x587   : > { %5215 = vmatpush.bf16.msrb.mxu1 %v9533_v13  ;;  %v10591_v60 = vld [vmem:[#allocation4 + $0x274] sm:$0xf0]  ;;  %v9328_v3 = vld [vmem:[#allocation4 + $0x368] sm:$0xf]  ;;  %v9073_v31 = vor.u32 %v10559_v20, %v9072_v24 }
 0x588   : > { %5228 = vmatpush.bf16.msrb.mxu2 %v9661_v46  ;;  %v10623_v21 = vld [vmem:[#allocation4 + $0x374] sm:$0xf0]  ;;  %v9201_v25 = vor.u32 %v10591_v60, %v9200_v4  ;;  %v8928_v13 = vld [vmem:[#allocation4 + $0x48] sm:$0xf] }
 0x589   : > { %5241 = vmatpush.bf16.msrb.mxu3 %v9789_v36  ;;  %5203 = vmatmul.bf16.vlgmr.msrb.gmra.mxu0 %v13108_v8  ;;  %v10523_v46 = vld [vmem:[#allocation4 + $0x54] sm:$0xf0]  ;;  %v9056_v52 = vld [vmem:[#allocation4 + $0x148] sm:$0xf]  ;;  %v9329_v19 = vor.u32 %v10623_v21, %v9328_v3 }
 0x58a   : > { %5247 = vmatpush.bf16.msra.mxu0 %v9009_v0  ;;  %5216 = vmatmul.bf16.vlgmr.msrb.gmra.mxu1 %v13112_v9  ;;  %v10555_v36 = vld [vmem:[#allocation4 + $0x154] sm:$0xf0]  ;;  %v9184_v0 = vld [vmem:[#allocation4 + $0x248] sm:$0xf]  ;;  %v8929_v33 = vor.u32 %v10523_v46, %v8928_v13 }
 0x58b   : > { %5260 = vmatpush.bf16.msra.mxu1 %v9137_v54  ;;  %5229 = vmatmul.bf16.vlgmr.msrb.gmra.mxu2 %v13106_v40  ;;  %v10587_v54 = vld [vmem:[#allocation4 + $0x254] sm:$0xf0]  ;;  %v9057_v34 = vor.u32 %v10555_v36, %v9056_v52  ;;  %v8912_v44 = vld [vmem:[#allocation4 + $0x28] sm:$0xf] }
 0x58c   : > { %5273 = vmatpush.bf16.msra.mxu2 %v9265_v39  ;;  %5242 = vmatmul.bf16.vlgmr.msrb.gmra.mxu3 %v13110_v57  ;;  %v9312_v39 = vld [vmem:[#allocation4 + $0x348] sm:$0xf]  ;;  %v10619_v10 = vld [vmem:[#allocation4 + $0x354] sm:$0xf0] }
 0x58d   : > { %5286 = vmatpush.bf16.msra.mxu3 %v9393_v47  ;;  %v9185_v47 = vor.u32 %v10587_v54, %v9184_v0  ;;  %v10519_v56 = vld [vmem:[#allocation4 + $0x34] sm:$0xf0]  ;;  %v9040_v5 = vld [vmem:[#allocation4 + $0x128] sm:$0xf]  ;;  %v9313_v30 = vor.u32 %v10619_v10, %v9312_v39 }
 0x58e   : > { %5248 = vmatpush.bf16.msra.mxu0 %v8993_v62  ;;  %v10551_v51 = vld [vmem:[#allocation4 + $0x134] sm:$0xf0]  ;;  %v9168_v62 = vld [vmem:[#allocation4 + $0x228] sm:$0xf]  ;;  %v8913_v26 = vor.u32 %v10519_v56, %v8912_v44 }
 0x58f   : > { %5261 = vmatpush.bf16.msra.mxu1 %v9121_v18  ;;  %v10583_v18 = vld [vmem:[#allocation4 + $0x234] sm:$0xf0]  ;;  %v8896_v1 = vld [vmem:[#allocation4 + $0x8] sm:$0xf]  ;;  %v9041_v58 = vor.u32 %v10551_v51, %v9040_v5 }
 0x590   : > { %5274 = vmatpush.bf16.msra.mxu2 %v9249_v45  ;;  %v9296_v45 = vld [vmem:[#allocation4 + $0x328] sm:$0xf]  ;;  %v10615_v28 = vld [vmem:[#allocation4 + $0x334] sm:$0xf0]  ;;  %v9169_v53 = vor.u32 %v10583_v18, %v9168_v62 }
 0x591   : > { %5287 = vmatpush.bf16.msra.mxu3 %v9377_v38  ;;  %v10515_v38 = vld [vmem:[#allocation4 + $0x14] sm:$0xf0]  ;;  %v9024_v7 = vld [vmem:[#allocation4 + $0x108] sm:$0xf] }
 0x592   : > { %5249 = vmatpush.bf16.msra.mxu0 %v8977_v15  ;;  %v10547_v14 = vld [vmem:[#allocation4 + $0x114] sm:$0xf0]  ;;  %v9152_v43 = vld [vmem:[#allocation4 + $0x208] sm:$0xf]  ;;  %v9297_v15 = vor.u32 %v10615_v28, %v9296_v45  ;;  %v8897_v27 = vor.u32 %v10515_v38, %v8896_v1  ;;  %v13133_v38 = vld [vmem:[%s14975_s11] sm:$0xf] }
 0x593   : > { %5262 = vmatpush.bf16.msra.mxu1 %v9105_v23  ;;  %v10579_v23 = vld [vmem:[#allocation4 + $0x214] sm:$0xf0]  ;;  %v9520_v12 = vld [vmem:[#allocation4 + $0x4e8] sm:$0xf]  ;;  %v9025_v49 = vor.u32 %v10547_v14, %v9024_v7 }
 0x594   : > { %5275 = vmatpush.bf16.msra.mxu2 %v9233_v11  ;;  %v9280_v11 = vld [vmem:[#allocation4 + $0x308] sm:$0xf]  ;;  %v10611_v50 = vld [vmem:[#allocation4 + $0x314] sm:$0xf0] }
 0x595   : > { %5288 = vmatpush.bf16.msra.mxu3 %v9361_v17  ;;  %v10671_v59 = vld [vmem:[#allocation4 + $0x4f4] sm:$0xf0]  ;;  %v9648_v17 = vld [vmem:[#allocation4 + $0x5e8] sm:$0xf]  ;;  %v9281_v55 = vor.u32 %v10611_v50, %v9280_v11  ;;  %v5031_v50 = vperm.slane %v13133_v38, 0 }
 0x596   : > { %5250 = vmatpush.bf16.msra.mxu0 %v8961_v42  ;;  %v10703_v16 = vld [vmem:[#allocation4 + $0x5f4] sm:$0xf0]  ;;  %v9776_v2 = vld [vmem:[#allocation4 + $0x6e8] sm:$0xf]  ;;  %v9153_v42 = vor.u32 %v10579_v23, %v9152_v43  ;;  %v9521_v63 = vor.u32 %v10671_v59, %v9520_v12 }
 0x597   : > { %5263 = vmatpush.bf16.msra.mxu1 %v9089_v6  ;;  %v10735_v61 = vld [vmem:[#allocation4 + $0x6f4] sm:$0xf0]  ;;  %v9904_v6 = vld [vmem:[#allocation4 + $0x7e8] sm:$0xf]  ;;  %v9649_v24 = vor.u32 %v10703_v16, %v9648_v17 }
 0x598   : > { %5276 = vmatpush.bf16.msra.mxu2 %v9217_v29  ;;  %v10767_v29 = vld [vmem:[#allocation4 + $0x7f4] sm:$0xf0]  ;;  %v9504_v20 = vld [vmem:[#allocation4 + $0x4c8] sm:$0xf] }
 0x599   : > { %5289 = vmatpush.bf16.msra.mxu3 %v9345_v35  ;;  %v9777_v35 = vor.u32 %v10735_v61, %v9776_v2  ;;  %v10667_v4 = vld [vmem:[#allocation4 + $0x4d4] sm:$0xf0]  ;;  %v9632_v60 = vld [vmem:[#allocation4 + $0x5c8] sm:$0xf]  ;;  %v9905_v3 = vor.u32 %v10767_v29, %v9904_v6 }
 0x59a   : > { %5251 = vmatpush.bf16.msra.mxu0 %v8945_v48  ;;  %v10699_v21 = vld [vmem:[#allocation4 + $0x5d4] sm:$0xf0]  ;;  %v9760_v48 = vld [vmem:[#allocation4 + $0x6c8] sm:$0xf]  ;;  %v9505_v46 = vor.u32 %v10667_v4, %v9504_v20 }
 0x59b   : > { %5264 = vmatpush.bf16.msra.mxu1 %v9073_v31  ;;  %v10731_v31 = vld [vmem:[#allocation4 + $0x6d4] sm:$0xf0]  ;;  %v9633_v52 = vor.u32 %v10699_v21, %v9632_v60  ;;  %v9488_v36 = vld [vmem:[#allocation4 + $0x4a8] sm:$0xf] }
 0x59c   : > { %5277 = vmatpush.bf16.msra.mxu2 %v9201_v25  ;;  %v9888_v25 = vld [vmem:[#allocation4 + $0x7c8] sm:$0xf]  ;;  %v10763_v13 = vld [vmem:[#allocation4 + $0x7d4] sm:$0xf0] }
 0x59d   : > { %5290 = vmatpush.bf16.msra.mxu3 %v9329_v19  ;;  %v9761_v19 = vor.u32 %v10731_v31, %v9760_v48  ;;  %v10663_v0 = vld [vmem:[#allocation4 + $0x4b4] sm:$0xf0]  ;;  %v9616_v54 = vld [vmem:[#allocation4 + $0x5a8] sm:$0xf]  ;;  %v9889_v39 = vor.u32 %v10763_v13, %v9888_v25 }
 0x59e   : > { %5252 = vmatpush.bf16.msra.mxu0 %v8929_v33  ;;  %v10695_v10 = vld [vmem:[#allocation4 + $0x5b4] sm:$0xf0]  ;;  %v9744_v33 = vld [vmem:[#allocation4 + $0x6a8] sm:$0xf]  ;;  %v9489_v56 = vor.u32 %v10663_v0, %v9488_v36 }
 0x59f   : > { %5265 = vmatpush.bf16.msra.mxu1 %v9057_v34  ;;  %v10727_v34 = vld [vmem:[#allocation4 + $0x6b4] sm:$0xf0]  ;;  %v9472_v5 = vld [vmem:[#allocation4 + $0x488] sm:$0xf] }
 0x5a0   : > { %5278 = vmatpush.bf16.msra.mxu2 %v9185_v47  ;;  %v9872_v47 = vld [vmem:[#allocation4 + $0x7a8] sm:$0xf]  ;;  %v10759_v44 = vld [vmem:[#allocation4 + $0x7b4] sm:$0xf0]  ;;  %v9745_v51 = vor.u32 %v10727_v34, %v9744_v33 }
 0x5a1   : > { %5291 = vmatpush.bf16.msra.mxu3 %v9313_v30  ;;  %v9617_v30 = vor.u32 %v10695_v10, %v9616_v54  ;;  %v10659_v62 = vld [vmem:[#allocation4 + $0x494] sm:$0xf0]  ;;  %v9600_v18 = vld [vmem:[#allocation4 + $0x588] sm:$0xf]  ;;  %v9873_v28 = vor.u32 %v10759_v44, %v9872_v47 }
 0x5a2   : > { %5253 = vmatpush.bf16.msra.mxu0 %v8913_v26  ;;  %v10691_v45 = vld [vmem:[#allocation4 + $0x594] sm:$0xf0]  ;;  %v9728_v26 = vld [vmem:[#allocation4 + $0x688] sm:$0xf]  ;;  %v9473_v7 = vor.u32 %v10659_v62, %v9472_v5 }
 0x5a3   : > { %5266 = vmatpush.bf16.msra.mxu1 %v9041_v58  ;;  %v10723_v1 = vld [vmem:[#allocation4 + $0x694] sm:$0xf0]  ;;  %v9856_v58 = vld [vmem:[#allocation4 + $0x788] sm:$0xf]  ;;  %v9601_v43 = vor.u32 %v10691_v45, %v9600_v18 }
 0x5a4   : > { %5279 = vmatpush.bf16.msra.mxu2 %v9169_v53  ;;  %v10755_v53 = vld [vmem:[#allocation4 + $0x794] sm:$0xf0]  ;;  %v9456_v14 = vld [vmem:[#allocation4 + $0x468] sm:$0xf] }
 0x5a5   : > { %5292 = vmatpush.bf16.msra.mxu3 %v9297_v15  ;;  %v9729_v15 = vor.u32 %v10723_v1, %v9728_v26  ;;  %v10655_v23 = vld [vmem:[#allocation4 + $0x474] sm:$0xf0]  ;;  %v9584_v11 = vld [vmem:[#allocation4 + $0x568] sm:$0xf]  ;;  %v9857_v12 = vor.u32 %v10755_v53, %v9856_v58 }
 0x5a6   : > { %5254 = vmatpush.bf16.msra.mxu0 %v8897_v27  ;;  %v10687_v59 = vld [vmem:[#allocation4 + $0x574] sm:$0xf0]  ;;  %v9712_v17 = vld [vmem:[#allocation4 + $0x668] sm:$0xf]  ;;  %v9457_v61 = vor.u32 %v10655_v23, %v9456_v14  ;;  %v10573_v23 = vld [vmem:[#allocation4 + $0x1ec] sm:$0xf] }
 0x5a7   : > { %5267 = vmatpush.bf16.msra.mxu1 %v9025_v49  ;;  %v10719_v27 = vld [vmem:[#allocation4 + $0x674] sm:$0xf0]  ;;  %v9840_v16 = vld [vmem:[#allocation4 + $0x768] sm:$0xf]  ;;  %v5048_v49 = vpop.f32.mrf.mxu0  ;;  %v5061_v48 = vpop.f32.mrf.mxu1 }
 0x5a8   : > { %5280 = vmatpush.bf16.msra.mxu2 %v9153_v42  ;;  %v10751_v2 = vld [vmem:[#allocation4 + $0x774] sm:$0xf0]  ;;  %v9585_v42 = vor.u32 %v10687_v59, %v9584_v11  ;;  %v9713_v6 = vor.u32 %v10719_v27, %v9712_v17  ;;  %v9440_v29 = vld [vmem:[#allocation4 + $0x448] sm:$0xf]  ;;  %v9138_v59 = vld [vmem:[#allocation4 + $0x1f8] sm:$0xf0] }
 0x5a9   : > { %5293 = vmatpush.bf16.msra.mxu3 %v9281_v55  ;;  %5255 = vmatmul.bf16.vlgmr.msra.gmra.mxu0 %v13090_v41  ;;  %v10651_v55 = vld [vmem:[#allocation4 + $0x454] sm:$0xf0]  ;;  %v9696_v4 = vld [vmem:[#allocation4 + $0x648] sm:$0xf]  ;;  %v10605_v17 = vld [vmem:[#allocation4 + $0x2ec] sm:$0xf] }
 0x5aa   : > { %5299 = vmatpush.bf16.msrb.mxu0 %v9521_v63  ;;  %5268 = vmatmul.bf16.vlgmr.msra.gmra.mxu1 %v13098_v37  ;;  %v9568_v63 = vld [vmem:[#allocation4 + $0x548] sm:$0xf]  ;;  %v10683_v20 = vld [vmem:[#allocation4 + $0x554] sm:$0xf0]  ;;  %v9441_v31 = vor.u32 %v10651_v55, %v9440_v29  ;;  %v9266_v27 = vld [vmem:[#allocation4 + $0x2f8] sm:$0xf0]  ;;  %v9141_v55 = vor.u32 %v10573_v23, %v9138_v59 }
 0x5ab   : > { %5312 = vmatpush.bf16.msrb.mxu1 %v9649_v24  ;;  %5281 = vmatmul.bf16.vlgmr.msra.gmra.mxu2 %v13088_v32  ;;  %v5049_v24 = vadd.f32 %v5048_v49, %v5031_v50  ;;  %v10715_v60 = vld [vmem:[#allocation4 + $0x654] sm:$0xf0]  ;;  %v9569_v13 = vor.u32 %v10683_v20, %v9568_v63  ;;  %v9552_v36 = vld [vmem:[#allocation4 + $0x528] sm:$0xf]  ;;  %v9394_v49 = vld [vmem:[#allocation4 + $0x3f8] sm:$0xf0]  ;;  %v9269_v63 = vor.u32 %v10605_v17, %v9266_v27 }
 0x5ac   : > { %5325 = vmatpush.bf16.msrb.mxu2 %v9777_v35  ;;  %5294 = vmatmul.bf16.vlgmr.msra.gmra.mxu3 %v13096_v22  ;;  %v9841_v35 = vor.u32 %v10751_v2, %v9840_v16  ;;  %v10747_v21 = vld [vmem:[#allocation4 + $0x754] sm:$0xf0]  ;;  %v9680_v10 = vld [vmem:[#allocation4 + $0x628] sm:$0xf]  ;;  %v10569_v20 = vld [vmem:[#allocation4 + $0x1cc] sm:$0xf] }
 0x5ad   : > { %5338 = vmatpush.bf16.msrb.mxu3 %v9905_v3  ;;  %v9824_v3 = vld [vmem:[#allocation4 + $0x748] sm:$0xf]  ;;  %v5062_v25 = vadd.f32 %v5061_v48, %v5049_v24  ;;  %v10711_v33 = vld [vmem:[#allocation4 + $0x634] sm:$0xf0]  ;;  %v10537_v24 = vld [vmem:[#allocation4 + $0xcc] sm:$0xf] }
 0x5ae   : > { %5300 = vmatpush.bf16.msrb.mxu0 %v9505_v46  ;;  %v9697_v46 = vor.u32 %v10715_v60, %v9696_v4  ;;  %v5074_v0 = vpop.f32.mrf.mxu2  ;;  %v9825_v54 = vor.u32 %v10747_v21, %v9824_v3  ;;  %v9808_v47 = vld [vmem:[#allocation4 + $0x728] sm:$0xf]  ;;  %v10743_v44 = vld [vmem:[#allocation4 + $0x734] sm:$0xf0]  ;;  %v9681_v18 = vor.u32 %v10711_v33, %v9680_v10  ;;  %v9122_v60 = vld [vmem:[#allocation4 + $0x1d8] sm:$0xf0] }
 0x5af   : > { %5313 = vmatpush.bf16.msrb.mxu1 %v9633_v52  ;;  %v9424_v52 = vld [vmem:[#allocation4 + $0x428] sm:$0xf]  ;;  %v5075_v34 = vadd.f32 %v5074_v0, %v5062_v25  ;;  %v9809_v1 = vor.u32 %v10743_v44, %v9808_v47  ;;  %v10707_v58 = vld [vmem:[#allocation4 + $0x614] sm:$0xf0]  ;;  %v5087_v14 = vpop.f32.mrf.mxu3  ;;  %v5063_v50 = vpop.f32.mrf.mxu1  ;;  %v10601_v3 = vld [vmem:[#allocation4 + $0x2cc] sm:$0xf] }
 0x5b0   : > { %5326 = vmatpush.bf16.msrb.mxu2 %v9761_v19  ;;  %v10647_v19 = vld [vmem:[#allocation4 + $0x434] sm:$0xf0]  ;;  %v9408_v5 = vld [vmem:[#allocation4 + $0x408] sm:$0xf]  ;;  %v9250_v21 = vld [vmem:[#allocation4 + $0x2d8] sm:$0xf0] }
 0x5b1   : > { %5339 = vmatpush.bf16.msrb.mxu3 %v9889_v39  ;;  %v10679_v39 = vld [vmem:[#allocation4 + $0x534] sm:$0xf0]  ;;  %v9536_v45 = vld [vmem:[#allocation4 + $0x508] sm:$0xf]  ;;  %v13136_v11 = vadd.f32 %v5087_v14, %v5075_v34  ;;  %v10633_v48 = vld [vmem:[#allocation4 + $0x3cc] sm:$0xf] }
 0x5b2   : > { %5301 = vmatpush.bf16.msrb.mxu0 %v9489_v56  ;;  %v9425_v56 = vor.u32 %v10647_v19, %v9424_v52  ;;  %v9553_v62 = vor.u32 %v10679_v39, %v9552_v36  ;;  %v9664_v26 = vld [vmem:[#allocation4 + $0x608] sm:$0xf]  ;;  %v9253_v52 = vor.u32 %v10601_v3, %v9250_v21  ;;  %v10533_v19 = vld [vmem:[#allocation4 + $0xac] sm:$0xf]  ;;  %v8978_v36 = vld [vmem:[#allocation4 + $0xb8] sm:$0xf0] }
 0x5b3   : > { %5314 = vmatpush.bf16.msrb.mxu1 %v9617_v30  ;;  %v10643_v30 = vld [vmem:[#allocation4 + $0x414] sm:$0xf0]  ;;  %v9792_v53 = vld [vmem:[#allocation4 + $0x708] sm:$0xf]  ;;  %v9665_v2 = vor.u32 %v10707_v58, %v9664_v26  ;;  %v10565_v0 = vld [vmem:[#allocation4 + $0x1ac] sm:$0xf]  ;;  %v8981_v44 = vor.u32 %v10533_v19, %v8978_v36 }
 0x5b4   : > { %5327 = vmatpush.bf16.msrb.mxu2 %v9745_v51  ;;  %v5050_v51 = vpop.f32.mrf.mxu0  ;;  %v9106_v39 = vld [vmem:[#allocation4 + $0x1b8] sm:$0xf0]  ;;  %v10597_v10 = vld [vmem:[#allocation4 + $0x2ac] sm:$0xf] }
 0x5b5   : > { %5340 = vmatpush.bf16.msrb.mxu3 %v9873_v28  ;;  %v10675_v28 = vld [vmem:[#allocation4 + $0x514] sm:$0xf0]  ;;  %v9234_v33 = vld [vmem:[#allocation4 + $0x2b8] sm:$0xf0]  ;;  %v10629_v34 = vld [vmem:[#allocation4 + $0x3ac] sm:$0xf] }
 0x5b6   : > { %5302 = vmatpush.bf16.msrb.mxu0 %v9473_v7  ;;  %v10739_v7 = vld [vmem:[#allocation4 + $0x714] sm:$0xf0]  ;;  %v9537_v16 = vor.u32 %v10675_v28, %v9536_v45  ;;  %v9362_v47 = vld [vmem:[#allocation4 + $0x3b8] sm:$0xf0]  ;;  %v10593_v28 = vld [vmem:[#allocation4 + $0x28c] sm:$0xf] }
 0x5b7   : > { %5315 = vmatpush.bf16.msrb.mxu1 %v9601_v43  ;;  %v10541_v43 = vld [vmem:[#allocation4 + $0xec] sm:$0xf]  ;;  %v8962_v51 = vld [vmem:[#allocation4 + $0x98] sm:$0xf0] }
 0x5b8   : > { %5328 = vmatpush.bf16.msrb.mxu2 %v9729_v15  ;;  %v9010_v15 = vld [vmem:[#allocation4 + $0xf8] sm:$0xf0]  ;;  %v10557_v50 = vld [vmem:[#allocation4 + $0x16c] sm:$0xf] }
 0x5b9   : > { %5341 = vmatpush.bf16.msrb.mxu3 %v9857_v12  ;;  %v9409_v12 = vor.u32 %v10643_v30, %v9408_v5  ;;  %v9013_v29 = vor.u32 %v10541_v43, %v9010_v15  ;;  %v9237_v5 = vor.u32 %v10597_v10, %v9234_v33  ;;  %v10529_v30 = vld [vmem:[#allocation4 + $0x8c] sm:$0xf]  ;;  %v9090_v45 = vld [vmem:[#allocation4 + $0x198] sm:$0xf0] }
 0x5ba   : > { %5303 = vmatpush.bf16.msrb.mxu0 %v9457_v61  ;;  %v10637_v61 = vld [vmem:[#allocation4 + $0x3ec] sm:$0xf]  ;;  %v9218_v26 = vld [vmem:[#allocation4 + $0x298] sm:$0xf0] }
 0x5bb   : > { %5316 = vmatpush.bf16.msrb.mxu1 %v9585_v42  ;;  %v5076_v42 = vpop.f32.mrf.mxu2  ;;  %v9397_v4 = vor.u32 %v10637_v61, %v9394_v49  ;;  %v9346_v58 = vld [vmem:[#allocation4 + $0x398] sm:$0xf0]  ;;  %v9221_v43 = vor.u32 %v10593_v28, %v9218_v26  ;;  %v10525_v15 = vld [vmem:[#allocation4 + $0x6c] sm:$0xf] }
 0x5bc   : > { %5329 = vmatpush.bf16.msrb.mxu2 %v9713_v6  ;;  %v9793_v6 = vor.u32 %v10739_v7, %v9792_v53  ;;  %v8965_v53 = vor.u32 %v10529_v30, %v8962_v51  ;;  %v8946_v23 = vld [vmem:[#allocation4 + $0x78] sm:$0xf0]  ;;  %v10621_v61 = vld [vmem:[#allocation4 + $0x36c] sm:$0xf] }
 0x5bd   : > { %5342 = vmatpush.bf16.msrb.mxu3 %v9841_v35  ;;  %v8994_v35 = vld [vmem:[#allocation4 + $0xd8] sm:$0xf0]  ;;  %v10513_v51 = vld [vmem:[#allocation4 + $0xc] sm:$0xf] }
 0x5be   : > { %5304 = vmatpush.bf16.msrb.mxu0 %v9441_v31  ;;  %v9378_v31 = vld [vmem:[#allocation4 + $0x3d8] sm:$0xf0]  ;;  %v8997_v25 = vor.u32 %v10537_v24, %v8994_v35  ;;  %v10553_v35 = vld [vmem:[#allocation4 + $0x14c] sm:$0xf] }
 0x5bf   : > { %5317 = vmatpush.bf16.msrb.mxu1 %v9569_v13  ;;  %v5089_v13 = vpop.f32.mrf.mxu3  ;;  %v9074_v27 = vld [vmem:[#allocation4 + $0x178] sm:$0xf0]  ;;  %v10545_v28 = vld [vmem:[#allocation4 + $0x10c] sm:$0xf] }
 0x5c0   : > { %5330 = vmatpush.bf16.msrb.mxu2 %v9697_v46  ;;  %v9125_v46 = vor.u32 %v10569_v20, %v9122_v60  ;;  %v9330_v49 = vld [vmem:[#allocation4 + $0x378] sm:$0xf0]  ;;  %v10585_v60 = vld [vmem:[#allocation4 + $0x24c] sm:$0xf] }
 0x5c1   : > { %5343 = vmatpush.bf16.msrb.mxu3 %v9825_v54  ;;  %v9381_v54 = vor.u32 %v10633_v48, %v9378_v31  ;;  %v8930_v24 = vld [vmem:[#allocation4 + $0x58] sm:$0xf0]  ;;  %v10617_v31 = vld [vmem:[#allocation4 + $0x34c] sm:$0xf] }
 0x5c2   : > { %5305 = vmatpush.bf16.msrb.mxu0 %v9425_v56  ;;  %v9109_v56 = vor.u32 %v10565_v0, %v9106_v39  ;;  %v9186_v3 = vld [vmem:[#allocation4 + $0x258] sm:$0xf0]  ;;  %v10517_v0 = vld [vmem:[#allocation4 + $0x2c] sm:$0xf] }
 0x5c3   : > { %5318 = vmatpush.bf16.msrb.mxu1 %v9553_v62  ;;  %v10561_v62 = vld [vmem:[#allocation4 + $0x18c] sm:$0xf]  ;;  %v9189_v36 = vor.u32 %v10585_v60, %v9186_v3  ;;  %v9026_v26 = vld [vmem:[#allocation4 + $0x118] sm:$0xf0] }
 0x5c4   : > { %5331 = vmatpush.bf16.msrb.mxu2 %v9681_v18  ;;  %v9365_v18 = vor.u32 %v10629_v34, %v9362_v47  ;;  %v9093_v14 = vor.u32 %v10561_v62, %v9090_v45  ;;  %v10549_v39 = vld [vmem:[#allocation4 + $0x12c] sm:$0xf]  ;;  %v9042_v34 = vld [vmem:[#allocation4 + $0x138] sm:$0xf0] }
 0x5c5   : > { %5344 = vmatpush.bf16.msrb.mxu3 %v9809_v1  ;;  %v10625_v1 = vld [vmem:[#allocation4 + $0x38c] sm:$0xf]  ;;  %v8898_v62 = vld [vmem:[#allocation4 + $0x18] sm:$0xf0] }
 0x5c6   : > { %5306 = vmatpush.bf16.msrb.mxu0 %v9409_v12  ;;  %v5100_v7 = vpop.f32.mrf.mxu0  ;;  %v9349_v17 = vor.u32 %v10625_v1, %v9346_v58  ;;  %v10581_v47 = vld [vmem:[#allocation4 + $0x22c] sm:$0xf]  ;;  %v9762_v3 = vld [vmem:[#allocation4 + $0x6d8] sm:$0xf0] }
 0x5c7   : > { %5319 = vmatpush.bf16.msrb.mxu1 %v9537_v16  ;;  %v5101_v12 = vadd.f32 %v5100_v7, %v13136_v11  ;;  %v5113_v59 = vpop.f32.mrf.mxu1  ;;  %v10589_v16 = vld [vmem:[#allocation4 + $0x26c] sm:$0xf]  ;;  %v9333_v11 = vor.u32 %v10621_v61, %v9330_v49  ;;  %v9154_v7 = vld [vmem:[#allocation4 + $0x218] sm:$0xf0] }
 0x5c8   : > { %5332 = vmatpush.bf16.msrb.mxu2 %v9665_v2  ;;  %v9202_v2 = vld [vmem:[#allocation4 + $0x278] sm:$0xf0]  ;;  %v10577_v1 = vld [vmem:[#allocation4 + $0x20c] sm:$0xf] }
 0x5c9   : > { %5345 = vmatpush.bf16.msrb.mxu3 %v9793_v6  ;;  %5307 = vmatmul.bf16.vlgmr.msrb.gmra.mxu0 %v13108_v8  ;;  %v5114_v42 = vadd.f32 %v5113_v59, %v5101_v12  ;;  %v8949_v6 = vor.u32 %v10525_v15, %v8946_v23  ;;  %v10669_v23 = vld [vmem:[#allocation4 + $0x4ec] sm:$0xf]  ;;  %v8901_v59 = vor.u32 %v10513_v51, %v8898_v62  ;;  %v5032_v51 = vperm.slane %v13133_v38, 1 }
 0x5ca   : > { %5351 = vmatpush.bf16.msra.mxu0 %v9013_v29  ;;  %5320 = vmatmul.bf16.vlgmr.msrb.gmra.mxu1 %v13112_v9  ;;  %v9077_v29 = vor.u32 %v10557_v50, %v9074_v27  ;;  %v9522_v50 = vld [vmem:[#allocation4 + $0x4f8] sm:$0xf0]  ;;  %v10701_v12 = vld [vmem:[#allocation4 + $0x5ec] sm:$0xf]  ;;  %v9157_v61 = vor.u32 %v10577_v1, %v9154_v7 }
 0x5cb   : > { %5364 = vmatpush.bf16.msra.mxu1 %v9141_v55  ;;  %5333 = vmatmul.bf16.vlgmr.msrb.gmra.mxu2 %v13106_v40  ;;  %v9205_v55 = vor.u32 %v10589_v16, %v9202_v2  ;;  %v10733_v27 = vld [vmem:[#allocation4 + $0x6ec] sm:$0xf]  ;;  %v9778_v16 = vld [vmem:[#allocation4 + $0x6f8] sm:$0xf0]  ;;  %v9029_v2 = vor.u32 %v10545_v28, %v9026_v26 }
 0x5cc   : > { %5377 = vmatpush.bf16.msra.mxu2 %v9269_v63  ;;  %5346 = vmatmul.bf16.vlgmr.msrb.gmra.mxu3 %v13110_v57  ;;  %v10521_v63 = vld [vmem:[#allocation4 + $0x4c] sm:$0xf]  ;;  %v9458_v7 = vld [vmem:[#allocation4 + $0x478] sm:$0xf0] }
 0x5cd   : > { %5390 = vmatpush.bf16.msra.mxu3 %v9397_v4  ;;  %v9058_v4 = vld [vmem:[#allocation4 + $0x158] sm:$0xf0]  ;;  %v8933_v13 = vor.u32 %v10521_v63, %v8930_v24  ;;  %v10765_v49 = vld [vmem:[#allocation4 + $0x7ec] sm:$0xf]  ;;  %v9781_v63 = vor.u32 %v10733_v27, %v9778_v16 }
 0x5ce   : > { %5352 = vmatpush.bf16.msra.mxu0 %v8997_v25  ;;  %v5126_v20 = vpop.f32.mrf.mxu2  ;;  %v9314_v25 = vld [vmem:[#allocation4 + $0x358] sm:$0xf0]  ;;  %v9061_v19 = vor.u32 %v10553_v35, %v9058_v4  ;;  %v10665_v24 = vld [vmem:[#allocation4 + $0x4cc] sm:$0xf] }
 0x5cf   : > { %5365 = vmatpush.bf16.msra.mxu1 %v9125_v46  ;;  %v5127_v21 = vadd.f32 %v5126_v20, %v5114_v42  ;;  %v5139_v48 = vpop.f32.mrf.mxu3  ;;  %v5115_v10 = vpop.f32.mrf.mxu1  ;;  %v9317_v33 = vor.u32 %v10617_v31, %v9314_v25  ;;  %v9906_v42 = vld [vmem:[#allocation4 + $0x7f8] sm:$0xf0]  ;;  %v10697_v20 = vld [vmem:[#allocation4 + $0x5cc] sm:$0xf] }
 0x5d0   : > { %5378 = vmatpush.bf16.msra.mxu2 %v9253_v52  ;;  %v5102_v52 = vpop.f32.mrf.mxu0  ;;  %v9506_v35 = vld [vmem:[#allocation4 + $0x4d8] sm:$0xf0]  ;;  %v10729_v60 = vld [vmem:[#allocation4 + $0x6cc] sm:$0xf] }
 0x5d1   : > { %5391 = vmatpush.bf16.msra.mxu3 %v9381_v54  ;;  %v13143_v46 = vadd.f32 %v5139_v48, %v5127_v21  ;;  %v8914_v54 = vld [vmem:[#allocation4 + $0x38] sm:$0xf0]  ;;  %v10761_v21 = vld [vmem:[#allocation4 + $0x7cc] sm:$0xf]  ;;  %v9509_v31 = vor.u32 %v10665_v24, %v9506_v35 }
 0x5d2   : > { %5353 = vmatpush.bf16.msra.mxu0 %v8981_v44  ;;  %v9170_v44 = vld [vmem:[#allocation4 + $0x238] sm:$0xf0]  ;;  %v8917_v30 = vor.u32 %v10517_v0, %v8914_v54  ;;  %v10661_v52 = vld [vmem:[#allocation4 + $0x4ac] sm:$0xf] }
 0x5d3   : > { %5366 = vmatpush.bf16.msra.mxu1 %v9109_v56  ;;  %v10613_v56 = vld [vmem:[#allocation4 + $0x32c] sm:$0xf]  ;;  %v9173_v45 = vor.u32 %v10581_v47, %v9170_v44  ;;  %v9634_v4 = vld [vmem:[#allocation4 + $0x5d8] sm:$0xf0] }
 0x5d4   : > { %5379 = vmatpush.bf16.msra.mxu2 %v9237_v5  ;;  %v9298_v5 = vld [vmem:[#allocation4 + $0x338] sm:$0xf0]  ;;  %v9637_v25 = vor.u32 %v10697_v20, %v9634_v4  ;;  %v10657_v44 = vld [vmem:[#allocation4 + $0x48c] sm:$0xf] }
 0x5d5   : > { %5392 = vmatpush.bf16.msra.mxu3 %v9365_v18  ;;  %v9045_v18 = vor.u32 %v10549_v39, %v9042_v34  ;;  %v9890_v48 = vld [vmem:[#allocation4 + $0x7d8] sm:$0xf0]  ;;  %v10725_v39 = vld [vmem:[#allocation4 + $0x6ac] sm:$0xf] }
 0x5d6   : > { %5354 = vmatpush.bf16.msra.mxu0 %v8965_v53  ;;  %v5128_v58 = vpop.f32.mrf.mxu2  ;;  %v9301_v53 = vor.u32 %v10613_v56, %v9298_v5  ;;  %v9893_v0 = vor.u32 %v10761_v21, %v9890_v48  ;;  %v9618_v54 = vld [vmem:[#allocation4 + $0x5b8] sm:$0xf0]  ;;  %v10753_v28 = vld [vmem:[#allocation4 + $0x78c] sm:$0xf] }
 0x5d7   : > { %5367 = vmatpush.bf16.msra.mxu1 %v9093_v14  ;;  %v10609_v14 = vld [vmem:[#allocation4 + $0x30c] sm:$0xf]  ;;  %v5141_v15 = vpop.f32.mrf.mxu3  ;;  %v9746_v10 = vld [vmem:[#allocation4 + $0x6b8] sm:$0xf0] }
 0x5d8   : > { %5380 = vmatpush.bf16.msra.mxu2 %v9221_v43  ;;  %v9282_v43 = vld [vmem:[#allocation4 + $0x318] sm:$0xf0]  ;;  %v9749_v5 = vor.u32 %v10725_v39, %v9746_v10  ;;  %v10713_v35 = vld [vmem:[#allocation4 + $0x64c] sm:$0xf] }
 0x5d9   : > { %5393 = vmatpush.bf16.msra.mxu3 %v9349_v17  ;;  %v9650_v17 = vld [vmem:[#allocation4 + $0x5f8] sm:$0xf0]  ;;  %v10709_v10 = vld [vmem:[#allocation4 + $0x62c] sm:$0xf] }
 0x5da   : > { %5355 = vmatpush.bf16.msra.mxu0 %v8949_v6  ;;  %v9285_v6 = vor.u32 %v10609_v14, %v9282_v43  ;;  %v9874_v34 = vld [vmem:[#allocation4 + $0x7b8] sm:$0xf0]  ;;  %v10685_v14 = vld [vmem:[#allocation4 + $0x56c] sm:$0xf] }
 0x5db   : > { %5368 = vmatpush.bf16.msra.mxu1 %v9077_v29  ;;  %v9525_v29 = vor.u32 %v10669_v23, %v9522_v50  ;;  %v9586_v50 = vld [vmem:[#allocation4 + $0x578] sm:$0xf0] }
 0x5dc   : > { %5381 = vmatpush.bf16.msra.mxu2 %v9205_v55  ;;  %v9653_v55 = vor.u32 %v10701_v12, %v9650_v17  ;;  %v10717_v12 = vld [vmem:[#allocation4 + $0x66c] sm:$0xf]  ;;  %v9842_v27 = vld [vmem:[#allocation4 + $0x778] sm:$0xf0] }
 0x5dd   : > { %5394 = vmatpush.bf16.msra.mxu3 %v9333_v11  ;;  %v9909_v11 = vor.u32 %v10765_v49, %v9906_v42  ;;  %v10749_v17 = vld [vmem:[#allocation4 + $0x76c] sm:$0xf]  ;;  %v9570_v24 = vld [vmem:[#allocation4 + $0x558] sm:$0xf0] }
 0x5de   : > { %5356 = vmatpush.bf16.msra.mxu0 %v8933_v13  ;;  %v9765_v13 = vor.u32 %v10729_v60, %v9762_v3  ;;  %v10649_v42 = vld [vmem:[#allocation4 + $0x44c] sm:$0xf]  ;;  %v9698_v20 = vld [vmem:[#allocation4 + $0x658] sm:$0xf0] }
 0x5df   : > { %5369 = vmatpush.bf16.msra.mxu1 %v9061_v19  ;;  %v9490_v19 = vld [vmem:[#allocation4 + $0x4b8] sm:$0xf0]  ;;  %v10745_v60 = vld [vmem:[#allocation4 + $0x74c] sm:$0xf] }
 0x5e0   : > { %5382 = vmatpush.bf16.msra.mxu2 %v9189_v36  ;;  %v10693_v36 = vld [vmem:[#allocation4 + $0x5ac] sm:$0xf]  ;;  %v9493_v47 = vor.u32 %v10661_v52, %v9490_v19  ;;  %v9826_v3 = vld [vmem:[#allocation4 + $0x758] sm:$0xf0] }
 0x5e1   : > { %5395 = vmatpush.bf16.msra.mxu3 %v9317_v33  ;;  %v10757_v33 = vld [vmem:[#allocation4 + $0x7ac] sm:$0xf]  ;;  %v9621_v56 = vor.u32 %v10693_v36, %v9618_v54  ;;  %v9426_v19 = vld [vmem:[#allocation4 + $0x438] sm:$0xf0]  ;;  %v9829_v54 = vor.u32 %v10745_v60, %v9826_v3 }
 0x5e2   : > { %5357 = vmatpush.bf16.msra.mxu0 %v8917_v30  ;;  %v9474_v30 = vld [vmem:[#allocation4 + $0x498] sm:$0xf0]  ;;  %v9877_v62 = vor.u32 %v10757_v33, %v9874_v34  ;;  %v10645_v52 = vld [vmem:[#allocation4 + $0x42c] sm:$0xf] }
 0x5e3   : > { %5370 = vmatpush.bf16.msra.mxu1 %v9045_v18  ;;  %v10721_v18 = vld [vmem:[#allocation4 + $0x68c] sm:$0xf]  ;;  %v9477_v26 = vor.u32 %v10657_v44, %v9474_v30  ;;  %v9554_v39 = vld [vmem:[#allocation4 + $0x538] sm:$0xf0]  ;;  %v9429_v44 = vor.u32 %v10645_v52, %v9426_v19 }
 0x5e4   : > { %5383 = vmatpush.bf16.msra.mxu2 %v9173_v45  ;;  %v9730_v45 = vld [vmem:[#allocation4 + $0x698] sm:$0xf0]  ;;  %v10677_v36 = vld [vmem:[#allocation4 + $0x52c] sm:$0xf] }
 0x5e5   : > { %5396 = vmatpush.bf16.msra.mxu3 %v9301_v53  ;;  %v9733_v58 = vor.u32 %v10721_v18, %v9730_v45  ;;  %v10653_v53 = vld [vmem:[#allocation4 + $0x46c] sm:$0xf]  ;;  %v9682_v33 = vld [vmem:[#allocation4 + $0x638] sm:$0xf0] }
 0x5e6   : > { %5358 = vmatpush.bf16.msra.mxu0 %v8901_v59  ;;  %v5152_v1 = vpop.f32.mrf.mxu0  ;;  %v9714_v59 = vld [vmem:[#allocation4 + $0x678] sm:$0xf0]  ;;  %v10741_v34 = vld [vmem:[#allocation4 + $0x72c] sm:$0xf] }
 0x5e7   : > { %5371 = vmatpush.bf16.msra.mxu1 %v9029_v2  ;;  %v5153_v43 = vadd.f32 %v5152_v1, %v5032_v51  ;;  %v5165_v15 = vpop.f32.mrf.mxu1  ;;  %v9461_v2 = vor.u32 %v10653_v53, %v9458_v7  ;;  %v9717_v49 = vor.u32 %v10717_v12, %v9714_v59  ;;  %v10641_v30 = vld [vmem:[#allocation4 + $0x40c] sm:$0xf]  ;;  %v9538_v18 = vld [vmem:[#allocation4 + $0x518] sm:$0xf0] }
 0x5e8   : > { %5384 = vmatpush.bf16.msra.mxu2 %v9157_v61  ;;  %v9589_v61 = vor.u32 %v10685_v14, %v9586_v50  ;;  %v10673_v51 = vld [vmem:[#allocation4 + $0x50c] sm:$0xf]  ;;  %v9794_v1 = vld [vmem:[#allocation4 + $0x718] sm:$0xf0] }
 0x5e9   : > { %5397 = vmatpush.bf16.msra.mxu3 %v9285_v6  ;;  %5359 = vmatmul.bf16.vlgmr.msra.gmra.mxu0 %v13090_v41  ;;  %v9858_v41 = vld [vmem:[#allocation4 + $0x798] sm:$0xf0]  ;;  %v5166_v16 = vadd.f32 %v5165_v15, %v5153_v43  ;;  %v10705_v45 = vld [vmem:[#allocation4 + $0x60c] sm:$0xf] }
 0x5ea   : > { %5403 = vmatpush.bf16.msrb.mxu0 %v9525_v29  ;;  %5372 = vmatmul.bf16.vlgmr.msra.gmra.mxu1 %v13098_v37  ;;  %v9861_v23 = vor.u32 %v10753_v28, %v9858_v41  ;;  %v9442_v6 = vld [vmem:[#allocation4 + $0x458] sm:$0xf0]  ;;  %v10681_v29 = vld [vmem:[#allocation4 + $0x54c] sm:$0xf] }
 0x5eb   : > { %5416 = vmatpush.bf16.msrb.mxu1 %v9653_v55  ;;  %5385 = vmatmul.bf16.vlgmr.msra.gmra.mxu2 %v13088_v32  ;;  %v10689_v32 = vld [vmem:[#allocation4 + $0x58c] sm:$0xf]  ;;  %v9445_v21 = vor.u32 %v10649_v42, %v9442_v6  ;;  %v9666_v28 = vld [vmem:[#allocation4 + $0x618] sm:$0xf0] }
 0x5ec   : > { %5429 = vmatpush.bf16.msrb.mxu2 %v9781_v63  ;;  %5398 = vmatmul.bf16.vlgmr.msra.gmra.mxu3 %v13096_v22  ;;  %v9602_v22 = vld [vmem:[#allocation4 + $0x598] sm:$0xf0]  ;;  %v9845_v63 = vor.u32 %v10749_v17, %v9842_v27  ;;  %v9669_v53 = vor.u32 %v10705_v45, %v9666_v28 }
 0x5ed   : > { %5442 = vmatpush.bf16.msrb.mxu3 %v9909_v11  ;;  %v9605_v37 = vor.u32 %v10689_v32, %v9602_v22  ;;  %v9410_v32 = vld [vmem:[#allocation4 + $0x418] sm:$0xf0] }
 0x5ee   : > { %5404 = vmatpush.bf16.msrb.mxu0 %v9509_v31  ;;  %v5178_v55 = vpop.f32.mrf.mxu2  ;;  %v5154_v31 = vpop.f32.mrf.mxu0 }
 0x5ef   : > { %5417 = vmatpush.bf16.msrb.mxu1 %v9637_v25  ;;  %v5179_v11 = vadd.f32 %v5178_v55, %v5166_v16  ;;  %v5191_v4 = vpop.f32.mrf.mxu3  ;;  %v9573_v25 = vor.u32 %v10681_v29, %v9570_v24 }
 0x5f0   : > { %5430 = vmatpush.bf16.msrb.mxu2 %v9765_v13  ;;  %v9701_v13 = vor.u32 %v10713_v35, %v9698_v20 }
 0x5f1   : > { %5443 = vmatpush.bf16.msrb.mxu3 %v9893_v0  ;;  %v5192_v48 = vadd.f32 %v5191_v4, %v5179_v11  ;;  %v5167_v0 = vpop.f32.mrf.mxu1 }
 0x5f2   : > { %5405 = vmatpush.bf16.msrb.mxu0 %v9493_v47  ;;  %v9810_v47 = vld [vmem:[#allocation4 + $0x738] sm:$0xf0] }
 0x5f3   : > { %5418 = vmatpush.bf16.msrb.mxu1 %v9621_v56  ;;  %v9557_v56 = vor.u32 %v10677_v36, %v9554_v39  ;;  %v9813_v22 = vor.u32 %v10741_v34, %v9810_v47 }
 0x5f4   : > { %5431 = vmatpush.bf16.msrb.mxu2 %v9749_v5  ;;  %v9685_v5 = vor.u32 %v10709_v10, %v9682_v33  ;;  %v5034_v10 = vperm.slane %v13133_v38, 3 }
 0x5f5   : > { %5444 = vmatpush.bf16.msrb.mxu3 %v9877_v62 }
 0x5f6   : > { %5406 = vmatpush.bf16.msrb.mxu0 %v9477_v26  ;;  %v5180_v62 = vpop.f32.mrf.mxu2  ;;  %v10737_v26 = vld [vmem:[#allocation4 + $0x70c] sm:$0xf] }
 0x5f7   : > { %5419 = vmatpush.bf16.msrb.mxu1 %v9605_v37  ;;  %v5193_v41 = vpop.f32.mrf.mxu3  ;;  %v9413_v37 = vor.u32 %v10641_v30, %v9410_v32  ;;  %v9797_v7 = vor.u32 %v10737_v26, %v9794_v1 }
 0x5f8   : > { %5432 = vmatpush.bf16.msrb.mxu2 %v9733_v58  ;;  %v9541_v58 = vor.u32 %v10673_v51, %v9538_v18 }
 0x5f9   : > { %5445 = vmatpush.bf16.msrb.mxu3 %v9861_v23 }
 0x5fa   : > { %5407 = vmatpush.bf16.msrb.mxu0 %v9461_v2 }
 0x5fb   : > { %5420 = vmatpush.bf16.msrb.mxu1 %v9589_v61 }
 0x5fc   : > { %5433 = vmatpush.bf16.msrb.mxu2 %v9717_v49 }
 0x5fd   : > { %5446 = vmatpush.bf16.msrb.mxu3 %v9845_v63 }
 0x5fe   : > { %5408 = vmatpush.bf16.msrb.mxu0 %v9445_v21 }
 0x5ff   : > { %5421 = vmatpush.bf16.msrb.mxu1 %v9573_v25 }
 0x600   : > { %5434 = vmatpush.bf16.msrb.mxu2 %v9701_v13 }
 0x601   : > { %5447 = vmatpush.bf16.msrb.mxu3 %v9829_v54 }
 0x602   : > { %5409 = vmatpush.bf16.msrb.mxu0 %v9429_v44 }
 0x603   : > { %5422 = vmatpush.bf16.msrb.mxu1 %v9557_v56 }
 0x604   : > { %5435 = vmatpush.bf16.msrb.mxu2 %v9685_v5 }
 0x605   : > { %5448 = vmatpush.bf16.msrb.mxu3 %v9813_v22 }
 0x606   : > { %5410 = vmatpush.bf16.msrb.mxu0 %v9413_v37  ;;  %v5204_v14 = vpop.f32.mrf.mxu0 }
 0x607   : > { %5423 = vmatpush.bf16.msrb.mxu1 %v9541_v58  ;;  %v5205_v43 = vadd.f32 %v5204_v14, %v5192_v48  ;;  %v5217_v15 = vpop.f32.mrf.mxu1  ;;  %v5469_v58 = vlaneseq }
 0x608   : > { %5436 = vmatpush.bf16.msrb.mxu2 %v9669_v53 }
 0x609   : > { %5449 = vmatpush.bf16.msrb.mxu3 %v9797_v7  ;;  %5411 = vmatmul.bf16.vlgmr.msrb.gmra.mxu0 %v13108_v8  ;;  %v5218_v23 = vadd.f32 %v5217_v15, %v5205_v43  ;;  %vm5471_vm3 = vcmp.lt.s32.totalorder %v5469_v58, 512 }
 0x60a   : > { %5424 = vmatmul.bf16.vlgmr.msrb.gmra.mxu1 %v13112_v9 }
 0x60b   : > { %5437 = vmatmul.bf16.vlgmr.msrb.gmra.mxu2 %v13106_v40  ;;  %v5033_v40 = vperm.slane %v13133_v38, 2 }
 0x60c   : > { %5450 = vmatmul.bf16.vlgmr.msrb.gmra.mxu3 %v13110_v57 }
 0x60e   : > { %v5230_v50 = vpop.f32.mrf.mxu2  ;;  %v5206_v27 = vpop.f32.mrf.mxu0 }
 0x60f   : > { %v5231_v12 = vadd.f32 %v5230_v50, %v5218_v23  ;;  %v5243_v59 = vpop.f32.mrf.mxu3  ;;  %v5219_v16 = vpop.f32.mrf.mxu1 }
 0x611   : > { %v5244_v17 = vadd.f32 %v5243_v59, %v5231_v12 }
 0x613   : > { %v5459_v2 = vrot.slane %v5244_v17, 7 }
 0x615   : > { %v5463_v8 = vsel %vm5462_vm0, %v13143_v46, %v5459_v2 }
 0x616   : > { %v5232_v61 = vpop.f32.mrf.mxu2 }
 0x617   : > { %v5245_v9 = vpop.f32.mrf.mxu3 }
 0x626   : > { %v5256_v49 = vpop.f32.mrf.mxu0 }
 0x627   : > { %v5257_v57 = vadd.f32 %v5256_v49, %v5033_v40  ;;  %v5269_v42 = vpop.f32.mrf.mxu1 }
 0x629   : > { %v5270_v6 = vadd.f32 %v5269_v42, %v5257_v57 }
 0x62e   : > { %v5282_v29 = vpop.f32.mrf.mxu2  ;;  %v5258_v35 = vpop.f32.mrf.mxu0 }
 0x62f   : > { %v5283_v55 = vadd.f32 %v5282_v29, %v5270_v6  ;;  %v5295_v63 = vpop.f32.mrf.mxu3  ;;  %v5271_v20 = vpop.f32.mrf.mxu1 }
 0x631   : > { %v5296_v24 = vadd.f32 %v5295_v63, %v5283_v55 }
 0x636   : > { %v5284_v11 = vpop.f32.mrf.mxu2 }
 0x637   : > { %v5297_v4 = vpop.f32.mrf.mxu3 }
 0x646   : > { %v5308_v60 = vpop.f32.mrf.mxu0 }
 0x647   : > { %v5321_v3 = vpop.f32.mrf.mxu1  ;;  %v5309_v56 = vadd.f32 %v5308_v60, %v5296_v24 }
 0x649   : > { %v5322_v30 = vadd.f32 %v5321_v3, %v5309_v56 }
 0x64e   : > { %v5334_v21 = vpop.f32.mrf.mxu2  ;;  %v5310_v48 = vpop.f32.mrf.mxu0 }
 0x64f   : > { %v5347_v46 = vpop.f32.mrf.mxu3  ;;  %v5323_v31 = vpop.f32.mrf.mxu1  ;;  %v5335_v18 = vadd.f32 %v5334_v21, %v5322_v30 }
 0x651   : > { %v5348_v41 = vadd.f32 %v5347_v46, %v5335_v18 }
 0x653   : > { %v5460_v7 = vrot.slane %v5348_v41, 6 }
 0x656   : > { %v5336_v25 = vpop.f32.mrf.mxu2 }
 0x657   : > { %v5349_v13 = vpop.f32.mrf.mxu3 }
 0x666   : > { %v5360_v52 = vpop.f32.mrf.mxu0 }
 0x667   : > { %v5373_v19 = vpop.f32.mrf.mxu1  ;;  %v5361_v47 = vadd.f32 %v5360_v52, %v5034_v10 }
 0x669   : > { %v5374_v44 = vadd.f32 %v5373_v19, %v5361_v47 }
 0x66e   : > { %v5386_v36 = vpop.f32.mrf.mxu2  ;;  %v5362_v54 = vpop.f32.mrf.mxu0 }
 0x66f   : > { %v5399_v0 = vpop.f32.mrf.mxu3  ;;  %v5375_v39 = vpop.f32.mrf.mxu1  ;;  %v5387_v5 = vadd.f32 %v5386_v36, %v5374_v44 }
 0x671   : > { %v5400_v32 = vadd.f32 %v5399_v0, %v5387_v5 }
 0x676   : > { %v5388_v33 = vpop.f32.mrf.mxu2 }
 0x677   : > { %v5401_v34 = vpop.f32.mrf.mxu3 }
 0x686   : > { %v5412_v51 = vpop.f32.mrf.mxu0 }
 0x687   : > { %v5425_v62 = vpop.f32.mrf.mxu1  ;;  %v5413_v22 = vadd.f32 %v5412_v51, %v5400_v32 }
 0x689   : > { %v5426_v45 = vadd.f32 %v5425_v62, %v5413_v22 }
 0x68e   : > { %v5438_v28 = vpop.f32.mrf.mxu2  ;;  %v5414_v37 = vpop.f32.mrf.mxu0 }
 0x68f   : > { %v5439_v26 = vadd.f32 %v5438_v28, %v5426_v45  ;;  %v5451_v1 = vpop.f32.mrf.mxu3  ;;  %v5427_v38 = vpop.f32.mrf.mxu1 }
 0x691   : > { %v5452_v53 = vadd.f32 %v5451_v1, %v5439_v26 }
 0x693   : > { %v5461_v14 = vrot.slane %v5452_v53, 5 }
 0x695   : > { %v5465_v43 = vsel %vm5464_vm15, %v5460_v7, %v5461_v14 }
 0x696   : > { %v5467_v15 = vsel %vm5466_vm2, %v5463_v8, %v5465_v43  ;;  %v5440_v23 = vpop.f32.mrf.mxu2 }
 0x697   : > { %5473 = vst.msk [vmem:[#allocation3] sm:$0xf] %vm5471_vm3, %v5467_v15  ;;  %v5453_v50 = vpop.f32.mrf.mxu3 }
 0x698 PF: > { %s15212_s22 = sld [smem:[#allocation66_spill]]  ;;  %vm5576_vm12 = vcmask 1040384   ;;  %vm5577_vm14 = vcmask 1041408   ;;  %v11066_v59 = vmov 65535   ;;  %v5474_v27 = vld [vmem:[%s11240_s2] sm:$0xff]  ;;  %v5475_v16 = vld [vmem:[%s11240_s2 + $0x8] sm:$0xff] }
 0x699   : > { %v5578_v17 = vsel %vm5576_vm12, 4294967295, %v11066_v59  ;;  %v5506_v61 = vpack.c.bf16 %v5475_v16, %v5474_v27  ;;  %vm5527_vm7 = vcmask 23552   ;;  %v5476_v9 = vld [vmem:[%s11240_s2 + $0x10] sm:$0xff]  ;;  %v5477_v40 = vld [vmem:[%s11240_s2 + $0x18] sm:$0xff]  ;;  %v5482_v57 = vld [vmem:[%s11240_s2 + $0x40] sm:$0xff]  ;;  %s15213_s17 = sld [smem:[#allocation67_spill]] }
 0x69a   : > { %v5579_v2 = vsel %vm5577_vm14, %v5578_v17, 0  ;;  %v5507_v49 = vpack.c.bf16 %v5477_v40, %v5476_v9  ;;  %v5483_v42 = vld [vmem:[%s11240_s2 + $0x48] sm:$0xff]  ;;  %v10771_v29 = vld [vmem:[%s14967_s3 + $0x18] sm:$0xff]  ;;  %v10770_v55 = vld [vmem:[%s14967_s3 + $0x10] sm:$0xff]  ;;  %vm5756_vm6 = vcmask 523264   ;;  %s15291_s25 = sld [smem:[#allocation69_spill]] }
 0x69b   : > { %v5510_v6 = vpack.c.bf16 %v5483_v42, %v5482_v57  ;;  %v5478_v63 = vld [vmem:[%s11240_s2 + $0x20] sm:$0xff]  ;;  %v5479_v24 = vld [vmem:[%s11240_s2 + $0x28] sm:$0xff]  ;;  %v5484_v20 = vld [vmem:[%s11240_s2 + $0x50] sm:$0xff]  ;;  %s15292_s28 = sld [smem:[#allocation71_spill]] }
 0x69c   : > { %v5508_v35 = vpack.c.bf16 %v5479_v24, %v5478_v63  ;;  %v5485_v11 = vld [vmem:[%s11240_s2 + $0x58] sm:$0xff]  ;;  %v10769_v60 = vld [vmem:[%s14967_s3 + $0x8] sm:$0xff]  ;;  %v5490_v3 = vld [vmem:[%s11240_s2 + $0x80] sm:$0xff] }
 0x69d   : > { %v5511_v4 = vpack.c.bf16 %v5485_v11, %v5484_v20  ;;  %v5491_v21 = vld [vmem:[%s11240_s2 + $0x88] sm:$0xff]  ;;  %v10768_v48 = vld [vmem:[%s14967_s3] sm:$0xff]  ;;  %v5480_v31 = vld [vmem:[%s11240_s2 + $0x30] sm:$0xff] }
 0x69e   : > { %v5522_v12 = vld [vmem:[%s15212_s22] sm:$0x3]  ;;  %v5514_v46 = vpack.c.bf16 %v5491_v21, %v5490_v3  ;;  %v5481_v25 = vld [vmem:[%s11240_s2 + $0x38] sm:$0xff]  ;;  %v5487_v19 = vld [vmem:[%s11240_s2 + $0x68] sm:$0xff]  ;;  %s15273_s22 = sld [smem:[#allocation70_spill]] }
 0x69f   : > { %v5581_v8 = vand.u32 %v5579_v2, %v5522_v12  ;;  %v5509_v13 = vpack.c.bf16 %v5481_v25, %v5480_v31  ;;  %v5486_v52 = vld [vmem:[%s11240_s2 + $0x60] sm:$0xff]  ;;  %v5488_v0 = vld [vmem:[%s11240_s2 + $0x70] sm:$0xff]  ;;  %v5489_v54 = vld [vmem:[%s11240_s2 + $0x78] sm:$0xff] }
 0x6a0   : > { %v5512_v36 = vpack.c.bf16 %v5487_v19, %v5486_v52  ;;  %v5513_v39 = vpack.c.bf16 %v5489_v54, %v5488_v0  ;;  %v5492_v10 = vld [vmem:[%s11240_s2 + $0x90] sm:$0xff]  ;;  %v5493_v33 = vld [vmem:[%s11240_s2 + $0x98] sm:$0xff]  ;;  %v5494_v47 = vld [vmem:[%s11240_s2 + $0xa0] sm:$0xff] }
 0x6a1   : > { %5590 = vmatpush.bf16.msra.mxu0 %v5581_v8  ;;  %10885 = vmatpush.bf16.msra.mxu1 %v5581_v8  ;;  %v5515_v34 = vpack.c.bf16 %v5493_v33, %v5492_v10  ;;  %v5495_v44 = vld [vmem:[%s11240_s2 + $0xa8] sm:$0xff]  ;;  %v10018_v5 = vld [vmem:[%s14973_s9 + $0x78] sm:$0xf0]  ;;  %v5496_v62 = vld [vmem:[%s11240_s2 + $0xb0] sm:$0xff] }
 0x6a2   : > { %10886 = vmatpush.bf16.msra.mxu2 %v5581_v8  ;;  %10887 = vmatpush.bf16.msra.mxu3 %v5581_v8  ;;  %v10785_v56 = vld [vmem:[%s14973_s9 + $0x6c] sm:$0xf]  ;;  %v5516_v30 = vpack.c.bf16 %v5495_v44, %v5494_v47  ;;  %v5497_v22 = vld [vmem:[%s11240_s2 + $0xb8] sm:$0xff]  ;;  %v13216_v18 = vld [vmem:[%s15213_s17] ss:$0 sm:$0xff] }
 0x6a3   : > { %v10021_v32 = vor.u32 %v10785_v56, %v10018_v5  ;;  %v5517_v45 = vpack.c.bf16 %v5497_v22, %v5496_v62  ;;  %v5498_v53 = vld [vmem:[%s11240_s2 + $0xc0] sm:$0xff]  ;;  %v5499_v7 = vld [vmem:[%s11240_s2 + $0xc8] sm:$0xff]  ;;  %v5500_v17 = vld [vmem:[%s11240_s2 + $0xd0] sm:$0xff] }
 0x6a4   : > { %9910 = vmatmul.msk.bf16.vlgmr.msra.gmra.mxu0 %vm5527_vm7, %v5506_v61  ;;  %9914 = vmatmul.msk.bf16.vlgmr.msra.gmra.mxu1 %vm5527_vm7, %v5510_v6  ;;  %v5518_v14 = vpack.c.bf16 %v5499_v7, %v5498_v53  ;;  %v5501_v27 = vld [vmem:[%s11240_s2 + $0xd8] sm:$0xff]  ;;  %v10781_v6 = vld [vmem:[%s14973_s9 + $0x4c] sm:$0xf]  ;;  %v10008_v20 = vld [vmem:[%s14973_s9 + $0x60] sm:$0xf] }
 0x6a5   : > { %5809 = vmatpush.bf16.msrb.mxu1 %v10771_v29  ;;  %9918 = vmatmul.msk.bf16.vlgmr.msra.gmra.mxu2 %vm5527_vm7, %v5514_v46  ;;  %v5519_v2 = vpack.c.bf16 %v5501_v27, %v5500_v17  ;;  %v10002_v29 = vld [vmem:[%s14973_s9 + $0x58] sm:$0xf0]  ;;  %v10786_v11 = vld [vmem:[%s14973_s9 + $0x6c] sm:$0xf0]  ;;  %v10784_v3 = vld [vmem:[%s14973_s9 + $0x64] sm:$0xf] }
 0x6a6   : > { %9922 = vmatmul.msk.bf16.vlgmr.msra.gmra.mxu3 %vm5527_vm7, %v5518_v14  ;;  %v10005_v24 = vor.u32 %v10781_v6, %v10002_v29  ;;  %v10010_v21 = vld [vmem:[%s14973_s9 + $0x70] sm:$0xf0]  ;;  %v5505_v54 = vld [vmem:[%s11240_s2 + $0xf8] sm:$0xff]  ;;  %v10782_v33 = vld [vmem:[%s14973_s9 + $0x4c] sm:$0xf0] }
 0x6a7   : > { %v10013_v46 = vor.u32 %v10784_v3, %v10010_v21  ;;  %v5504_v0 = vld [vmem:[%s11240_s2 + $0xf0] sm:$0xff]  ;;  %v10783_v6 = vld [vmem:[%s14973_s9 + $0x54] sm:$0xf0] }
 0x6a8   : > { %v9994_v47 = vld [vmem:[%s14973_s9 + $0x50] sm:$0xf0]  ;;  %v5521_v44 = vpack.c.bf16 %v5505_v54, %v5504_v0  ;;  %v10144_v0 = vld [vmem:[%s14976_s12 + $0x70] sm:$0xf]  ;;  %v10803_v54 = vld [vmem:[%s14976_s12 + $0x74] sm:$0xf0] }
 0x6a9   : > { %5810 = vmatpush.bf16.msrb.mxu1 %v10770_v55  ;;  %v5502_v55 = vld [vmem:[%s11240_s2 + $0xe0] sm:$0xff]  ;;  %6189 = vmatpush.bf16.msrb.mxu3 %v10013_v46 }
 0x6ad   : > { %5811 = vmatpush.bf16.msrb.mxu1 %v10769_v60  ;;  %v10009_v60 = vor.u32 %v10786_v11, %v10008_v20  ;;  %v9986_v20 = vld [vmem:[%s14973_s9 + $0x38] sm:$0xf0] }
 0x6af   : > { %6100 = vmatpush.bf16.msrb.mxu2 %v10009_v60  ;;  %v10779_v60 = vld [vmem:[%s14973_s9 + $0x34] sm:$0xf0] }
 0x6b1   : > { %5812 = vmatpush.bf16.msrb.mxu1 %v10768_v48 }
 0x6b4   : > { %9911 = vmatmul.msk.bf16.gmra.mxu0 %vm5527_vm7, %v5507_v49  ;;  %9915 = vmatmul.msk.bf16.gmra.mxu1 %vm5527_vm7, %v5511_v4 }
 0x6b5   : > { %9919 = vmatmul.msk.bf16.gmra.mxu2 %vm5527_vm7, %v5515_v34  ;;  %6367 = vmatpush.bf16.msra.mxu1 %v10021_v32  ;;  %v10780_v34 = vld [vmem:[%s14973_s9 + $0x44] sm:$0xf] }
 0x6b6   : > { %9923 = vmatmul.msk.bf16.gmra.mxu3 %vm5527_vm7, %v5519_v2  ;;  %v9997_v5 = vor.u32 %v10780_v34, %v9994_v47  ;;  %v10819_v34 = vld [vmem:[%s14976_s12 + $0xf4] sm:$0xf0] }
 0x6b8   : > { %6190 = vmatpush.bf16.msrb.mxu3 %v9997_v5 }
 0x6b9   : > { %6368 = vmatpush.bf16.msra.mxu1 %v10005_v24  ;;  %v10777_v24 = vld [vmem:[%s14973_s9 + $0x2c] sm:$0xf] }
 0x6ba   : > { %v9989_v11 = vor.u32 %v10777_v24, %v9986_v20 }
 0x6bd   : > { %6369 = vmatpush.bf16.msra.mxu1 %v9989_v11  ;;  %v10773_v11 = vld [vmem:[%s14973_s9 + $0xc] sm:$0xf] }
 0x6c4   : > { %9912 = vmatmul.msk.bf16.gmra.mxu0 %vm5527_vm7, %v5508_v35  ;;  %9916 = vmatmul.msk.bf16.gmra.mxu1 %vm5527_vm7, %v5512_v36  ;;  %v5503_v35 = vld [vmem:[%s11240_s2 + $0xe8] sm:$0xff] }
 0x6c5   : > { %9920 = vmatmul.msk.bf16.gmra.mxu2 %vm5527_vm7, %v5516_v30  ;;  %v5520_v4 = vpack.c.bf16 %v5503_v35, %v5502_v55  ;;  %v10772_v55 = vld [vmem:[%s14973_s9 + $0x4] sm:$0xf] }
 0x6c7   : > { %9924 = vmatmul.msk.bf16.gmra.mxu3 %vm5527_vm7, %v5520_v4  ;;  %v9984_v4 = vld [vmem:[%s14973_s9 + $0x28] sm:$0xf] }
 0x6c8   : > { %v9985_v21 = vor.u32 %v10779_v60, %v9984_v4  ;;  %v9970_v4 = vld [vmem:[%s14973_s9 + $0x18] sm:$0xf0] }
 0x6c9   : > { %v9973_v60 = vor.u32 %v10773_v11, %v9970_v4 }
 0x6cb   : > { %6370 = vmatpush.bf16.msra.mxu1 %v9973_v60 }
 0x6d4   : > { %9913 = vmatmul.msk.bf16.gmra.mxu0 %vm5527_vm7, %v5509_v13  ;;  %9917 = vmatmul.msk.bf16.gmra.mxu1 %vm5527_vm7, %v5513_v39  ;;  %v9992_v39 = vld [vmem:[%s14973_s9 + $0x40] sm:$0xf] }
 0x6d5   : > { %9921 = vmatmul.msk.bf16.gmra.mxu2 %vm5527_vm7, %v5517_v45  ;;  %v9993_v56 = vor.u32 %v10782_v33, %v9992_v39  ;;  %v10208_v33 = vld [vmem:[%s14976_s12 + $0xf0] sm:$0xf] }
 0x6d7   : > { %6101 = vmatpush.bf16.msrb.mxu2 %v9993_v56  ;;  %9925 = vmatmul.msk.bf16.gmra.mxu3 %vm5527_vm7, %v5521_v44  ;;  %v10209_v44 = vor.u32 %v10819_v34, %v10208_v33  ;;  %v10799_v33 = vld [vmem:[%s14976_s12 + $0x54] sm:$0xf0] }
 0x721   : > { %v5592_v51 = vpop.f32.mrf.mxu0  ;;  %v5612_v57 = vpop.f32.mrf.mxu1 }
 0x722   : > { %v5593_v28 = vadd.f32 %v13216_v18, %v5592_v51  ;;  %v5613_v30 = vadd.f32 %v13216_v18, %v5612_v57 }
 0x724   : > { %v5672_v1 = vmax.f32 %v5593_v28, 0.0  ;;  %v5680_v51 = vmax.f32 %v5613_v30, 0.0  ;;  %v9976_v28 = vld [vmem:[%s14973_s9 + $0x20] sm:$0xf] }
 0x729   : > { %v5594_v41 = vpop.f32.mrf.mxu0  ;;  %v5614_v48 = vpop.f32.mrf.mxu1 }
 0x72a   : > { %v5595_v26 = vadd.f32 %v13216_v18, %v5594_v41  ;;  %v5615_v32 = vadd.f32 %v13216_v18, %v5614_v48  ;;  %v10778_v41 = vld [vmem:[%s14973_s9 + $0x2c] sm:$0xf0] }
 0x72c   : > { %v5673_v37 = vmax.f32 %v5595_v26, 0.0  ;;  %v5681_v62 = vmax.f32 %v5615_v32, 0.0  ;;  %v10776_v26 = vld [vmem:[%s14973_s9 + $0x24] sm:$0xf] }
 0x72e   : > { %v5704_v58 = vpack.c.bf16 %v5673_v37, %v5672_v1  ;;  %v5708_v45 = vpack.c.bf16 %v5681_v62, %v5680_v51  ;;  %v9977_v1 = vor.u32 %v10778_v41, %v9976_v28  ;;  %v9978_v37 = vld [vmem:[%s14973_s9 + $0x30] sm:$0xf0] }
 0x730   : > { %9942 = vmatmul.msk.bf16.vlgmr.msrb.gmra.mxu1 %vm5756_vm6, %v5704_v58  ;;  %v9981_v58 = vor.u32 %v10776_v26, %v9978_v37  ;;  %6102 = vmatpush.bf16.msrb.mxu2 %v9977_v1 }
 0x731   : > { %v5597_v38 = vpop.f32.mrf.mxu0  ;;  %v5617_v10 = vpop.f32.mrf.mxu1 }
 0x732   : > { %v5598_v43 = vadd.f32 %v13216_v18, %v5597_v38  ;;  %6191 = vmatpush.bf16.msrb.mxu3 %v9981_v58  ;;  %v5618_v53 = vadd.f32 %v13216_v18, %v5617_v10  ;;  %v10145_v10 = vor.u32 %v10803_v54, %v10144_v0 }
 0x734   : > { %v5674_v50 = vmax.f32 %v5598_v43, 0.0  ;;  %v5682_v14 = vmax.f32 %v5618_v53, 0.0 }
 0x739   : > { %v5599_v15 = vpop.f32.mrf.mxu0  ;;  %v5619_v22 = vpop.f32.mrf.mxu1 }
 0x73a   : > { %v5600_v23 = vadd.f32 %v13216_v18, %v5599_v15  ;;  %v5620_v7 = vadd.f32 %v13216_v18, %v5619_v22 }
 0x73c   : > { %v5675_v12 = vmax.f32 %v5600_v23, 0.0  ;;  %v5683_v43 = vmax.f32 %v5620_v7, 0.0 }
 0x73e   : > { %v5705_v59 = vpack.c.bf16 %v5675_v12, %v5674_v50  ;;  %v5709_v15 = vpack.c.bf16 %v5683_v43, %v5682_v14  ;;  %v9960_v50 = vld [vmem:[%s14973_s9] sm:$0xf]  ;;  %v10774_v12 = vld [vmem:[%s14973_s9 + $0xc] sm:$0xf0] }
 0x740   : > { %9943 = vmatmul.msk.bf16.gmra.mxu1 %vm5756_vm6, %v5705_v59  ;;  %v9961_v59 = vor.u32 %v10774_v12, %v9960_v50  ;;  %v10801_v50 = vld [vmem:[%s14976_s12 + $0x64] sm:$0xf0] }
 0x741   : > { %v5602_v16 = vpop.f32.mrf.mxu0  ;;  %v5622_v38 = vpop.f32.mrf.mxu1 }
 0x742   : > { %v5603_v8 = vadd.f32 %v13216_v18, %v5602_v16  ;;  %6103 = vmatpush.bf16.msrb.mxu2 %v9961_v59  ;;  %v5623_v17 = vadd.f32 %v13216_v18, %v5622_v38 }
 0x744   : > { %v5676_v40 = vmax.f32 %v5603_v8, 0.0  ;;  %v5684_v2 = vmax.f32 %v5623_v17, 0.0 }
 0x746   : > { %7034 = vmatpush.bf16.msra.mxu2 %v10145_v10  ;;  %v10128_v10 = vld [vmem:[%s14976_s12 + $0x50] sm:$0xf] }
 0x749   : > { %v5604_v61 = vpop.f32.mrf.mxu0  ;;  %v5624_v23 = vpop.f32.mrf.mxu1 }
 0x74a   : > { %v5605_v9 = vadd.f32 %v13216_v18, %v5604_v61  ;;  %v5625_v27 = vadd.f32 %v13216_v18, %v5624_v23  ;;  %v10016_v61 = vld [vmem:[%s14973_s9 + $0x68] sm:$0xf]  ;;  %v10136_v23 = vld [vmem:[%s14976_s12 + $0x60] sm:$0xf] }
 0x74b   : > { %v10137_v59 = vor.u32 %v10801_v50, %v10136_v23 }
 0x74c   : > { %v5677_v49 = vmax.f32 %v5605_v9, 0.0  ;;  %v5685_v8 = vmax.f32 %v5625_v27, 0.0  ;;  %v10787_v9 = vld [vmem:[%s14973_s9 + $0x74] sm:$0xf0]  ;;  %v10200_v27 = vld [vmem:[%s14976_s12 + $0xe0] sm:$0xf] }
 0x74d   : > { %7035 = vmatpush.bf16.msra.mxu2 %v10137_v59 }
 0x74e   : > { %v5706_v42 = vpack.c.bf16 %v5677_v49, %v5676_v40  ;;  %v10017_v40 = vor.u32 %v10787_v9, %v10016_v61  ;;  %v5632_v49 = vpop.f32.mrf.mxu2  ;;  %v5710_v57 = vpack.c.bf16 %v5685_v8, %v5684_v2 }
 0x74f   : > { %v5633_v56 = vadd.f32 %v13216_v18, %v5632_v49 }
 0x750   : > { %9944 = vmatmul.msk.bf16.gmra.mxu1 %vm5756_vm6, %v5706_v42  ;;  %6278 = vmatpush.bf16.msrb.mxu0 %v10017_v40  ;;  %v10000_v42 = vld [vmem:[%s14973_s9 + $0x48] sm:$0xf] }
 0x751   : > { %v5607_v63 = vpop.f32.mrf.mxu0  ;;  %v5627_v16 = vpop.f32.mrf.mxu1  ;;  %v10001_v29 = vor.u32 %v10783_v6, %v10000_v42  ;;  %v5688_v30 = vmax.f32 %v5633_v56, 0.0  ;;  %v10815_v56 = vld [vmem:[%s14976_s12 + $0xd4] sm:$0xf0] }
 0x752   : > { %v5608_v31 = vadd.f32 %v13216_v18, %v5607_v63  ;;  %v9962_v63 = vld [vmem:[%s14973_s9 + $0x10] sm:$0xf0]  ;;  %v5628_v46 = vadd.f32 %v13216_v18, %v5627_v16  ;;  %v10817_v16 = vld [vmem:[%s14976_s12 + $0xe4] sm:$0xf0] }
 0x753   : > { %v9965_v35 = vor.u32 %v10772_v55, %v9962_v63  ;;  %v10201_v2 = vor.u32 %v10817_v16, %v10200_v27 }
 0x754   : > { %v5678_v52 = vmax.f32 %v5608_v31, 0.0  ;;  %6279 = vmatpush.bf16.msrb.mxu0 %v10001_v29  ;;  %v9968_v31 = vld [vmem:[%s14973_s9 + $0x8] sm:$0xf] }
 0x755   : > { %6192 = vmatpush.bf16.msrb.mxu3 %v9965_v35  ;;  %v5652_v35 = vpop.f32.mrf.mxu3 }
 0x758   : > { %6280 = vmatpush.bf16.msrb.mxu0 %v9985_v21 }
 0x759   : > { %v5609_v25 = vpop.f32.mrf.mxu0  ;;  %v5629_v3 = vpop.f32.mrf.mxu1  ;;  %7123 = vmatpush.bf16.msra.mxu3 %v10209_v44  ;;  %v10192_v44 = vld [vmem:[%s14976_s12 + $0xd0] sm:$0xf] }
 0x75a   : > { %v5610_v13 = vadd.f32 %v13216_v18, %v5609_v25  ;;  %v5630_v48 = vadd.f32 %v13216_v18, %v5629_v3  ;;  %v10775_v25 = vld [vmem:[%s14973_s9 + $0x14] sm:$0xf0] }
 0x75c   : > { %v5679_v19 = vmax.f32 %v5610_v13, 0.0  ;;  %v5634_v13 = vpop.f32.mrf.mxu2 }
 0x75d   : > { %v5635_v5 = vadd.f32 %v13216_v18, %v5634_v13  ;;  %7124 = vmatpush.bf16.msra.mxu3 %v10201_v2  ;;  %v5654_v13 = vpop.f32.mrf.mxu3 }
 0x75e   : > { %v5707_v36 = vpack.c.bf16 %v5679_v19, %v5678_v52  ;;  %v9969_v52 = vor.u32 %v10775_v25, %v9968_v31  ;;  %v5686_v19 = vmax.f32 %v5628_v46, 0.0 }
 0x75f   : > { %v5689_v32 = vmax.f32 %v5635_v5, 0.0 }
 0x760   : > { %9945 = vmatmul.msk.bf16.gmra.mxu1 %vm5756_vm6, %v5707_v36  ;;  %6281 = vmatpush.bf16.msrb.mxu0 %v9969_v52  ;;  %v5687_v36 = vmax.f32 %v5630_v48, 0.0 }
 0x761   : > { %v5712_v22 = vpack.c.bf16 %v5689_v32, %v5688_v30  ;;  %v10193_v30 = vor.u32 %v10815_v56, %v10192_v44 }
 0x762   : > { %v5711_v39 = vpack.c.bf16 %v5687_v36, %v5686_v19 }
 0x763   : > { %7125 = vmatpush.bf16.msra.mxu3 %v10193_v30 }
 0x764   : > { %v5637_v47 = vpop.f32.mrf.mxu2 }
 0x765   : > { %v5638_v1 = vadd.f32 %v13216_v18, %v5637_v47  ;;  %v10129_v47 = vor.u32 %v10799_v33, %v10128_v10  ;;  %v5657_v5 = vpop.f32.mrf.mxu3 }
 0x766   : > { %v5658_v50 = vadd.f32 %v13216_v18, %v5657_v5 }
 0x767   : > { %v5690_v7 = vmax.f32 %v5638_v1, 0.0  ;;  %7036 = vmatpush.bf16.msra.mxu2 %v10129_v47 }
 0x768   : > { %v5698_v16 = vmax.f32 %v5658_v50, 0.0 }
 0x76c   : > { %v5639_v51 = vpop.f32.mrf.mxu2 }
 0x76d   : > { %v5640_v37 = vadd.f32 %v13216_v18, %v5639_v51 }
 0x76f   : > { %v5691_v14 = vmax.f32 %v5640_v37, 0.0 }
 0x770   : > { %9946 = vmatmul.msk.bf16.gmra.mxu1 %vm5756_vm6, %v5708_v45  ;;  %v13356_v45 = vld [vmem:[%s14968_s4] ss:$0 sm:$0xff] }
 0x771   : > { %v5713_v12 = vpack.c.bf16 %v5691_v14, %v5690_v7 }
 0x774   : > { %v5642_v26 = vpop.f32.mrf.mxu2 }
 0x775   : > { %v5643_v9 = vadd.f32 %v13216_v18, %v5642_v26 }
 0x777   : > { %v5692_v29 = vmax.f32 %v5643_v9, 0.0  ;;  %v10120_v9 = vld [vmem:[%s14976_s12 + $0x40] sm:$0xf] }
 0x77c   : > { %v5644_v17 = vpop.f32.mrf.mxu2 }
 0x77d   : > { %v5645_v40 = vadd.f32 %v13216_v18, %v5644_v17 }
 0x77f   : > { %v5693_v55 = vmax.f32 %v5645_v40, 0.0  ;;  %v10797_v40 = vld [vmem:[%s14976_s12 + $0x44] sm:$0xf0] }
 0x780   : > { %9947 = vmatmul.msk.bf16.gmra.mxu1 %vm5756_vm6, %v5709_v15 }
 0x781   : > { %v5714_v20 = vpack.c.bf16 %v5693_v55, %v5692_v29  ;;  %v10813_v29 = vld [vmem:[%s14976_s12 + $0xc4] sm:$0xf0] }
 0x784   : > { %v5647_v6 = vpop.f32.mrf.mxu2 }
 0x785   : > { %v5648_v48 = vadd.f32 %v13216_v18, %v5647_v6  ;;  %v10184_v6 = vld [vmem:[%s14976_s12 + $0xc0] sm:$0xf] }
 0x786   : > { %v10185_v55 = vor.u32 %v10813_v29, %v10184_v6 }
 0x787   : > { %v5694_v36 = vmax.f32 %v5648_v48, 0.0 }
 0x788   : > { %7126 = vmatpush.bf16.msra.mxu3 %v10185_v55 }
 0x78c   : > { %v5649_v3 = vpop.f32.mrf.mxu2 }
 0x78d   : > { %v5650_v31 = vadd.f32 %v13216_v18, %v5649_v3 }
 0x78f   : > { %v5695_v0 = vmax.f32 %v5650_v31, 0.0 }
 0x790   : > { %9948 = vmatmul.msk.bf16.gmra.mxu1 %vm5756_vm6, %v5710_v57 }
 0x791   : > { %v5715_v34 = vpack.c.bf16 %v5695_v0, %v5694_v36  ;;  %v10336_v0 = vld [vmem:[%s14976_s12 + $0x1f0] sm:$0xf] }
 0x7a0   : > { %9949 = vmatmul.msk.bf16.gmra.mxu1 %vm5756_vm6, %v5711_v39 }
 0x7ad   : > { %v5814_v62 = vpop.f32.mrf.mxu1 }
 0x7ae   : > { %v5815_v28 = vadd.f32 %v13356_v45, %v5814_v62  ;;  %v5653_v62 = vadd.f32 %v13216_v18, %v5652_v35 }
 0x7b0   : > { %9950 = vmatmul.msk.bf16.gmra.mxu1 %vm5756_vm6, %v5712_v22  ;;  %v5894_v38 = vmax.f32 %v5815_v28, 0.0  ;;  %v5655_v22 = vadd.f32 %v13216_v18, %v5654_v13  ;;  %v5696_v1 = vmax.f32 %v5653_v62, 0.0 }
 0x7b2   : > { %v5697_v37 = vmax.f32 %v5655_v22, 0.0 }
 0x7b4   : > { %v5716_v7 = vpack.c.bf16 %v5697_v37, %v5696_v1  ;;  %v10176_v37 = vld [vmem:[%s14976_s12 + $0xb0] sm:$0xf] }
 0x7b5   : > { %v5816_v41 = vpop.f32.mrf.mxu1 }
 0x7b6   : > { %v5817_v58 = vadd.f32 %v13356_v45, %v5816_v41 }
 0x7b8   : > { %v5895_v53 = vmax.f32 %v5817_v58, 0.0 }
 0x7ba   : > { %v13363_v43 = vpack.c.bf16 %v5895_v53, %v5894_v38  ;;  %v5659_v38 = vpop.f32.mrf.mxu3 }
 0x7bc   : > { %10022 = vmatmul.msk.bf16.vlgmr.msrb.gmra.mxu2 %vm5756_vm6, %v13363_v43  ;;  %10038 = vmatmul.msk.bf16.vlgmr.msrb.gmra.mxu3 %vm5756_vm6, %v13363_v43 }
 0x7bd   : > { %10054 = vmatmul.msk.bf16.vlgmr.msrb.gmra.mxu0 %vm5756_vm6, %v13363_v43  ;;  %v5819_v15 = vpop.f32.mrf.mxu1 }
 0x7be   : > { %v5820_v8 = vadd.f32 %v13356_v45, %v5819_v15 }
 0x7c0   : > { %9951 = vmatmul.msk.bf16.gmra.mxu1 %vm5756_vm6, %v5713_v12  ;;  %v5896_v57 = vmax.f32 %v5820_v8, 0.0  ;;  %v5660_v12 = vadd.f32 %v13216_v18, %v5659_v38  ;;  %v10811_v38 = vld [vmem:[%s14976_s12 + $0xb4] sm:$0xf0] }
 0x7c2   : > { %v5662_v23 = vpop.f32.mrf.mxu3  ;;  %v5699_v2 = vmax.f32 %v5660_v12, 0.0 }
 0x7c5   : > { %v5821_v61 = vpop.f32.mrf.mxu1 }
 0x7c6   : > { %v5822_v49 = vadd.f32 %v13356_v45, %v5821_v61 }
 0x7c8   : > { %v5897_v42 = vmax.f32 %v5822_v49, 0.0  ;;  %v5717_v49 = vpack.c.bf16 %v5699_v2, %v5698_v16 }
 0x7ca   : > { %v13388_v63 = vpack.c.bf16 %v5897_v42, %v5896_v57  ;;  %v10121_v57 = vor.u32 %v10797_v40, %v10120_v9  ;;  %v5664_v42 = vpop.f32.mrf.mxu3  ;;  %v10328_v9 = vld [vmem:[%s14976_s12 + $0x1e0] sm:$0xf] }
 0x7cb   : > { %v5665_v11 = vadd.f32 %v13216_v18, %v5664_v42 }
 0x7cc   : > { %10023 = vmatmul.msk.bf16.gmra.mxu2 %vm5756_vm6, %v13388_v63  ;;  %10039 = vmatmul.msk.bf16.gmra.mxu3 %vm5756_vm6, %v13388_v63 }
 0x7cd   : > { %10055 = vmatmul.msk.bf16.gmra.mxu0 %vm5756_vm6, %v13388_v63  ;;  %v5824_v24 = vpop.f32.mrf.mxu1  ;;  %7037 = vmatpush.bf16.msra.mxu2 %v10121_v57  ;;  %v5701_v48 = vmax.f32 %v5665_v11, 0.0 }
 0x7ce   : > { %v5825_v21 = vadd.f32 %v13356_v45, %v5824_v24 }
 0x7d0   : > { %9952 = vmatmul.msk.bf16.gmra.mxu1 %vm5756_vm6, %v5714_v20  ;;  %v5898_v52 = vmax.f32 %v5825_v21, 0.0  ;;  %v5663_v20 = vadd.f32 %v13216_v18, %v5662_v23 }
 0x7d2   : > { %v5667_v21 = vpop.f32.mrf.mxu3 }
 0x7d3   : > { %v5668_v44 = vadd.f32 %v13216_v18, %v5667_v21  ;;  %v10809_v21 = vld [vmem:[%s14976_s12 + $0xa4] sm:$0xf0] }
 0x7d5   : > { %v5826_v46 = vpop.f32.mrf.mxu1 }
 0x7d6   : > { %v5827_v25 = vadd.f32 %v13356_v45, %v5826_v46  ;;  %v5700_v46 = vmax.f32 %v5663_v20, 0.0 }
 0x7d8   : > { %v5899_v19 = vmax.f32 %v5827_v25, 0.0  ;;  %v5718_v13 = vpack.c.bf16 %v5701_v48, %v5700_v46 }
 0x7da   : > { %v13407_v54 = vpack.c.bf16 %v5899_v19, %v5898_v52  ;;  %v10272_v52 = vld [vmem:[%s14976_s12 + $0x170] sm:$0xf]  ;;  %v10835_v19 = vld [vmem:[%s14976_s12 + $0x174] sm:$0xf0]  ;;  %v5669_v33 = vpop.f32.mrf.mxu3 }
 0x7db   : > { %v10273_v36 = vor.u32 %v10835_v19, %v10272_v52  ;;  %v5670_v56 = vadd.f32 %v13216_v18, %v5669_v33  ;;  %v10112_v18 = vld [vmem:[%s14976_s12 + $0x30] sm:$0xf] }
 0x7dc   : > { %10024 = vmatmul.msk.bf16.gmra.mxu2 %vm5756_vm6, %v13407_v54  ;;  %10040 = vmatmul.msk.bf16.gmra.mxu3 %vm5756_vm6, %v13407_v54 }
 0x7dd   : > { %10056 = vmatmul.msk.bf16.gmra.mxu0 %vm5756_vm6, %v13407_v54  ;;  %v5829_v39 = vpop.f32.mrf.mxu1  ;;  %v5703_v62 = vmax.f32 %v5670_v56, 0.0 }
 0x7de   : > { %v5830_v32 = vadd.f32 %v13356_v45, %v5829_v39  ;;  %v10851_v39 = vld [vmem:[%s14976_s12 + $0x1f4] sm:$0xf0]  ;;  %7212 = vmatpush.bf16.msra.mxu0 %v10273_v36 }
 0x7df   : > { %v10337_v10 = vor.u32 %v10851_v39, %v10336_v0 }
 0x7e0   : > { %9953 = vmatmul.msk.bf16.gmra.mxu1 %vm5756_vm6, %v5715_v34  ;;  %v5900_v41 = vmax.f32 %v5830_v32, 0.0 }
 0x7e1   : > { %7301 = vmatpush.bf16.msrb.mxu1 %v10337_v10 }
 0x7e5   : > { %v5831_v51 = vpop.f32.mrf.mxu1 }
 0x7e6   : > { %v5832_v28 = vadd.f32 %v13356_v45, %v5831_v51  ;;  %v5702_v51 = vmax.f32 %v5668_v44, 0.0 }
 0x7e8   : > { %v5901_v26 = vmax.f32 %v5832_v28, 0.0 }
 0x7ea   : > { %v13432_v58 = vpack.c.bf16 %v5901_v26, %v5900_v41  ;;  %v10795_v41 = vld [vmem:[%s14976_s12 + $0x34] sm:$0xf0]  ;;  %v5719_v26 = vpack.c.bf16 %v5703_v62, %v5702_v51 }
 0x7eb   : > { %v10113_v1 = vor.u32 %v10795_v41, %v10112_v18 }
 0x7ec   : > { %10025 = vmatmul.msk.bf16.gmra.mxu2 %vm5756_vm6, %v13432_v58  ;;  %10041 = vmatmul.msk.bf16.gmra.mxu3 %vm5756_vm6, %v13432_v58 }
 0x7ed   : > { %10057 = vmatmul.msk.bf16.gmra.mxu0 %vm5756_vm6, %v13432_v58  ;;  %v5834_v53 = vpop.f32.mrf.mxu1  ;;  %7038 = vmatpush.bf16.msra.mxu2 %v10113_v1 }
 0x7ee   : > { %v5835_v14 = vadd.f32 %v13356_v45, %v5834_v53  ;;  %v10177_v53 = vor.u32 %v10811_v38, %v10176_v37  ;;  %v10256_v38 = vld [vmem:[%s14976_s12 + $0x150] sm:$0xf] }
 0x7f0   : > { %9954 = vmatmul.msk.bf16.gmra.mxu1 %vm5756_vm6, %v5716_v7  ;;  %v5902_v17 = vmax.f32 %v5835_v14, 0.0  ;;  %7127 = vmatpush.bf16.msra.mxu3 %v10177_v53  ;;  %v10831_v53 = vld [vmem:[%s14976_s12 + $0x154] sm:$0xf0] }
 0x7f5   : > { %v5836_v15 = vpop.f32.mrf.mxu1 }
 0x7f6   : > { %v5837_v59 = vadd.f32 %v13356_v45, %v5836_v15 }
 0x7f8   : > { %v5903_v27 = vmax.f32 %v5837_v59, 0.0 }
 0x7fa   : > { %v13445_v8 = vpack.c.bf16 %v5903_v27, %v5902_v17  ;;  %v10264_v17 = vld [vmem:[%s14976_s12 + $0x160] sm:$0xf]  ;;  %v10833_v27 = vld [vmem:[%s14976_s12 + $0x164] sm:$0xf0] }
 0x7fb   : > { %v10265_v16 = vor.u32 %v10833_v27, %v10264_v17 }
 0x7fc   : > { %10026 = vmatmul.msk.bf16.gmra.mxu2 %vm5756_vm6, %v13445_v8  ;;  %10042 = vmatmul.msk.bf16.gmra.mxu3 %vm5756_vm6, %v13445_v8 }
 0x7fd   : > { %10058 = vmatmul.msk.bf16.gmra.mxu0 %vm5756_vm6, %v13445_v8  ;;  %v5839_v61 = vpop.f32.mrf.mxu1 }
 0x7fe   : > { %v5840_v24 = vadd.f32 %v13356_v45, %v5839_v61  ;;  %7213 = vmatpush.bf16.msra.mxu0 %v10265_v16 }
 0x800   : > { %9955 = vmatmul.msk.bf16.gmra.mxu1 %vm5756_vm6, %v5717_v49  ;;  %v5904_v60 = vmax.f32 %v5840_v24, 0.0  ;;  %v10104_v24 = vld [vmem:[%s14976_s12 + $0x20] sm:$0xf] }
 0x805   : > { %v5841_v35 = vpop.f32.mrf.mxu1 }
 0x806   : > { %v5842_v4 = vadd.f32 %v13356_v45, %v5841_v35  ;;  %v10793_v35 = vld [vmem:[%s14976_s12 + $0x24] sm:$0xf0] }
 0x807   : > { %v10105_v20 = vor.u32 %v10793_v35, %v10104_v24 }
 0x808   : > { %v5905_v3 = vmax.f32 %v5842_v4, 0.0 }
 0x809   : > { %7039 = vmatpush.bf16.msra.mxu2 %v10105_v20 }
 0x80a   : > { %v13470_v31 = vpack.c.bf16 %v5905_v3, %v5904_v60  ;;  %v13558_v60 = vld [vmem:[#allocation3] sm:$0xf]  ;;  %v10168_v3 = vld [vmem:[%s14976_s12 + $0xa0] sm:$0xf] }
 0x80b   : > { %v13569_v46 = vperm.slane %v13558_v60, 0  ;;  %v10169_v48 = vor.u32 %v10809_v21, %v10168_v3  ;;  %v10096_v3 = vld [vmem:[%s14976_s12 + $0x10] sm:$0xf]  ;;  %v10791_v21 = vld [vmem:[%s14976_s12 + $0x14] sm:$0xf0] }
 0x80c   : > { %10027 = vmatmul.msk.bf16.gmra.mxu2 %vm5756_vm6, %v13470_v31  ;;  %10043 = vmatmul.msk.bf16.gmra.mxu3 %vm5756_vm6, %v13470_v31 }
 0x80d   : > { %10059 = vmatmul.msk.bf16.gmra.mxu0 %vm5756_vm6, %v13470_v31  ;;  %v5844_v25 = vpop.f32.mrf.mxu1  ;;  %7128 = vmatpush.bf16.msra.mxu3 %v10169_v48  ;;  %v10097_v48 = vor.u32 %v10791_v21, %v10096_v3 }
 0x80e   : > { %v5845_v34 = vadd.f32 %v13356_v45, %v5844_v25  ;;  %v13572_v25 = vperm.slane %v13558_v60, 1 }
 0x80f   : > { %7040 = vmatpush.bf16.msra.mxu2 %v10097_v48 }
 0x810   : > { %9956 = vmatmul.msk.bf16.gmra.mxu1 %vm5756_vm6, %v5718_v13  ;;  %v5906_v30 = vmax.f32 %v5845_v34, 0.0 }
 0x815   : > { %v5846_v47 = vpop.f32.mrf.mxu1 }
 0x816   : > { %v5847_v5 = vadd.f32 %v13356_v45, %v5846_v47 }
 0x818   : > { %v5907_v32 = vmax.f32 %v5847_v5, 0.0 }
 0x81a   : > { %v13495_v22 = vpack.c.bf16 %v5907_v32, %v5906_v30 }
 0x81c   : > { %10028 = vmatmul.msk.bf16.gmra.mxu2 %vm5756_vm6, %v13495_v22  ;;  %10044 = vmatmul.msk.bf16.gmra.mxu3 %vm5756_vm6, %v13495_v22 }
 0x81d   : > { %10060 = vmatmul.msk.bf16.gmra.mxu0 %vm5756_vm6, %v13495_v22  ;;  %v5849_v28 = vpop.f32.mrf.mxu1 }
 0x81e   : > { %v5850_v7 = vadd.f32 %v13356_v45, %v5849_v28 }
 0x820   : > { %9957 = vmatmul.msk.bf16.gmra.mxu1 %vm5756_vm6, %v5719_v26  ;;  %v5908_v23 = vmax.f32 %v5850_v7, 0.0  ;;  %v10257_v7 = vor.u32 %v10831_v53, %v10256_v38 }
 0x822   : > { %7214 = vmatpush.bf16.msra.mxu0 %v10257_v7 }
 0x825   : > { %v5851_v14 = vpop.f32.mrf.mxu1 }
 0x826   : > { %v5852_v15 = vadd.f32 %v13356_v45, %v5851_v14 }
 0x828   : > { %v5909_v50 = vmax.f32 %v5852_v15, 0.0 }
 0x82a   : > { %v13518_v12 = vpack.c.bf16 %v5909_v50, %v5908_v23  ;;  %v10847_v50 = vld [vmem:[%s14976_s12 + $0x1d4] sm:$0xf0] }
 0x82c   : > { %10029 = vmatmul.msk.bf16.gmra.mxu2 %vm5756_vm6, %v13518_v12  ;;  %10045 = vmatmul.msk.bf16.gmra.mxu3 %vm5756_vm6, %v13518_v12 }
 0x82d   : > { %10061 = vmatmul.msk.bf16.gmra.mxu0 %vm5756_vm6, %v13518_v12  ;;  %v5854_v59 = vpop.f32.mrf.mxu1 }
 0x82e   : > { %v5855_v2 = vadd.f32 %v13356_v45, %v5854_v59 }
 0x830   : > { %10070 = vmatmul.msk.bf16.vlgmr.msra.gmra.mxu1 %vm5756_vm6, %v13363_v43  ;;  %v10849_v43 = vld [vmem:[%s14976_s12 + $0x1e4] sm:$0xf0]  ;;  %v5910_v57 = vmax.f32 %v5855_v2, 0.0 }
 0x831   : > { %v10329_v49 = vor.u32 %v10849_v43, %v10328_v9 }
 0x833   : > { %7302 = vmatpush.bf16.msrb.mxu1 %v10329_v49 }
 0x835   : > { %v5856_v61 = vpop.f32.mrf.mxu1 }
 0x836   : > { %v5857_v40 = vadd.f32 %v13356_v45, %v5856_v61 }
 0x838   : > { %v5911_v42 = vmax.f32 %v5857_v40, 0.0 }
 0x83a   : > { %v13542_v6 = vpack.c.bf16 %v5911_v42, %v5910_v57  ;;  %v13544_v29 = vpop.f32.mrf.mxu0 }
 0x83c   : > { %10030 = vmatmul.msk.bf16.gmra.mxu2 %vm5756_vm6, %v13542_v6  ;;  %10046 = vmatmul.msk.bf16.gmra.mxu3 %vm5756_vm6, %v13542_v6 }
 0x83d   : > { %10062 = vmatmul.msk.bf16.gmra.mxu0 %vm5756_vm6, %v13542_v6  ;;  %v5859_v55 = vpop.f32.mrf.mxu1 }
 0x83f   : > { %v6105_v11 = vpop.f32.mrf.mxu2  ;;  %v6194_v4 = vpop.f32.mrf.mxu3 }
 0x840   : > { %10071 = vmatmul.msk.bf16.gmra.mxu1 %vm5756_vm6, %v13388_v63  ;;  %v5860_v63 = vadd.f32 %v13356_v45, %v5859_v55  ;;  %v6106_v52 = vadd.f32 %v6105_v11, %v13569_v46  ;;  %v6195_v36 = vadd.f32 %v6194_v4, %v13572_v25 }
 0x842   : > { %v13574_v13 = vpop.f32.mrf.mxu0  ;;  %v5912_v33 = vmax.f32 %v5860_v63, 0.0  ;;  %v6452_v56 = vmax.f32 %v6106_v52, 0.0  ;;  %v6453_v5 = vmax.f32 %v6195_v36, 0.0  ;;  %v10807_v36 = vld [vmem:[%s14976_s12 + $0x94] sm:$0xf0] }
 0x845   : > { %v5861_v19 = vpop.f32.mrf.mxu1 }
 0x846   : > { %v5862_v0 = vadd.f32 %v13356_v45, %v5861_v19  ;;  %v10160_v19 = vld [vmem:[%s14976_s12 + $0x90] sm:$0xf] }
 0x847   : > { %v6107_v39 = vpop.f32.mrf.mxu2  ;;  %v6196_v10 = vpop.f32.mrf.mxu3 }
 0x848   : > { %v5913_v34 = vmax.f32 %v5862_v0, 0.0  ;;  %v6108_v47 = vadd.f32 %v6107_v39, %v13569_v46  ;;  %v6197_v44 = vadd.f32 %v6196_v10, %v13572_v25  ;;  %v10161_v0 = vor.u32 %v10807_v36, %v10160_v19 }
 0x84a   : > { %v13582_v30 = vpack.c.bf16 %v5913_v34, %v5912_v33  ;;  %v6456_v32 = vmax.f32 %v6108_v47, 0.0  ;;  %v6457_v51 = vmax.f32 %v6197_v44, 0.0  ;;  %v13584_v62 = vpop.f32.mrf.mxu0  ;;  %7129 = vmatpush.bf16.msra.mxu3 %v10161_v0 }
 0x84c   : > { %v13586_v28 = vpack.c.bf16 %v6456_v32, %v6452_v56  ;;  %v13588_v18 = vpack.c.bf16 %v6457_v51, %v6453_v5  ;;  %10031 = vmatmul.msk.bf16.gmra.mxu2 %vm5756_vm6, %v13582_v30  ;;  %10047 = vmatmul.msk.bf16.gmra.mxu3 %vm5756_vm6, %v13582_v30 }
 0x84d   : > { %10063 = vmatmul.msk.bf16.gmra.mxu0 %vm5756_vm6, %v13582_v30  ;;  %v5864_v41 = vpop.f32.mrf.mxu1 }
 0x84e   : > { %15214 = vst [vmem:[#allocation28_spill] sm:$0xff] %v13588_v18  ;;  %v5865_v14 = vadd.f32 %v13356_v45, %v5864_v41 }
 0x84f   : > { %v6110_v26 = vpop.f32.mrf.mxu2  ;;  %v6199_v1 = vpop.f32.mrf.mxu3 }
 0x850   : > { %10072 = vmatmul.msk.bf16.gmra.mxu1 %vm5756_vm6, %v13407_v54  ;;  %v6111_v15 = vadd.f32 %v6110_v26, %v13569_v46  ;;  %v10320_v54 = vld [vmem:[%s14976_s12 + $0x1d0] sm:$0xf]  ;;  %v6200_v59 = vadd.f32 %v6199_v1, %v13572_v25  ;;  %v5914_v61 = vmax.f32 %v5865_v14, 0.0 }
 0x851   : > { %v10321_v27 = vor.u32 %v10847_v50, %v10320_v54 }
 0x852   : > { %v13598_v37 = vpop.f32.mrf.mxu0  ;;  %v6460_v49 = vmax.f32 %v6111_v15, 0.0  ;;  %v6461_v57 = vmax.f32 %v6200_v59, 0.0 }
 0x853   : > { %7303 = vmatpush.bf16.msrb.mxu1 %v10321_v27  ;;  %v10248_v27 = vld [vmem:[%s14976_s12 + $0x140] sm:$0xf] }
 0x855   : > { %v5866_v23 = vpop.f32.mrf.mxu1 }
 0x856   : > { %v5867_v17 = vadd.f32 %v13356_v45, %v5866_v23 }
 0x857   : > { %v6112_v16 = vpop.f32.mrf.mxu2  ;;  %v6201_v2 = vpop.f32.mrf.mxu3 }
 0x858   : > { %v5915_v9 = vmax.f32 %v5867_v17, 0.0  ;;  %v6113_v43 = vadd.f32 %v6112_v16, %v13569_v46  ;;  %v6202_v40 = vadd.f32 %v6201_v2, %v13572_v25  ;;  %v10829_v16 = vld [vmem:[%s14976_s12 + $0x144] sm:$0xf0] }
 0x859   : > { %v10249_v2 = vor.u32 %v10829_v16, %v10248_v27 }
 0x85a   : > { %v13618_v42 = vpack.c.bf16 %v5915_v9, %v5914_v61  ;;  %v6464_v55 = vmax.f32 %v6113_v43, 0.0  ;;  %v6465_v24 = vmax.f32 %v6202_v40, 0.0  ;;  %v13620_v35 = vpop.f32.mrf.mxu0  ;;  %v10845_v40 = vld [vmem:[%s14976_s12 + $0x1c4] sm:$0xf0] }
 0x85b   : > { %7215 = vmatpush.bf16.msra.mxu0 %v10249_v2 }
 0x85c   : > { %10032 = vmatmul.msk.bf16.gmra.mxu2 %vm5756_vm6, %v13618_v42  ;;  %10048 = vmatmul.msk.bf16.gmra.mxu3 %vm5756_vm6, %v13618_v42  ;;  %v13626_v20 = vpack.c.bf16 %v6464_v55, %v6460_v49  ;;  %v13628_v11 = vpack.c.bf16 %v6465_v24, %v6461_v57 }
 0x85d   : > { %10064 = vmatmul.msk.bf16.gmra.mxu0 %vm5756_vm6, %v13618_v42  ;;  %v5869_v4 = vpop.f32.mrf.mxu1 }
 0x85e   : > { %15215 = vst [vmem:[#allocation29_spill] sm:$0xff] %v13626_v20  ;;  %v5870_v10 = vadd.f32 %v13356_v45, %v5869_v4 }
 0x85f   : > { %15216 = vst [vmem:[#allocation30_spill] sm:$0xff] %v13628_v11  ;;  %v6115_v63 = vpop.f32.mrf.mxu2  ;;  %v6204_v52 = vpop.f32.mrf.mxu3 }
 0x860   : > { %10073 = vmatmul.msk.bf16.gmra.mxu1 %vm5756_vm6, %v13432_v58  ;;  %v6116_v33 = vadd.f32 %v6115_v63, %v13569_v46  ;;  %v6205_v58 = vadd.f32 %v6204_v52, %v13572_v25  ;;  %v5916_v5 = vmax.f32 %v5870_v10, 0.0 }
 0x862   : > { %v13646_v39 = vpop.f32.mrf.mxu0  ;;  %v6468_v26 = vmax.f32 %v6116_v33, 0.0  ;;  %v6469_v1 = vmax.f32 %v6205_v58, 0.0 }
 0x865   : > { %v5871_v34 = vpop.f32.mrf.mxu1 }
 0x866   : > { %v5872_v47 = vadd.f32 %v13356_v45, %v5871_v34 }
 0x867   : > { %v6117_v44 = vpop.f32.mrf.mxu2  ;;  %v6206_v56 = vpop.f32.mrf.mxu3 }
 0x868   : > { %v5917_v32 = vmax.f32 %v5872_v47, 0.0  ;;  %v6118_v51 = vadd.f32 %v6117_v44, %v13569_v46  ;;  %v6207_v41 = vadd.f32 %v6206_v56, %v13572_v25  ;;  %v10088_v44 = vld [vmem:[%s14976_s12] sm:$0xf]  ;;  %v10789_v56 = vld [vmem:[%s14976_s12 + $0x4] sm:$0xf0] }
 0x86a   : > { %v13654_v38 = vpack.c.bf16 %v5917_v32, %v5916_v5  ;;  %v6472_v53 = vmax.f32 %v6118_v51, 0.0  ;;  %v6473_v7 = vmax.f32 %v6207_v41, 0.0  ;;  %v13656_v14 = vpop.f32.mrf.mxu0  ;;  %v10089_v5 = vor.u32 %v10789_v56, %v10088_v44  ;;  %v10152_v41 = vld [vmem:[%s14976_s12 + $0x80] sm:$0xf] }
 0x86c   : > { %10033 = vmatmul.msk.bf16.gmra.mxu2 %vm5756_vm6, %v13654_v38  ;;  %10049 = vmatmul.msk.bf16.gmra.mxu3 %vm5756_vm6, %v13654_v38  ;;  %v13662_v15 = vpack.c.bf16 %v6472_v53, %v6468_v26  ;;  %v13664_v23 = vpack.c.bf16 %v6473_v7, %v6469_v1  ;;  %v10805_v26 = vld [vmem:[%s14976_s12 + $0x84] sm:$0xf0] }
 0x86d   : > { %10065 = vmatmul.msk.bf16.gmra.mxu0 %vm5756_vm6, %v13654_v38  ;;  %v5874_v54 = vpop.f32.mrf.mxu1  ;;  %7041 = vmatpush.bf16.msra.mxu2 %v10089_v5  ;;  %v10153_v1 = vor.u32 %v10805_v26, %v10152_v41 }
 0x86e   : > { %15217 = vst [vmem:[#allocation31_spill] sm:$0xff] %v13662_v15  ;;  %v5875_v61 = vadd.f32 %v13356_v45, %v5874_v54 }
 0x86f   : > { %15218 = vst [vmem:[#allocation32_spill] sm:$0xff] %v13664_v23  ;;  %v6120_v50 = vpop.f32.mrf.mxu2  ;;  %v6209_v59 = vpop.f32.mrf.mxu3  ;;  %7130 = vmatpush.bf16.msra.mxu3 %v10153_v1 }
 0x870   : > { %10074 = vmatmul.msk.bf16.gmra.mxu1 %vm5756_vm6, %v13445_v8  ;;  %v6121_v9 = vadd.f32 %v6120_v50, %v13569_v46  ;;  %v10312_v8 = vld [vmem:[%s14976_s12 + $0x1c0] sm:$0xf]  ;;  %v6210_v49 = vadd.f32 %v6209_v59, %v13572_v25  ;;  %v5918_v3 = vmax.f32 %v5875_v61, 0.0 }
 0x871   : > { %v10313_v55 = vor.u32 %v10845_v40, %v10312_v8 }
 0x872   : > { %v13670_v17 = vpop.f32.mrf.mxu0  ;;  %v6476_v52 = vmax.f32 %v6121_v9, 0.0  ;;  %v6477_v19 = vmax.f32 %v6210_v49, 0.0 }
 0x873   : > { %7304 = vmatpush.bf16.msrb.mxu1 %v10313_v55 }
 0x875   : > { %v5876_v43 = vpop.f32.mrf.mxu1 }
 0x876   : > { %v5877_v57 = vadd.f32 %v13356_v45, %v5876_v43 }
 0x877   : > { %v6122_v24 = vpop.f32.mrf.mxu2  ;;  %v6211_v4 = vpop.f32.mrf.mxu3 }
 0x878   : > { %v5919_v21 = vmax.f32 %v5877_v57, 0.0  ;;  %v6123_v48 = vadd.f32 %v6122_v24, %v13569_v46  ;;  %v6212_v63 = vadd.f32 %v6211_v4, %v13572_v25  ;;  %v10240_v4 = vld [vmem:[%s14976_s12 + $0x130] sm:$0xf] }
 0x87a   : > { %v13690_v36 = vpack.c.bf16 %v5919_v21, %v5918_v3  ;;  %v6480_v0 = vmax.f32 %v6123_v48, 0.0  ;;  %v6481_v10 = vmax.f32 %v6212_v63, 0.0  ;;  %v13692_v33 = vpop.f32.mrf.mxu0  ;;  %v10827_v3 = vld [vmem:[%s14976_s12 + $0x134] sm:$0xf0] }
 0x87b   : > { %v10241_v21 = vor.u32 %v10827_v3, %v10240_v4 }
 0x87c   : > { %10034 = vmatmul.msk.bf16.gmra.mxu2 %vm5756_vm6, %v13690_v36  ;;  %10050 = vmatmul.msk.bf16.gmra.mxu3 %vm5756_vm6, %v13690_v36  ;;  %v13698_v34 = vpack.c.bf16 %v6480_v0, %v6476_v52  ;;  %v13700_v58 = vpack.c.bf16 %v6481_v10, %v6477_v19  ;;  %v10232_v10 = vld [vmem:[%s14976_s12 + $0x120] sm:$0xf] }
 0x87d   : > { %10066 = vmatmul.msk.bf16.gmra.mxu0 %vm5756_vm6, %v13690_v36  ;;  %v5879_v47 = vpop.f32.mrf.mxu1 }
 0x87e   : > { %15219 = vst [vmem:[#allocation33_spill] sm:$0xff] %v13698_v34  ;;  %v5880_v7 = vadd.f32 %v13356_v45, %v5879_v47  ;;  %7216 = vmatpush.bf16.msra.mxu0 %v10241_v21  ;;  %v10825_v47 = vld [vmem:[%s14976_s12 + $0x124] sm:$0xf0] }
 0x87f   : > { %15220 = vst [vmem:[#allocation34_spill] sm:$0xff] %v13700_v58  ;;  %v6125_v32 = vpop.f32.mrf.mxu2  ;;  %v6214_v51 = vpop.f32.mrf.mxu3  ;;  %v10233_v44 = vor.u32 %v10825_v47, %v10232_v10  ;;  %v10802_v47 = vld [vmem:[%s14976_s12 + $0x74] sm:$0xf] }
 0x880   : > { %10075 = vmatmul.msk.bf16.gmra.mxu1 %vm5756_vm6, %v13470_v31  ;;  %v6126_v54 = vadd.f32 %v6125_v32, %v13569_v46  ;;  %v6215_v31 = vadd.f32 %v6214_v51, %v13572_v25  ;;  %v5920_v2 = vmax.f32 %v5880_v7, 0.0  ;;  %v10224_v32 = vld [vmem:[%s14976_s12 + $0x110] sm:$0xf]  ;;  %v10823_v51 = vld [vmem:[%s14976_s12 + $0x114] sm:$0xf0] }
 0x881   : > { %v10225_v41 = vor.u32 %v10823_v51, %v10224_v32  ;;  %v10843_v7 = vld [vmem:[%s14976_s12 + $0x1b4] sm:$0xf0] }
 0x882   : > { %v13718_v53 = vpop.f32.mrf.mxu0  ;;  %v6484_v8 = vmax.f32 %v6126_v54, 0.0  ;;  %v6485_v40 = vmax.f32 %v6215_v31, 0.0  ;;  %7217 = vmatpush.bf16.msra.mxu0 %v10233_v44  ;;  %v10146_v44 = vld [vmem:[%s14976_s12 + $0x78] sm:$0xf0] }
 0x885   : > { %v5881_v50 = vpop.f32.mrf.mxu1 }
 0x886   : > { %v5882_v59 = vadd.f32 %v13356_v45, %v5881_v50  ;;  %7218 = vmatpush.bf16.msra.mxu0 %v10225_v41  ;;  %v10818_v41 = vld [vmem:[%s14976_s12 + $0xf4] sm:$0xf] }
 0x887   : > { %v6127_v27 = vpop.f32.mrf.mxu2  ;;  %v6216_v16 = vpop.f32.mrf.mxu3 }
 0x888   : > { %v5921_v61 = vmax.f32 %v5882_v59, 0.0  ;;  %v6128_v9 = vadd.f32 %v6127_v27, %v13569_v46  ;;  %v6217_v43 = vadd.f32 %v6216_v16, %v13572_v25 }
 0x88a   : > { %v13726_v49 = vpack.c.bf16 %v5921_v61, %v5920_v2  ;;  %v6488_v57 = vmax.f32 %v6128_v9, 0.0  ;;  %v6489_v55 = vmax.f32 %v6217_v43, 0.0  ;;  %v13728_v24 = vpop.f32.mrf.mxu0  ;;  %v10216_v2 = vld [vmem:[%s14976_s12 + $0x100] sm:$0xf]  ;;  %v10821_v61 = vld [vmem:[%s14976_s12 + $0x104] sm:$0xf0] }
 0x88c   : > { %10035 = vmatmul.msk.bf16.gmra.mxu2 %vm5756_vm6, %v13726_v49  ;;  %10051 = vmatmul.msk.bf16.gmra.mxu3 %vm5756_vm6, %v13726_v49  ;;  %v13740_v48 = vpack.c.bf16 %v6488_v57, %v6484_v8  ;;  %v13742_v63 = vpack.c.bf16 %v6489_v55, %v6485_v40  ;;  %v10217_v40 = vor.u32 %v10821_v61, %v10216_v2 }
 0x88d   : > { %10067 = vmatmul.msk.bf16.gmra.mxu0 %vm5756_vm6, %v13726_v49  ;;  %v5884_v52 = vpop.f32.mrf.mxu1 }
 0x88e   : > { %15221 = vst [vmem:[#allocation35_spill] sm:$0xff] %v13740_v48  ;;  %v5885_v5 = vadd.f32 %v13356_v45, %v5884_v52  ;;  %7219 = vmatpush.bf16.msra.mxu0 %v10217_v40 }
 0x88f   : > { %15222 = vst [vmem:[#allocation36_spill] sm:$0xff] %v13742_v63  ;;  %v6130_v19 = vpop.f32.mrf.mxu2  ;;  %v6219_v0 = vpop.f32.mrf.mxu3 }
 0x890   : > { %10076 = vmatmul.msk.bf16.gmra.mxu1 %vm5756_vm6, %v13495_v22  ;;  %v6131_v26 = vadd.f32 %v6130_v19, %v13569_v46  ;;  %v10304_v22 = vld [vmem:[%s14976_s12 + $0x1b0] sm:$0xf]  ;;  %v6220_v54 = vadd.f32 %v6219_v0, %v13572_v25  ;;  %v5922_v59 = vmax.f32 %v5885_v5, 0.0  ;;  %v10149_v5 = vor.u32 %v10802_v47, %v10146_v44 }
 0x891   : > { %v10305_v31 = vor.u32 %v10843_v7, %v10304_v22 }
 0x892   : > { %v13754_v56 = vpop.f32.mrf.mxu0  ;;  %v6492_v57 = vmax.f32 %v6131_v26, 0.0  ;;  %v6493_v55 = vmax.f32 %v6220_v54, 0.0  ;;  %7390 = vmatpush.bf16.msrb.mxu2 %v10149_v5  ;;  %v10210_v26 = vld [vmem:[%s14976_s12 + $0xf8] sm:$0xf0]  ;;  %v13831_v5 = vperm.slane %v13558_v60, 3 }
 0x893   : > { %7305 = vmatpush.bf16.msrb.mxu1 %v10305_v31 }
 0x895   : > { %v5886_v1 = vpop.f32.mrf.mxu1 }
 0x896   : > { %v5887_v50 = vadd.f32 %v13356_v45, %v5886_v1  ;;  %v10213_v1 = vor.u32 %v10818_v41, %v10210_v26 }
 0x897   : > { %v6132_v27 = vpop.f32.mrf.mxu2  ;;  %v6221_v16 = vpop.f32.mrf.mxu3 }
 0x898   : > { %v5923_v9 = vmax.f32 %v5887_v50, 0.0  ;;  %v6133_v43 = vadd.f32 %v6132_v27, %v13569_v46  ;;  %v6222_v8 = vadd.f32 %v6221_v16, %v13572_v25  ;;  %7479 = vmatpush.bf16.msrb.mxu3 %v10213_v1 }
 0x89a   : > { %v13780_v4 = vpack.c.bf16 %v5923_v9, %v5922_v59  ;;  %v6496_v3 = vmax.f32 %v6133_v43, 0.0  ;;  %v6497_v21 = vmax.f32 %v6222_v8, 0.0  ;;  %v13782_v52 = vpop.f32.mrf.mxu0 }
 0x89c   : > { %10036 = vmatmul.msk.bf16.gmra.mxu2 %vm5756_vm6, %v13780_v4  ;;  %10052 = vmatmul.msk.bf16.gmra.mxu3 %vm5756_vm6, %v13780_v4  ;;  %v13788_v19 = vpack.c.bf16 %v6496_v3, %v6492_v57  ;;  %v13790_v0 = vpack.c.bf16 %v6497_v21, %v6493_v55 }
 0x89d   : > { %10068 = vmatmul.msk.bf16.gmra.mxu0 %vm5756_vm6, %v13780_v4  ;;  %v5889_v10 = vpop.f32.mrf.mxu1 }
 0x89e   : > { %15223 = vst [vmem:[#allocation37_spill] sm:$0xff] %v13788_v19  ;;  %v5890_v7 = vadd.f32 %v13356_v45, %v5889_v10 }
 0x89f   : > { %15224 = vst [vmem:[#allocation38_spill] sm:$0xff] %v13790_v0  ;;  %v6135_v32 = vpop.f32.mrf.mxu2  ;;  %v6224_v51 = vpop.f32.mrf.mxu3 }
 0x8a0   : > { %10077 = vmatmul.msk.bf16.gmra.mxu1 %vm5756_vm6, %v13518_v12  ;;  %v6136_v54 = vadd.f32 %v6135_v32, %v13569_v46  ;;  %v6225_v12 = vadd.f32 %v6224_v51, %v13572_v25  ;;  %v5924_v16 = vmax.f32 %v5890_v7, 0.0  ;;  %v13836_v32 = vperm.slane %v13558_v60, 2  ;;  %v10841_v60 = vld [vmem:[%s14976_s12 + $0x1a4] sm:$0xf0] }
 0x8a2   : > { %v13808_v22 = vpop.f32.mrf.mxu0  ;;  %v6500_v43 = vmax.f32 %v6136_v54, 0.0  ;;  %v6501_v8 = vmax.f32 %v6225_v12, 0.0  ;;  %v6286_v41 = vadd.f32 %v13574_v13, %v13836_v32  ;;  %v6284_v1 = vadd.f32 %v13544_v29, %v13836_v32 }
 0x8a5   : > { %v5891_v50 = vpop.f32.mrf.mxu1 }
 0x8a6   : > { %v5892_v31 = vadd.f32 %v13356_v45, %v5891_v50 }
 0x8a7   : > { %v6137_v59 = vpop.f32.mrf.mxu2  ;;  %v6226_v27 = vpop.f32.mrf.mxu3 }
 0x8a8   : > { %v5925_v2 = vmax.f32 %v5892_v31, 0.0  ;;  %v6138_v61 = vadd.f32 %v6137_v59, %v13569_v46  ;;  %v6227_v9 = vadd.f32 %v6226_v27, %v13572_v25  ;;  %v6458_v31 = vmax.f32 %v6286_v41, 0.0 }
 0x8aa   : > { %v13816_v40 = vpack.c.bf16 %v5925_v2, %v5924_v16  ;;  %v6504_v57 = vmax.f32 %v6138_v61, 0.0  ;;  %v6505_v55 = vmax.f32 %v6227_v9, 0.0  ;;  %v13818_v3 = vpop.f32.mrf.mxu0  ;;  %v6454_v9 = vmax.f32 %v6284_v1, 0.0 }
 0x8ac   : > { %10037 = vmatmul.msk.bf16.gmra.mxu2 %vm5756_vm6, %v13816_v40  ;;  %10053 = vmatmul.msk.bf16.gmra.mxu3 %vm5756_vm6, %v13816_v40  ;;  %v13824_v45 = vpack.c.bf16 %v6504_v57, %v6500_v43  ;;  %v13826_v21 = vpack.c.bf16 %v6505_v55, %v6501_v8 }
 0x8ad   : > { %10069 = vmatmul.msk.bf16.gmra.mxu0 %vm5756_vm6, %v13816_v40  ;;  %v6372_v10 = vpop.f32.mrf.mxu1 }
 0x8ae   : > { %v6373_v26 = vadd.f32 %v6372_v10, %v13831_v5 }
 0x8af   : > { %v6140_v47 = vpop.f32.mrf.mxu2  ;;  %v6229_v44 = vpop.f32.mrf.mxu3 }
 0x8b0   : > { %10078 = vmatmul.msk.bf16.gmra.mxu1 %vm5756_vm6, %v13542_v6  ;;  %v6141_v7 = vadd.f32 %v6140_v47, %v13569_v46  ;;  %v10296_v6 = vld [vmem:[%s14976_s12 + $0x1a0] sm:$0xf]  ;;  %v6230_v50 = vadd.f32 %v6229_v44, %v13572_v25  ;;  %v6455_v29 = vmax.f32 %v6373_v26, 0.0  ;;  %v13860_v44 = vpack.c.bf16 %v6458_v31, %v6454_v9 }
 0x8b1   : > { %v10297_v12 = vor.u32 %v10841_v60, %v10296_v6 }
 0x8b2   : > { %v13838_v51 = vpop.f32.mrf.mxu0  ;;  %v6508_v43 = vmax.f32 %v6141_v7, 0.0  ;;  %v6509_v8 = vmax.f32 %v6230_v50, 0.0  ;;  %15226 = vst [vmem:[#allocation40_spill] sm:$0xff] %v13860_v44  ;;  %v10800_v7 = vld [vmem:[%s14976_s12 + $0x64] sm:$0xf] }
 0x8b3   : > { %7306 = vmatpush.bf16.msrb.mxu1 %v10297_v12  ;;  %v10202_v12 = vld [vmem:[%s14976_s12 + $0xe8] sm:$0xf0] }
 0x8b5   : > { %v6374_v54 = vpop.f32.mrf.mxu1 }
 0x8b6   : > { %v6375_v13 = vadd.f32 %v6374_v54, %v13831_v5  ;;  %v10138_v54 = vld [vmem:[%s14976_s12 + $0x68] sm:$0xf0] }
 0x8b7   : > { %v6142_v59 = vpop.f32.mrf.mxu2  ;;  %v6231_v27 = vpop.f32.mrf.mxu3  ;;  %v10141_v6 = vor.u32 %v10800_v7, %v10138_v54 }
 0x8b8   : > { %v6459_v16 = vmax.f32 %v6375_v13, 0.0  ;;  %v6143_v2 = vadd.f32 %v6142_v59, %v13569_v46  ;;  %v6232_v61 = vadd.f32 %v6231_v27, %v13572_v25  ;;  %v10816_v13 = vld [vmem:[%s14976_s12 + $0xe4] sm:$0xf]  ;;  %v6291_v27 = vadd.f32 %v13598_v37, %v13836_v32 }
 0x8b9   : > { %7391 = vmatpush.bf16.msrb.mxu2 %v10141_v6  ;;  %v10205_v31 = vor.u32 %v10816_v13, %v10202_v12 }
 0x8ba   : > { %v13856_v57 = vpack.c.bf16 %v6459_v16, %v6455_v29  ;;  %v6512_v55 = vmax.f32 %v6143_v2, 0.0  ;;  %v6513_v10 = vmax.f32 %v6232_v61, 0.0  ;;  %v13858_v47 = vpop.f32.mrf.mxu0 }
 0x8bb   : > { %7480 = vmatpush.bf16.msrb.mxu3 %v10205_v31 }
 0x8bc   : > { %15225 = vst [vmem:[#allocation39_spill] sm:$0xff] %v13856_v57  ;;  %7042 = vmatmul.bf16.vlgmr.msra.gmra.mxu2 %v13586_v28  ;;  %7131 = vmatmul.bf16.vlgmr.msra.gmra.mxu3 %v13588_v18  ;;  %v13864_v41 = vpack.c.bf16 %v6512_v55, %v6508_v43  ;;  %v13866_v26 = vpack.c.bf16 %v6513_v10, %v6509_v8  ;;  %v6466_v43 = vmax.f32 %v6291_v27, 0.0 }
 0x8bd   : > { %7220 = vmatmul.bf16.vlgmr.msra.gmra.mxu0 %v13860_v44  ;;  %v6377_v1 = vpop.f32.mrf.mxu1 }
 0x8be   : > { %15227 = vst [vmem:[#allocation41_spill] sm:$0xff] %v13866_v26  ;;  %v6378_v29 = vadd.f32 %v6377_v1, %v13831_v5 }
 0x8bf   : > { %v6145_v60 = vpop.f32.mrf.mxu2  ;;  %v6234_v50 = vpop.f32.mrf.mxu3 }
 0x8c0   : > { %10079 = vmatmul.msk.bf16.gmra.mxu1 %vm5756_vm6, %v13582_v30  ;;  %v6289_v30 = vadd.f32 %v13584_v62, %v13836_v32  ;;  %v6146_v16 = vadd.f32 %v6145_v60, %v13569_v46  ;;  %v6235_v61 = vadd.f32 %v6234_v50, %v13572_v25  ;;  %v6463_v10 = vmax.f32 %v6378_v29, 0.0 }
 0x8c2   : > { %v13883_v59 = vpop.f32.mrf.mxu0  ;;  %v6462_v1 = vmax.f32 %v6289_v30, 0.0  ;;  %v6516_v6 = vmax.f32 %v6146_v16, 0.0  ;;  %v6517_v13 = vmax.f32 %v6235_v61, 0.0 }
 0x8c4   : > { %v13899_v50 = vpack.c.bf16 %v6466_v43, %v6462_v1 }
 0x8c5   : > { %v6379_v2 = vpop.f32.mrf.mxu1 }
 0x8c6   : > { %v6380_v9 = vadd.f32 %v6379_v2, %v13831_v5  ;;  %15229 = vst [vmem:[#allocation43_spill] sm:$0xff] %v13899_v50 }
 0x8c7   : > { %v6147_v8 = vpop.f32.mrf.mxu2  ;;  %v6236_v55 = vpop.f32.mrf.mxu3 }
 0x8c8   : > { %v6467_v7 = vmax.f32 %v6380_v9, 0.0  ;;  %v6148_v37 = vadd.f32 %v6147_v8, %v13569_v46  ;;  %v6237_v54 = vadd.f32 %v6236_v55, %v13572_v25  ;;  %v6296_v9 = vadd.f32 %v13646_v39, %v13836_v32 }
 0x8c9   : > { %v6294_v8 = vadd.f32 %v13620_v35, %v13836_v32 }
 0x8ca   : > { %v6520_v62 = vmax.f32 %v6148_v37, 0.0  ;;  %v6521_v12 = vmax.f32 %v6237_v54, 0.0  ;;  %v13895_v60 = vpop.f32.mrf.mxu0  ;;  %v13897_v31 = vpack.c.bf16 %v6467_v7, %v6463_v10  ;;  %v10288_v7 = vld [vmem:[%s14976_s12 + $0x190] sm:$0xf]  ;;  %v6474_v1 = vmax.f32 %v6296_v9, 0.0 }
 0x8cc   : > { %15228 = vst [vmem:[#allocation42_spill] sm:$0xff] %v13897_v31  ;;  %7047 = vmatmul.bf16.gmra.mxu2 %v13626_v20  ;;  %7136 = vmatmul.bf16.gmra.mxu3 %v13628_v11  ;;  %v13903_v27 = vpack.c.bf16 %v6520_v62, %v6516_v6  ;;  %v13905_v29 = vpack.c.bf16 %v6521_v12, %v6517_v13 }
 0x8cd   : > { %7225 = vmatmul.bf16.gmra.mxu0 %v13899_v50  ;;  %v6382_v30 = vpop.f32.mrf.mxu1 }
 0x8ce   : > { %v6383_v43 = vadd.f32 %v6382_v30, %v13831_v5 }
 0x8cf   : > { %v6150_v16 = vpop.f32.mrf.mxu2  ;;  %v6239_v2 = vpop.f32.mrf.mxu3 }
 0x8d0   : > { %10080 = vmatmul.msk.bf16.gmra.mxu1 %vm5756_vm6, %v13618_v42  ;;  %v6151_v55 = vadd.f32 %v6150_v16, %v13569_v46  ;;  %v10839_v42 = vld [vmem:[%s14976_s12 + $0x194] sm:$0xf0]  ;;  %v6240_v37 = vadd.f32 %v6239_v2, %v13572_v25  ;;  %v6471_v35 = vmax.f32 %v6383_v43, 0.0  ;;  %v6470_v16 = vmax.f32 %v6294_v8, 0.0 }
 0x8d1   : > { %v10289_v54 = vor.u32 %v10839_v42, %v10288_v7  ;;  %v10130_v7 = vld [vmem:[%s14976_s12 + $0x58] sm:$0xf0] }
 0x8d2   : > { %v13910_v61 = vpop.f32.mrf.mxu0  ;;  %v6524_v50 = vmax.f32 %v6151_v55, 0.0  ;;  %v6525_v11 = vmax.f32 %v6240_v37, 0.0  ;;  %v10798_v55 = vld [vmem:[%s14976_s12 + $0x54] sm:$0xf] }
 0x8d3   : > { %7307 = vmatpush.bf16.msrb.mxu1 %v10289_v54  ;;  %v10133_v42 = vor.u32 %v10798_v55, %v10130_v7  ;;  %v6301_v54 = vadd.f32 %v13670_v17, %v13836_v32 }
 0x8d5   : > { %v6384_v10 = vpop.f32.mrf.mxu1  ;;  %7392 = vmatpush.bf16.msrb.mxu2 %v10133_v42 }
 0x8d6   : > { %v6385_v39 = vadd.f32 %v6384_v10, %v13831_v5  ;;  %v13932_v10 = vpack.c.bf16 %v6474_v1, %v6470_v16 }
 0x8d7   : > { %v6152_v6 = vpop.f32.mrf.mxu2  ;;  %v6241_v13 = vpop.f32.mrf.mxu3 }
 0x8d8   : > { %v6475_v62 = vmax.f32 %v6385_v39, 0.0  ;;  %v6153_v12 = vadd.f32 %v6152_v6, %v13569_v46  ;;  %v6242_v30 = vadd.f32 %v6241_v13, %v13572_v25  ;;  %15231 = vst [vmem:[#allocation45_spill] sm:$0xff] %v13932_v10 }
 0x8da   : > { %v6528_v20 = vmax.f32 %v6153_v12, 0.0  ;;  %v6529_v44 = vmax.f32 %v6242_v30, 0.0  ;;  %v13928_v18 = vpop.f32.mrf.mxu0  ;;  %v13930_v2 = vpack.c.bf16 %v6475_v62, %v6471_v35  ;;  %v6482_v12 = vmax.f32 %v6301_v54, 0.0 }
 0x8dc   : > { %15230 = vst [vmem:[#allocation44_spill] sm:$0xff] %v13930_v2  ;;  %7052 = vmatmul.bf16.gmra.mxu2 %v13662_v15  ;;  %7141 = vmatmul.bf16.gmra.mxu3 %v13664_v23  ;;  %v13936_v9 = vpack.c.bf16 %v6528_v20, %v6524_v50  ;;  %v13938_v43 = vpack.c.bf16 %v6529_v44, %v6525_v11  ;;  %v10814_v20 = vld [vmem:[%s14976_s12 + $0xd4] sm:$0xf]  ;;  %v10194_v11 = vld [vmem:[%s14976_s12 + $0xd8] sm:$0xf0] }
 0x8dd   : > { %7230 = vmatmul.bf16.gmra.mxu0 %v13932_v10  ;;  %v6387_v8 = vpop.f32.mrf.mxu1  ;;  %v10197_v44 = vor.u32 %v10814_v20, %v10194_v11 }
 0x8de   : > { %15232 = vst [vmem:[#allocation46_spill] sm:$0xff] %v13938_v43  ;;  %v6388_v1 = vadd.f32 %v6387_v8, %v13831_v5 }
 0x8df   : > { %v6155_v37 = vpop.f32.mrf.mxu2  ;;  %v6244_v39 = vpop.f32.mrf.mxu3  ;;  %7481 = vmatpush.bf16.msrb.mxu3 %v10197_v44 }
 0x8e0   : > { %10081 = vmatmul.msk.bf16.gmra.mxu1 %vm5756_vm6, %v13654_v38  ;;  %v6299_v38 = vadd.f32 %v13656_v14, %v13836_v32  ;;  %v6156_v6 = vadd.f32 %v6155_v37, %v13569_v46  ;;  %v6245_v35 = vadd.f32 %v6244_v39, %v13572_v25  ;;  %v6479_v55 = vmax.f32 %v6388_v1, 0.0 }
 0x8e2   : > { %v13955_v50 = vpop.f32.mrf.mxu0  ;;  %v6478_v8 = vmax.f32 %v6299_v38, 0.0  ;;  %v6532_v20 = vmax.f32 %v6156_v6, 0.0  ;;  %v6533_v11 = vmax.f32 %v6245_v35, 0.0 }
 0x8e4   : > { %v13971_v39 = vpack.c.bf16 %v6482_v12, %v6478_v8 }
 0x8e5   : > { %v6389_v13 = vpop.f32.mrf.mxu1 }
 0x8e6   : > { %v6390_v62 = vadd.f32 %v6389_v13, %v13831_v5  ;;  %15234 = vst [vmem:[#allocation48_spill] sm:$0xff] %v13971_v39 }
 0x8e7   : > { %v6157_v30 = vpop.f32.mrf.mxu2  ;;  %v6246_v16 = vpop.f32.mrf.mxu3 }
 0x8e8   : > { %v6483_v7 = vmax.f32 %v6390_v62, 0.0  ;;  %v6158_v17 = vadd.f32 %v6157_v30, %v13569_v46  ;;  %v6247_v42 = vadd.f32 %v6246_v16, %v13572_v25  ;;  %v6306_v62 = vadd.f32 %v13718_v53, %v13836_v32 }
 0x8e9   : > { %v6304_v30 = vadd.f32 %v13692_v33, %v13836_v32 }
 0x8ea   : > { %v6536_v14 = vmax.f32 %v6158_v17, 0.0  ;;  %v6537_v44 = vmax.f32 %v6247_v42, 0.0  ;;  %v13967_v37 = vpop.f32.mrf.mxu0  ;;  %v13969_v10 = vpack.c.bf16 %v6483_v7, %v6479_v55  ;;  %v10280_v7 = vld [vmem:[%s14976_s12 + $0x180] sm:$0xf]  ;;  %v6490_v8 = vmax.f32 %v6306_v62, 0.0 }
 0x8ec   : > { %15233 = vst [vmem:[#allocation47_spill] sm:$0xff] %v13969_v10  ;;  %7057 = vmatmul.bf16.gmra.mxu2 %v13698_v34  ;;  %7146 = vmatmul.bf16.gmra.mxu3 %v13700_v58  ;;  %v13975_v54 = vpack.c.bf16 %v6536_v14, %v6532_v20  ;;  %v13977_v1 = vpack.c.bf16 %v6537_v44, %v6533_v11 }
 0x8ed   : > { %7235 = vmatmul.bf16.gmra.mxu0 %v13971_v39  ;;  %v6392_v38 = vpop.f32.mrf.mxu1 }
 0x8ee   : > { %v6393_v12 = vadd.f32 %v6392_v38, %v13831_v5 }
 0x8ef   : > { %v6160_v6 = vpop.f32.mrf.mxu2  ;;  %v6249_v13 = vpop.f32.mrf.mxu3 }
 0x8f0   : > { %10082 = vmatmul.msk.bf16.gmra.mxu1 %vm5756_vm6, %v13690_v36  ;;  %v6161_v16 = vadd.f32 %v6160_v6, %v13569_v46  ;;  %v10837_v36 = vld [vmem:[%s14976_s12 + $0x184] sm:$0xf0]  ;;  %v6250_v17 = vadd.f32 %v6249_v13, %v13572_v25  ;;  %v6487_v33 = vmax.f32 %v6393_v12, 0.0  ;;  %v6486_v6 = vmax.f32 %v6304_v30, 0.0 }
 0x8f1   : > { %v10281_v42 = vor.u32 %v10837_v36, %v10280_v7  ;;  %v10122_v7 = vld [vmem:[%s14976_s12 + $0x48] sm:$0xf0] }
 0x8f2   : > { %v13982_v35 = vpop.f32.mrf.mxu0  ;;  %v6540_v39 = vmax.f32 %v6161_v16, 0.0  ;;  %v6541_v58 = vmax.f32 %v6250_v17, 0.0  ;;  %v10796_v16 = vld [vmem:[%s14976_s12 + $0x44] sm:$0xf] }
 0x8f3   : > { %7308 = vmatpush.bf16.msrb.mxu1 %v10281_v42  ;;  %v10125_v36 = vor.u32 %v10796_v16, %v10122_v7  ;;  %v6311_v42 = vadd.f32 %v13754_v56, %v13836_v32 }
 0x8f5   : > { %v6394_v55 = vpop.f32.mrf.mxu1  ;;  %7393 = vmatpush.bf16.msrb.mxu2 %v10125_v36 }
 0x8f6   : > { %v6395_v53 = vadd.f32 %v6394_v55, %v13831_v5  ;;  %v14004_v55 = vpack.c.bf16 %v6490_v8, %v6486_v6 }
 0x8f7   : > { %v6162_v20 = vpop.f32.mrf.mxu2  ;;  %v6251_v11 = vpop.f32.mrf.mxu3 }
 0x8f8   : > { %v6491_v14 = vmax.f32 %v6395_v53, 0.0  ;;  %v6163_v44 = vadd.f32 %v6162_v20, %v13569_v46  ;;  %v6252_v38 = vadd.f32 %v6251_v11, %v13572_v25  ;;  %15236 = vst [vmem:[#allocation50_spill] sm:$0xff] %v14004_v55 }
 0x8fa   : > { %v6544_v34 = vmax.f32 %v6163_v44, 0.0  ;;  %v6545_v23 = vmax.f32 %v6252_v38, 0.0  ;;  %v14000_v15 = vpop.f32.mrf.mxu0  ;;  %v14002_v13 = vpack.c.bf16 %v6491_v14, %v6487_v33  ;;  %v6498_v44 = vmax.f32 %v6311_v42, 0.0 }
 0x8fc   : > { %15235 = vst [vmem:[#allocation49_spill] sm:$0xff] %v14002_v13  ;;  %7062 = vmatmul.bf16.gmra.mxu2 %v13740_v48  ;;  %7151 = vmatmul.bf16.gmra.mxu3 %v13742_v63  ;;  %v14008_v62 = vpack.c.bf16 %v6544_v34, %v6540_v39  ;;  %v14010_v12 = vpack.c.bf16 %v6545_v23, %v6541_v58  ;;  %v10812_v23 = vld [vmem:[%s14976_s12 + $0xc4] sm:$0xf]  ;;  %v10186_v34 = vld [vmem:[%s14976_s12 + $0xc8] sm:$0xf0] }
 0x8fd   : > { %7240 = vmatmul.bf16.gmra.mxu0 %v14004_v55  ;;  %v6397_v30 = vpop.f32.mrf.mxu1  ;;  %v10189_v58 = vor.u32 %v10812_v23, %v10186_v34 }
 0x8fe   : > { %15237 = vst [vmem:[#allocation51_spill] sm:$0xff] %v14010_v12  ;;  %v6398_v8 = vadd.f32 %v6397_v30, %v13831_v5 }
 0x8ff   : > { %v6165_v17 = vpop.f32.mrf.mxu2  ;;  %v6254_v53 = vpop.f32.mrf.mxu3  ;;  %7482 = vmatpush.bf16.msrb.mxu3 %v10189_v58 }
 0x900   : > { %10083 = vmatmul.msk.bf16.gmra.mxu1 %vm5756_vm6, %v13726_v49  ;;  %v6309_v49 = vadd.f32 %v13728_v24, %v13836_v32  ;;  %v6166_v20 = vadd.f32 %v6165_v17, %v13569_v46  ;;  %v6255_v33 = vadd.f32 %v6254_v53, %v13572_v25  ;;  %v6495_v16 = vmax.f32 %v6398_v8, 0.0 }
 0x902   : > { %v14027_v39 = vpop.f32.mrf.mxu0  ;;  %v6494_v30 = vmax.f32 %v6309_v49, 0.0  ;;  %v6548_v23 = vmax.f32 %v6166_v20, 0.0  ;;  %v6549_v34 = vmax.f32 %v6255_v33, 0.0 }
 0x904   : > { %v14043_v53 = vpack.c.bf16 %v6498_v44, %v6494_v30  ;;  %v10274_v44 = vld [vmem:[%s14976_s12 + $0x178] sm:$0xf0] }
 0x905   : > { %v6399_v11 = vpop.f32.mrf.mxu1  ;;  %v10338_v30 = vld [vmem:[%s14976_s12 + $0x1f8] sm:$0xf0] }
 0x906   : > { %v6400_v14 = vadd.f32 %v6399_v11, %v13831_v5  ;;  %15239 = vst [vmem:[#allocation53_spill] sm:$0xff] %v14043_v53 }
 0x907   : > { %v6167_v38 = vpop.f32.mrf.mxu2  ;;  %v6256_v6 = vpop.f32.mrf.mxu3 }
 0x908   : > { %v6499_v7 = vmax.f32 %v6400_v14, 0.0  ;;  %v6168_v56 = vadd.f32 %v6167_v38, %v13569_v46  ;;  %v6257_v36 = vadd.f32 %v6256_v6, %v13572_v25  ;;  %v10834_v14 = vld [vmem:[%s14976_s12 + $0x174] sm:$0xf]  ;;  %v6316_v38 = vadd.f32 %v13808_v22, %v13836_v32 }
 0x909   : > { %v10277_v6 = vor.u32 %v10834_v14, %v10274_v44 }
 0x90a   : > { %v6552_v24 = vmax.f32 %v6168_v56, 0.0  ;;  %v6553_v58 = vmax.f32 %v6257_v36, 0.0  ;;  %v14039_v17 = vpop.f32.mrf.mxu0  ;;  %v14041_v55 = vpack.c.bf16 %v6499_v7, %v6495_v16  ;;  %v6314_v7 = vadd.f32 %v13782_v52, %v13836_v32  ;;  %v10850_v36 = vld [vmem:[%s14976_s12 + $0x1f4] sm:$0xf] }
 0x90b   : > { %7568 = vmatpush.bf16.msrb.mxu0 %v10277_v6 }
 0x90c   : > { %15238 = vst [vmem:[#allocation52_spill] sm:$0xff] %v14041_v55  ;;  %7067 = vmatmul.bf16.gmra.mxu2 %v13788_v19  ;;  %7156 = vmatmul.bf16.gmra.mxu3 %v13790_v0  ;;  %v14047_v42 = vpack.c.bf16 %v6552_v24, %v6548_v23  ;;  %v14049_v8 = vpack.c.bf16 %v6553_v58, %v6549_v34  ;;  %v6506_v24 = vmax.f32 %v6316_v38, 0.0  ;;  %v6502_v6 = vmax.f32 %v6314_v7, 0.0 }
 0x90d   : > { %7245 = vmatmul.bf16.gmra.mxu0 %v14043_v53  ;;  %v6402_v49 = vpop.f32.mrf.mxu1  ;;  %v10341_v34 = vor.u32 %v10850_v36, %v10338_v30  ;;  %v10114_v36 = vld [vmem:[%s14976_s12 + $0x38] sm:$0xf0] }
 0x90e   : > { %v6403_v16 = vadd.f32 %v6402_v49, %v13831_v5 }
 0x90f   : > { %v6170_v20 = vpop.f32.mrf.mxu2  ;;  %v6259_v11 = vpop.f32.mrf.mxu3  ;;  %7657 = vmatpush.bf16.msra.mxu1 %v10341_v34  ;;  %v6321_v34 = vadd.f32 %v13838_v51, %v13836_v32 }
 0x910   : > { %10084 = vmatmul.msk.bf16.gmra.mxu1 %vm5756_vm6, %v13780_v4  ;;  %v6171_v4 = vadd.f32 %v6170_v20, %v13569_v46  ;;  %v6260_v22 = vadd.f32 %v6259_v11, %v13572_v25  ;;  %v6503_v49 = vmax.f32 %v6403_v16, 0.0 }
 0x912   : > { %v14054_v33 = vpop.f32.mrf.mxu0  ;;  %v6556_v53 = vmax.f32 %v6171_v4, 0.0  ;;  %v6557_v0 = vmax.f32 %v6260_v22, 0.0  ;;  %v10794_v4 = vld [vmem:[%s14976_s12 + $0x34] sm:$0xf] }
 0x913   : > { %v10117_v30 = vor.u32 %v10794_v4, %v10114_v36 }
 0x915   : > { %v6404_v56 = vpop.f32.mrf.mxu1  ;;  %7394 = vmatpush.bf16.msrb.mxu2 %v10117_v30 }
 0x916   : > { %v6405_v23 = vadd.f32 %v6404_v56, %v13831_v5  ;;  %v14082_v56 = vpack.c.bf16 %v6506_v24, %v6502_v6 }
 0x917   : > { %v6172_v58 = vpop.f32.mrf.mxu2  ;;  %v6261_v52 = vpop.f32.mrf.mxu3 }
 0x918   : > { %v6507_v20 = vmax.f32 %v6405_v23, 0.0  ;;  %v6173_v14 = vadd.f32 %v6172_v58, %v13569_v46  ;;  %v6262_v44 = vadd.f32 %v6261_v52, %v13572_v25  ;;  %15241 = vst [vmem:[#allocation55_spill] sm:$0xff] %v14082_v56 }
 0x91a   : > { %v6560_v19 = vmax.f32 %v6173_v14, 0.0  ;;  %v6561_v63 = vmax.f32 %v6262_v44, 0.0  ;;  %v14078_v48 = vpop.f32.mrf.mxu0  ;;  %v14080_v11 = vpack.c.bf16 %v6507_v20, %v6503_v49  ;;  %v6514_v14 = vmax.f32 %v6321_v34, 0.0 }
 0x91c   : > { %15240 = vst [vmem:[#allocation54_spill] sm:$0xff] %v14080_v11  ;;  %7072 = vmatmul.bf16.gmra.mxu2 %v13824_v45  ;;  %7161 = vmatmul.bf16.gmra.mxu3 %v13826_v21  ;;  %v14086_v38 = vpack.c.bf16 %v6560_v19, %v6556_v53  ;;  %v14088_v16 = vpack.c.bf16 %v6561_v63, %v6557_v0  ;;  %v10810_v63 = vld [vmem:[%s14976_s12 + $0xb4] sm:$0xf]  ;;  %v10178_v19 = vld [vmem:[%s14976_s12 + $0xb8] sm:$0xf0] }
 0x91d   : > { %7250 = vmatmul.bf16.gmra.mxu0 %v14082_v56  ;;  %v6407_v7 = vpop.f32.mrf.mxu1  ;;  %v10181_v0 = vor.u32 %v10810_v63, %v10178_v19 }
 0x91e   : > { %v6408_v24 = vadd.f32 %v6407_v7, %v13831_v5 }
 0x91f   : > { %v6175_v22 = vpop.f32.mrf.mxu2  ;;  %v6264_v23 = vpop.f32.mrf.mxu3  ;;  %7483 = vmatpush.bf16.msrb.mxu3 %v10181_v0 }
 0x920   : > { %10085 = vmatmul.msk.bf16.gmra.mxu1 %vm5756_vm6, %v13816_v40  ;;  %v6319_v40 = vadd.f32 %v13818_v3, %v13836_v32  ;;  %v6176_v58 = vadd.f32 %v6175_v22, %v13569_v46  ;;  %v6265_v49 = vadd.f32 %v6264_v23, %v13572_v25  ;;  %v6511_v4 = vmax.f32 %v6408_v24, 0.0 }
 0x922   : > { %v14105_v53 = vpop.f32.mrf.mxu0  ;;  %v6510_v7 = vmax.f32 %v6319_v40, 0.0  ;;  %v6564_v63 = vmax.f32 %v6176_v58, 0.0  ;;  %v6565_v19 = vmax.f32 %v6265_v49, 0.0 }
 0x924   : > { %v14121_v23 = vpack.c.bf16 %v6514_v14, %v6510_v7  ;;  %v10266_v14 = vld [vmem:[%s14976_s12 + $0x168] sm:$0xf0]  ;;  %v6324_v7 = vadd.f32 %v13858_v47, %v13836_v32 }
 0x925   : > { %v6409_v52 = vpop.f32.mrf.mxu1 }
 0x926   : > { %v6410_v20 = vadd.f32 %v6409_v52, %v13831_v5  ;;  %15243 = vst [vmem:[#allocation57_spill] sm:$0xff] %v14121_v23 }
 0x927   : > { %v6177_v44 = vpop.f32.mrf.mxu2  ;;  %v6266_v6 = vpop.f32.mrf.mxu3 }
 0x928   : > { %v6515_v36 = vmax.f32 %v6410_v20, 0.0  ;;  %v6178_v51 = vadd.f32 %v6177_v44, %v13569_v46  ;;  %v6267_v30 = vadd.f32 %v6266_v6, %v13572_v25  ;;  %v10832_v20 = vld [vmem:[%s14976_s12 + $0x164] sm:$0xf]  ;;  %v6326_v44 = vadd.f32 %v13883_v59, %v13836_v32 }
 0x929   : > { %v10269_v6 = vor.u32 %v10832_v20, %v10266_v14 }
 0x92a   : > { %v6568_v3 = vmax.f32 %v6178_v51, 0.0  ;;  %v6569_v0 = vmax.f32 %v6267_v30, 0.0  ;;  %v14117_v22 = vpop.f32.mrf.mxu0  ;;  %v14119_v56 = vpack.c.bf16 %v6515_v36, %v6511_v4  ;;  %v10848_v4 = vld [vmem:[%s14976_s12 + $0x1e4] sm:$0xf]  ;;  %v10330_v36 = vld [vmem:[%s14976_s12 + $0x1e8] sm:$0xf0] }
 0x92b   : > { %v10333_v30 = vor.u32 %v10848_v4, %v10330_v36  ;;  %7569 = vmatpush.bf16.msrb.mxu0 %v10269_v6  ;;  %v6518_v36 = vmax.f32 %v6324_v7, 0.0 }
 0x92c   : > { %15242 = vst [vmem:[#allocation56_spill] sm:$0xff] %v14119_v56  ;;  %7077 = vmatmul.bf16.gmra.mxu2 %v13864_v41  ;;  %7166 = vmatmul.bf16.gmra.mxu3 %v13866_v26  ;;  %v14125_v34 = vpack.c.bf16 %v6568_v3, %v6564_v63  ;;  %v14127_v24 = vpack.c.bf16 %v6569_v0, %v6565_v19  ;;  %v6522_v0 = vmax.f32 %v6326_v44, 0.0 }
 0x92d   : > { %7255 = vmatmul.bf16.gmra.mxu0 %v14121_v23  ;;  %v6412_v40 = vpop.f32.mrf.mxu1  ;;  %7658 = vmatpush.bf16.msra.mxu1 %v10333_v30 }
 0x92e   : > { %15244 = vst [vmem:[#allocation58_spill] sm:$0xff] %v14127_v24  ;;  %v6413_v51 = vadd.f32 %v6412_v40, %v13831_v5  ;;  %v14162_v26 = vpack.c.bf16 %v6522_v0, %v6518_v36 }
 0x92f   : > { %v6180_v58 = vpop.f32.mrf.mxu2  ;;  %v6269_v52 = vpop.f32.mrf.mxu3 }
 0x930   : > { %7309 = vmatmul.bf16.vlgmr.msrb.gmra.mxu1 %v13856_v57  ;;  %v6181_v63 = vadd.f32 %v6180_v58, %v13569_v46  ;;  %v6270_v59 = vadd.f32 %v6269_v52, %v13572_v25  ;;  %v6519_v57 = vmax.f32 %v6413_v51, 0.0  ;;  %v14158_v58 = vld [vmem:[%s14977_s13] sm:$0x3]  ;;  %15245 = vst [vmem:[#allocation59_spill] sm:$0xff] %v14162_v26 }
 0x932   : > { %v14131_v49 = vpop.f32.mrf.mxu0  ;;  %v6572_v47 = vmax.f32 %v6181_v63, 0.0  ;;  %v6573_v52 = vmax.f32 %v6270_v59, 0.0 }
 0x935   : > { %v6414_v19 = vpop.f32.mrf.mxu1 }
 0x936   : > { %v6415_v3 = vadd.f32 %v6414_v19, %v13831_v5 }
 0x937   : > { %v6182_v20 = vpop.f32.mrf.mxu2  ;;  %v6271_v14 = vpop.f32.mrf.mxu3 }
 0x938   : > { %v6523_v23 = vmax.f32 %v6415_v3, 0.0  ;;  %v6183_v40 = vadd.f32 %v6182_v20, %v13569_v46  ;;  %v6272_v4 = vadd.f32 %v6271_v14, %v13572_v25  ;;  %v14167_v46 = vperm.slane %v14158_v58, 0  ;;  %v10808_v20 = vld [vmem:[%s14976_s12 + $0xa4] sm:$0xf]  ;;  %v10170_v14 = vld [vmem:[%s14976_s12 + $0xa8] sm:$0xf0] }
 0x93a   : > { %v6576_v6 = vmax.f32 %v6183_v40, 0.0  ;;  %v6577_v19 = vmax.f32 %v6272_v4, 0.0  ;;  %v7221_v30 = vpop.f32.mrf.mxu0  ;;  %v14160_v44 = vpack.c.bf16 %v6523_v23, %v6519_v57  ;;  %v10792_v57 = vld [vmem:[%s14976_s12 + $0x24] sm:$0xf]  ;;  %v10106_v23 = vld [vmem:[%s14976_s12 + $0x28] sm:$0xf0]  ;;  %v10173_v40 = vor.u32 %v10808_v20, %v10170_v14 }
 0x93b   : > { %v10109_v63 = vor.u32 %v10792_v57, %v10106_v23 }
 0x93c   : > { %7082 = vmatmul.bf16.gmra.mxu2 %v13903_v27  ;;  %7171 = vmatmul.bf16.gmra.mxu3 %v13905_v29  ;;  %v14169_v25 = vpack.c.bf16 %v6576_v6, %v6572_v47  ;;  %v14171_v51 = vpack.c.bf16 %v6577_v19, %v6573_v52  ;;  %v6331_v47 = vadd.f32 %v13910_v61, %v13836_v32 }
 0x93d   : > { %7260 = vmatmul.bf16.gmra.mxu0 %v14162_v26  ;;  %v6417_v7 = vpop.f32.mrf.mxu1  ;;  %7395 = vmatpush.bf16.msrb.mxu2 %v10109_v63  ;;  %v6329_v19 = vadd.f32 %v13895_v60, %v13836_v32 }
 0x93e   : > { %7484 = vmatpush.bf16.msrb.mxu3 %v10173_v40  ;;  %v6418_v52 = vadd.f32 %v6417_v7, %v13831_v5  ;;  %v6530_v63 = vmax.f32 %v6331_v47, 0.0 }
 0x93f   : > { %v7043_v59 = vpop.f32.mrf.mxu2  ;;  %v7132_v3 = vpop.f32.mrf.mxu3  ;;  %v6526_v14 = vmax.f32 %v6329_v19, 0.0 }
 0x940   : > { %v7044_v0 = vadd.f32 %v7043_v59, %v14167_v46  ;;  %7314 = vmatmul.bf16.gmra.mxu1 %v13897_v31  ;;  %v6527_v20 = vmax.f32 %v6418_v52, 0.0 }
 0x942   : > { %v7133_v4 = vadd.f32 %v7132_v3, %v7044_v0  ;;  %v7223_v36 = vpop.f32.mrf.mxu0 }
 0x944   : > { %v14191_v6 = vadd.f32 %v7221_v30, %v7133_v4  ;;  %v14199_v30 = vpack.c.bf16 %v6530_v63, %v6526_v14  ;;  %v6336_v63 = vadd.f32 %v13955_v50, %v13836_v32 }
 0x945   : > { %v6419_v57 = vpop.f32.mrf.mxu1 }
 0x946   : > { %v6420_v23 = vadd.f32 %v6419_v57, %v13831_v5  ;;  %15246 = vst [vmem:[#allocation60_spill] sm:$0xff] %v14199_v30  ;;  %v10830_v57 = vld [vmem:[%s14976_s12 + $0x154] sm:$0xf] }
 0x947   : > { %v7045_v59 = vpop.f32.mrf.mxu2  ;;  %v7134_v31 = vpop.f32.mrf.mxu3 }
 0x948   : > { %v6531_v3 = vmax.f32 %v6420_v23, 0.0  ;;  %v7046_v0 = vadd.f32 %v7045_v59, %v14167_v46  ;;  %v10846_v23 = vld [vmem:[%s14976_s12 + $0x1d4] sm:$0xf] }
 0x94a   : > { %v7135_v61 = vadd.f32 %v7134_v31, %v7046_v0  ;;  %v7226_v40 = vpop.f32.mrf.mxu0  ;;  %v14197_v26 = vpack.c.bf16 %v6531_v3, %v6527_v20  ;;  %v10322_v20 = vld [vmem:[%s14976_s12 + $0x1d8] sm:$0xf0] }
 0x94b   : > { %v10325_v0 = vor.u32 %v10846_v23, %v10322_v20 }
 0x94c   : > { %7087 = vmatmul.bf16.gmra.mxu2 %v13936_v9  ;;  %7176 = vmatmul.bf16.gmra.mxu3 %v13938_v43  ;;  %v14203_v60 = vadd.f32 %v7223_v36, %v7135_v61  ;;  %v10258_v36 = vld [vmem:[%s14976_s12 + $0x158] sm:$0xf0]  ;;  %v6334_v61 = vadd.f32 %v13928_v18, %v13836_v32 }
 0x94d   : > { %7265 = vmatmul.bf16.gmra.mxu0 %v14199_v30  ;;  %v6422_v7 = vpop.f32.mrf.mxu1  ;;  %v10261_v59 = vor.u32 %v10830_v57, %v10258_v36  ;;  %7659 = vmatpush.bf16.msra.mxu1 %v10325_v0  ;;  %v10162_v0 = vld [vmem:[%s14976_s12 + $0x98] sm:$0xf0] }
 0x94e   : > { %v6423_v3 = vadd.f32 %v6422_v7, %v13831_v5  ;;  %v6534_v43 = vmax.f32 %v6334_v61, 0.0 }
 0x94f   : > { %v7048_v4 = vpop.f32.mrf.mxu2  ;;  %v7137_v47 = vpop.f32.mrf.mxu3  ;;  %7570 = vmatpush.bf16.msrb.mxu0 %v10261_v59  ;;  %v10790_v59 = vld [vmem:[%s14976_s12 + $0x14] sm:$0xf] }
 0x950   : > { %v7049_v52 = vadd.f32 %v7048_v4, %v14167_v46  ;;  %7319 = vmatmul.bf16.gmra.mxu1 %v13930_v2  ;;  %v6535_v36 = vmax.f32 %v6423_v3, 0.0 }
 0x952   : > { %v7138_v31 = vadd.f32 %v7137_v47, %v7049_v52  ;;  %v7228_v19 = vpop.f32.mrf.mxu0  ;;  %v6538_v52 = vmax.f32 %v6336_v63, 0.0 }
 0x954   : > { %v14223_v14 = vadd.f32 %v7226_v40, %v7138_v31  ;;  %v14231_v31 = vpack.c.bf16 %v6538_v52, %v6534_v43  ;;  %v6341_v52 = vadd.f32 %v13982_v35, %v13836_v32 }
 0x955   : > { %v6424_v4 = vpop.f32.mrf.mxu1 }
 0x956   : > { %v6425_v47 = vadd.f32 %v6424_v4, %v13831_v5 }
 0x957   : > { %v7050_v50 = vpop.f32.mrf.mxu2  ;;  %v7139_v57 = vpop.f32.mrf.mxu3 }
 0x958   : > { %v6539_v2 = vmax.f32 %v6425_v47, 0.0  ;;  %v7051_v30 = vadd.f32 %v7050_v50, %v14167_v46 }
 0x95a   : > { %v7140_v7 = vadd.f32 %v7139_v57, %v7051_v30  ;;  %v7231_v23 = vpop.f32.mrf.mxu0  ;;  %v14229_v40 = vpack.c.bf16 %v6539_v2, %v6535_v36  ;;  %v10098_v2 = vld [vmem:[%s14976_s12 + $0x18] sm:$0xf0]  ;;  %v6339_v36 = vadd.f32 %v13967_v37, %v13836_v32 }
 0x95b   : > { %v10101_v30 = vor.u32 %v10790_v59, %v10098_v2  ;;  %v6546_v2 = vmax.f32 %v6341_v52, 0.0 }
 0x95c   : > { %15247 = vst [vmem:[#allocation61_spill] sm:$0xff] %v14229_v40  ;;  %7092 = vmatmul.bf16.gmra.mxu2 %v13975_v54  ;;  %7181 = vmatmul.bf16.gmra.mxu3 %v13977_v1  ;;  %v14235_v18 = vadd.f32 %v7228_v19, %v7140_v7  ;;  %v10806_v19 = vld [vmem:[%s14976_s12 + $0x94] sm:$0xf] }
 0x95d   : > { %7270 = vmatmul.bf16.gmra.mxu0 %v14231_v31  ;;  %v6427_v63 = vpop.f32.mrf.mxu1  ;;  %7396 = vmatpush.bf16.msrb.mxu2 %v10101_v30  ;;  %v10165_v61 = vor.u32 %v10806_v19, %v10162_v0  ;;  %v6542_v0 = vmax.f32 %v6339_v36, 0.0 }
 0x95e   : > { %v6428_v50 = vadd.f32 %v6427_v63, %v13831_v5 }
 0x95f   : > { %v7053_v43 = vpop.f32.mrf.mxu2  ;;  %v7142_v20 = vpop.f32.mrf.mxu3  ;;  %7485 = vmatpush.bf16.msrb.mxu3 %v10165_v61 }
 0x960   : > { %v7054_v3 = vadd.f32 %v7053_v43, %v14167_v46  ;;  %7324 = vmatmul.bf16.gmra.mxu1 %v13969_v10  ;;  %v6543_v19 = vmax.f32 %v6428_v50, 0.0 }
 0x962   : > { %v7143_v4 = vadd.f32 %v7142_v20, %v7054_v3  ;;  %v7233_v47 = vpop.f32.mrf.mxu0 }
 0x964   : > { %v14255_v57 = vadd.f32 %v7231_v23, %v7143_v4  ;;  %v14263_v23 = vpack.c.bf16 %v6546_v2, %v6542_v0  ;;  %v10844_v2 = vld [vmem:[%s14976_s12 + $0x1c4] sm:$0xf] }
 0x965   : > { %v6429_v7 = vpop.f32.mrf.mxu1 }
 0x966   : > { %v6430_v59 = vadd.f32 %v6429_v7, %v13831_v5  ;;  %15248 = vst [vmem:[#allocation62_spill] sm:$0xff] %v14263_v23 }
 0x967   : > { %v7055_v30 = vpop.f32.mrf.mxu2  ;;  %v7144_v43 = vpop.f32.mrf.mxu3 }
 0x968   : > { %v6547_v20 = vmax.f32 %v6430_v59, 0.0  ;;  %v7056_v3 = vadd.f32 %v7055_v30, %v14167_v46  ;;  %v10828_v59 = vld [vmem:[%s14976_s12 + $0x144] sm:$0xf]  ;;  %v6346_v30 = vadd.f32 %v14027_v39, %v13836_v32 }
 0x96a   : > { %v7145_v35 = vadd.f32 %v7144_v43, %v7056_v3  ;;  %v7236_v61 = vpop.f32.mrf.mxu0  ;;  %v14261_v10 = vpack.c.bf16 %v6547_v20, %v6543_v19  ;;  %v10314_v19 = vld [vmem:[%s14976_s12 + $0x1c8] sm:$0xf0] }
 0x96b   : > { %v10317_v3 = vor.u32 %v10844_v2, %v10314_v19 }
 0x96c   : > { %7097 = vmatmul.bf16.gmra.mxu2 %v14008_v62  ;;  %7186 = vmatmul.bf16.gmra.mxu3 %v14010_v12  ;;  %v14267_v37 = vadd.f32 %v7233_v47, %v7145_v35  ;;  %v10250_v47 = vld [vmem:[%s14976_s12 + $0x148] sm:$0xf0]  ;;  %v6344_v35 = vadd.f32 %v14000_v15, %v13836_v32 }
 0x96d   : > { %7275 = vmatmul.bf16.gmra.mxu0 %v14263_v23  ;;  %v6432_v63 = vpop.f32.mrf.mxu1  ;;  %v10253_v43 = vor.u32 %v10828_v59, %v10250_v47  ;;  %7660 = vmatpush.bf16.msra.mxu1 %v10317_v3  ;;  %v10154_v3 = vld [vmem:[%s14976_s12 + $0x88] sm:$0xf0] }
 0x96e   : > { %v6433_v20 = vadd.f32 %v6432_v63, %v13831_v5  ;;  %v6550_v12 = vmax.f32 %v6344_v35, 0.0 }
 0x96f   : > { %v7058_v4 = vpop.f32.mrf.mxu2  ;;  %v7147_v52 = vpop.f32.mrf.mxu3  ;;  %7571 = vmatpush.bf16.msrb.mxu0 %v10253_v43  ;;  %v10788_v43 = vld [vmem:[%s14976_s12 + $0x4] sm:$0xf] }
 0x970   : > { %v7059_v50 = vadd.f32 %v7058_v4, %v14167_v46  ;;  %7329 = vmatmul.bf16.gmra.mxu1 %v14002_v13  ;;  %v6551_v47 = vmax.f32 %v6433_v20, 0.0 }
 0x972   : > { %v7148_v36 = vadd.f32 %v7147_v52, %v7059_v50  ;;  %v7238_v7 = vpop.f32.mrf.mxu0  ;;  %v6554_v50 = vmax.f32 %v6346_v30, 0.0 }
 0x974   : > { %v14287_v0 = vadd.f32 %v7236_v61, %v7148_v36  ;;  %v14295_v36 = vpack.c.bf16 %v6554_v50, %v6550_v12  ;;  %v6351_v50 = vadd.f32 %v14054_v33, %v13836_v32 }
 0x975   : > { %v6434_v4 = vpop.f32.mrf.mxu1 }
 0x976   : > { %v6435_v52 = vadd.f32 %v6434_v4, %v13831_v5 }
 0x977   : > { %v7060_v39 = vpop.f32.mrf.mxu2  ;;  %v7149_v59 = vpop.f32.mrf.mxu3 }
 0x978   : > { %v6555_v13 = vmax.f32 %v6435_v52, 0.0  ;;  %v7061_v23 = vadd.f32 %v7060_v39, %v14167_v46 }
 0x97a   : > { %v7150_v63 = vadd.f32 %v7149_v59, %v7061_v23  ;;  %v7241_v2 = vpop.f32.mrf.mxu0  ;;  %v14293_v61 = vpack.c.bf16 %v6555_v13, %v6551_v47  ;;  %v10090_v13 = vld [vmem:[%s14976_s12 + $0x8] sm:$0xf0]  ;;  %v6349_v47 = vadd.f32 %v14039_v17, %v13836_v32  ;;  %v10826_v17 = vld [vmem:[%s14976_s12 + $0x134] sm:$0xf] }
 0x97b   : > { %v10093_v23 = vor.u32 %v10788_v43, %v10090_v13  ;;  %v6562_v13 = vmax.f32 %v6351_v50, 0.0 }
 0x97c   : > { %15249 = vst [vmem:[#allocation63_spill] sm:$0xff] %v14293_v61  ;;  %7102 = vmatmul.bf16.gmra.mxu2 %v14047_v42  ;;  %7191 = vmatmul.bf16.gmra.mxu3 %v14049_v8  ;;  %v14299_v15 = vadd.f32 %v7238_v7, %v7150_v63  ;;  %v10804_v7 = vld [vmem:[%s14976_s12 + $0x84] sm:$0xf] }
 0x97d   : > { %7280 = vmatmul.bf16.gmra.mxu0 %v14295_v36  ;;  %v6437_v30 = vpop.f32.mrf.mxu1  ;;  %7397 = vmatpush.bf16.msrb.mxu2 %v10093_v23  ;;  %v10157_v35 = vor.u32 %v10804_v7, %v10154_v3  ;;  %v6558_v3 = vmax.f32 %v6349_v47, 0.0 }
 0x97e   : > { %v6438_v39 = vadd.f32 %v6437_v30, %v13831_v5  ;;  %v10242_v30 = vld [vmem:[%s14976_s12 + $0x138] sm:$0xf0] }
 0x97f   : > { %v7063_v12 = vpop.f32.mrf.mxu2  ;;  %v7152_v19 = vpop.f32.mrf.mxu3  ;;  %7486 = vmatpush.bf16.msrb.mxu3 %v10157_v35 }
 0x980   : > { %v7064_v20 = vadd.f32 %v7063_v12, %v14167_v46  ;;  %7334 = vmatmul.bf16.gmra.mxu1 %v14041_v55  ;;  %v6559_v7 = vmax.f32 %v6438_v39, 0.0 }
 0x982   : > { %v7153_v4 = vadd.f32 %v7152_v19, %v7064_v20  ;;  %v7243_v52 = vpop.f32.mrf.mxu0 }
 0x984   : > { %v14319_v59 = vadd.f32 %v7241_v2, %v7153_v4  ;;  %v14327_v2 = vpack.c.bf16 %v6562_v13, %v6558_v3  ;;  %v10245_v4 = vor.u32 %v10826_v17, %v10242_v30  ;;  %v10234_v13 = vld [vmem:[%s14976_s12 + $0x128] sm:$0xf0]  ;;  %v6356_v3 = vadd.f32 %v14105_v53, %v13836_v32  ;;  %v10822_v17 = vld [vmem:[%s14976_s12 + $0x114] sm:$0xf]  ;;  %v10226_v30 = vld [vmem:[%s14976_s12 + $0x118] sm:$0xf0] }
 0x985   : > { %v6439_v63 = vpop.f32.mrf.mxu1 }
 0x986   : > { %v6440_v43 = vadd.f32 %v6439_v63, %v13831_v5  ;;  %7572 = vmatpush.bf16.msrb.mxu0 %v10245_v4 }
 0x987   : > { %v7065_v23 = vpop.f32.mrf.mxu2  ;;  %v7154_v12 = vpop.f32.mrf.mxu3 }
 0x988   : > { %v6563_v19 = vmax.f32 %v6440_v43, 0.0  ;;  %v7066_v20 = vadd.f32 %v7065_v23, %v14167_v46  ;;  %v10824_v43 = vld [vmem:[%s14976_s12 + $0x124] sm:$0xf] }
 0x98a   : > { %v7155_v33 = vadd.f32 %v7154_v12, %v7066_v20  ;;  %v7246_v35 = vpop.f32.mrf.mxu0  ;;  %v14325_v55 = vpack.c.bf16 %v6563_v19, %v6559_v7  ;;  %v10842_v19 = vld [vmem:[%s14976_s12 + $0x1b4] sm:$0xf]  ;;  %v10306_v20 = vld [vmem:[%s14976_s12 + $0x1b8] sm:$0xf0] }
 0x98c   : > { %7107 = vmatmul.bf16.gmra.mxu2 %v14086_v38  ;;  %7196 = vmatmul.bf16.gmra.mxu3 %v14088_v16  ;;  %v14337_v50 = vadd.f32 %v7243_v52, %v7155_v33  ;;  %v10237_v52 = vor.u32 %v10824_v43, %v10234_v13  ;;  %v10309_v33 = vor.u32 %v10842_v19, %v10306_v20  ;;  %v10820_v20 = vld [vmem:[%s14976_s12 + $0x104] sm:$0xf] }
 0x98d   : > { %7285 = vmatmul.bf16.gmra.mxu0 %v14327_v2  ;;  %v6442_v39 = vpop.f32.mrf.mxu1  ;;  %v6354_v43 = vadd.f32 %v14078_v48, %v13836_v32 }
 0x98e   : > { %7573 = vmatpush.bf16.msrb.mxu0 %v10237_v52  ;;  %v6443_v4 = vadd.f32 %v6442_v39, %v13831_v5  ;;  %7661 = vmatpush.bf16.msra.mxu1 %v10309_v33 }
 0x98f   : > { %v7068_v47 = vpop.f32.mrf.mxu2  ;;  %v7157_v63 = vpop.f32.mrf.mxu3  ;;  %v6566_v33 = vmax.f32 %v6354_v43, 0.0  ;;  %v10859_v43 = vld [vmem:[%s14978_s14 + $0x38] sm:$0xff] }
 0x990   : > { %v7069_v23 = vadd.f32 %v7068_v47, %v14167_v46  ;;  %7339 = vmatmul.bf16.gmra.mxu1 %v14080_v11  ;;  %v10229_v47 = vor.u32 %v10822_v17, %v10226_v30  ;;  %v6567_v39 = vmax.f32 %v6443_v4, 0.0  ;;  %7974 = vmatpush.bf16.msra.mxu2 %v10859_v43 }
 0x992   : > { %v7158_v12 = vadd.f32 %v7157_v63, %v7069_v23  ;;  %v7248_v7 = vpop.f32.mrf.mxu0  ;;  %7574 = vmatpush.bf16.msrb.mxu0 %v10229_v47  ;;  %v6570_v23 = vmax.f32 %v6356_v3, 0.0 }
 0x994   : > { %v14363_v63 = vadd.f32 %v7246_v35, %v7158_v12  ;;  %v10218_v35 = vld [vmem:[%s14976_s12 + $0x108] sm:$0xf0]  ;;  %v14377_v47 = vpack.c.bf16 %v6570_v23, %v6566_v33  ;;  %v10867_v23 = vld [vmem:[%s14978_s14 + $0x78] sm:$0xff] }
 0x995   : > { %v6444_v13 = vpop.f32.mrf.mxu1  ;;  %v10221_v17 = vor.u32 %v10820_v20, %v10218_v35  ;;  %8063 = vmatpush.bf16.msra.mxu3 %v10867_v23  ;;  %v6361_v35 = vadd.f32 %v14131_v49, %v13836_v32 }
 0x996   : > { %v6445_v53 = vadd.f32 %v6444_v13, %v13831_v5  ;;  %15250 = vst [vmem:[#allocation64_spill] sm:$0xff] %v14377_v47 }
 0x997   : > { %v7070_v52 = vpop.f32.mrf.mxu2  ;;  %v7159_v19 = vpop.f32.mrf.mxu3  ;;  %7575 = vmatpush.bf16.msrb.mxu0 %v10221_v17 }
 0x998   : > { %v6571_v12 = vmax.f32 %v6445_v53, 0.0  ;;  %v7071_v48 = vadd.f32 %v7070_v52, %v14167_v46 }
 0x99a   : > { %v7160_v30 = vadd.f32 %v7159_v19, %v7071_v48  ;;  %v7251_v13 = vpop.f32.mrf.mxu0  ;;  %v14375_v3 = vpack.c.bf16 %v6571_v12, %v6567_v39  ;;  %v6359_v48 = vadd.f32 %v14117_v22, %v13836_v32 }
 0x99c   : > { %7112 = vmatmul.bf16.gmra.mxu2 %v14125_v34  ;;  %7201 = vmatmul.bf16.gmra.mxu3 %v14127_v24  ;;  %v14381_v11 = vadd.f32 %v7248_v7, %v7160_v30  ;;  %v6578_v30 = vmax.f32 %v6361_v35, 0.0  ;;  %v6574_v23 = vmax.f32 %v6359_v48, 0.0  ;;  %v10840_v48 = vld [vmem:[%s14976_s12 + $0x1a4] sm:$0xf] }
 0x99d   : > { %7290 = vmatmul.bf16.gmra.mxu0 %v14377_v47  ;;  %v6447_v4 = vpop.f32.mrf.mxu1 }
 0x99e   : > { %v6448_v39 = vadd.f32 %v6447_v4, %v13831_v5 }
 0x99f   : > { %v7073_v53 = vpop.f32.mrf.mxu2  ;;  %v7162_v52 = vpop.f32.mrf.mxu3 }
 0x9a0   : > { %v7074_v19 = vadd.f32 %v7073_v53, %v14167_v46  ;;  %7344 = vmatmul.bf16.gmra.mxu1 %v14119_v56  ;;  %v6575_v56 = vmax.f32 %v6448_v39, 0.0 }
 0x9a2   : > { %v7163_v7 = vadd.f32 %v7162_v52, %v7074_v19  ;;  %v7253_v20 = vpop.f32.mrf.mxu0 }
 0x9a4   : > { %v14395_v12 = vadd.f32 %v7251_v13, %v7163_v7  ;;  %v14403_v13 = vpack.c.bf16 %v6578_v30, %v6574_v23 }
 0x9a5   : > { %v6449_v17 = vpop.f32.mrf.mxu1 }
 0x9a6   : > { %v6450_v33 = vadd.f32 %v6449_v17, %v13831_v5 }
 0x9a7   : > { %v7075_v43 = vpop.f32.mrf.mxu2  ;;  %v7164_v53 = vpop.f32.mrf.mxu3 }
 0x9a8   : > { %v6579_v52 = vmax.f32 %v6450_v33, 0.0  ;;  %v7076_v19 = vadd.f32 %v7075_v43, %v14167_v46 }
 0x9aa   : > { %v7165_v47 = vadd.f32 %v7164_v53, %v7076_v19  ;;  %v7256_v49 = vpop.f32.mrf.mxu0  ;;  %v14401_v24 = vpack.c.bf16 %v6579_v52, %v6575_v56 }
 0x9ac   : > { %7117 = vmatmul.bf16.gmra.mxu2 %v14169_v25  ;;  %7206 = vmatmul.bf16.gmra.mxu3 %v14171_v51  ;;  %v14407_v32 = vadd.f32 %v7253_v20, %v7165_v47  ;;  %v10298_v47 = vld [vmem:[%s14976_s12 + $0x1a8] sm:$0xf0] }
 0x9ad   : > { %7295 = vmatmul.bf16.gmra.mxu0 %v14403_v13  ;;  %v7310_v5 = vpop.f32.mrf.mxu1  ;;  %v10301_v20 = vor.u32 %v10840_v48, %v10298_v47 }
 0x9ae   : > { %v7311_v22 = vadd.f32 %v7310_v5, %v14191_v6 }
 0x9af   : > { %v7078_v4 = vpop.f32.mrf.mxu2  ;;  %v7167_v7 = vpop.f32.mrf.mxu3  ;;  %7662 = vmatpush.bf16.msra.mxu1 %v10301_v20 }
 0x9b0   : > { %v7079_v35 = vadd.f32 %v7078_v4, %v14167_v46  ;;  %7349 = vmatmul.bf16.gmra.mxu1 %v14160_v44  ;;  %v7746_v53 = vmax.f32 %v7311_v22, 0.0 }
 0x9b2   : > { %v7168_v56 = vadd.f32 %v7167_v7, %v7079_v35  ;;  %v7258_v39 = vpop.f32.mrf.mxu0  ;;  %v15251_v7 = vld [vmem:[#allocation28_spill] sm:$0xff] }
 0x9b3   : > { %v15252_v35 = vld [vmem:[#allocation40_spill] sm:$0xff] }
 0x9b4   : > { %v14419_v17 = vadd.f32 %v7256_v49, %v7168_v56 }
 0x9b5   : > { %v7312_v6 = vpop.f32.mrf.mxu1 }
 0x9b6   : > { %v7313_v33 = vadd.f32 %v7312_v6, %v14203_v60  ;;  %v10858_v60 = vld [vmem:[%s14978_s14 + $0x30] sm:$0xff] }
 0x9b7   : > { %v7080_v30 = vpop.f32.mrf.mxu2  ;;  %v7169_v43 = vpop.f32.mrf.mxu3  ;;  %7975 = vmatpush.bf16.msra.mxu2 %v10858_v60  ;;  %v15253_v60 = vld [vmem:[#allocation29_spill] sm:$0xff] }
 0x9b8   : > { %v7748_v52 = vmax.f32 %v7313_v33, 0.0  ;;  %v7081_v19 = vadd.f32 %v7080_v30, %v14167_v46 }
 0x9ba   : > { %v14423_v23 = vpack.c.bf16 %v7748_v52, %v7746_v53  ;;  %v7170_v5 = vadd.f32 %v7169_v43, %v7081_v19  ;;  %v7261_v4 = vpop.f32.mrf.mxu0 }
 0x9bc   : > { %7398 = vmatmul.bf16.vlgmr.msrb.gmra.mxu2 %v13586_v28  ;;  %7487 = vmatmul.bf16.vlgmr.msrb.gmra.mxu3 %v15251_v7  ;;  %v14427_v49 = vadd.f32 %v7258_v39, %v7170_v5  ;;  %v10866_v28 = vld [vmem:[%s14978_s14 + $0x70] sm:$0xff] }
 0x9bd   : > { %7576 = vmatmul.bf16.vlgmr.msrb.gmra.mxu0 %v15252_v35  ;;  %v7315_v56 = vpop.f32.mrf.mxu1  ;;  %8064 = vmatpush.bf16.msra.mxu3 %v10866_v28 }
 0x9be   : > { %v7316_v22 = vadd.f32 %v7315_v56, %v14223_v14 }
 0x9bf   : > { %v7083_v48 = vpop.f32.mrf.mxu2  ;;  %v7172_v47 = vpop.f32.mrf.mxu3 }
 0x9c0   : > { %v7084_v20 = vadd.f32 %v7083_v48, %v14167_v46  ;;  %7354 = vmatmul.bf16.gmra.mxu1 %v14197_v26  ;;  %v7750_v52 = vmax.f32 %v7316_v22, 0.0  ;;  %v15254_v48 = vld [vmem:[#allocation30_spill] sm:$0xff] }
 0x9c2   : > { %v7173_v39 = vadd.f32 %v7172_v47, %v7084_v20  ;;  %v7263_v6 = vpop.f32.mrf.mxu0 }
 0x9c4   : > { %v14439_v33 = vadd.f32 %v7261_v4, %v7173_v39  ;;  %v15255_v4 = vld [vmem:[#allocation43_spill] sm:$0xff] }
 0x9c5   : > { %v7317_v30 = vpop.f32.mrf.mxu1 }
 0x9c6   : > { %v7318_v43 = vadd.f32 %v7317_v30, %v14235_v18 }
 0x9c7   : > { %v7085_v14 = vpop.f32.mrf.mxu2  ;;  %v7174_v53 = vpop.f32.mrf.mxu3 }
 0x9c8   : > { %v7752_v19 = vmax.f32 %v7318_v43, 0.0  ;;  %v7086_v5 = vadd.f32 %v7085_v14, %v14167_v46  ;;  %v10838_v14 = vld [vmem:[%s14976_s12 + $0x194] sm:$0xf] }
 0x9ca   : > { %v7175_v7 = vadd.f32 %v7174_v53, %v7086_v5  ;;  %v7266_v35 = vpop.f32.mrf.mxu0  ;;  %v14443_v56 = vpack.c.bf16 %v7752_v19, %v7750_v52 }
 0x9cc   : > { %7403 = vmatmul.bf16.gmra.mxu2 %v15253_v60  ;;  %7492 = vmatmul.bf16.gmra.mxu3 %v15254_v48  ;;  %v14447_v47 = vadd.f32 %v7263_v6, %v7175_v7  ;;  %v10290_v6 = vld [vmem:[%s14976_s12 + $0x198] sm:$0xf0] }
 0x9cd   : > { %7581 = vmatmul.bf16.gmra.mxu0 %v15255_v4  ;;  %v7320_v20 = vpop.f32.mrf.mxu1  ;;  %v10293_v53 = vor.u32 %v10838_v14, %v10290_v6 }
 0x9ce   : > { %v7321_v18 = vadd.f32 %v7320_v20, %v14255_v57 }
 0x9cf   : > { %v7088_v28 = vpop.f32.mrf.mxu2  ;;  %v7177_v22 = vpop.f32.mrf.mxu3  ;;  %7663 = vmatpush.bf16.msra.mxu1 %v10293_v53 }
 0x9d0   : > { %v7089_v39 = vadd.f32 %v7088_v28, %v14167_v46  ;;  %7359 = vmatmul.bf16.gmra.mxu1 %v14229_v40  ;;  %v7754_v60 = vmax.f32 %v7321_v18, 0.0  ;;  %v15257_v40 = vld [vmem:[#allocation32_spill] sm:$0xff] }
 0x9d2   : > { %v7178_v30 = vadd.f32 %v7177_v22, %v7089_v39  ;;  %v7268_v43 = vpop.f32.mrf.mxu0  ;;  %v15256_v39 = vld [vmem:[#allocation31_spill] sm:$0xff] }
 0x9d4   : > { %v14459_v52 = vadd.f32 %v7266_v35, %v7178_v30  ;;  %v15258_v30 = vld [vmem:[#allocation45_spill] sm:$0xff] }
 0x9d5   : > { %v7322_v57 = vpop.f32.mrf.mxu1 }
 0x9d6   : > { %v7323_v19 = vadd.f32 %v7322_v57, %v14267_v37  ;;  %v10857_v37 = vld [vmem:[%s14978_s14 + $0x28] sm:$0xff] }
 0x9d7   : > { %v7090_v5 = vpop.f32.mrf.mxu2  ;;  %v7179_v7 = vpop.f32.mrf.mxu3  ;;  %7976 = vmatpush.bf16.msra.mxu2 %v10857_v37 }
 0x9d8   : > { %v7756_v48 = vmax.f32 %v7323_v19, 0.0  ;;  %v7091_v4 = vadd.f32 %v7090_v5, %v14167_v46 }
 0x9da   : > { %v7180_v20 = vadd.f32 %v7179_v7, %v7091_v4  ;;  %v7271_v28 = vpop.f32.mrf.mxu0  ;;  %v14463_v22 = vpack.c.bf16 %v7756_v48, %v7754_v60 }
 0x9dc   : > { %7408 = vmatmul.bf16.gmra.mxu2 %v15256_v39  ;;  %7497 = vmatmul.bf16.gmra.mxu3 %v15257_v40  ;;  %v14467_v35 = vadd.f32 %v7268_v43, %v7180_v20  ;;  %v10865_v40 = vld [vmem:[%s14978_s14 + $0x68] sm:$0xff] }
 0x9dd   : > { %7586 = vmatmul.bf16.gmra.mxu0 %v15258_v30  ;;  %v7325_v14 = vpop.f32.mrf.mxu1  ;;  %8065 = vmatpush.bf16.msra.mxu3 %v10865_v40 }
 0x9de   : > { %v7326_v18 = vadd.f32 %v7325_v14, %v14287_v0 }
 0x9df   : > { %v7093_v6 = vpop.f32.mrf.mxu2  ;;  %v7182_v53 = vpop.f32.mrf.mxu3 }
 0x9e0   : > { %v7094_v57 = vadd.f32 %v7093_v6, %v14167_v46  ;;  %7364 = vmatmul.bf16.gmra.mxu1 %v14261_v10  ;;  %v7758_v4 = vmax.f32 %v7326_v18, 0.0  ;;  %v15260_v6 = vld [vmem:[#allocation33_spill] sm:$0xff] }
 0x9e2   : > { %v7183_v43 = vadd.f32 %v7182_v53, %v7094_v57  ;;  %v7273_v19 = vpop.f32.mrf.mxu0  ;;  %v15261_v53 = vld [vmem:[#allocation34_spill] sm:$0xff] }
 0x9e4   : > { %v14479_v5 = vadd.f32 %v7271_v28, %v7183_v43  ;;  %v15262_v28 = vld [vmem:[#allocation48_spill] sm:$0xff] }
 0x9e5   : > { %v7327_v7 = vpop.f32.mrf.mxu1 }
 0x9e6   : > { %v7328_v60 = vadd.f32 %v7327_v7, %v14299_v15 }
 0x9e7   : > { %v7095_v0 = vpop.f32.mrf.mxu2  ;;  %v7184_v48 = vpop.f32.mrf.mxu3 }
 0x9e8   : > { %v7760_v20 = vmax.f32 %v7328_v60, 0.0  ;;  %v7096_v39 = vadd.f32 %v7095_v0, %v14167_v46 }
 0x9ea   : > { %v7185_v30 = vadd.f32 %v7184_v48, %v7096_v39  ;;  %v7276_v14 = vpop.f32.mrf.mxu0  ;;  %v14483_v37 = vpack.c.bf16 %v7760_v20, %v7758_v4  ;;  %v10836_v48 = vld [vmem:[%s14976_s12 + $0x184] sm:$0xf] }
 0x9ec   : > { %15259 = vst [vmem:[#allocation28_spill] sm:$0xff] %v14483_v37  ;;  %7413 = vmatmul.bf16.gmra.mxu2 %v15260_v6  ;;  %7502 = vmatmul.bf16.gmra.mxu3 %v15261_v53  ;;  %v14487_v57 = vadd.f32 %v7273_v19, %v7185_v30  ;;  %v10282_v19 = vld [vmem:[%s14976_s12 + $0x188] sm:$0xf0] }
 0x9ed   : > { %7591 = vmatmul.bf16.gmra.mxu0 %v15262_v28  ;;  %v7330_v40 = vpop.f32.mrf.mxu1  ;;  %v10285_v4 = vor.u32 %v10836_v48, %v10282_v19  ;;  %v15264_v37 = vld [vmem:[#allocation36_spill] sm:$0xff] }
 0x9ee   : > { %v7331_v15 = vadd.f32 %v7330_v40, %v14319_v59 }
 0x9ef   : > { %v7098_v43 = vpop.f32.mrf.mxu2  ;;  %v7187_v18 = vpop.f32.mrf.mxu3  ;;  %7664 = vmatpush.bf16.msra.mxu1 %v10285_v4 }
 0x9f0   : > { %v7099_v7 = vadd.f32 %v7098_v43, %v14167_v46  ;;  %7369 = vmatmul.bf16.gmra.mxu1 %v14293_v61  ;;  %v7762_v53 = vmax.f32 %v7331_v15, 0.0  ;;  %v15263_v61 = vld [vmem:[#allocation35_spill] sm:$0xff] }
 0x9f2   : > { %v7188_v60 = vadd.f32 %v7187_v18, %v7099_v7  ;;  %v7278_v0 = vpop.f32.mrf.mxu0 }
 0x9f4   : > { %v14499_v20 = vadd.f32 %v7276_v14, %v7188_v60  ;;  %v15265_v60 = vld [vmem:[#allocation50_spill] sm:$0xff] }
 0x9f5   : > { %v7332_v59 = vpop.f32.mrf.mxu1 }
 0x9f6   : > { %v7333_v39 = vadd.f32 %v7332_v59, %v14337_v50  ;;  %v10856_v50 = vld [vmem:[%s14978_s14 + $0x20] sm:$0xff] }
 0x9f7   : > { %v7100_v30 = vpop.f32.mrf.mxu2  ;;  %v7189_v6 = vpop.f32.mrf.mxu3  ;;  %7977 = vmatpush.bf16.msra.mxu2 %v10856_v50 }
 0x9f8   : > { %v7764_v28 = vmax.f32 %v7333_v39, 0.0  ;;  %v7101_v40 = vadd.f32 %v7100_v30, %v14167_v46 }
 0x9fa   : > { %v7190_v43 = vadd.f32 %v7189_v6, %v7101_v40  ;;  %v7281_v18 = vpop.f32.mrf.mxu0  ;;  %v14503_v7 = vpack.c.bf16 %v7764_v28, %v7762_v53 }
 0x9fc   : > { %7418 = vmatmul.bf16.gmra.mxu2 %v15263_v61  ;;  %7507 = vmatmul.bf16.gmra.mxu3 %v15264_v37  ;;  %v14507_v14 = vadd.f32 %v7278_v0, %v7190_v43  ;;  %v10864_v61 = vld [vmem:[%s14978_s14 + $0x60] sm:$0xff] }
 0x9fd   : > { %7596 = vmatmul.bf16.gmra.mxu0 %v15265_v60  ;;  %v7335_v48 = vpop.f32.mrf.mxu1  ;;  %8066 = vmatpush.bf16.msra.mxu3 %v10864_v61 }
 0x9fe   : > { %v7336_v15 = vadd.f32 %v7335_v48, %v14363_v63 }
 0x9ff   : > { %v7103_v19 = vpop.f32.mrf.mxu2  ;;  %v7192_v4 = vpop.f32.mrf.mxu3 }
 0xa00   : > { %v7104_v59 = vadd.f32 %v7103_v19, %v14167_v46  ;;  %7374 = vmatmul.bf16.gmra.mxu1 %v14325_v55  ;;  %v7766_v28 = vmax.f32 %v7336_v15, 0.0  ;;  %v15266_v19 = vld [vmem:[#allocation37_spill] sm:$0xff] }
 0xa02   : > { %v7193_v37 = vadd.f32 %v7192_v4, %v7104_v59  ;;  %v7283_v0 = vpop.f32.mrf.mxu0  ;;  %v15267_v4 = vld [vmem:[#allocation38_spill] sm:$0xff] }
 0xa04   : > { %v14519_v39 = vadd.f32 %v7281_v18, %v7193_v37  ;;  %v15268_v18 = vld [vmem:[#allocation53_spill] sm:$0xff] }
 0xa05   : > { %v7337_v30 = vpop.f32.mrf.mxu1 }
 0xa06   : > { %v7338_v6 = vadd.f32 %v7337_v30, %v14381_v11 }
 0xa07   : > { %v7105_v63 = vpop.f32.mrf.mxu2  ;;  %v7194_v53 = vpop.f32.mrf.mxu3 }
 0xa08   : > { %v7768_v40 = vmax.f32 %v7338_v6, 0.0  ;;  %v7106_v43 = vadd.f32 %v7105_v63, %v14167_v46 }
 0xa0a   : > { %v7195_v60 = vadd.f32 %v7194_v53, %v7106_v43  ;;  %v7286_v48 = vpop.f32.mrf.mxu0  ;;  %v14523_v50 = vpack.c.bf16 %v7768_v40, %v7766_v28 }
 0xa0c   : > { %7423 = vmatmul.bf16.gmra.mxu2 %v15266_v19  ;;  %7512 = vmatmul.bf16.gmra.mxu3 %v15267_v4  ;;  %v14527_v59 = vadd.f32 %v7283_v0, %v7195_v60 }
 0xa0d   : > { %7601 = vmatmul.bf16.gmra.mxu0 %v15268_v18  ;;  %v7340_v61 = vpop.f32.mrf.mxu1 }
 0xa0e   : > { %v7341_v11 = vadd.f32 %v7340_v61, %v14395_v12 }
 0xa0f   : > { %v7108_v37 = vpop.f32.mrf.mxu2  ;;  %v7197_v15 = vpop.f32.mrf.mxu3 }
 0xa10   : > { %v7109_v30 = vadd.f32 %v7108_v37, %v14167_v46  ;;  %7379 = vmatmul.bf16.gmra.mxu1 %v14375_v3  ;;  %v7770_v60 = vmax.f32 %v7341_v11, 0.0 }
 0xa12   : > { %v7198_v6 = vadd.f32 %v7197_v15, %v7109_v30  ;;  %v7288_v63 = vpop.f32.mrf.mxu0 }
 0xa14   : > { %v14533_v53 = vadd.f32 %v7286_v48, %v7198_v6  ;;  %v15269_v48 = vld [vmem:[#allocation55_spill] sm:$0xff] }
 0xa15   : > { %v7342_v28 = vpop.f32.mrf.mxu1 }
 0xa16   : > { %v7343_v40 = vadd.f32 %v7342_v28, %v14407_v32  ;;  %v10855_v32 = vld [vmem:[%s14978_s14 + $0x18] sm:$0xff] }
 0xa17   : > { %v7110_v0 = vpop.f32.mrf.mxu2  ;;  %v7199_v43 = vpop.f32.mrf.mxu3  ;;  %7978 = vmatpush.bf16.msra.mxu2 %v10855_v32  ;;  %v15270_v32 = vld [vmem:[#allocation41_spill] sm:$0xff] }
 0xa18   : > { %v7772_v19 = vmax.f32 %v7343_v40, 0.0  ;;  %v7111_v4 = vadd.f32 %v7110_v0, %v14167_v46 }
 0xa1a   : > { %v7200_v12 = vadd.f32 %v7199_v43, %v7111_v4  ;;  %v14537_v18 = vpack.c.bf16 %v7772_v19, %v7770_v60  ;;  %v7291_v61 = vpop.f32.mrf.mxu0 }
 0xa1c   : > { %7428 = vmatmul.bf16.gmra.mxu2 %v13824_v45  ;;  %7517 = vmatmul.bf16.gmra.mxu3 %v13826_v21  ;;  %v14541_v37 = vadd.f32 %v7288_v63, %v7200_v12  ;;  %v10863_v45 = vld [vmem:[%s14978_s14 + $0x58] sm:$0xff] }
 0xa1d   : > { %7606 = vmatmul.bf16.gmra.mxu0 %v15269_v48  ;;  %v7345_v15 = vpop.f32.mrf.mxu1  ;;  %8067 = vmatpush.bf16.msra.mxu3 %v10863_v45 }
 0xa1e   : > { %v7346_v11 = vadd.f32 %v7345_v15, %v14419_v17 }
 0xa1f   : > { %v7113_v30 = vpop.f32.mrf.mxu2  ;;  %v7202_v6 = vpop.f32.mrf.mxu3 }
 0xa20   : > { %v7114_v28 = vadd.f32 %v7113_v30, %v14167_v46  ;;  %7384 = vmatmul.bf16.gmra.mxu1 %v14401_v24  ;;  %v7774_v19 = vmax.f32 %v7346_v11, 0.0 }
 0xa22   : > { %v7203_v21 = vadd.f32 %v7202_v6, %v7114_v28  ;;  %v7293_v0 = vpop.f32.mrf.mxu0 }
 0xa24   : > { %v14553_v63 = vadd.f32 %v7291_v61, %v7203_v21  ;;  %v15271_v61 = vld [vmem:[#allocation57_spill] sm:$0xff]  ;;  %v15272_v21 = vld [vmem:[#allocation39_spill] sm:$0xff] }
 0xa25   : > { %v7347_v40 = vpop.f32.mrf.mxu1 }
 0xa26   : > { %v7348_v43 = vadd.f32 %v7347_v40, %v14427_v49 }
 0xa27   : > { %v7115_v17 = vpop.f32.mrf.mxu2  ;;  %v7204_v60 = vpop.f32.mrf.mxu3 }
 0xa28   : > { %v7776_v4 = vmax.f32 %v7348_v43, 0.0  ;;  %v7116_v12 = vadd.f32 %v7115_v17, %v14167_v46 }
 0xa2a   : > { %v7205_v48 = vadd.f32 %v7204_v60, %v7116_v12  ;;  %v14557_v15 = vpack.c.bf16 %v7776_v4, %v7774_v19  ;;  %v7296_v40 = vpop.f32.mrf.mxu0 }
 0xa2c   : > { %7433 = vmatmul.bf16.gmra.mxu2 %v13864_v41  ;;  %7522 = vmatmul.bf16.gmra.mxu3 %v15270_v32  ;;  %v14561_v30 = vadd.f32 %v7293_v0, %v7205_v48  ;;  %v10875_v41 = vld [vmem:[%s15273_s22 + $0x38] sm:$0xff] }
 0xa2d   : > { %7611 = vmatmul.bf16.gmra.mxu0 %v15271_v61  ;;  %v7350_v6 = vpop.f32.mrf.mxu1 }
 0xa2e   : > { %v7351_v49 = vadd.f32 %v7350_v6, %v14439_v33  ;;  %8268 = vmatpush.bf16.msra.mxu0 %v10875_v41 }
 0xa2f   : > { %v7118_v28 = vpop.f32.mrf.mxu2  ;;  %v7207_v45 = vpop.f32.mrf.mxu3 }
 0xa30   : > { %v7119_v11 = vadd.f32 %v7118_v28, %v14167_v46  ;;  %7665 = vmatmul.bf16.vlgmr.msra.gmra.mxu1 %v15272_v21  ;;  %v7778_v4 = vmax.f32 %v7351_v49, 0.0  ;;  %v14579_v28 = vperm.slane %v14158_v58, 1  ;;  %v10862_v58 = vld [vmem:[%s14978_s14 + $0x50] sm:$0xff] }
 0xa31   : > { %8068 = vmatpush.bf16.msra.mxu3 %v10862_v58 }
 0xa32   : > { %v7208_v43 = vadd.f32 %v7207_v45, %v7119_v11  ;;  %v7298_v6 = vpop.f32.mrf.mxu0 }
 0xa34   : > { %v14570_v0 = vadd.f32 %v7296_v40, %v7208_v43 }
 0xa35   : > { %v7352_v17 = vpop.f32.mrf.mxu1 }
 0xa36   : > { %v7353_v60 = vadd.f32 %v7352_v17, %v14447_v47  ;;  %v15274_v47 = vld [vmem:[#allocation59_spill] sm:$0xff] }
 0xa37   : > { %v7120_v19 = vpop.f32.mrf.mxu2  ;;  %v7209_v33 = vpop.f32.mrf.mxu3 }
 0xa38   : > { %v7780_v12 = vmax.f32 %v7353_v60, 0.0  ;;  %v7121_v48 = vadd.f32 %v7120_v19, %v14167_v46  ;;  %v10854_v46 = vld [vmem:[%s14978_s14 + $0x10] sm:$0xff] }
 0xa39   : > { %7979 = vmatpush.bf16.msra.mxu2 %v10854_v46 }
 0xa3a   : > { %v7210_v32 = vadd.f32 %v7209_v33, %v7121_v48  ;;  %v14574_v61 = vpack.c.bf16 %v7780_v12, %v7778_v4 }
 0xa3c   : > { %7438 = vmatmul.bf16.gmra.mxu2 %v13903_v27  ;;  %7527 = vmatmul.bf16.gmra.mxu3 %v13905_v29  ;;  %v14581_v45 = vadd.f32 %v7298_v6, %v7210_v32  ;;  %v15275_v29 = vld [vmem:[#allocation42_spill] sm:$0xff]  ;;  %v15277_v6 = vld [vmem:[#allocation60_spill] sm:$0xff] }
 0xa3d   : > { %7616 = vmatmul.bf16.gmra.mxu0 %v15274_v47  ;;  %v7355_v11 = vpop.f32.mrf.mxu1  ;;  %v15276_v32 = vld [vmem:[#allocation46_spill] sm:$0xff] }
 0xa3e   : > { %v7356_v49 = vadd.f32 %v7355_v11, %v14459_v52 }
 0xa3f   : > { %v7399_v21 = vpop.f32.mrf.mxu2  ;;  %v7488_v40 = vpop.f32.mrf.mxu3 }
 0xa40   : > { %v7400_v27 = vadd.f32 %v7399_v21, %v14579_v28  ;;  %7670 = vmatmul.bf16.gmra.mxu1 %v15275_v29  ;;  %v7782_v52 = vmax.f32 %v7356_v49, 0.0  ;;  %v15278_v21 = vld [vmem:[#allocation44_spill] sm:$0xff] }
 0xa42   : > { %v14593_v43 = vadd.f32 %v7488_v40, %v7400_v27  ;;  %v10874_v27 = vld [vmem:[%s15273_s22 + $0x30] sm:$0xff] }
 0xa43   : > { %8269 = vmatpush.bf16.msra.mxu0 %v10874_v27 }
 0xa45   : > { %v7357_v41 = vpop.f32.mrf.mxu1 }
 0xa46   : > { %v7358_v17 = vadd.f32 %v7357_v41, %v14467_v35 }
 0xa47   : > { %v7401_v60 = vpop.f32.mrf.mxu2  ;;  %v7490_v19 = vpop.f32.mrf.mxu3 }
 0xa48   : > { %v7784_v33 = vmax.f32 %v7358_v17, 0.0  ;;  %v7402_v4 = vadd.f32 %v7401_v60, %v14579_v28 }
 0xa4a   : > { %v14597_v12 = vadd.f32 %v7490_v19, %v7402_v4  ;;  %v14599_v48 = vpack.c.bf16 %v7784_v33, %v7782_v52 }
 0xa4c   : > { %7443 = vmatmul.bf16.gmra.mxu2 %v13936_v9  ;;  %7532 = vmatmul.bf16.gmra.mxu3 %v15276_v32 }
 0xa4d   : > { %7621 = vmatmul.bf16.gmra.mxu0 %v15277_v6  ;;  %v7360_v47 = vpop.f32.mrf.mxu1 }
 0xa4e   : > { %v7361_v11 = vadd.f32 %v7360_v47, %v14479_v5 }
 0xa4f   : > { %v7404_v35 = vpop.f32.mrf.mxu2  ;;  %v7493_v46 = vpop.f32.mrf.mxu3 }
 0xa50   : > { %v7405_v49 = vadd.f32 %v7404_v35, %v14579_v28  ;;  %7675 = vmatmul.bf16.gmra.mxu1 %v15278_v21  ;;  %v7786_v17 = vmax.f32 %v7361_v11, 0.0  ;;  %v15279_v11 = vld [vmem:[#allocation47_spill] sm:$0xff]  ;;  %v14632_v35 = vpop.f32.mrf.mxu0 }
 0xa52   : > { %v14607_v40 = vadd.f32 %v7493_v46, %v7405_v49 }
 0xa55   : > { %v7362_v9 = vpop.f32.mrf.mxu1 }
 0xa56   : > { %v7363_v29 = vadd.f32 %v7362_v9, %v14487_v57  ;;  %v10853_v57 = vld [vmem:[%s14978_s14 + $0x8] sm:$0xff] }
 0xa57   : > { %v7406_v58 = vpop.f32.mrf.mxu2  ;;  %v7495_v41 = vpop.f32.mrf.mxu3  ;;  %7980 = vmatpush.bf16.msra.mxu2 %v10853_v57 }
 0xa58   : > { %v7788_v5 = vmax.f32 %v7363_v29, 0.0  ;;  %v7407_v60 = vadd.f32 %v7406_v58, %v14579_v28  ;;  %v14644_v57 = vpop.f32.mrf.mxu0 }
 0xa5a   : > { %v14614_v19 = vadd.f32 %v7495_v41, %v7407_v60  ;;  %v14616_v52 = vpack.c.bf16 %v7788_v5, %v7786_v17  ;;  %v15280_v41 = vld [vmem:[#allocation51_spill] sm:$0xff]  ;;  %v15281_v17 = vld [vmem:[#allocation62_spill] sm:$0xff] }
 0xa5c   : > { %7448 = vmatmul.bf16.gmra.mxu2 %v13975_v54  ;;  %7537 = vmatmul.bf16.gmra.mxu3 %v13977_v1  ;;  %v10861_v54 = vld [vmem:[%s14978_s14 + $0x48] sm:$0xff] }
 0xa5d   : > { %7626 = vmatmul.bf16.gmra.mxu0 %v14231_v31  ;;  %v7365_v33 = vpop.f32.mrf.mxu1  ;;  %8069 = vmatpush.bf16.msra.mxu3 %v10861_v54 }
 0xa5e   : > { %v7366_v4 = vadd.f32 %v7365_v33, %v14499_v20 }
 0xa5f   : > { %v7409_v32 = vpop.f32.mrf.mxu2  ;;  %v7498_v6 = vpop.f32.mrf.mxu3 }
 0xa60   : > { %v7410_v47 = vadd.f32 %v7409_v32, %v14579_v28  ;;  %7680 = vmatmul.bf16.gmra.mxu1 %v15279_v11  ;;  %v7790_v21 = vmax.f32 %v7366_v4, 0.0  ;;  %v15282_v32 = vld [vmem:[#allocation49_spill] sm:$0xff] }
 0xa62   : > { %v14630_v1 = vadd.f32 %v7498_v6, %v7410_v47 }
 0xa65   : > { %v7367_v31 = vpop.f32.mrf.mxu1 }
 0xa66   : > { %v7368_v46 = vadd.f32 %v7367_v31, %v14507_v14 }
 0xa67   : > { %v7411_v20 = vpop.f32.mrf.mxu2  ;;  %v7500_v49 = vpop.f32.mrf.mxu3 }
 0xa68   : > { %v7792_v27 = vmax.f32 %v7368_v46, 0.0  ;;  %v7412_v9 = vadd.f32 %v7411_v20, %v14579_v28 }
 0xa6a   : > { %v14636_v29 = vadd.f32 %v7500_v49, %v7412_v9  ;;  %v14638_v58 = vpack.c.bf16 %v7792_v27, %v7790_v21  ;;  %v14655_v49 = vpop.f32.mrf.mxu0 }
 0xa6c   : > { %7453 = vmatmul.bf16.gmra.mxu2 %v14008_v62  ;;  %7542 = vmatmul.bf16.gmra.mxu3 %v15280_v41  ;;  %v10873_v62 = vld [vmem:[%s15273_s22 + $0x28] sm:$0xff] }
 0xa6d   : > { %7631 = vmatmul.bf16.gmra.mxu0 %v15281_v17  ;;  %v7370_v5 = vpop.f32.mrf.mxu1 }
 0xa6e   : > { %v7371_v60 = vadd.f32 %v7370_v5, %v14519_v39  ;;  %8270 = vmatpush.bf16.msra.mxu0 %v10873_v62 }
 0xa6f   : > { %v7414_v14 = vpop.f32.mrf.mxu2  ;;  %v7503_v33 = vpop.f32.mrf.mxu3 }
 0xa70   : > { %v7415_v4 = vadd.f32 %v7414_v14, %v14579_v28  ;;  %7685 = vmatmul.bf16.gmra.mxu1 %v15282_v32  ;;  %v7794_v31 = vmax.f32 %v7371_v60, 0.0  ;;  %v15283_v14 = vld [vmem:[#allocation52_spill] sm:$0xff] }
 0xa72   : > { %v14648_v6 = vadd.f32 %v7503_v33, %v7415_v4 }
 0xa75   : > { %v7372_v47 = vpop.f32.mrf.mxu1 }
 0xa76   : > { %v7373_v11 = vadd.f32 %v7372_v47, %v14527_v59  ;;  %v10852_v59 = vld [vmem:[%s14978_s14] sm:$0xff] }
 0xa77   : > { %v7416_v54 = vpop.f32.mrf.mxu2  ;;  %v7505_v39 = vpop.f32.mrf.mxu3  ;;  %7981 = vmatpush.bf16.msra.mxu2 %v10852_v59 }
 0xa78   : > { %v7796_v46 = vmax.f32 %v7373_v11, 0.0  ;;  %v7417_v20 = vadd.f32 %v7416_v54, %v14579_v28 }
 0xa7a   : > { %v14657_v21 = vadd.f32 %v7505_v39, %v7417_v20  ;;  %v14659_v27 = vpack.c.bf16 %v7796_v46, %v7794_v31 }
 0xa7c   : > { %7458 = vmatmul.bf16.gmra.mxu2 %v14047_v42  ;;  %7547 = vmatmul.bf16.gmra.mxu3 %v14049_v8  ;;  %v10860_v42 = vld [vmem:[%s14978_s14 + $0x40] sm:$0xff] }
 0xa7d   : > { %7636 = vmatmul.bf16.gmra.mxu0 %v14295_v36  ;;  %v7375_v9 = vpop.f32.mrf.mxu1  ;;  %8070 = vmatpush.bf16.msra.mxu3 %v10860_v42  ;;  %v14675_v36 = vpop.f32.mrf.mxu0 }
 0xa7e   : > { %v7376_v41 = vadd.f32 %v7375_v9, %v14533_v53 }
 0xa7f   : > { %v7419_v17 = vpop.f32.mrf.mxu2  ;;  %v7508_v5 = vpop.f32.mrf.mxu3 }
 0xa80   : > { %v7420_v60 = vadd.f32 %v7419_v17, %v14579_v28  ;;  %7690 = vmatmul.bf16.gmra.mxu1 %v15283_v14  ;;  %v7798_v62 = vmax.f32 %v7376_v41, 0.0  ;;  %v15284_v41 = vld [vmem:[#allocation54_spill] sm:$0xff] }
 0xa82   : > { %v14673_v8 = vadd.f32 %v7508_v5, %v7420_v60 }
 0xa85   : > { %v7377_v33 = vpop.f32.mrf.mxu1  ;;  %v14686_v46 = vpop.f32.mrf.mxu0 }
 0xa86   : > { %v7378_v4 = vadd.f32 %v7377_v33, %v14541_v37 }
 0xa87   : > { %v7421_v53 = vpop.f32.mrf.mxu2  ;;  %v7510_v32 = vpop.f32.mrf.mxu3 }
 0xa88   : > { %v7800_v47 = vmax.f32 %v7378_v4, 0.0  ;;  %v7422_v11 = vadd.f32 %v7421_v53, %v14579_v28 }
 0xa8a   : > { %v14679_v54 = vadd.f32 %v7510_v32, %v7422_v11  ;;  %v14681_v39 = vpack.c.bf16 %v7800_v47, %v7798_v62  ;;  %v15285_v32 = vld [vmem:[#allocation58_spill] sm:$0xff]  ;;  %v15286_v62 = vld [vmem:[#allocation64_spill] sm:$0xff] }
 0xa8c   : > { %7463 = vmatmul.bf16.gmra.mxu2 %v14086_v38  ;;  %7552 = vmatmul.bf16.gmra.mxu3 %v14088_v16  ;;  %v10872_v38 = vld [vmem:[%s15273_s22 + $0x20] sm:$0xff] }
 0xa8d   : > { %7641 = vmatmul.bf16.gmra.mxu0 %v14327_v2  ;;  %v7380_v31 = vpop.f32.mrf.mxu1  ;;  %v14698_v33 = vpop.f32.mrf.mxu0 }
 0xa8e   : > { %v7381_v37 = vadd.f32 %v7380_v31, %v14553_v63  ;;  %8271 = vmatpush.bf16.msra.mxu0 %v10872_v38 }
 0xa8f   : > { %v7424_v20 = vpop.f32.mrf.mxu2  ;;  %v7513_v9 = vpop.f32.mrf.mxu3 }
 0xa90   : > { %v7425_v59 = vadd.f32 %v7424_v20, %v14579_v28  ;;  %7695 = vmatmul.bf16.gmra.mxu1 %v15284_v41  ;;  %v7802_v14 = vmax.f32 %v7381_v37, 0.0  ;;  %v15287_v20 = vld [vmem:[#allocation56_spill] sm:$0xff] }
 0xa92   : > { %v14691_v17 = vadd.f32 %v7513_v9, %v7425_v59 }
 0xa95   : > { %v7382_v16 = vpop.f32.mrf.mxu1  ;;  %v14712_v59 = vpop.f32.mrf.mxu0 }
 0xa96   : > { %v7383_v2 = vadd.f32 %v7382_v16, %v14561_v30 }
 0xa97   : > { %v7426_v5 = vpop.f32.mrf.mxu2  ;;  %v7515_v60 = vpop.f32.mrf.mxu3 }
 0xa98   : > { %v7804_v63 = vmax.f32 %v7383_v2, 0.0  ;;  %v7427_v42 = vadd.f32 %v7426_v5, %v14579_v28 }
 0xa9a   : > { %v14700_v4 = vadd.f32 %v7515_v60, %v7427_v42  ;;  %v14702_v53 = vpack.c.bf16 %v7804_v63, %v7802_v14 }
 0xa9c   : > { %7468 = vmatmul.bf16.gmra.mxu2 %v14125_v34  ;;  %7557 = vmatmul.bf16.gmra.mxu3 %v15285_v32 }
 0xa9d   : > { %7646 = vmatmul.bf16.gmra.mxu0 %v15286_v62  ;;  %v7385_v47 = vpop.f32.mrf.mxu1  ;;  %v14722_v63 = vpop.f32.mrf.mxu0 }
 0xa9e   : > { %v7386_v30 = vadd.f32 %v7385_v47, %v14570_v0  ;;  %v7578_v47 = vadd.f32 %v14632_v35, %v14593_v43 }
 0xa9f   : > { %v7429_v11 = vpop.f32.mrf.mxu2  ;;  %v7518_v31 = vpop.f32.mrf.mxu3 }
 0xaa0   : > { %v7430_v37 = vadd.f32 %v7429_v11, %v14579_v28  ;;  %7700 = vmatmul.bf16.gmra.mxu1 %v15287_v20  ;;  %v7806_v2 = vmax.f32 %v7386_v30, 0.0 }
 0xaa2   : > { %v14710_v9 = vadd.f32 %v7518_v31, %v7430_v37 }
 0xaa5   : > { %v7387_v41 = vpop.f32.mrf.mxu1 }
 0xaa6   : > { %v7388_v34 = vadd.f32 %v7387_v41, %v14581_v45 }
 0xaa7   : > { %v7431_v38 = vpop.f32.mrf.mxu2  ;;  %v7520_v16 = vpop.f32.mrf.mxu3 }
 0xaa8   : > { %v7808_v5 = vmax.f32 %v7388_v34, 0.0  ;;  %v7432_v60 = vadd.f32 %v7431_v38, %v14579_v28  ;;  %v14739_v38 = vpop.f32.mrf.mxu0 }
 0xaaa   : > { %v14716_v0 = vadd.f32 %v7520_v16, %v7432_v60  ;;  %v14718_v14 = vpack.c.bf16 %v7808_v5, %v7806_v2  ;;  %v7583_v5 = vadd.f32 %v14655_v49, %v14607_v40 }
 0xaac   : > { %7473 = vmatmul.bf16.gmra.mxu2 %v14169_v25  ;;  %7562 = vmatmul.bf16.gmra.mxu3 %v14171_v51  ;;  %v10871_v25 = vld [vmem:[%s15273_s22 + $0x18] sm:$0xff] }
 0xaad   : > { %7651 = vmatmul.bf16.gmra.mxu0 %v14403_v13  ;;  %v7666_v42 = vpop.f32.mrf.mxu1  ;;  %v7580_v13 = vadd.f32 %v14644_v57, %v14597_v12 }
 0xaae   : > { %v7667_v51 = vadd.f32 %v7666_v42, %v7578_v47  ;;  %8272 = vmatpush.bf16.msra.mxu0 %v10871_v25 }
 0xaaf   : > { %v7434_v45 = vpop.f32.mrf.mxu2  ;;  %v7523_v32 = vpop.f32.mrf.mxu3 }
 0xab0   : > { %v7435_v62 = vadd.f32 %v7434_v45, %v14579_v28  ;;  %7705 = vmatmul.bf16.gmra.mxu1 %v14160_v44  ;;  %v7747_v41 = vmax.f32 %v7667_v51, 0.0  ;;  %v7585_v45 = vadd.f32 %v14675_v36, %v14614_v19 }
 0xab2   : > { %v14729_v30 = vadd.f32 %v7523_v32, %v7435_v62  ;;  %v14750_v62 = vpop.f32.mrf.mxu0 }
 0xab5   : > { %v7668_v11 = vpop.f32.mrf.mxu1 }
 0xab6   : > { %v7669_v31 = vadd.f32 %v7668_v11, %v7580_v13 }
 0xab7   : > { %v7436_v37 = vpop.f32.mrf.mxu2  ;;  %v7525_v20 = vpop.f32.mrf.mxu3 }
 0xab8   : > { %v7749_v44 = vmax.f32 %v7669_v31, 0.0  ;;  %v7437_v34 = vadd.f32 %v7436_v37, %v14579_v28 }
 0xaba   : > { %v7811_v43 = vpack.c.bf16 %v7749_v44, %v7747_v41  ;;  %v14737_v35 = vadd.f32 %v7525_v20, %v7437_v34  ;;  %v14756_v19 = vpop.f32.mrf.mxu0  ;;  %v15288_v20 = vld [vmem:[#allocation61_spill] sm:$0xff]  ;;  %v7588_v41 = vadd.f32 %v14686_v46, %v14630_v1 }
 0xabb   : > { %v10870_v34 = vld [vmem:[%s15273_s22 + $0x10] sm:$0xff] }
 0xabc   : > { %7982 = vmatmul.bf16.vlgmr.msra.gmra.mxu2 %v14423_v23  ;;  %8071 = vmatmul.bf16.vlgmr.msra.gmra.mxu3 %v7811_v43  ;;  %v7590_v43 = vadd.f32 %v14698_v33, %v14636_v29  ;;  %v7593_v33 = vadd.f32 %v14712_v59, %v14648_v6  ;;  %v15289_v6 = vld [vmem:[#allocation28_spill] sm:$0xff] }
 0xabd   : > { %v7671_v16 = vpop.f32.mrf.mxu1  ;;  %8273 = vmatpush.bf16.msra.mxu0 %v10870_v34 }
 0xabe   : > { %v7672_v42 = vadd.f32 %v7671_v16, %v7583_v5 }
 0xabf   : > { %v7439_v2 = vpop.f32.mrf.mxu2  ;;  %v7528_v12 = vpop.f32.mrf.mxu3 }
 0xac0   : > { %v7440_v57 = vadd.f32 %v7439_v2, %v14579_v28  ;;  %7710 = vmatmul.bf16.gmra.mxu1 %v14197_v26  ;;  %v7751_v51 = vmax.f32 %v7672_v42, 0.0 }
 0xac2   : > { %v14746_v60 = vadd.f32 %v7528_v12, %v7440_v57  ;;  %v7604_v1 = vpop.f32.mrf.mxu0 }
 0xac5   : > { %v7673_v32 = vpop.f32.mrf.mxu1 }
 0xac6   : > { %v7674_v23 = vadd.f32 %v7673_v32, %v7585_v45 }
 0xac7   : > { %v7441_v47 = vpop.f32.mrf.mxu2  ;;  %v7530_v25 = vpop.f32.mrf.mxu3 }
 0xac8   : > { %v7753_v13 = vmax.f32 %v7674_v23, 0.0  ;;  %v7442_v11 = vadd.f32 %v7441_v47, %v14579_v28 }
 0xaca   : > { %v14753_v26 = vadd.f32 %v7530_v25, %v7442_v11  ;;  %v7813_v31 = vpack.c.bf16 %v7753_v13, %v7751_v51  ;;  %v14779_v13 = vpop.f32.mrf.mxu0 }
 0xacc   : > { %7987 = vmatmul.bf16.gmra.mxu2 %v14443_v56  ;;  %8076 = vmatmul.bf16.gmra.mxu3 %v7813_v31  ;;  %v7595_v31 = vadd.f32 %v14722_v63, %v14657_v21  ;;  %v15290_v63 = vld [vmem:[#allocation63_spill] sm:$0xff] }
 0xacd   : > { %v7676_v40 = vpop.f32.mrf.mxu1 }
 0xace   : > { %v7677_v56 = vadd.f32 %v7676_v40, %v7588_v41 }
 0xacf   : > { %v7444_v49 = vpop.f32.mrf.mxu2  ;;  %v7533_v37 = vpop.f32.mrf.mxu3 }
 0xad0   : > { %v7445_v36 = vadd.f32 %v7444_v49, %v14579_v28  ;;  %7715 = vmatmul.bf16.gmra.mxu1 %v15288_v20  ;;  %v7755_v5 = vmax.f32 %v7677_v56, 0.0 }
 0xad2   : > { %v14762_v44 = vadd.f32 %v7533_v37, %v7445_v36  ;;  %v7609_v56 = vpop.f32.mrf.mxu0 }
 0xad5   : > { %v7678_v16 = vpop.f32.mrf.mxu1 }
 0xad6   : > { %v7679_v2 = vadd.f32 %v7678_v16, %v7590_v43 }
 0xad7   : > { %v7446_v12 = vpop.f32.mrf.mxu2  ;;  %v7535_v57 = vpop.f32.mrf.mxu3 }
 0xad8   : > { %v7757_v42 = vmax.f32 %v7679_v2, 0.0  ;;  %v7447_v45 = vadd.f32 %v7446_v12, %v14579_v28  ;;  %v7598_v2 = vadd.f32 %v14739_v38, %v14673_v8 }
 0xada   : > { %v14770_v46 = vadd.f32 %v7535_v57, %v7447_v45  ;;  %v7815_v32 = vpack.c.bf16 %v7757_v42, %v7755_v5  ;;  %v10869_v57 = vld [vmem:[%s15273_s22 + $0x8] sm:$0xff]  ;;  %v7600_v42 = vadd.f32 %v14750_v62, %v14679_v54 }
 0xadb   : > { %8274 = vmatpush.bf16.msra.mxu0 %v10869_v57 }
 0xadc   : > { %7992 = vmatmul.bf16.gmra.mxu2 %v14463_v22  ;;  %8081 = vmatmul.bf16.gmra.mxu3 %v7815_v32 }
 0xadd   : > { %v7681_v23 = vpop.f32.mrf.mxu1 }
 0xade   : > { %v7682_v11 = vadd.f32 %v7681_v23, %v7593_v33 }
 0xadf   : > { %v7449_v47 = vpop.f32.mrf.mxu2  ;;  %v7538_v25 = vpop.f32.mrf.mxu3 }
 0xae0   : > { %v7450_v29 = vadd.f32 %v7449_v47, %v14579_v28  ;;  %7720 = vmatmul.bf16.gmra.mxu1 %v14261_v10  ;;  %v7759_v36 = vmax.f32 %v7682_v11, 0.0 }
 0xae2   : > { %v14777_v51 = vadd.f32 %v7538_v25, %v7450_v29  ;;  %v7612_v25 = vpop.f32.mrf.mxu0 }
 0xae5   : > { %v7683_v22 = vpop.f32.mrf.mxu1 }
 0xae6   : > { %v7684_v40 = vadd.f32 %v7683_v22, %v7595_v31 }
 0xae7   : > { %v7451_v49 = vpop.f32.mrf.mxu2  ;;  %v7540_v37 = vpop.f32.mrf.mxu3 }
 0xae8   : > { %v7761_v20 = vmax.f32 %v7684_v40, 0.0  ;;  %v7452_v41 = vadd.f32 %v7451_v49, %v14579_v28  ;;  %v7603_v49 = vadd.f32 %v14756_v19, %v14691_v17 }
 0xaea   : > { %v14784_v10 = vadd.f32 %v7540_v37, %v7452_v41  ;;  %v7817_v34 = vpack.c.bf16 %v7761_v20, %v7759_v36  ;;  %v7614_v62 = vpop.f32.mrf.mxu0  ;;  %v7605_v20 = vadd.f32 %v7604_v1, %v14700_v4  ;;  %v7608_v1 = vadd.f32 %v14779_v13, %v14710_v9 }
 0xaec   : > { %7997 = vmatmul.bf16.gmra.mxu2 %v15289_v6  ;;  %8086 = vmatmul.bf16.gmra.mxu3 %v7817_v34 }
 0xaed   : > { %v7686_v59 = vpop.f32.mrf.mxu1 }
 0xaee   : > { %v7687_v5 = vadd.f32 %v7686_v59, %v7598_v2 }
 0xaef   : > { %v7454_v43 = vpop.f32.mrf.mxu2  ;;  %v7543_v16 = vpop.f32.mrf.mxu3 }
 0xaf0   : > { %v7455_v21 = vadd.f32 %v7454_v43, %v14579_v28  ;;  %7725 = vmatmul.bf16.gmra.mxu1 %v15290_v63  ;;  %v7763_v29 = vmax.f32 %v7687_v5, 0.0  ;;  %v10868_v5 = vld [vmem:[%s15273_s22] sm:$0xff] }
 0xaf1   : > { %8275 = vmatpush.bf16.msra.mxu0 %v10868_v5 }
 0xaf2   : > { %v14791_v12 = vadd.f32 %v7543_v16, %v7455_v21 }
 0xaf5   : > { %v7688_v45 = vpop.f32.mrf.mxu1 }
 0xaf6   : > { %v7689_v32 = vadd.f32 %v7688_v45, %v7600_v42 }
 0xaf7   : > { %v7456_v23 = vpop.f32.mrf.mxu2  ;;  %v7545_v47 = vpop.f32.mrf.mxu3 }
 0xaf8   : > { %v7765_v33 = vmax.f32 %v7689_v32, 0.0  ;;  %v7457_v8 = vadd.f32 %v7456_v23, %v14579_v28 }
 0xafa   : > { %v7819_v38 = vpack.c.bf16 %v7765_v33, %v7763_v29  ;;  %v14799_v11 = vadd.f32 %v7545_v47, %v7457_v8 }
 0xafc   : > { %8002 = vmatmul.bf16.gmra.mxu2 %v14503_v7  ;;  %8091 = vmatmul.bf16.gmra.mxu3 %v7819_v38 }
 0xafd   : > { %v7691_v31 = vpop.f32.mrf.mxu1 }
 0xafe   : > { %v7692_v36 = vadd.f32 %v7691_v31, %v7603_v49 }
 0xaff   : > { %v7459_v22 = vpop.f32.mrf.mxu2  ;;  %v7548_v40 = vpop.f32.mrf.mxu3 }
 0xb00   : > { %v7460_v54 = vadd.f32 %v7459_v22, %v14579_v28  ;;  %7730 = vmatmul.bf16.gmra.mxu1 %v14325_v55  ;;  %v7767_v59 = vmax.f32 %v7692_v36, 0.0  ;;  %v7617_v55 = vpop.f32.mrf.mxu0  ;;  %v7615_v36 = vadd.f32 %v7614_v62, %v14737_v35 }
 0xb01   : > { %v7618_v62 = vadd.f32 %v7617_v55, %v14746_v60 }
 0xb02   : > { %v14806_v37 = vadd.f32 %v7548_v40, %v7460_v54  ;;  %v7613_v40 = vadd.f32 %v7612_v25, %v14729_v30 }
 0xb05   : > { %v7693_v41 = vpop.f32.mrf.mxu1 }
 0xb06   : > { %v7694_v34 = vadd.f32 %v7693_v41, %v7605_v20 }
 0xb07   : > { %v7461_v7 = vpop.f32.mrf.mxu2  ;;  %v7550_v6 = vpop.f32.mrf.mxu3 }
 0xb08   : > { %v7769_v43 = vmax.f32 %v7694_v34, 0.0  ;;  %v7462_v16 = vadd.f32 %v7461_v7, %v14579_v28  ;;  %v7619_v32 = vpop.f32.mrf.mxu0 }
 0xb0a   : > { %v7821_v21 = vpack.c.bf16 %v7769_v43, %v7767_v59  ;;  %v14810_v63 = vadd.f32 %v7550_v6, %v7462_v16 }
 0xb0c   : > { %8007 = vmatmul.bf16.gmra.mxu2 %v14523_v50  ;;  %8096 = vmatmul.bf16.gmra.mxu3 %v7821_v21  ;;  %v7610_v50 = vadd.f32 %v7609_v56, %v14716_v0 }
 0xb0d   : > { %v7696_v17 = vpop.f32.mrf.mxu1 }
 0xb0e   : > { %v7697_v42 = vadd.f32 %v7696_v17, %v7608_v1 }
 0xb0f   : > { %v7464_v19 = vpop.f32.mrf.mxu2  ;;  %v7553_v2 = vpop.f32.mrf.mxu3 }
 0xb10   : > { %v7465_v4 = vadd.f32 %v7464_v19, %v14579_v28  ;;  %7735 = vmatmul.bf16.gmra.mxu1 %v14375_v3  ;;  %v7771_v33 = vmax.f32 %v7697_v42, 0.0  ;;  %v7622_v0 = vpop.f32.mrf.mxu0 }
 0xb12   : > { %v14817_v57 = vadd.f32 %v7553_v2, %v7465_v4  ;;  %v7620_v4 = vadd.f32 %v7619_v32, %v14753_v26  ;;  %v14849_v26 = vld [vmem:[%s15291_s25] ss:$0 sm:$0xff]  ;;  %v7623_v32 = vadd.f32 %v7622_v0, %v14762_v44 }
 0xb15   : > { %v7698_v45 = vpop.f32.mrf.mxu1 }
 0xb16   : > { %v7699_v23 = vadd.f32 %v7698_v45, %v7610_v50 }
 0xb17   : > { %v7466_v47 = vpop.f32.mrf.mxu2  ;;  %v7555_v29 = vpop.f32.mrf.mxu3 }
 0xb18   : > { %v7773_v3 = vmax.f32 %v7699_v23, 0.0  ;;  %v7467_v8 = vadd.f32 %v7466_v47, %v14579_v28  ;;  %v7624_v43 = vpop.f32.mrf.mxu0 }
 0xb1a   : > { %v7823_v9 = vpack.c.bf16 %v7773_v3, %v7771_v33  ;;  %v14824_v13 = vadd.f32 %v7555_v29, %v7467_v8 }
 0xb1c   : > { %8012 = vmatmul.bf16.gmra.mxu2 %v14537_v18  ;;  %8101 = vmatmul.bf16.gmra.mxu3 %v7823_v9  ;;  %v7625_v9 = vadd.f32 %v7624_v43, %v14770_v46 }
 0xb1d   : > { %v7701_v38 = vpop.f32.mrf.mxu1 }
 0xb1e   : > { %v7702_v49 = vadd.f32 %v7701_v38, %v7613_v40 }
 0xb1f   : > { %v7469_v31 = vpop.f32.mrf.mxu2  ;;  %v7558_v22 = vpop.f32.mrf.mxu3 }
 0xb20   : > { %v7470_v56 = vadd.f32 %v7469_v31, %v14579_v28  ;;  %7740 = vmatmul.bf16.gmra.mxu1 %v14401_v24  ;;  %v7775_v7 = vmax.f32 %v7702_v49, 0.0  ;;  %v7627_v19 = vpop.f32.mrf.mxu0 }
 0xb21   : > { %v7628_v43 = vadd.f32 %v7627_v19, %v14777_v51 }
 0xb22   : > { %v14830_v54 = vadd.f32 %v7558_v22, %v7470_v56 }
 0xb25   : > { %v7703_v20 = vpop.f32.mrf.mxu1 }
 0xb26   : > { %v7704_v41 = vadd.f32 %v7703_v20, %v7615_v36 }
 0xb27   : > { %v7471_v34 = vpop.f32.mrf.mxu2  ;;  %v7560_v18 = vpop.f32.mrf.mxu3 }
 0xb28   : > { %v7777_v6 = vmax.f32 %v7704_v41, 0.0  ;;  %v7472_v59 = vadd.f32 %v7471_v34, %v14579_v28  ;;  %v7629_v55 = vpop.f32.mrf.mxu0 }
 0xb2a   : > { %v7825_v16 = vpack.c.bf16 %v7777_v6, %v7775_v7  ;;  %v14834_v21 = vadd.f32 %v7560_v18, %v7472_v59 }
 0xb2c   : > { %8017 = vmatmul.bf16.gmra.mxu2 %v14557_v15  ;;  %8106 = vmatmul.bf16.gmra.mxu3 %v7825_v16 }
 0xb2d   : > { %v7706_v24 = vpop.f32.mrf.mxu1 }
 0xb2e   : > { %v7707_v2 = vadd.f32 %v7706_v24, %v7618_v62 }
 0xb2f   : > { %v7474_v30 = vpop.f32.mrf.mxu2  ;;  %v7563_v25 = vpop.f32.mrf.mxu3 }
 0xb30   : > { %v7475_v35 = vadd.f32 %v7474_v30, %v14579_v28  ;;  %v7779_v45 = vmax.f32 %v7707_v2, 0.0  ;;  %v7632_v56 = vpop.f32.mrf.mxu0  ;;  %v7630_v30 = vadd.f32 %v7629_v55, %v14784_v10 }
 0xb32   : > { %v14839_v17 = vadd.f32 %v7563_v25, %v7475_v35 }
 0xb35   : > { %v7708_v1 = vpop.f32.mrf.mxu1 }
 0xb36   : > { %v7709_v5 = vadd.f32 %v7708_v1, %v7620_v4 }
 0xb37   : > { %v7476_v42 = vpop.f32.mrf.mxu2  ;;  %v7565_v50 = vpop.f32.mrf.mxu3 }
 0xb38   : > { %v7781_v15 = vmax.f32 %v7709_v5, 0.0  ;;  %v7477_v23 = vadd.f32 %v7476_v42, %v14579_v28  ;;  %v7634_v59 = vpop.f32.mrf.mxu0 }
 0xb3a   : > { %v7827_v47 = vpack.c.bf16 %v7781_v15, %v7779_v45  ;;  %v14843_v29 = vadd.f32 %v7565_v50, %v7477_v23 }
 0xb3c   : > { %8022 = vmatmul.bf16.gmra.mxu2 %v14574_v61  ;;  %8111 = vmatmul.bf16.gmra.mxu3 %v7827_v47 }
 0xb3d   : > { %v7711_v60 = vpop.f32.mrf.mxu1 }
 0xb3e   : > { %v7712_v8 = vadd.f32 %v7711_v60, %v7623_v32  ;;  %v7633_v60 = vadd.f32 %v7632_v56, %v14791_v12 }
 0xb3f   : > { %v7983_v33 = vpop.f32.mrf.mxu2  ;;  %v8072_v3 = vpop.f32.mrf.mxu3 }
 0xb40   : > { %v7984_v28 = vadd.f32 %v14849_v26, %v7983_v33  ;;  %v7783_v40 = vmax.f32 %v7712_v8, 0.0  ;;  %v7637_v45 = vpop.f32.mrf.mxu0 }
 0xb42   : > { %v8073_v49 = vadd.f32 %v8072_v3, %v7984_v28  ;;  %v7635_v3 = vadd.f32 %v7634_v59, %v14799_v11 }
 0xb44   : > { %v8152_v18 = vmax.f32 %v8073_v49, 0.0 }
 0xb45   : > { %v7713_v38 = vpop.f32.mrf.mxu1 }
 0xb46   : > { %v7714_v31 = vadd.f32 %v7713_v38, %v7625_v9 }
 0xb47   : > { %v7985_v61 = vpop.f32.mrf.mxu2  ;;  %v8074_v22 = vpop.f32.mrf.mxu3 }
 0xb48   : > { %v7785_v36 = vmax.f32 %v7714_v31, 0.0  ;;  %v7986_v20 = vadd.f32 %v14849_v26, %v7985_v61  ;;  %v7639_v8 = vpop.f32.mrf.mxu0 }
 0xb4a   : > { %v7829_v41 = vpack.c.bf16 %v7785_v36, %v7783_v40  ;;  %v8075_v34 = vadd.f32 %v8074_v22, %v7986_v20 }
 0xb4c   : > { %v8153_v7 = vmax.f32 %v8075_v34, 0.0  ;;  %8027 = vmatmul.bf16.gmra.mxu2 %v14599_v48  ;;  %8116 = vmatmul.bf16.gmra.mxu3 %v7829_v41 }
 0xb4d   : > { %v7716_v44 = vpop.f32.mrf.mxu1 }
 0xb4e   : > { %v8184_v0 = vpack.c.bf16 %v8153_v7, %v8152_v18  ;;  %v7717_v16 = vadd.f32 %v7716_v44, %v7628_v43  ;;  %v7638_v18 = vadd.f32 %v7637_v45, %v14806_v37 }
 0xb4f   : > { %v7988_v46 = vpop.f32.mrf.mxu2  ;;  %v8077_v6 = vpop.f32.mrf.mxu3 }
 0xb50   : > { %8276 = vmatmul.bf16.vlgmr.msra.gmra.mxu0 %v8184_v0  ;;  %v7989_v24 = vadd.f32 %v14849_v26, %v7988_v46  ;;  %v7787_v4 = vmax.f32 %v7717_v16, 0.0  ;;  %v7642_v34 = vpop.f32.mrf.mxu0  ;;  %v7640_v0 = vadd.f32 %v7639_v8, %v14810_v63 }
 0xb52   : > { %v8078_v48 = vadd.f32 %v8077_v6, %v7989_v24 }
 0xb54   : > { %v8154_v15 = vmax.f32 %v8078_v48, 0.0 }
 0xb55   : > { %v7718_v25 = vpop.f32.mrf.mxu1 }
 0xb56   : > { %v7719_v35 = vadd.f32 %v7718_v25, %v7630_v30 }
 0xb57   : > { %v7990_v62 = vpop.f32.mrf.mxu2  ;;  %v8079_v2 = vpop.f32.mrf.mxu3 }
 0xb58   : > { %v7789_v1 = vmax.f32 %v7719_v35, 0.0  ;;  %v7991_v5 = vadd.f32 %v14849_v26, %v7990_v62  ;;  %v7644_v25 = vpop.f32.mrf.mxu0 }
 0xb5a   : > { %v7831_v42 = vpack.c.bf16 %v7789_v1, %v7787_v4  ;;  %v8080_v50 = vadd.f32 %v8079_v2, %v7991_v5  ;;  %v7643_v5 = vadd.f32 %v7642_v34, %v14817_v57 }
 0xb5c   : > { %v8155_v23 = vmax.f32 %v8080_v50, 0.0  ;;  %8032 = vmatmul.bf16.gmra.mxu2 %v14616_v52  ;;  %8121 = vmatmul.bf16.gmra.mxu3 %v7831_v42 }
 0xb5d   : > { %v7721_v51 = vpop.f32.mrf.mxu1 }
 0xb5e   : > { %v8185_v19 = vpack.c.bf16 %v8155_v23, %v8154_v15  ;;  %v7722_v55 = vadd.f32 %v7721_v51, %v7633_v60  ;;  %v7645_v15 = vadd.f32 %v7644_v25, %v14824_v13 }
 0xb5f   : > { %v7993_v10 = vpop.f32.mrf.mxu2  ;;  %v8082_v47 = vpop.f32.mrf.mxu3 }
 0xb60   : > { %8281 = vmatmul.bf16.gmra.mxu0 %v8185_v19  ;;  %v7994_v33 = vadd.f32 %v14849_v26, %v7993_v10  ;;  %v7791_v31 = vmax.f32 %v7722_v55, 0.0  ;;  %v7647_v42 = vpop.f32.mrf.mxu0 }
 0xb62   : > { %v8083_v52 = vadd.f32 %v8082_v47, %v7994_v33 }
 0xb64   : > { %v8156_v36 = vmax.f32 %v8083_v52, 0.0 }
 0xb65   : > { %v7723_v32 = vpop.f32.mrf.mxu1 }
 0xb66   : > { %v7724_v28 = vadd.f32 %v7723_v32, %v7635_v3 }
 0xb67   : > { %v7995_v9 = vpop.f32.mrf.mxu2  ;;  %v8084_v38 = vpop.f32.mrf.mxu3 }
 0xb68   : > { %v7793_v61 = vmax.f32 %v7724_v28, 0.0  ;;  %v7996_v22 = vadd.f32 %v14849_v26, %v7995_v9  ;;  %v7649_v28 = vpop.f32.mrf.mxu0 }
 0xb6a   : > { %v7833_v40 = vpack.c.bf16 %v7793_v61, %v7791_v31  ;;  %v8085_v49 = vadd.f32 %v8084_v38, %v7996_v22  ;;  %v7648_v31 = vadd.f32 %v7647_v42, %v14830_v54  ;;  %v7650_v22 = vadd.f32 %v7649_v28, %v14834_v21 }
 0xb6c   : > { %v8157_v20 = vmax.f32 %v8085_v49, 0.0  ;;  %8037 = vmatmul.bf16.gmra.mxu2 %v14638_v58  ;;  %8126 = vmatmul.bf16.gmra.mxu3 %v7833_v40 }
 0xb6d   : > { %v7726_v12 = vpop.f32.mrf.mxu1 }
 0xb6e   : > { %v8186_v56 = vpack.c.bf16 %v8157_v20, %v8156_v36  ;;  %v7727_v7 = vadd.f32 %v7726_v12, %v7638_v18 }
 0xb6f   : > { %v7998_v11 = vpop.f32.mrf.mxu2  ;;  %v8087_v41 = vpop.f32.mrf.mxu3 }
 0xb70   : > { %8286 = vmatmul.bf16.gmra.mxu0 %v8186_v56  ;;  %v7999_v44 = vadd.f32 %v14849_v26, %v7998_v11  ;;  %v7795_v16 = vmax.f32 %v7727_v7, 0.0 }
 0xb72   : > { %v8088_v58 = vadd.f32 %v8087_v41, %v7999_v44  ;;  %v7652_v41 = vpop.f32.mrf.mxu0 }
 0xb74   : > { %v8158_v2 = vmax.f32 %v8088_v58, 0.0 }
 0xb75   : > { %v7728_v46 = vpop.f32.mrf.mxu1 }
 0xb76   : > { %v7729_v6 = vadd.f32 %v7728_v46, %v7640_v0 }
 0xb77   : > { %v8000_v59 = vpop.f32.mrf.mxu2  ;;  %v8089_v43 = vpop.f32.mrf.mxu3 }
 0xb78   : > { %v7797_v24 = vmax.f32 %v7729_v6, 0.0  ;;  %v8001_v30 = vadd.f32 %v14849_v26, %v8000_v59  ;;  %v7653_v6 = vadd.f32 %v7652_v41, %v14839_v17 }
 0xb7a   : > { %v7835_v35 = vpack.c.bf16 %v7797_v24, %v7795_v16  ;;  %v8090_v62 = vadd.f32 %v8089_v43, %v8001_v30  ;;  %v7654_v59 = vpop.f32.mrf.mxu0 }
 0xb7b   : > { %v7655_v58 = vadd.f32 %v7654_v59, %v14843_v29 }
 0xb7c   : > { %v8159_v4 = vmax.f32 %v8090_v62, 0.0  ;;  %8042 = vmatmul.bf16.gmra.mxu2 %v14659_v27  ;;  %8131 = vmatmul.bf16.gmra.mxu3 %v7835_v35 }
 0xb7d   : > { %v7731_v37 = vpop.f32.mrf.mxu1 }
 0xb7e   : > { %v8187_v48 = vpack.c.bf16 %v8159_v4, %v8158_v2  ;;  %v7732_v50 = vadd.f32 %v7731_v37, %v7643_v5 }
 0xb7f   : > { %v8003_v63 = vpop.f32.mrf.mxu2  ;;  %v8092_v1 = vpop.f32.mrf.mxu3 }
 0xb80   : > { %8291 = vmatmul.bf16.gmra.mxu0 %v8187_v48  ;;  %v8004_v45 = vadd.f32 %v14849_v26, %v8003_v63  ;;  %v7799_v47 = vmax.f32 %v7732_v50, 0.0 }
 0xb82   : > { %v8093_v27 = vadd.f32 %v8092_v1, %v8004_v45 }
 0xb84   : > { %v8160_v32 = vmax.f32 %v8093_v27, 0.0 }
 0xb85   : > { %v7733_v23 = vpop.f32.mrf.mxu1 }
 0xb86   : > { %v7734_v51 = vadd.f32 %v7733_v23, %v7645_v15 }
 0xb87   : > { %v8005_v19 = vpop.f32.mrf.mxu2  ;;  %v8094_v10 = vpop.f32.mrf.mxu3 }
 0xb88   : > { %v7801_v60 = vmax.f32 %v7734_v51, 0.0  ;;  %v8006_v55 = vadd.f32 %v14849_v26, %v8005_v19 }
 0xb8a   : > { %v7837_v33 = vpack.c.bf16 %v7801_v60, %v7799_v47  ;;  %v8095_v3 = vadd.f32 %v8094_v10, %v8006_v55 }
 0xb8c   : > { %v8161_v8 = vmax.f32 %v8095_v3, 0.0  ;;  %8047 = vmatmul.bf16.gmra.mxu2 %v14681_v39  ;;  %8136 = vmatmul.bf16.gmra.mxu3 %v7837_v33 }
 0xb8d   : > { %v7736_v57 = vpop.f32.mrf.mxu1 }
 0xb8e   : > { %v8188_v9 = vpack.c.bf16 %v8161_v8, %v8160_v32  ;;  %v7737_v52 = vadd.f32 %v7736_v57, %v7648_v31  ;;  %v14893_v57 = vld [vmem:[%s15292_s28] ss:$0 sm:$0xff] }
 0xb8f   : > { %v8008_v13 = vpop.f32.mrf.mxu2  ;;  %v8097_v38 = vpop.f32.mrf.mxu3 }
 0xb90   : > { %8296 = vmatmul.bf16.gmra.mxu0 %v8188_v9  ;;  %v8009_v61 = vadd.f32 %v14849_v26, %v8008_v13  ;;  %v7803_v12 = vmax.f32 %v7737_v52, 0.0 }
 0xb92   : > { %v8098_v39 = vadd.f32 %v8097_v38, %v8009_v61 }
 0xb94   : > { %v8162_v7 = vmax.f32 %v8098_v39, 0.0 }
 0xb95   : > { %v7738_v40 = vpop.f32.mrf.mxu1 }
 0xb96   : > { %v7739_v49 = vadd.f32 %v7738_v40, %v7650_v22 }
 0xb97   : > { %v8010_v36 = vpop.f32.mrf.mxu2  ;;  %v8099_v20 = vpop.f32.mrf.mxu3 }
 0xb98   : > { %v7805_v56 = vmax.f32 %v7739_v49, 0.0  ;;  %v8011_v11 = vadd.f32 %v14849_v26, %v8010_v36 }
 0xb9a   : > { %v7839_v34 = vpack.c.bf16 %v7805_v56, %v7803_v12  ;;  %v8100_v18 = vadd.f32 %v8099_v20, %v8011_v11 }
 0xb9c   : > { %v8163_v44 = vmax.f32 %v8100_v18, 0.0  ;;  %8052 = vmatmul.bf16.gmra.mxu2 %v14702_v53  ;;  %8141 = vmatmul.bf16.gmra.mxu3 %v7839_v34 }
 0xb9d   : > { %v7741_v54 = vpop.f32.mrf.mxu1 }
 0xb9e   : > { %v8189_v0 = vpack.c.bf16 %v8163_v44, %v8162_v7  ;;  %v7742_v43 = vadd.f32 %v7741_v54, %v7653_v6 }
 0xb9f   : > { %v8013_v21 = vpop.f32.mrf.mxu2  ;;  %v8102_v46 = vpop.f32.mrf.mxu3 }
 0xba0   : > { %8301 = vmatmul.bf16.gmra.mxu0 %v8189_v0  ;;  %v8014_v16 = vadd.f32 %v14849_v26, %v8013_v21  ;;  %v7807_v62 = vmax.f32 %v7742_v43, 0.0 }
 0xba2   : > { %v8103_v53 = vadd.f32 %v8102_v46, %v8014_v16 }
 0xba4   : > { %v8164_v63 = vmax.f32 %v8103_v53, 0.0 }
 0xba5   : > { %v7743_v24 = vpop.f32.mrf.mxu1 }
 0xba6   : > { %v7744_v30 = vadd.f32 %v7743_v24, %v7655_v58 }
 0xba7   : > { %v8015_v25 = vpop.f32.mrf.mxu2  ;;  %v8104_v35 = vpop.f32.mrf.mxu3 }
 0xba8   : > { %v7809_v2 = vmax.f32 %v7744_v30, 0.0  ;;  %v8016_v4 = vadd.f32 %v14849_v26, %v8015_v25 }
 0xbaa   : > { %v7841_v37 = vpack.c.bf16 %v7809_v2, %v7807_v62  ;;  %v8105_v48 = vadd.f32 %v8104_v35, %v8016_v4 }
 0xbac   : > { %v8165_v1 = vmax.f32 %v8105_v48, 0.0  ;;  %8057 = vmatmul.bf16.gmra.mxu2 %v14718_v14  ;;  %8146 = vmatmul.bf16.gmra.mxu3 %v7841_v37 }
 0xbae   : > { %v8190_v17 = vpack.c.bf16 %v8165_v1, %v8164_v63 }
 0xbaf   : > { %v8018_v5 = vpop.f32.mrf.mxu2  ;;  %v8107_v42 = vpop.f32.mrf.mxu3 }
 0xbb0   : > { %8306 = vmatmul.bf16.gmra.mxu0 %v8190_v17  ;;  %v8019_v29 = vadd.f32 %v14849_v26, %v8018_v5 }
 0xbb2   : > { %v8108_v15 = vadd.f32 %v8107_v42, %v8019_v29 }
 0xbb4   : > { %v8166_v19 = vmax.f32 %v8108_v15, 0.0 }
 0xbb7   : > { %v8020_v50 = vpop.f32.mrf.mxu2  ;;  %v8109_v45 = vpop.f32.mrf.mxu3 }
 0xbb8   : > { %v8021_v23 = vadd.f32 %v14849_v26, %v8020_v50 }
 0xbba   : > { %v8110_v51 = vadd.f32 %v8109_v45, %v8021_v23 }
 0xbbc   : > { %v8167_v10 = vmax.f32 %v8110_v51, 0.0 }
 0xbbe   : > { %v8191_v47 = vpack.c.bf16 %v8167_v10, %v8166_v19 }
 0xbbf   : > { %v8023_v27 = vpop.f32.mrf.mxu2  ;;  %v8112_v60 = vpop.f32.mrf.mxu3 }
 0xbc0   : > { %8311 = vmatmul.bf16.gmra.mxu0 %v8191_v47  ;;  %v8024_v14 = vadd.f32 %v14849_v26, %v8023_v27 }
 0xbc2   : > { %v8113_v3 = vadd.f32 %v8112_v60, %v8024_v14 }
 0xbc4   : > { %v8168_v28 = vmax.f32 %v8113_v3, 0.0 }
 0xbc7   : > { %v8025_v55 = vpop.f32.mrf.mxu2  ;;  %v8114_v33 = vpop.f32.mrf.mxu3 }
 0xbc8   : > { %v8026_v32 = vadd.f32 %v14849_v26, %v8025_v55 }
 0xbca   : > { %v8115_v8 = vadd.f32 %v8114_v33, %v8026_v32 }
 0xbcc   : > { %v8169_v9 = vmax.f32 %v8115_v8, 0.0 }
 0xbcd   : > { %v8277_v13 = vpop.f32.mrf.mxu0 }
 0xbce   : > { %v8192_v38 = vpack.c.bf16 %v8169_v9, %v8168_v28  ;;  %v8278_v31 = vadd.f32 %v14893_v57, %v8277_v13 }
 0xbcf   : > { %v8028_v52 = vpop.f32.mrf.mxu2  ;;  %v8117_v61 = vpop.f32.mrf.mxu3 }
 0xbd0   : > { %8316 = vmatmul.bf16.gmra.mxu0 %v8192_v38  ;;  %8357 = vxpose.xlu0.b32.start [1/16] (narrow) %v8278_v31, 8  ;;  %v8029_v22 = vadd.f32 %v14849_v26, %v8028_v52 }
 0xbd2   : > { %v8118_v12 = vadd.f32 %v8117_v61, %v8029_v22 }
 0xbd4   : > { %v8170_v11 = vmax.f32 %v8118_v12, 0.0 }
 0xbd5   : > { %v8279_v40 = vpop.f32.mrf.mxu0 }
 0xbd6   : > { %v8280_v49 = vadd.f32 %v14893_v57, %v8279_v40 }
 0xbd7   : > { %v8030_v36 = vpop.f32.mrf.mxu2  ;;  %v8119_v20 = vpop.f32.mrf.mxu3 }
 0xbd8   : > { %v8031_v39 = vadd.f32 %v14849_v26, %v8030_v36  ;;  %8358 = vxpose.xlu0.b32.cont [2/16] (narrow) %v8280_v49, 8 }
 0xbda   : > { %v8120_v56 = vadd.f32 %v8119_v20, %v8031_v39 }
 0xbdc   : > { %v8171_v41 = vmax.f32 %v8120_v56, 0.0 }
 0xbdd   : > { %v8282_v34 = vpop.f32.mrf.mxu0 }
 0xbde   : > { %v8193_v18 = vpack.c.bf16 %v8171_v41, %v8170_v11  ;;  %v8283_v7 = vadd.f32 %v14893_v57, %v8282_v34 }
 0xbdf   : > { %v8033_v44 = vpop.f32.mrf.mxu2  ;;  %v8122_v54 = vpop.f32.mrf.mxu3 }
 0xbe0   : > { %8321 = vmatmul.bf16.gmra.mxu0 %v8193_v18  ;;  %8359 = vxpose.xlu0.b32.cont [3/16] (narrow) %v8283_v7, 8  ;;  %v8034_v0 = vadd.f32 %v14849_v26, %v8033_v44 }
 0xbe2   : > { %v8123_v43 = vadd.f32 %v8122_v54, %v8034_v0 }
 0xbe4   : > { %v8172_v24 = vmax.f32 %v8123_v43, 0.0 }
 0xbe5   : > { %v8284_v21 = vpop.f32.mrf.mxu0 }
 0xbe6   : > { %v8285_v46 = vadd.f32 %v14893_v57, %v8284_v21 }
 0xbe7   : > { %v8035_v6 = vpop.f32.mrf.mxu2  ;;  %v8124_v59 = vpop.f32.mrf.mxu3 }
 0xbe8   : > { %v8036_v16 = vadd.f32 %v14849_v26, %v8035_v6  ;;  %8360 = vxpose.xlu0.b32.cont [4/16] (narrow) %v8285_v46, 8 }
 0xbea   : > { %v8125_v58 = vadd.f32 %v8124_v59, %v8036_v16 }
 0xbec   : > { %v8173_v30 = vmax.f32 %v8125_v58, 0.0 }
 0xbed   : > { %v8287_v25 = vpop.f32.mrf.mxu0 }
 0xbee   : > { %v8194_v35 = vpack.c.bf16 %v8173_v30, %v8172_v24  ;;  %v8288_v62 = vadd.f32 %v14893_v57, %v8287_v25 }
 0xbef   : > { %v8038_v53 = vpop.f32.mrf.mxu2  ;;  %v8127_v2 = vpop.f32.mrf.mxu3 }
 0xbf0   : > { %8326 = vmatmul.bf16.gmra.mxu0 %v8194_v35  ;;  %8361 = vxpose.xlu0.b32.cont [5/16] (narrow) %v8288_v62, 8  ;;  %v8039_v4 = vadd.f32 %v14849_v26, %v8038_v53 }
 0xbf2   : > { %v8128_v17 = vadd.f32 %v8127_v2, %v8039_v4 }
 0xbf4   : > { %v8174_v29 = vmax.f32 %v8128_v17, 0.0 }
 0xbf5   : > { %v8289_v37 = vpop.f32.mrf.mxu0 }
 0xbf6   : > { %v8290_v48 = vadd.f32 %v14893_v57, %v8289_v37 }
 0xbf7   : > { %v8040_v63 = vpop.f32.mrf.mxu2  ;;  %v8129_v1 = vpop.f32.mrf.mxu3 }
 0xbf8   : > { %v8041_v5 = vadd.f32 %v14849_v26, %v8040_v63  ;;  %8362 = vxpose.xlu0.b32.cont [6/16] (narrow) %v8290_v48, 8 }
 0xbfa   : > { %v8130_v42 = vadd.f32 %v8129_v1, %v8041_v5 }
 0xbfc   : > { %v8175_v50 = vmax.f32 %v8130_v42, 0.0 }
 0xbfd   : > { %v8292_v45 = vpop.f32.mrf.mxu0 }
 0xbfe   : > { %v8195_v15 = vpack.c.bf16 %v8175_v50, %v8174_v29  ;;  %v8293_v23 = vadd.f32 %v14893_v57, %v8292_v45 }
 0xbff   : > { %v8043_v51 = vpop.f32.mrf.mxu2  ;;  %v8132_v19 = vpop.f32.mrf.mxu3 }
 0xc00   : > { %8331 = vmatmul.bf16.gmra.mxu0 %v8195_v15  ;;  %8363 = vxpose.xlu0.b32.cont [7/16] (narrow) %v8293_v23, 8  ;;  %v8044_v10 = vadd.f32 %v14849_v26, %v8043_v51 }
 0xc02   : > { %v8133_v55 = vadd.f32 %v8132_v19, %v8044_v10 }
 0xc04   : > { %v8176_v32 = vmax.f32 %v8133_v55, 0.0 }
 0xc05   : > { %v8294_v47 = vpop.f32.mrf.mxu0 }
 0xc06   : > { %v8295_v27 = vadd.f32 %v14893_v57, %v8294_v47 }
 0xc07   : > { %v8045_v60 = vpop.f32.mrf.mxu2  ;;  %v8134_v14 = vpop.f32.mrf.mxu3 }
 0xc08   : > { %v8046_v33 = vadd.f32 %v14849_v26, %v8045_v60  ;;  %8364 = vxpose.xlu0.b32.cont [8/16] (narrow) %v8295_v27, 8 }
 0xc0a   : > { %v8135_v3 = vadd.f32 %v8134_v14, %v8046_v33 }
 0xc0c   : > { %v8177_v8 = vmax.f32 %v8135_v3, 0.0 }
 0xc0d   : > { %v8297_v28 = vpop.f32.mrf.mxu0 }
 0xc0e   : > { %v8196_v9 = vpack.c.bf16 %v8177_v8, %v8176_v32  ;;  %v8298_v13 = vadd.f32 %v14893_v57, %v8297_v28 }
 0xc0f   : > { %v8048_v38 = vpop.f32.mrf.mxu2  ;;  %v8137_v31 = vpop.f32.mrf.mxu3 }
 0xc10   : > { %8336 = vmatmul.bf16.gmra.mxu0 %v8196_v9  ;;  %8365 = vxpose.xlu0.b32.cont [9/16] (narrow) %v8298_v13, 8  ;;  %v8049_v52 = vadd.f32 %v14849_v26, %v8048_v38 }
 0xc12   : > { %v8138_v36 = vadd.f32 %v8137_v31, %v8049_v52 }
 0xc14   : > { %v8178_v39 = vmax.f32 %v8138_v36, 0.0 }
 0xc15   : > { %v8299_v61 = vpop.f32.mrf.mxu0 }
 0xc16   : > { %v8300_v22 = vadd.f32 %v14893_v57, %v8299_v61 }
 0xc17   : > { %v8050_v40 = vpop.f32.mrf.mxu2  ;;  %v8139_v49 = vpop.f32.mrf.mxu3 }
 0xc18   : > { %v8051_v20 = vadd.f32 %v14849_v26, %v8050_v40  ;;  %8366 = vxpose.xlu0.b32.cont [10/16] (narrow) %v8300_v22, 8 }
 0xc1a   : > { %v8140_v12 = vadd.f32 %v8139_v49, %v8051_v20 }
 0xc1c   : > { %v8179_v56 = vmax.f32 %v8140_v12, 0.0 }
 0xc1d   : > { %v8302_v11 = vpop.f32.mrf.mxu0 }
 0xc1e   : > { %v8197_v41 = vpack.c.bf16 %v8179_v56, %v8178_v39  ;;  %v8303_v34 = vadd.f32 %v14893_v57, %v8302_v11 }
 0xc1f   : > { %v8053_v18 = vpop.f32.mrf.mxu2  ;;  %v8142_v7 = vpop.f32.mrf.mxu3 }
 0xc20   : > { %8341 = vmatmul.bf16.gmra.mxu0 %v8197_v41  ;;  %8367 = vxpose.xlu0.b32.cont [11/16] (narrow) %v8303_v34, 8  ;;  %v8054_v44 = vadd.f32 %v14849_v26, %v8053_v18 }
 0xc22   : > { %v8143_v6 = vadd.f32 %v8142_v7, %v8054_v44 }
 0xc24   : > { %v8180_v16 = vmax.f32 %v8143_v6, 0.0 }
 0xc25   : > { %v8304_v54 = vpop.f32.mrf.mxu0 }
 0xc26   : > { %v8305_v0 = vadd.f32 %v14893_v57, %v8304_v54 }
 0xc27   : > { %v8055_v21 = vpop.f32.mrf.mxu2  ;;  %v8144_v46 = vpop.f32.mrf.mxu3 }
 0xc28   : > { %v8056_v59 = vadd.f32 %v14849_v26, %v8055_v21  ;;  %8368 = vxpose.xlu0.b32.cont [12/16] (narrow) %v8305_v0, 8 }
 0xc2a   : > { %v8145_v43 = vadd.f32 %v8144_v46, %v8056_v59 }
 0xc2c   : > { %v8181_v58 = vmax.f32 %v8145_v43, 0.0 }
 0xc2d   : > { %v8307_v24 = vpop.f32.mrf.mxu0 }
 0xc2e   : > { %v8198_v30 = vpack.c.bf16 %v8181_v58, %v8180_v16  ;;  %v8308_v25 = vadd.f32 %v14893_v57, %v8307_v24 }
 0xc2f   : > { %v8058_v35 = vpop.f32.mrf.mxu2  ;;  %v8147_v62 = vpop.f32.mrf.mxu3 }
 0xc30   : > { %8346 = vmatmul.bf16.gmra.mxu0 %v8198_v30  ;;  %8369 = vxpose.xlu0.b32.cont [13/16] (narrow) %v8308_v25, 8  ;;  %v8059_v53 = vadd.f32 %v14849_v26, %v8058_v35 }
 0xc32   : > { %v8148_v48 = vadd.f32 %v8147_v62, %v8059_v53 }
 0xc34   : > { %v8182_v5 = vmax.f32 %v8148_v48, 0.0 }
 0xc35   : > { %v8309_v2 = vpop.f32.mrf.mxu0 }
 0xc36   : > { %v8310_v4 = vadd.f32 %v14893_v57, %v8309_v2 }
 0xc37   : > { %v8060_v37 = vpop.f32.mrf.mxu2  ;;  %v8149_v1 = vpop.f32.mrf.mxu3 }
 0xc38   : > { %v8061_v63 = vadd.f32 %v14849_v26, %v8060_v37  ;;  %8370 = vxpose.xlu0.b32.cont [14/16] (narrow) %v8310_v4, 8 }
 0xc3a   : > { %v8150_v17 = vadd.f32 %v8149_v1, %v8061_v63 }
 0xc3c   : > { %v8183_v42 = vmax.f32 %v8150_v17, 0.0 }
 0xc3d   : > { %v8312_v29 = vpop.f32.mrf.mxu0 }
 0xc3e   : > { %v8199_v50 = vpack.c.bf16 %v8183_v42, %v8182_v5  ;;  %v8313_v45 = vadd.f32 %v14893_v57, %v8312_v29 }
 0xc40   : > { %8351 = vmatmul.bf16.gmra.mxu0 %v8199_v50  ;;  %8371 = vxpose.xlu0.b32.cont [15/16] (narrow) %v8313_v45, 8 }
 0xc45   : > { %v8314_v15 = vpop.f32.mrf.mxu0 }
 0xc46   : > { %v8315_v23 = vadd.f32 %v14893_v57, %v8314_v15 }
 0xc48   : > { %8372 = vxpose.xlu0.b32.end [16/16] (narrow) %v8315_v23, 8 }
 0xc4d   : > { %v8317_v51 = vpop.f32.mrf.mxu0 }
 0xc4e   : > { %v8318_v19 = vadd.f32 %v14893_v57, %v8317_v51 }
 0xc50   : > { %8389 = vxpose.xlu1.b32.start [1/16] (narrow) %v8318_v19, 8 }
 0xc55   : > { %v8319_v26 = vpop.f32.mrf.mxu0 }
 0xc56   : > { %v8320_v10 = vadd.f32 %v14893_v57, %v8319_v26 }
 0xc58   : > { %8390 = vxpose.xlu1.b32.cont [2/16] (narrow) %v8320_v10, 8 }
 0xc5d   : > { %v8322_v47 = vpop.f32.mrf.mxu0 }
 0xc5e   : > { %v8323_v27 = vadd.f32 %v14893_v57, %v8322_v47 }
 0xc60   : > { %8391 = vxpose.xlu1.b32.cont [3/16] (narrow) %v8323_v27, 8 }
 0xc65   : > { %v8324_v60 = vpop.f32.mrf.mxu0 }
 0xc66   : > { %v8325_v14 = vadd.f32 %v14893_v57, %v8324_v60 }
 0xc68   : > { %8392 = vxpose.xlu1.b32.cont [4/16] (narrow) %v8325_v14, 8 }
 0xc6d   : > { %v8327_v55 = vpop.f32.mrf.mxu0 }
 0xc6e   : > { %v8328_v33 = vadd.f32 %v14893_v57, %v8327_v55 }
 0xc70   : > { %8393 = vxpose.xlu1.b32.cont [5/16] (narrow) %v8328_v33, 8 }
 0xc74   : > { %v8373_v7 = vpop.trf.xlu0 }
 0xc75   : > { %v8329_v3 = vpop.f32.mrf.mxu0  ;;  %8421 = vst [vmem:[%s11245_s16] sm:$0x3f] %v8373_v7 }
 0xc76   : > { %v8330_v32 = vadd.f32 %v14893_v57, %v8329_v3 }
 0xc78   : > { %8394 = vxpose.xlu1.b32.cont [6/16] (narrow) %v8330_v32, 8 }
 0xc7d   : > { %v8332_v8 = vpop.f32.mrf.mxu0 }
 0xc7e   : > { %v8333_v28 = vadd.f32 %v14893_v57, %v8332_v8 }
 0xc80   : > { %8395 = vxpose.xlu1.b32.cont [7/16] (narrow) %v8333_v28, 8 }
 0xc85   : > { %v8334_v9 = vpop.f32.mrf.mxu0 }
 0xc86   : > { %v8335_v13 = vadd.f32 %v14893_v57, %v8334_v9 }
 0xc88   : > { %8396 = vxpose.xlu1.b32.cont [8/16] (narrow) %v8335_v13, 8 }
 0xc8d   : > { %v8337_v38 = vpop.f32.mrf.mxu0 }
 0xc8e   : > { %v8338_v31 = vadd.f32 %v14893_v57, %v8337_v38 }
 0xc90   : > { %8397 = vxpose.xlu1.b32.cont [9/16] (narrow) %v8338_v31, 8 }
 0xc95   : > { %v8339_v52 = vpop.f32.mrf.mxu0 }
 0xc96   : > { %v8340_v61 = vadd.f32 %v14893_v57, %v8339_v52 }
 0xc98   : > { %8398 = vxpose.xlu1.b32.cont [10/16] (narrow) %v8340_v61, 8 }
 0xc9d   : > { %v8342_v22 = vpop.f32.mrf.mxu0 }
 0xc9e   : > { %v8343_v40 = vadd.f32 %v14893_v57, %v8342_v22 }
 0xca0   : > { %8399 = vxpose.xlu1.b32.cont [11/16] (narrow) %v8343_v40, 8 }
 0xca5   : > { %v8344_v49 = vpop.f32.mrf.mxu0 }
 0xca6   : > { %v8345_v36 = vadd.f32 %v14893_v57, %v8344_v49 }
 0xca8   : > { %8400 = vxpose.xlu1.b32.cont [12/16] (narrow) %v8345_v36, 8 }
 0xcad   : > { %v8347_v20 = vpop.f32.mrf.mxu0 }
 0xcae   : > { %v8348_v12 = vadd.f32 %v14893_v57, %v8347_v20 }
 0xcb0   : > { %8401 = vxpose.xlu1.b32.cont [13/16] (narrow) %v8348_v12, 8 }
 0xcb5   : > { %v8349_v39 = vpop.f32.mrf.mxu0 }
 0xcb6   : > { %v8350_v56 = vadd.f32 %v14893_v57, %v8349_v39 }
 0xcb8   : > { %8402 = vxpose.xlu1.b32.cont [14/16] (narrow) %v8350_v56, 8 }
 0xcbd   : > { %v8352_v11 = vpop.f32.mrf.mxu0 }
 0xcbe   : > { %v8353_v41 = vadd.f32 %v14893_v57, %v8352_v11 }
 0xcc0   : > { %8403 = vxpose.xlu1.b32.cont [15/16] (narrow) %v8353_v41, 8 }
 0xcc5   : > { %v8354_v34 = vpop.f32.mrf.mxu0 }
 0xcc6   : > { %v8355_v18 = vadd.f32 %v14893_v57, %v8354_v34 }
 0xcc8   : > { %8404 = vxpose.xlu1.b32.end [16/16] (narrow) %v8355_v18, 8 }
 0xcf4   : > { %v8405_v44 = vpop.trf.xlu1 }
 0xcf5   : > { %8422 = vst [vmem:[%s11245_s16 + $0x8] sm:$0x3f] %v8405_v44 }
 0xcf6 PF: > { %s15293_s17 = sld [smem:[#allocation10_spill]] }
 0xcf7   : > { %s15294_s27 = sld [smem:[#allocation7_spill]] }
 0xcf8   : > { %s15295_s28 = sld [smem:[#allocation8_spill]] }
 0xcf9   : > { %s15296_s29 = sld [smem:[#allocation9_spill]] }
 0xcfa   : > { %s15297_s30 = sld [smem:[#allocation11_spill]] }
 0xcfb   : > { %s15298_s0 = sld [smem:[#allocation12_spill]] }
 0xcfc   : > { %s29_s1 = sadd.s32 1, %s15293_s17   ;;  %s15299_s19 = sld [smem:[#allocation13_spill]] }
 0xcfd   : > { %p26_p2 = scmp.ge.s32.totalorder %s29_s1, 14  }
 0xcff   :  { %28 = sbr.rel (!%p26_p2) target bundleno = 12 (0xc), region = 143 }
 0xd04   :  { %8456 = vsyncpa [#allocation5], 1 }
 0xd05   :  { %8458 = vsyncpa [#allocation5 + $0x1], 1 }

</bundles_post_ra>
